<compile_context>
chip_gen: v7x
topology: tpu7x:2x2x1
jax: 0.10.0
libtpu: 0.0.40
codegen_flags: <defaults>
</compile_context>

<pallas_src>
import functools
from typing import NamedTuple

import numpy as np
import jax
import jax.numpy as jnp
from jax import lax
from jax.experimental import pallas as pl
from jax.experimental.pallas import tpu as pltpu


class _CNNConfig(NamedTuple):
    ks: tuple        # ((KH0, KW0), (KH1, KW1), (KH2, KW2))
    strides: tuple   # ((SH0, SW0), (SH1, SW1), (SH2, SW2))
    chans: tuple     # (C_in, 32, 64, 32)
    out_hw: tuple    # ((OH0, OW0), (OH1, OW1), (OH2, OW2))
    gh: int          # H // SH0  (cell rows)
    gw: int          # W // SW0  (cell cols)
    ncells_pad: int  # padded cell-row count handed to the kernel (per image)


def _conv_out(d, k, s):
    return (d - k) // s + 1


def _round_up(x, m):
    return (x + m - 1) // m * m


def _rows(ref, start, size, stride=1):
    """Contiguous or strided sublane row-slice load from a 2-D VMEM ref."""
    if stride == 1:
        return ref[pl.ds(start, size), :]
    return ref[pl.ds(start, size, stride=stride), :]


# -----------------------------------------------------------------------------
# Fused 3-layer CNN kernel (NB images per grid step; all refs 2-D row-major)
# -----------------------------------------------------------------------------
def _fused_cnn_kernel(x_ref, w0_ref, b0_ref, w1_ref, b1_ref, w2_ref, b2_ref,
                      o_ref, y0_scr, y1_scr, *, cfg, nb):
    (OH0, OW0), (OH1, OW1), (OH2, OW2) = cfg.out_hw
    (KH1, KW1), (KH2, KW2) = cfg.ks[1], cfg.ks[2]
    (SH1, SW1), (SH2, SW2) = cfg.strides[1], cfg.strides[2]
    GW = cfg.gw
    NCELLS = cfg.ncells_pad
    LSLAB = OH0 * GW          # layer-0 rows incl. the per-row wrap ("gap") column
    P1 = OH1 * OW1
    P2 = OH2 * OW2

    # Biases: read & broadcast once per grid step (hoisted out of all loops).
    b0v = b0_ref[...]
    b1v = b1_ref[...]
    b2v = b2_ref[...]

    for b in range(nb):
        xo = b * NCELLS

        # ---- layer 0: 8x8 / stride 4 as 4 shifted-slab matmuls over cells ----
        # cell row gi*GW + gj holds the (SH0, SW0, C) pixel block; output pixel
        # (i, j) is the 2x2 cell group {(i+di', j+dj')}, so each quadrant weight
        # (48, 32) multiplies one shifted (LSLAB, 48) slab.  Accumulator is
        # initialized from the first dot (no zeros + add).
        acc0 = jnp.dot(x_ref[pl.ds(xo + 0, LSLAB), :], w0_ref[0],
                       preferred_element_type=jnp.float32)
        acc0 = acc0 + jnp.dot(x_ref[pl.ds(xo + 1, LSLAB), :], w0_ref[1],
                              preferred_element_type=jnp.float32)
        acc0 = acc0 + jnp.dot(x_ref[pl.ds(xo + GW, LSLAB), :], w0_ref[2],
                              preferred_element_type=jnp.float32)
        acc0 = acc0 + jnp.dot(x_ref[pl.ds(xo + GW + 1, LSLAB), :], w0_ref[3],
                              preferred_element_type=jnp.float32)
        y0o = b * LSLAB
        # valid y0[i, j] lives at scratch row i*GW + j (j < OW0 = GW-1); the
        # j = GW-1 rows are wrap-around garbage that layer 1 never reads.
        y0_scr[pl.ds(y0o, LSLAB), :] = jnp.maximum(acc0 + b0v, 0.0)

        # ---- layer 1: 4x4 / stride 2, 32 -> 64; ONE K=512 dot per output row --
        # TODO(synk): at large resolutions (OH1 ~ 30) switch these unrolled row
        # loops to lax.fori_loop to bound live ranges / code size.
        y1o = b * P1
        for i1 in range(OH1):
            pieces = []
            for di in range(KH1):
                base = y0o + (SH1 * i1 + di) * GW
                for dj in range(KW1):
                    # strided sublane load == stride-SW1 column gather
                    pieces.append(_rows(y0_scr, base + dj, OW1, SW1))
            patch = jnp.concatenate(pieces, axis=1).astype(jnp.bfloat16)
            acc1 = jnp.dot(patch, w1_ref[...],
                           preferred_element_type=jnp.float32)
            y1_scr[pl.ds(y1o + i1 * OW1, OW1), :] = jnp.maximum(acc1 + b1v, 0.0)

        # ---- layer 2: 3x3 / stride 1, 64 -> 32; ONE K=576 dot per output row --
        oo = b * P2
        for i2 in range(OH2):
            pieces = []
            for di in range(KH2):
                base = y1o + (SH2 * i2 + di) * OW1
                for dj in range(KW2):
                    pieces.append(_rows(y1_scr, base + dj, OW2, SW2))
            patch = jnp.concatenate(pieces, axis=1).astype(jnp.bfloat16)
            acc2 = jnp.dot(patch, w2_ref[...],
                           preferred_element_type=jnp.float32)
            o_ref[pl.ds(oo + i2 * OW2, OW2), :] = jnp.maximum(acc2 + b2v, 0.0)


# -----------------------------------------------------------------------------
# Forward wrapper (layout glue + pallas_call)
# -----------------------------------------------------------------------------
@functools.partial(jax.jit, static_argnames=("cfg",))
def _fused_forward(rgb, w0q, b0, w1, b1, w2, b2, *, cfg):
    B, H, W, C = rgb.shape
    (OH0, OW0), (OH1, OW1), (OH2, OW2) = cfg.out_hw
    SH0, SW0 = cfg.strides[0]
    GH, GW, NCELLS = cfg.gh, cfg.gw, cfg.ncells_pad
    C1, C2, C3 = cfg.chans[1], cfg.chans[2], cfg.chans[3]
    P2 = OH2 * OW2
    KCELL = SH0 * SW0 * C
    assert H == GH * SH0 and W == GW * SW0

    # Batch block: largest divisor of B up to 8 (amortizes per-grid-step cost).
    NB = 1
    for cand in (8, 4, 2):
        if B % cand == 0:
            NB = cand
            break

    # Raw pixels -> bf16 "cell" layout (same element count as the raw image, no
    # im2col blowup):  cells[b, gi*GW+gj, (dy*SW0+dx)*C + c] = x[b, 4gi+dy, 4gj+dx, c]
    # uint8-range pixel values are exact in bf16; /255 is folded into w0q.
    x = rgb.astype(jnp.bfloat16)
    x = x.reshape(B, GH, SH0, GW, SW0, C).transpose(0, 1, 3, 2, 4, 5)
    x = x.reshape(B, GH * GW, KCELL)
    x = jnp.pad(x, ((0, 0), (0, NCELLS - GH * GW), (0, 0)))
    x = x.reshape(B * NCELLS, KCELL)

    out = pl.pallas_call(
        functools.partial(_fused_cnn_kernel, cfg=cfg, nb=NB),
        out_shape=jax.ShapeDtypeStruct((B * P2, C3), jnp.float32),
        grid_spec=pltpu.PrefetchScalarGridSpec(
            num_scalar_prefetch=0,
            grid=(B // NB,),
            in_specs=[
                pl.BlockSpec((NB * NCELLS, KCELL), lambda g: (g, 0)),  # pixels
                pl.BlockSpec(w0q.shape, lambda g: (0, 0, 0)),  # resident weights
                pl.BlockSpec(b0.shape, lambda g: (0, 0)),
                pl.BlockSpec(w1.shape, lambda g: (0, 0)),
                pl.BlockSpec(b1.shape, lambda g: (0, 0)),
                pl.BlockSpec(w2.shape, lambda g: (0, 0)),
                pl.BlockSpec(b2.shape, lambda g: (0, 0)),
            ],
            out_specs=pl.BlockSpec((NB * P2, C3), lambda g: (g, 0)),
            scratch_shapes=[
                pltpu.VMEM((NB * OH0 * GW, C1), jnp.float32),   # layer-0 activ.
                pltpu.VMEM((NB * OH1 * OW1, C2), jnp.float32),  # layer-1 activ.
            ],
        ),
        compiler_params=pltpu.CompilerParams(
            dimension_semantics=("parallel",),   # megacore shards image blocks
            vmem_limit_bytes=48 * 1024 * 1024,   # fits v7x (64 MiB physical)
        ),
    )(x, w0q, b0, w1, b1, w2, b2)

    # TODO(synk): make the kernel's output store lane-dense ((OH2, OW2*C3) rows)
    # rather than 32-lane rows; negligible here since the output tile is tiny.
    return out.reshape(B, OH2, OW2, C3).transpose(0, 3, 1, 2)


# -----------------------------------------------------------------------------
# Module equivalent of SimpleRgbCNN (forward applies only the 3-conv stack)
# -----------------------------------------------------------------------------
class SimpleRgbCNNPallas:
    _kernel_sizes = ((8, 8), (4, 4), (3, 3))
    _strides = ((4, 4), (2, 2), (1, 1))
    _channels = (32, 64, 32)

    def __init__(self, rgb_shape, output_size, key):
        del output_size  # SimpleRgbCNN.forward never applies an FC layer
        H, W, C = rgb_shape
        self._n_input_rgb = C

        (kh0, kw0), (kh1, kw1), (kh2, kw2) = self._kernel_sizes
        (sh0, sw0), (sh1, sw1), (sh2, sw2) = self._strides
        # The in-kernel layer-0 patch builder uses the stride-cell layout, which
        # needs kernel == 2*stride and stride-aligned frame dims (true for the
        # fixed habitat config and 64x64 / 256x256 frames).
        assert kh0 == 2 * sh0 and kw0 == 2 * sw0
        assert H % sh0 == 0 and W % sw0 == 0, \
            "H, W must be multiples of the layer-0 stride"
        # TODO(synk): zero-pad H/W up to the next stride multiple to lift this.
        assert sw2 == 1  # layer-2 row loads rely on contiguous columns

        hw = (H, W)
        out_hw = []
        for (kh, kw), (sh, sw) in zip(self._kernel_sizes, self._strides):
            hw = (_conv_out(hw[0], kh, sh), _conv_out(hw[1], kw, sw))
            assert hw[0] > 0 and hw[1] > 0, "input too small for the conv stack"
            out_hw.append(hw)

        chans = (C,) + self._channels
        gh, gw = H // sh0, W // sw0
        # +1 row needed by the (di'=1, dj'=1) shifted slab; round up for safety.
        ncells_pad = _round_up(gh * gw + gw, 8)
        self.cfg = _CNNConfig(ks=self._kernel_sizes, strides=self._strides,
                              chans=chans, out_hw=tuple(out_hw),
                              gh=gh, gw=gw, ncells_pad=ncells_pad)

        # ---- master parameters (PyTorch Conv2d OIHW layout, f32) ------------
        # mimic nn.init.kaiming_normal_(w, a=calculate_gain('relu')):
        # leaky_relu gain with a = sqrt(2)  ->  gain = sqrt(2 / (1 + 2))
        self.params = []
        for i, (kh, kw) in enumerate(self._kernel_sizes):
            fan_in = chans[i] * kh * kw
            std = np.sqrt(2.0 / 3.0) / np.sqrt(fan_in)
            key, sub = jax.random.split(key)
            w = jax.random.normal(sub, (chans[i + 1], chans[i], kh, kw),
                                  dtype=jnp.float32) * std
            b = jnp.zeros((chans[i + 1],), dtype=jnp.float32)
            self.params.append((w, b))

        # ---- kernel operands precomputed ONCE (not per forward call) --------
        (w0, b0), (w1, b1), (w2, b2) = self.params

        # layer 0: fold 1/255, OIHW -> HWIO, split into the 4 stride-cell
        # quadrants, each (SH0*SW0*C, C1) and matching the cell lane order.
        w0_hwio = (w0 / 255.0).transpose(2, 3, 1, 0)         # (KH0, KW0, C, C1)
        quads = []
        for dq in range(kh0 // sh0):          # 2
            for dj in range(kw0 // sw0):      # 2
                q = w0_hwio[dq * sh0:(dq + 1) * sh0, dj * sw0:(dj + 1) * sw0]
                quads.append(q.reshape(sh0 * sw0 * chans[0], chans[1]))
        self.w0_eff = jnp.stack(quads, axis=0).astype(jnp.bfloat16)  # (4, 48, 32)
        self.b0_eff = b0.reshape(1, -1).astype(jnp.float32)

        # layers 1/2: taps fused along K -> (KH*KW*C_in, C_out), bf16 for MXU.
        self.w1_eff = w1.transpose(2, 3, 1, 0).reshape(
            kh1 * kw1 * chans[1], chans[2]).astype(jnp.bfloat16)     # (512, 64)
        self.b1_eff = b1.reshape(1, -1).astype(jnp.float32)
        self.w2_eff = w2.transpose(2, 3, 1, 0).reshape(
            kh2 * kw2 * chans[2], chans[3]).astype(jnp.bfloat16)     # (576, 32)
        self.b2_eff = b2.reshape(1, -1).astype(jnp.float32)

    @property
    def is_blind(self):
        return self._n_input_rgb == 0

    def __call__(self, observations):
        rgb = observations["rgb"]  # (B, H, W, C), uint8-range values in [0, 255]
        return _fused_forward(rgb, self.w0_eff, self.b0_eff,
                              self.w1_eff, self.b1_eff,
                              self.w2_eff, self.b2_eff, cfg=self.cfg)


# -----------------------------------------------------------------------------
# References for the sanity check
# -----------------------------------------------------------------------------
def _reference_forward_f32(model, rgb):
    """Original SimpleRgbCNN semantics: NCHW f32 convs on rgb / 255."""
    x = jnp.transpose(rgb, (0, 3, 1, 2)).astype(jnp.float32) / 255.0
    for (w, b), st in zip(model.params, model.cfg.strides):
        x = lax.conv_general_dilated(
            x, w, window_strides=st, padding="VALID",
            dimension_numbers=("NCHW", "OIHW", "NCHW"),
            precision=lax.Precision.HIGHEST)
        x = jnp.maximum(x + b[None, :, None, None], 0.0)
    return x


def _reference_forward_bf16(model, rgb):
    """Mirror of the kernel's dtype policy (bf16 operands, f32 accumulate)."""
    cfg = model.cfg
    (w0, b0), (w1, b1), (w2, b2) = model.params

    def prep(w, fold_255=False):
        w = w / 255.0 if fold_255 else w
        return w.transpose(2, 3, 1, 0).astype(jnp.bfloat16).astype(jnp.float32)

    def conv(x, w, st, b):
        y = lax.conv_general_dilated(
            x, w, window_strides=st, padding="VALID",
            dimension_numbers=("NHWC", "HWIO", "NHWC"),
            precision=lax.Precision.HIGHEST)
        return jnp.maximum(y + b.reshape(1, 1, 1, -1), 0.0)

    x = rgb.astype(jnp.bfloat16).astype(jnp.float32)
    x = conv(x, prep(w0, True), cfg.strides[0], b0)      # /255 folded into w0
    x = x.astype(jnp.bfloat16).astype(jnp.float32)
    x = conv(x, prep(w1), cfg.strides[1], b1)
    x = x.astype(jnp.bfloat16).astype(jnp.float32)
    x = conv(x, prep(w2), cfg.strides[2], b2)
    return jnp.transpose(x, (0, 3, 1, 2))


if __name__ == "__main__":
    key = jax.random.PRNGKey(0)
    k_obs, k_params = jax.random.split(key)

    # Small habitat-like RGB observation: batch=2, 64x64x3, uint8-range pixels.
    B, H, W, C = 2, 64, 64, 3
    rgb = jax.random.randint(k_obs, (B, H, W, C), 0, 256).astype(jnp.float32)
    observations = {"rgb": rgb}

    model = SimpleRgbCNNPallas((H, W, C), output_size=512, key=k_params)

    out = jax.block_until_ready(model(observations))
    # spatial chain: 64 -> 15 -> 6 -> 4 ; channels 3 -> 32 -> 64 -> 32
    assert out.shape == (B, 32, 4, 4), out.shape

    # tight check vs a reference that mirrors the kernel's bf16/f32 policy
    ref = jax.block_until_ready(_reference_forward_bf16(model, rgb))
    np.testing.assert_allclose(np.asarray(out), np.asarray(ref),
                               rtol=2e-3, atol=2e-3)

    # loose check vs the original full-f32 SimpleRgbCNN math
    ref32 = jax.block_until_ready(_reference_forward_f32(model, rgb))
    np.testing.assert_allclose(np.asarray(out), np.asarray(ref32),
                               rtol=5e-2, atol=5e-2)

    print("KERNEL_OK")
</pallas_src>

<mosaic_0001>
module attributes {stable_mosaic.version = 11 : i64} {
  func.func @_fused_cnn_kernel(%arg0: i32, %arg1: memref<544x48xbf16, #tpu.memory_space<vmem>>, %arg2: memref<4x48x32xbf16, #tpu.memory_space<vmem>>, %arg3: memref<1x32xf32, #tpu.memory_space<vmem>>, %arg4: memref<512x64xbf16, #tpu.memory_space<vmem>>, %arg5: memref<1x64xf32, #tpu.memory_space<vmem>>, %arg6: memref<576x32xbf16, #tpu.memory_space<vmem>>, %arg7: memref<1x32xf32, #tpu.memory_space<vmem>>, %arg8: memref<32x32xf32, #tpu.memory_space<vmem>>, %arg9: memref<480x32xf32, #tpu.memory_space<vmem>>, %arg10: memref<72x64xf32, #tpu.memory_space<vmem>>) attributes {dimension_semantics = [#tpu.dimension_semantics<parallel>], iteration_bounds = array<i64: 1>, scalar_prefetch = 0 : i64, scratch_operands = 2 : i64, tpu.core_type = #tpu.core_type<tc>, window_params = [{transform_indices = @transform_0, window_bounds = array<i64: 544, 48>}, {pipeline_mode = #tpu.pipeline_mode<synchronous>, transform_indices = @transform_1, window_bounds = array<i64: 4, 48, 32>}, {pipeline_mode = #tpu.pipeline_mode<synchronous>, transform_indices = @transform_2, window_bounds = array<i64: 1, 32>}, {pipeline_mode = #tpu.pipeline_mode<synchronous>, transform_indices = @transform_3, window_bounds = array<i64: 512, 64>}, {pipeline_mode = #tpu.pipeline_mode<synchronous>, transform_indices = @transform_4, window_bounds = array<i64: 1, 64>}, {pipeline_mode = #tpu.pipeline_mode<synchronous>, transform_indices = @transform_5, window_bounds = array<i64: 576, 32>}, {pipeline_mode = #tpu.pipeline_mode<synchronous>, transform_indices = @transform_6, window_bounds = array<i64: 1, 32>}, {transform_indices = @transform_7, window_bounds = array<i64: 32, 32>}]} {
    %c0 = arith.constant 0 : index
    %c0_0 = arith.constant 0 : index
    %0 = vector.load %arg3[%c0, %c0_0] : memref<1x32xf32, #tpu.memory_space<vmem>>, vector<1x32xf32>
    %c0_1 = arith.constant 0 : index
    %c0_2 = arith.constant 0 : index
    %1 = vector.load %arg5[%c0_1, %c0_2] : memref<1x64xf32, #tpu.memory_space<vmem>>, vector<1x64xf32>
    %c0_3 = arith.constant 0 : index
    %c0_4 = arith.constant 0 : index
    %2 = vector.load %arg7[%c0_3, %c0_4] : memref<1x32xf32, #tpu.memory_space<vmem>>, vector<1x32xf32>
    %c0_5 = arith.constant 0 : index
    %c0_6 = arith.constant 0 : index
    %3 = vector.load %arg1[%c0_5, %c0_6] : memref<544x48xbf16, #tpu.memory_space<vmem>>, vector<240x48xbf16>
    %c0_7 = arith.constant 0 : index
    %c0_8 = arith.constant 0 : index
    %c0_9 = arith.constant 0 : index
    %4 = vector.load %arg2[%c0_7, %c0_8, %c0_9] : memref<4x48x32xbf16, #tpu.memory_space<vmem>>, vector<1x48x32xbf16>
    %5 = vector.shape_cast %4 : vector<1x48x32xbf16> to vector<48x32xbf16>
    %cst = arith.constant dense<0.000000e+00> : vector<240x32xf32>
    %6 = tpu.matmul %3, %5, %cst {dimension_numbers = #tpu.dot_dimension_numbers<[1], [0], [0], [1], [0, 0, 1, 1], [], []>} : vector<240x48xbf16>, vector<48x32xbf16>, vector<240x32xf32> -> vector<240x32xf32>
    %c1 = arith.constant 1 : index
    %c0_10 = arith.constant 0 : index
    %7 = vector.load %arg1[%c1, %c0_10] : memref<544x48xbf16, #tpu.memory_space<vmem>>, vector<240x48xbf16>
    %c1_11 = arith.constant 1 : index
    %c0_12 = arith.constant 0 : index
    %c0_13 = arith.constant 0 : index
    %8 = vector.load %arg2[%c1_11, %c0_12, %c0_13] : memref<4x48x32xbf16, #tpu.memory_space<vmem>>, vector<1x48x32xbf16>
    %9 = vector.shape_cast %8 : vector<1x48x32xbf16> to vector<48x32xbf16>
    %cst_14 = arith.constant dense<0.000000e+00> : vector<240x32xf32>
    %10 = tpu.matmul %7, %9, %cst_14 {dimension_numbers = #tpu.dot_dimension_numbers<[1], [0], [0], [1], [0, 0, 1, 1], [], []>} : vector<240x48xbf16>, vector<48x32xbf16>, vector<240x32xf32> -> vector<240x32xf32>
    %11 = arith.addf %6, %10 : vector<240x32xf32>
    %c16 = arith.constant 16 : index
    %c0_15 = arith.constant 0 : index
    %12 = vector.load %arg1[%c16, %c0_15] : memref<544x48xbf16, #tpu.memory_space<vmem>>, vector<240x48xbf16>
    %c2 = arith.constant 2 : index
    %c0_16 = arith.constant 0 : index
    %c0_17 = arith.constant 0 : index
    %13 = vector.load %arg2[%c2, %c0_16, %c0_17] : memref<4x48x32xbf16, #tpu.memory_space<vmem>>, vector<1x48x32xbf16>
    %14 = vector.shape_cast %13 : vector<1x48x32xbf16> to vector<48x32xbf16>
    %cst_18 = arith.constant dense<0.000000e+00> : vector<240x32xf32>
    %15 = tpu.matmul %12, %14, %cst_18 {dimension_numbers = #tpu.dot_dimension_numbers<[1], [0], [0], [1], [0, 0, 1, 1], [], []>} : vector<240x48xbf16>, vector<48x32xbf16>, vector<240x32xf32> -> vector<240x32xf32>
    %16 = arith.addf %11, %15 : vector<240x32xf32>
    %c17 = arith.constant 17 : index
    %c0_19 = arith.constant 0 : index
    %17 = vector.load %arg1[%c17, %c0_19] : memref<544x48xbf16, #tpu.memory_space<vmem>>, vector<240x48xbf16>
    %c3 = arith.constant 3 : index
    %c0_20 = arith.constant 0 : index
    %c0_21 = arith.constant 0 : index
    %18 = vector.load %arg2[%c3, %c0_20, %c0_21] : memref<4x48x32xbf16, #tpu.memory_space<vmem>>, vector<1x48x32xbf16>
    %19 = vector.shape_cast %18 : vector<1x48x32xbf16> to vector<48x32xbf16>
    %cst_22 = arith.constant dense<0.000000e+00> : vector<240x32xf32>
    %20 = tpu.matmul %17, %19, %cst_22 {dimension_numbers = #tpu.dot_dimension_numbers<[1], [0], [0], [1], [0, 0, 1, 1], [], []>} : vector<240x48xbf16>, vector<48x32xbf16>, vector<240x32xf32> -> vector<240x32xf32>
    %21 = arith.addf %16, %20 : vector<240x32xf32>
    %22 = vector.broadcast %0 : vector<1x32xf32> to vector<240x32xf32>
    %23 = arith.addf %21, %22 : vector<240x32xf32>
    %cst_23 = arith.constant 0.000000e+00 : f32
    %24 = vector.broadcast %cst_23 : f32 to vector<240x32xf32>
    %25 = arith.maximumf %23, %24 : vector<240x32xf32>
    %c0_24 = arith.constant 0 : index
    %c0_25 = arith.constant 0 : index
    %26 = vector.load %arg9[%c0_24, %c0_25] : memref<480x32xf32, #tpu.memory_space<vmem>>, vector<240x32xf32>
    tpu.vector_store %arg9[%c0_24, %c0_25], %25 {strides = array<i32>} : memref<480x32xf32, #tpu.memory_space<vmem>>, vector<240x32xf32>,
    %c0_26 = arith.constant 0 : index
    %c0_27 = arith.constant 0 : index
    %27 = tpu.strided_load %arg9[%c0_26, %c0_27] {strides = array<i32: 2, 1>} : memref<480x32xf32, #tpu.memory_space<vmem>>, vector<6x32xf32>
    %c1_28 = arith.constant 1 : index
    %c0_29 = arith.constant 0 : index
    %28 = tpu.strided_load %arg9[%c1_28, %c0_29] {strides = array<i32: 2, 1>} : memref<480x32xf32, #tpu.memory_space<vmem>>, vector<6x32xf32>
    %c2_30 = arith.constant 2 : index
    %c0_31 = arith.constant 0 : index
    %29 = tpu.strided_load %arg9[%c2_30, %c0_31] {strides = array<i32: 2, 1>} : memref<480x32xf32, #tpu.memory_space<vmem>>, vector<6x32xf32>
    %c3_32 = arith.constant 3 : index
    %c0_33 = arith.constant 0 : index
    %30 = tpu.strided_load %arg9[%c3_32, %c0_33] {strides = array<i32: 2, 1>} : memref<480x32xf32, #tpu.memory_space<vmem>>, vector<6x32xf32>
    %c16_34 = arith.constant 16 : index
    %c0_35 = arith.constant 0 : index
    %31 = tpu.strided_load %arg9[%c16_34, %c0_35] {strides = array<i32: 2, 1>} : memref<480x32xf32, #tpu.memory_space<vmem>>, vector<6x32xf32>
    %c17_36 = arith.constant 17 : index
    %c0_37 = arith.constant 0 : index
    %32 = tpu.strided_load %arg9[%c17_36, %c0_37] {strides = array<i32: 2, 1>} : memref<480x32xf32, #tpu.memory_space<vmem>>, vector<6x32xf32>
    %c18 = arith.constant 18 : index
    %c0_38 = arith.constant 0 : index
    %33 = tpu.strided_load %arg9[%c18, %c0_38] {strides = array<i32: 2, 1>} : memref<480x32xf32, #tpu.memory_space<vmem>>, vector<6x32xf32>
    %c19 = arith.constant 19 : index
    %c0_39 = arith.constant 0 : index
    %34 = tpu.strided_load %arg9[%c19, %c0_39] {strides = array<i32: 2, 1>} : memref<480x32xf32, #tpu.memory_space<vmem>>, vector<6x32xf32>
    %c32 = arith.constant 32 : index
    %c0_40 = arith.constant 0 : index
    %35 = tpu.strided_load %arg9[%c32, %c0_40] {strides = array<i32: 2, 1>} : memref<480x32xf32, #tpu.memory_space<vmem>>, vector<6x32xf32>
    %c33 = arith.constant 33 : index
    %c0_41 = arith.constant 0 : index
    %36 = tpu.strided_load %arg9[%c33, %c0_41] {strides = array<i32: 2, 1>} : memref<480x32xf32, #tpu.memory_space<vmem>>, vector<6x32xf32>
    %c34 = arith.constant 34 : index
    %c0_42 = arith.constant 0 : index
    %37 = tpu.strided_load %arg9[%c34, %c0_42] {strides = array<i32: 2, 1>} : memref<480x32xf32, #tpu.memory_space<vmem>>, vector<6x32xf32>
    %c35 = arith.constant 35 : index
    %c0_43 = arith.constant 0 : index
    %38 = tpu.strided_load %arg9[%c35, %c0_43] {strides = array<i32: 2, 1>} : memref<480x32xf32, #tpu.memory_space<vmem>>, vector<6x32xf32>
    %c48 = arith.constant 48 : index
    %c0_44 = arith.constant 0 : index
    %39 = tpu.strided_load %arg9[%c48, %c0_44] {strides = array<i32: 2, 1>} : memref<480x32xf32, #tpu.memory_space<vmem>>, vector<6x32xf32>
    %c49 = arith.constant 49 : index
    %c0_45 = arith.constant 0 : index
    %40 = tpu.strided_load %arg9[%c49, %c0_45] {strides = array<i32: 2, 1>} : memref<480x32xf32, #tpu.memory_space<vmem>>, vector<6x32xf32>
    %c50 = arith.constant 50 : index
    %c0_46 = arith.constant 0 : index
    %41 = tpu.strided_load %arg9[%c50, %c0_46] {strides = array<i32: 2, 1>} : memref<480x32xf32, #tpu.memory_space<vmem>>, vector<6x32xf32>
    %c51 = arith.constant 51 : index
    %c0_47 = arith.constant 0 : index
    %42 = tpu.strided_load %arg9[%c51, %c0_47] {strides = array<i32: 2, 1>} : memref<480x32xf32, #tpu.memory_space<vmem>>, vector<6x32xf32>
    %43 = tpu.concatenate %27, %28, %29, %30, %31, %32, %33, %34, %35, %36, %37, %38, %39, %40, %41, %42 in 1 : vector<6x32xf32>, vector<6x32xf32>, vector<6x32xf32>, vector<6x32xf32>, vector<6x32xf32>, vector<6x32xf32>, vector<6x32xf32>, vector<6x32xf32>, vector<6x32xf32>, vector<6x32xf32>, vector<6x32xf32>, vector<6x32xf32>, vector<6x32xf32>, vector<6x32xf32>, vector<6x32xf32>, vector<6x32xf32> -> vector<6x512xf32>
    %44 = arith.truncf %43 : vector<6x512xf32> to vector<6x512xbf16>
    %c0_48 = arith.constant 0 : index
    %c0_49 = arith.constant 0 : index
    %45 = vector.load %arg4[%c0_48, %c0_49] : memref<512x64xbf16, #tpu.memory_space<vmem>>, vector<512x64xbf16>
    %cst_50 = arith.constant dense<0.000000e+00> : vector<6x64xf32>
    %46 = tpu.matmul %44, %45, %cst_50 {dimension_numbers = #tpu.dot_dimension_numbers<[1], [0], [0], [1], [0, 0, 1, 1], [], []>} : vector<6x512xbf16>, vector<512x64xbf16>, vector<6x64xf32> -> vector<6x64xf32>
    %47 = vector.broadcast %1 : vector<1x64xf32> to vector<6x64xf32>
    %48 = arith.addf %46, %47 : vector<6x64xf32>
    %cst_51 = arith.constant 0.000000e+00 : f32
    %49 = vector.broadcast %cst_51 : f32 to vector<6x64xf32>
    %50 = arith.maximumf %48, %49 : vector<6x64xf32>
    %c0_52 = arith.constant 0 : index
    %c0_53 = arith.constant 0 : index
    %51 = vector.load %arg10[%c0_52, %c0_53] : memref<72x64xf32, #tpu.memory_space<vmem>>, vector<6x64xf32>
    tpu.vector_store %arg10[%c0_52, %c0_53], %50 {strides = array<i32>} : memref<72x64xf32, #tpu.memory_space<vmem>>, vector<6x64xf32>,
    %c32_54 = arith.constant 32 : index
    %c0_55 = arith.constant 0 : index
    %52 = tpu.strided_load %arg9[%c32_54, %c0_55] {strides = array<i32: 2, 1>} : memref<480x32xf32, #tpu.memory_space<vmem>>, vector<6x32xf32>
    %c33_56 = arith.constant 33 : index
    %c0_57 = arith.constant 0 : index
    %53 = tpu.strided_load %arg9[%c33_56, %c0_57] {strides = array<i32: 2, 1>} : memref<480x32xf32, #tpu.memory_space<vmem>>, vector<6x32xf32>
    %c34_58 = arith.constant 34 : index
    %c0_59 = arith.constant 0 : index
    %54 = tpu.strided_load %arg9[%c34_58, %c0_59] {strides = array<i32: 2, 1>} : memref<480x32xf32, #tpu.memory_space<vmem>>, vector<6x32xf32>
    %c35_60 = arith.constant 35 : index
    %c0_61 = arith.constant 0 : index
    %55 = tpu.strided_load %arg9[%c35_60, %c0_61] {strides = array<i32: 2, 1>} : memref<480x32xf32, #tpu.memory_space<vmem>>, vector<6x32xf32>
    %c48_62 = arith.constant 48 : index
    %c0_63 = arith.constant 0 : index
    %56 = tpu.strided_load %arg9[%c48_62, %c0_63] {strides = array<i32: 2, 1>} : memref<480x32xf32, #tpu.memory_space<vmem>>, vector<6x32xf32>
    %c49_64 = arith.constant 49 : index
    %c0_65 = arith.constant 0 : index
    %57 = tpu.strided_load %arg9[%c49_64, %c0_65] {strides = array<i32: 2, 1>} : memref<480x32xf32, #tpu.memory_space<vmem>>, vector<6x32xf32>
    %c50_66 = arith.constant 50 : index
    %c0_67 = arith.constant 0 : index
    %58 = tpu.strided_load %arg9[%c50_66, %c0_67] {strides = array<i32: 2, 1>} : memref<480x32xf32, #tpu.memory_space<vmem>>, vector<6x32xf32>
    %c51_68 = arith.constant 51 : index
    %c0_69 = arith.constant 0 : index
    %59 = tpu.strided_load %arg9[%c51_68, %c0_69] {strides = array<i32: 2, 1>} : memref<480x32xf32, #tpu.memory_space<vmem>>, vector<6x32xf32>
    %c64 = arith.constant 64 : index
    %c0_70 = arith.constant 0 : index
    %60 = tpu.strided_load %arg9[%c64, %c0_70] {strides = array<i32: 2, 1>} : memref<480x32xf32, #tpu.memory_space<vmem>>, vector<6x32xf32>
    %c65 = arith.constant 65 : index
    %c0_71 = arith.constant 0 : index
    %61 = tpu.strided_load %arg9[%c65, %c0_71] {strides = array<i32: 2, 1>} : memref<480x32xf32, #tpu.memory_space<vmem>>, vector<6x32xf32>
    %c66 = arith.constant 66 : index
    %c0_72 = arith.constant 0 : index
    %62 = tpu.strided_load %arg9[%c66, %c0_72] {strides = array<i32: 2, 1>} : memref<480x32xf32, #tpu.memory_space<vmem>>, vector<6x32xf32>
    %c67 = arith.constant 67 : index
    %c0_73 = arith.constant 0 : index
    %63 = tpu.strided_load %arg9[%c67, %c0_73] {strides = array<i32: 2, 1>} : memref<480x32xf32, #tpu.memory_space<vmem>>, vector<6x32xf32>
    %c80 = arith.constant 80 : index
    %c0_74 = arith.constant 0 : index
    %64 = tpu.strided_load %arg9[%c80, %c0_74] {strides = array<i32: 2, 1>} : memref<480x32xf32, #tpu.memory_space<vmem>>, vector<6x32xf32>
    %c81 = arith.constant 81 : index
    %c0_75 = arith.constant 0 : index
    %65 = tpu.strided_load %arg9[%c81, %c0_75] {strides = array<i32: 2, 1>} : memref<480x32xf32, #tpu.memory_space<vmem>>, vector<6x32xf32>
    %c82 = arith.constant 82 : index
    %c0_76 = arith.constant 0 : index
    %66 = tpu.strided_load %arg9[%c82, %c0_76] {strides = array<i32: 2, 1>} : memref<480x32xf32, #tpu.memory_space<vmem>>, vector<6x32xf32>
    %c83 = arith.constant 83 : index
    %c0_77 = arith.constant 0 : index
    %67 = tpu.strided_load %arg9[%c83, %c0_77] {strides = array<i32: 2, 1>} : memref<480x32xf32, #tpu.memory_space<vmem>>, vector<6x32xf32>
    %68 = tpu.concatenate %52, %53, %54, %55, %56, %57, %58, %59, %60, %61, %62, %63, %64, %65, %66, %67 in 1 : vector<6x32xf32>, vector<6x32xf32>, vector<6x32xf32>, vector<6x32xf32>, vector<6x32xf32>, vector<6x32xf32>, vector<6x32xf32>, vector<6x32xf32>, vector<6x32xf32>, vector<6x32xf32>, vector<6x32xf32>, vector<6x32xf32>, vector<6x32xf32>, vector<6x32xf32>, vector<6x32xf32>, vector<6x32xf32> -> vector<6x512xf32>
    %69 = arith.truncf %68 : vector<6x512xf32> to vector<6x512xbf16>
    %c0_78 = arith.constant 0 : index
    %c0_79 = arith.constant 0 : index
    %70 = vector.load %arg4[%c0_78, %c0_79] : memref<512x64xbf16, #tpu.memory_space<vmem>>, vector<512x64xbf16>
    %cst_80 = arith.constant dense<0.000000e+00> : vector<6x64xf32>
    %71 = tpu.matmul %69, %70, %cst_80 {dimension_numbers = #tpu.dot_dimension_numbers<[1], [0], [0], [1], [0, 0, 1, 1], [], []>} : vector<6x512xbf16>, vector<512x64xbf16>, vector<6x64xf32> -> vector<6x64xf32>
    %72 = vector.broadcast %1 : vector<1x64xf32> to vector<6x64xf32>
    %73 = arith.addf %71, %72 : vector<6x64xf32>
    %cst_81 = arith.constant 0.000000e+00 : f32
    %74 = vector.broadcast %cst_81 : f32 to vector<6x64xf32>
    %75 = arith.maximumf %73, %74 : vector<6x64xf32>
    %c6 = arith.constant 6 : index
    %c0_82 = arith.constant 0 : index
    %76 = vector.load %arg10[%c6, %c0_82] : memref<72x64xf32, #tpu.memory_space<vmem>>, vector<6x64xf32>
    tpu.vector_store %arg10[%c6, %c0_82], %75 {strides = array<i32>} : memref<72x64xf32, #tpu.memory_space<vmem>>, vector<6x64xf32>,
    %c64_83 = arith.constant 64 : index
    %c0_84 = arith.constant 0 : index
    %77 = tpu.strided_load %arg9[%c64_83, %c0_84] {strides = array<i32: 2, 1>} : memref<480x32xf32, #tpu.memory_space<vmem>>, vector<6x32xf32>
    %c65_85 = arith.constant 65 : index
    %c0_86 = arith.constant 0 : index
    %78 = tpu.strided_load %arg9[%c65_85, %c0_86] {strides = array<i32: 2, 1>} : memref<480x32xf32, #tpu.memory_space<vmem>>, vector<6x32xf32>
    %c66_87 = arith.constant 66 : index
    %c0_88 = arith.constant 0 : index
    %79 = tpu.strided_load %arg9[%c66_87, %c0_88] {strides = array<i32: 2, 1>} : memref<480x32xf32, #tpu.memory_space<vmem>>, vector<6x32xf32>
    %c67_89 = arith.constant 67 : index
    %c0_90 = arith.constant 0 : index
    %80 = tpu.strided_load %arg9[%c67_89, %c0_90] {strides = array<i32: 2, 1>} : memref<480x32xf32, #tpu.memory_space<vmem>>, vector<6x32xf32>
    %c80_91 = arith.constant 80 : index
    %c0_92 = arith.constant 0 : index
    %81 = tpu.strided_load %arg9[%c80_91, %c0_92] {strides = array<i32: 2, 1>} : memref<480x32xf32, #tpu.memory_space<vmem>>, vector<6x32xf32>
    %c81_93 = arith.constant 81 : index
    %c0_94 = arith.constant 0 : index
    %82 = tpu.strided_load %arg9[%c81_93, %c0_94] {strides = array<i32: 2, 1>} : memref<480x32xf32, #tpu.memory_space<vmem>>, vector<6x32xf32>
    %c82_95 = arith.constant 82 : index
    %c0_96 = arith.constant 0 : index
    %83 = tpu.strided_load %arg9[%c82_95, %c0_96] {strides = array<i32: 2, 1>} : memref<480x32xf32, #tpu.memory_space<vmem>>, vector<6x32xf32>
    %c83_97 = arith.constant 83 : index
    %c0_98 = arith.constant 0 : index
    %84 = tpu.strided_load %arg9[%c83_97, %c0_98] {strides = array<i32: 2, 1>} : memref<480x32xf32, #tpu.memory_space<vmem>>, vector<6x32xf32>
    %c96 = arith.constant 96 : index
    %c0_99 = arith.constant 0 : index
    %85 = tpu.strided_load %arg9[%c96, %c0_99] {strides = array<i32: 2, 1>} : memref<480x32xf32, #tpu.memory_space<vmem>>, vector<6x32xf32>
    %c97 = arith.constant 97 : index
    %c0_100 = arith.constant 0 : index
    %86 = tpu.strided_load %arg9[%c97, %c0_100] {strides = array<i32: 2, 1>} : memref<480x32xf32, #tpu.memory_space<vmem>>, vector<6x32xf32>
    %c98 = arith.constant 98 : index
    %c0_101 = arith.constant 0 : index
    %87 = tpu.strided_load %arg9[%c98, %c0_101] {strides = array<i32: 2, 1>} : memref<480x32xf32, #tpu.memory_space<vmem>>, vector<6x32xf32>
    %c99 = arith.constant 99 : index
    %c0_102 = arith.constant 0 : index
    %88 = tpu.strided_load %arg9[%c99, %c0_102] {strides = array<i32: 2, 1>} : memref<480x32xf32, #tpu.memory_space<vmem>>, vector<6x32xf32>
    %c112 = arith.constant 112 : index
    %c0_103 = arith.constant 0 : index
    %89 = tpu.strided_load %arg9[%c112, %c0_103] {strides = array<i32: 2, 1>} : memref<480x32xf32, #tpu.memory_space<vmem>>, vector<6x32xf32>
    %c113 = arith.constant 113 : index
    %c0_104 = arith.constant 0 : index
    %90 = tpu.strided_load %arg9[%c113, %c0_104] {strides = array<i32: 2, 1>} : memref<480x32xf32, #tpu.memory_space<vmem>>, vector<6x32xf32>
    %c114 = arith.constant 114 : index
    %c0_105 = arith.constant 0 : index
    %91 = tpu.strided_load %arg9[%c114, %c0_105] {strides = array<i32: 2, 1>} : memref<480x32xf32, #tpu.memory_space<vmem>>, vector<6x32xf32>
    %c115 = arith.constant 115 : index
    %c0_106 = arith.constant 0 : index
    %92 = tpu.strided_load %arg9[%c115, %c0_106] {strides = array<i32: 2, 1>} : memref<480x32xf32, #tpu.memory_space<vmem>>, vector<6x32xf32>
    %93 = tpu.concatenate %77, %78, %79, %80, %81, %82, %83, %84, %85, %86, %87, %88, %89, %90, %91, %92 in 1 : vector<6x32xf32>, vector<6x32xf32>, vector<6x32xf32>, vector<6x32xf32>, vector<6x32xf32>, vector<6x32xf32>, vector<6x32xf32>, vector<6x32xf32>, vector<6x32xf32>, vector<6x32xf32>, vector<6x32xf32>, vector<6x32xf32>, vector<6x32xf32>, vector<6x32xf32>, vector<6x32xf32>, vector<6x32xf32> -> vector<6x512xf32>
    %94 = arith.truncf %93 : vector<6x512xf32> to vector<6x512xbf16>
    %c0_107 = arith.constant 0 : index
    %c0_108 = arith.constant 0 : index
    %95 = vector.load %arg4[%c0_107, %c0_108] : memref<512x64xbf16, #tpu.memory_space<vmem>>, vector<512x64xbf16>
    %cst_109 = arith.constant dense<0.000000e+00> : vector<6x64xf32>
    %96 = tpu.matmul %94, %95, %cst_109 {dimension_numbers = #tpu.dot_dimension_numbers<[1], [0], [0], [1], [0, 0, 1, 1], [], []>} : vector<6x512xbf16>, vector<512x64xbf16>, vector<6x64xf32> -> vector<6x64xf32>
    %97 = vector.broadcast %1 : vector<1x64xf32> to vector<6x64xf32>
    %98 = arith.addf %96, %97 : vector<6x64xf32>
    %cst_110 = arith.constant 0.000000e+00 : f32
    %99 = vector.broadcast %cst_110 : f32 to vector<6x64xf32>
    %100 = arith.maximumf %98, %99 : vector<6x64xf32>
    %c12 = arith.constant 12 : index
    %c0_111 = arith.constant 0 : index
    %101 = vector.load %arg10[%c12, %c0_111] : memref<72x64xf32, #tpu.memory_space<vmem>>, vector<6x64xf32>
    tpu.vector_store %arg10[%c12, %c0_111], %100 {strides = array<i32>} : memref<72x64xf32, #tpu.memory_space<vmem>>, vector<6x64xf32>,
    %c96_112 = arith.constant 96 : index
    %c0_113 = arith.constant 0 : index
    %102 = tpu.strided_load %arg9[%c96_112, %c0_113] {strides = array<i32: 2, 1>} : memref<480x32xf32, #tpu.memory_space<vmem>>, vector<6x32xf32>
    %c97_114 = arith.constant 97 : index
    %c0_115 = arith.constant 0 : index
    %103 = tpu.strided_load %arg9[%c97_114, %c0_115] {strides = array<i32: 2, 1>} : memref<480x32xf32, #tpu.memory_space<vmem>>, vector<6x32xf32>
    %c98_116 = arith.constant 98 : index
    %c0_117 = arith.constant 0 : index
    %104 = tpu.strided_load %arg9[%c98_116, %c0_117] {strides = array<i32: 2, 1>} : memref<480x32xf32, #tpu.memory_space<vmem>>, vector<6x32xf32>
    %c99_118 = arith.constant 99 : index
    %c0_119 = arith.constant 0 : index
    %105 = tpu.strided_load %arg9[%c99_118, %c0_119] {strides = array<i32: 2, 1>} : memref<480x32xf32, #tpu.memory_space<vmem>>, vector<6x32xf32>
    %c112_120 = arith.constant 112 : index
    %c0_121 = arith.constant 0 : index
    %106 = tpu.strided_load %arg9[%c112_120, %c0_121] {strides = array<i32: 2, 1>} : memref<480x32xf32, #tpu.memory_space<vmem>>, vector<6x32xf32>
    %c113_122 = arith.constant 113 : index
    %c0_123 = arith.constant 0 : index
    %107 = tpu.strided_load %arg9[%c113_122, %c0_123] {strides = array<i32: 2, 1>} : memref<480x32xf32, #tpu.memory_space<vmem>>, vector<6x32xf32>
    %c114_124 = arith.constant 114 : index
    %c0_125 = arith.constant 0 : index
    %108 = tpu.strided_load %arg9[%c114_124, %c0_125] {strides = array<i32: 2, 1>} : memref<480x32xf32, #tpu.memory_space<vmem>>, vector<6x32xf32>
    %c115_126 = arith.constant 115 : index
    %c0_127 = arith.constant 0 : index
    %109 = tpu.strided_load %arg9[%c115_126, %c0_127] {strides = array<i32: 2, 1>} : memref<480x32xf32, #tpu.memory_space<vmem>>, vector<6x32xf32>
    %c128 = arith.constant 128 : index
    %c0_128 = arith.constant 0 : index
    %110 = tpu.strided_load %arg9[%c128, %c0_128] {strides = array<i32: 2, 1>} : memref<480x32xf32, #tpu.memory_space<vmem>>, vector<6x32xf32>
    %c129 = arith.constant 129 : index
    %c0_129 = arith.constant 0 : index
    %111 = tpu.strided_load %arg9[%c129, %c0_129] {strides = array<i32: 2, 1>} : memref<480x32xf32, #tpu.memory_space<vmem>>, vector<6x32xf32>
    %c130 = arith.constant 130 : index
    %c0_130 = arith.constant 0 : index
    %112 = tpu.strided_load %arg9[%c130, %c0_130] {strides = array<i32: 2, 1>} : memref<480x32xf32, #tpu.memory_space<vmem>>, vector<6x32xf32>
    %c131 = arith.constant 131 : index
    %c0_131 = arith.constant 0 : index
    %113 = tpu.strided_load %arg9[%c131, %c0_131] {strides = array<i32: 2, 1>} : memref<480x32xf32, #tpu.memory_space<vmem>>, vector<6x32xf32>
    %c144 = arith.constant 144 : index
    %c0_132 = arith.constant 0 : index
    %114 = tpu.strided_load %arg9[%c144, %c0_132] {strides = array<i32: 2, 1>} : memref<480x32xf32, #tpu.memory_space<vmem>>, vector<6x32xf32>
    %c145 = arith.constant 145 : index
    %c0_133 = arith.constant 0 : index
    %115 = tpu.strided_load %arg9[%c145, %c0_133] {strides = array<i32: 2, 1>} : memref<480x32xf32, #tpu.memory_space<vmem>>, vector<6x32xf32>
    %c146 = arith.constant 146 : index
    %c0_134 = arith.constant 0 : index
    %116 = tpu.strided_load %arg9[%c146, %c0_134] {strides = array<i32: 2, 1>} : memref<480x32xf32, #tpu.memory_space<vmem>>, vector<6x32xf32>
    %c147 = arith.constant 147 : index
    %c0_135 = arith.constant 0 : index
    %117 = tpu.strided_load %arg9[%c147, %c0_135] {strides = array<i32: 2, 1>} : memref<480x32xf32, #tpu.memory_space<vmem>>, vector<6x32xf32>
    %118 = tpu.concatenate %102, %103, %104, %105, %106, %107, %108, %109, %110, %111, %112, %113, %114, %115, %116, %117 in 1 : vector<6x32xf32>, vector<6x32xf32>, vector<6x32xf32>, vector<6x32xf32>, vector<6x32xf32>, vector<6x32xf32>, vector<6x32xf32>, vector<6x32xf32>, vector<6x32xf32>, vector<6x32xf32>, vector<6x32xf32>, vector<6x32xf32>, vector<6x32xf32>, vector<6x32xf32>, vector<6x32xf32>, vector<6x32xf32> -> vector<6x512xf32>
    %119 = arith.truncf %118 : vector<6x512xf32> to vector<6x512xbf16>
    %c0_136 = arith.constant 0 : index
    %c0_137 = arith.constant 0 : index
    %120 = vector.load %arg4[%c0_136, %c0_137] : memref<512x64xbf16, #tpu.memory_space<vmem>>, vector<512x64xbf16>
    %cst_138 = arith.constant dense<0.000000e+00> : vector<6x64xf32>
    %121 = tpu.matmul %119, %120, %cst_138 {dimension_numbers = #tpu.dot_dimension_numbers<[1], [0], [0], [1], [0, 0, 1, 1], [], []>} : vector<6x512xbf16>, vector<512x64xbf16>, vector<6x64xf32> -> vector<6x64xf32>
    %122 = vector.broadcast %1 : vector<1x64xf32> to vector<6x64xf32>
    %123 = arith.addf %121, %122 : vector<6x64xf32>
    %cst_139 = arith.constant 0.000000e+00 : f32
    %124 = vector.broadcast %cst_139 : f32 to vector<6x64xf32>
    %125 = arith.maximumf %123, %124 : vector<6x64xf32>
    %c18_140 = arith.constant 18 : index
    %c0_141 = arith.constant 0 : index
    %126 = vector.load %arg10[%c18_140, %c0_141] : memref<72x64xf32, #tpu.memory_space<vmem>>, vector<6x64xf32>
    tpu.vector_store %arg10[%c18_140, %c0_141], %125 {strides = array<i32>} : memref<72x64xf32, #tpu.memory_space<vmem>>, vector<6x64xf32>,
    %c128_142 = arith.constant 128 : index
    %c0_143 = arith.constant 0 : index
    %127 = tpu.strided_load %arg9[%c128_142, %c0_143] {strides = array<i32: 2, 1>} : memref<480x32xf32, #tpu.memory_space<vmem>>, vector<6x32xf32>
    %c129_144 = arith.constant 129 : index
    %c0_145 = arith.constant 0 : index
    %128 = tpu.strided_load %arg9[%c129_144, %c0_145] {strides = array<i32: 2, 1>} : memref<480x32xf32, #tpu.memory_space<vmem>>, vector<6x32xf32>
    %c130_146 = arith.constant 130 : index
    %c0_147 = arith.constant 0 : index
    %129 = tpu.strided_load %arg9[%c130_146, %c0_147] {strides = array<i32: 2, 1>} : memref<480x32xf32, #tpu.memory_space<vmem>>, vector<6x32xf32>
    %c131_148 = arith.constant 131 : index
    %c0_149 = arith.constant 0 : index
    %130 = tpu.strided_load %arg9[%c131_148, %c0_149] {strides = array<i32: 2, 1>} : memref<480x32xf32, #tpu.memory_space<vmem>>, vector<6x32xf32>
    %c144_150 = arith.constant 144 : index
    %c0_151 = arith.constant 0 : index
    %131 = tpu.strided_load %arg9[%c144_150, %c0_151] {strides = array<i32: 2, 1>} : memref<480x32xf32, #tpu.memory_space<vmem>>, vector<6x32xf32>
    %c145_152 = arith.constant 145 : index
    %c0_153 = arith.constant 0 : index
    %132 = tpu.strided_load %arg9[%c145_152, %c0_153] {strides = array<i32: 2, 1>} : memref<480x32xf32, #tpu.memory_space<vmem>>, vector<6x32xf32>
    %c146_154 = arith.constant 146 : index
    %c0_155 = arith.constant 0 : index
    %133 = tpu.strided_load %arg9[%c146_154, %c0_155] {strides = array<i32: 2, 1>} : memref<480x32xf32, #tpu.memory_space<vmem>>, vector<6x32xf32>
    %c147_156 = arith.constant 147 : index
    %c0_157 = arith.constant 0 : index
    %134 = tpu.strided_load %arg9[%c147_156, %c0_157] {strides = array<i32: 2, 1>} : memref<480x32xf32, #tpu.memory_space<vmem>>, vector<6x32xf32>
    %c160 = arith.constant 160 : index
    %c0_158 = arith.constant 0 : index
    %135 = tpu.strided_load %arg9[%c160, %c0_158] {strides = array<i32: 2, 1>} : memref<480x32xf32, #tpu.memory_space<vmem>>, vector<6x32xf32>
    %c161 = arith.constant 161 : index
    %c0_159 = arith.constant 0 : index
    %136 = tpu.strided_load %arg9[%c161, %c0_159] {strides = array<i32: 2, 1>} : memref<480x32xf32, #tpu.memory_space<vmem>>, vector<6x32xf32>
    %c162 = arith.constant 162 : index
    %c0_160 = arith.constant 0 : index
    %137 = tpu.strided_load %arg9[%c162, %c0_160] {strides = array<i32: 2, 1>} : memref<480x32xf32, #tpu.memory_space<vmem>>, vector<6x32xf32>
    %c163 = arith.constant 163 : index
    %c0_161 = arith.constant 0 : index
    %138 = tpu.strided_load %arg9[%c163, %c0_161] {strides = array<i32: 2, 1>} : memref<480x32xf32, #tpu.memory_space<vmem>>, vector<6x32xf32>
    %c176 = arith.constant 176 : index
    %c0_162 = arith.constant 0 : index
    %139 = tpu.strided_load %arg9[%c176, %c0_162] {strides = array<i32: 2, 1>} : memref<480x32xf32, #tpu.memory_space<vmem>>, vector<6x32xf32>
    %c177 = arith.constant 177 : index
    %c0_163 = arith.constant 0 : index
    %140 = tpu.strided_load %arg9[%c177, %c0_163] {strides = array<i32: 2, 1>} : memref<480x32xf32, #tpu.memory_space<vmem>>, vector<6x32xf32>
    %c178 = arith.constant 178 : index
    %c0_164 = arith.constant 0 : index
    %141 = tpu.strided_load %arg9[%c178, %c0_164] {strides = array<i32: 2, 1>} : memref<480x32xf32, #tpu.memory_space<vmem>>, vector<6x32xf32>
    %c179 = arith.constant 179 : index
    %c0_165 = arith.constant 0 : index
    %142 = tpu.strided_load %arg9[%c179, %c0_165] {strides = array<i32: 2, 1>} : memref<480x32xf32, #tpu.memory_space<vmem>>, vector<6x32xf32>
    %143 = tpu.concatenate %127, %128, %129, %130, %131, %132, %133, %134, %135, %136, %137, %138, %139, %140, %141, %142 in 1 : vector<6x32xf32>, vector<6x32xf32>, vector<6x32xf32>, vector<6x32xf32>, vector<6x32xf32>, vector<6x32xf32>, vector<6x32xf32>, vector<6x32xf32>, vector<6x32xf32>, vector<6x32xf32>, vector<6x32xf32>, vector<6x32xf32>, vector<6x32xf32>, vector<6x32xf32>, vector<6x32xf32>, vector<6x32xf32> -> vector<6x512xf32>
    %144 = arith.truncf %143 : vector<6x512xf32> to vector<6x512xbf16>
    %c0_166 = arith.constant 0 : index
    %c0_167 = arith.constant 0 : index
    %145 = vector.load %arg4[%c0_166, %c0_167] : memref<512x64xbf16, #tpu.memory_space<vmem>>, vector<512x64xbf16>
    %cst_168 = arith.constant dense<0.000000e+00> : vector<6x64xf32>
    %146 = tpu.matmul %144, %145, %cst_168 {dimension_numbers = #tpu.dot_dimension_numbers<[1], [0], [0], [1], [0, 0, 1, 1], [], []>} : vector<6x512xbf16>, vector<512x64xbf16>, vector<6x64xf32> -> vector<6x64xf32>
    %147 = vector.broadcast %1 : vector<1x64xf32> to vector<6x64xf32>
    %148 = arith.addf %146, %147 : vector<6x64xf32>
    %cst_169 = arith.constant 0.000000e+00 : f32
    %149 = vector.broadcast %cst_169 : f32 to vector<6x64xf32>
    %150 = arith.maximumf %148, %149 : vector<6x64xf32>
    %c24 = arith.constant 24 : index
    %c0_170 = arith.constant 0 : index
    %151 = vector.load %arg10[%c24, %c0_170] : memref<72x64xf32, #tpu.memory_space<vmem>>, vector<6x64xf32>
    tpu.vector_store %arg10[%c24, %c0_170], %150 {strides = array<i32>} : memref<72x64xf32, #tpu.memory_space<vmem>>, vector<6x64xf32>,
    %c160_171 = arith.constant 160 : index
    %c0_172 = arith.constant 0 : index
    %152 = tpu.strided_load %arg9[%c160_171, %c0_172] {strides = array<i32: 2, 1>} : memref<480x32xf32, #tpu.memory_space<vmem>>, vector<6x32xf32>
    %c161_173 = arith.constant 161 : index
    %c0_174 = arith.constant 0 : index
    %153 = tpu.strided_load %arg9[%c161_173, %c0_174] {strides = array<i32: 2, 1>} : memref<480x32xf32, #tpu.memory_space<vmem>>, vector<6x32xf32>
    %c162_175 = arith.constant 162 : index
    %c0_176 = arith.constant 0 : index
    %154 = tpu.strided_load %arg9[%c162_175, %c0_176] {strides = array<i32: 2, 1>} : memref<480x32xf32, #tpu.memory_space<vmem>>, vector<6x32xf32>
    %c163_177 = arith.constant 163 : index
    %c0_178 = arith.constant 0 : index
    %155 = tpu.strided_load %arg9[%c163_177, %c0_178] {strides = array<i32: 2, 1>} : memref<480x32xf32, #tpu.memory_space<vmem>>, vector<6x32xf32>
    %c176_179 = arith.constant 176 : index
    %c0_180 = arith.constant 0 : index
    %156 = tpu.strided_load %arg9[%c176_179, %c0_180] {strides = array<i32: 2, 1>} : memref<480x32xf32, #tpu.memory_space<vmem>>, vector<6x32xf32>
    %c177_181 = arith.constant 177 : index
    %c0_182 = arith.constant 0 : index
    %157 = tpu.strided_load %arg9[%c177_181, %c0_182] {strides = array<i32: 2, 1>} : memref<480x32xf32, #tpu.memory_space<vmem>>, vector<6x32xf32>
    %c178_183 = arith.constant 178 : index
    %c0_184 = arith.constant 0 : index
    %158 = tpu.strided_load %arg9[%c178_183, %c0_184] {strides = array<i32: 2, 1>} : memref<480x32xf32, #tpu.memory_space<vmem>>, vector<6x32xf32>
    %c179_185 = arith.constant 179 : index
    %c0_186 = arith.constant 0 : index
    %159 = tpu.strided_load %arg9[%c179_185, %c0_186] {strides = array<i32: 2, 1>} : memref<480x32xf32, #tpu.memory_space<vmem>>, vector<6x32xf32>
    %c192 = arith.constant 192 : index
    %c0_187 = arith.constant 0 : index
    %160 = tpu.strided_load %arg9[%c192, %c0_187] {strides = array<i32: 2, 1>} : memref<480x32xf32, #tpu.memory_space<vmem>>, vector<6x32xf32>
    %c193 = arith.constant 193 : index
    %c0_188 = arith.constant 0 : index
    %161 = tpu.strided_load %arg9[%c193, %c0_188] {strides = array<i32: 2, 1>} : memref<480x32xf32, #tpu.memory_space<vmem>>, vector<6x32xf32>
    %c194 = arith.constant 194 : index
    %c0_189 = arith.constant 0 : index
    %162 = tpu.strided_load %arg9[%c194, %c0_189] {strides = array<i32: 2, 1>} : memref<480x32xf32, #tpu.memory_space<vmem>>, vector<6x32xf32>
    %c195 = arith.constant 195 : index
    %c0_190 = arith.constant 0 : index
    %163 = tpu.strided_load %arg9[%c195, %c0_190] {strides = array<i32: 2, 1>} : memref<480x32xf32, #tpu.memory_space<vmem>>, vector<6x32xf32>
    %c208 = arith.constant 208 : index
    %c0_191 = arith.constant 0 : index
    %164 = tpu.strided_load %arg9[%c208, %c0_191] {strides = array<i32: 2, 1>} : memref<480x32xf32, #tpu.memory_space<vmem>>, vector<6x32xf32>
    %c209 = arith.constant 209 : index
    %c0_192 = arith.constant 0 : index
    %165 = tpu.strided_load %arg9[%c209, %c0_192] {strides = array<i32: 2, 1>} : memref<480x32xf32, #tpu.memory_space<vmem>>, vector<6x32xf32>
    %c210 = arith.constant 210 : index
    %c0_193 = arith.constant 0 : index
    %166 = tpu.strided_load %arg9[%c210, %c0_193] {strides = array<i32: 2, 1>} : memref<480x32xf32, #tpu.memory_space<vmem>>, vector<6x32xf32>
    %c211 = arith.constant 211 : index
    %c0_194 = arith.constant 0 : index
    %167 = tpu.strided_load %arg9[%c211, %c0_194] {strides = array<i32: 2, 1>} : memref<480x32xf32, #tpu.memory_space<vmem>>, vector<6x32xf32>
    %168 = tpu.concatenate %152, %153, %154, %155, %156, %157, %158, %159, %160, %161, %162, %163, %164, %165, %166, %167 in 1 : vector<6x32xf32>, vector<6x32xf32>, vector<6x32xf32>, vector<6x32xf32>, vector<6x32xf32>, vector<6x32xf32>, vector<6x32xf32>, vector<6x32xf32>, vector<6x32xf32>, vector<6x32xf32>, vector<6x32xf32>, vector<6x32xf32>, vector<6x32xf32>, vector<6x32xf32>, vector<6x32xf32>, vector<6x32xf32> -> vector<6x512xf32>
    %169 = arith.truncf %168 : vector<6x512xf32> to vector<6x512xbf16>
    %c0_195 = arith.constant 0 : index
    %c0_196 = arith.constant 0 : index
    %170 = vector.load %arg4[%c0_195, %c0_196] : memref<512x64xbf16, #tpu.memory_space<vmem>>, vector<512x64xbf16>
    %cst_197 = arith.constant dense<0.000000e+00> : vector<6x64xf32>
    %171 = tpu.matmul %169, %170, %cst_197 {dimension_numbers = #tpu.dot_dimension_numbers<[1], [0], [0], [1], [0, 0, 1, 1], [], []>} : vector<6x512xbf16>, vector<512x64xbf16>, vector<6x64xf32> -> vector<6x64xf32>
    %172 = vector.broadcast %1 : vector<1x64xf32> to vector<6x64xf32>
    %173 = arith.addf %171, %172 : vector<6x64xf32>
    %cst_198 = arith.constant 0.000000e+00 : f32
    %174 = vector.broadcast %cst_198 : f32 to vector<6x64xf32>
    %175 = arith.maximumf %173, %174 : vector<6x64xf32>
    %c30 = arith.constant 30 : index
    %c0_199 = arith.constant 0 : index
    %176 = vector.load %arg10[%c30, %c0_199] : memref<72x64xf32, #tpu.memory_space<vmem>>, vector<6x64xf32>
    tpu.vector_store %arg10[%c30, %c0_199], %175 {strides = array<i32>} : memref<72x64xf32, #tpu.memory_space<vmem>>, vector<6x64xf32>,
    %c0_200 = arith.constant 0 : index
    %c0_201 = arith.constant 0 : index
    %177 = vector.load %arg10[%c0_200, %c0_201] : memref<72x64xf32, #tpu.memory_space<vmem>>, vector<4x64xf32>
    %c1_202 = arith.constant 1 : index
    %c0_203 = arith.constant 0 : index
    %178 = vector.load %arg10[%c1_202, %c0_203] : memref<72x64xf32, #tpu.memory_space<vmem>>, vector<4x64xf32>
    %c2_204 = arith.constant 2 : index
    %c0_205 = arith.constant 0 : index
    %179 = vector.load %arg10[%c2_204, %c0_205] : memref<72x64xf32, #tpu.memory_space<vmem>>, vector<4x64xf32>
    %c6_206 = arith.constant 6 : index
    %c0_207 = arith.constant 0 : index
    %180 = vector.load %arg10[%c6_206, %c0_207] : memref<72x64xf32, #tpu.memory_space<vmem>>, vector<4x64xf32>
    %c7 = arith.constant 7 : index
    %c0_208 = arith.constant 0 : index
    %181 = vector.load %arg10[%c7, %c0_208] : memref<72x64xf32, #tpu.memory_space<vmem>>, vector<4x64xf32>
    %c8 = arith.constant 8 : index
    %c0_209 = arith.constant 0 : index
    %182 = vector.load %arg10[%c8, %c0_209] : memref<72x64xf32, #tpu.memory_space<vmem>>, vector<4x64xf32>
    %c12_210 = arith.constant 12 : index
    %c0_211 = arith.constant 0 : index
    %183 = vector.load %arg10[%c12_210, %c0_211] : memref<72x64xf32, #tpu.memory_space<vmem>>, vector<4x64xf32>
    %c13 = arith.constant 13 : index
    %c0_212 = arith.constant 0 : index
    %184 = vector.load %arg10[%c13, %c0_212] : memref<72x64xf32, #tpu.memory_space<vmem>>, vector<4x64xf32>
    %c14 = arith.constant 14 : index
    %c0_213 = arith.constant 0 : index
    %185 = vector.load %arg10[%c14, %c0_213] : memref<72x64xf32, #tpu.memory_space<vmem>>, vector<4x64xf32>
    %186 = tpu.concatenate %177, %178, %179, %180, %181, %182, %183, %184, %185 in 1 : vector<4x64xf32>, vector<4x64xf32>, vector<4x64xf32>, vector<4x64xf32>, vector<4x64xf32>, vector<4x64xf32>, vector<4x64xf32>, vector<4x64xf32>, vector<4x64xf32> -> vector<4x576xf32>
    %187 = arith.truncf %186 : vector<4x576xf32> to vector<4x576xbf16>
    %c0_214 = arith.constant 0 : index
    %c0_215 = arith.constant 0 : index
    %188 = vector.load %arg6[%c0_214, %c0_215] : memref<576x32xbf16, #tpu.memory_space<vmem>>, vector<576x32xbf16>
    %cst_216 = arith.constant dense<0.000000e+00> : vector<4x32xf32>
    %189 = tpu.matmul %187, %188, %cst_216 {dimension_numbers = #tpu.dot_dimension_numbers<[1], [0], [0], [1], [0, 0, 1, 1], [], []>} : vector<4x576xbf16>, vector<576x32xbf16>, vector<4x32xf32> -> vector<4x32xf32>
    %190 = vector.broadcast %2 : vector<1x32xf32> to vector<4x32xf32>
    %191 = arith.addf %189, %190 : vector<4x32xf32>
    %cst_217 = arith.constant 0.000000e+00 : f32
    %192 = vector.broadcast %cst_217 : f32 to vector<4x32xf32>
    %193 = arith.maximumf %191, %192 : vector<4x32xf32>
    %c0_218 = arith.constant 0 : index
    %c0_219 = arith.constant 0 : index
    %194 = vector.load %arg8[%c0_218, %c0_219] : memref<32x32xf32, #tpu.memory_space<vmem>>, vector<4x32xf32>
    tpu.vector_store %arg8[%c0_218, %c0_219], %193 {strides = array<i32>} : memref<32x32xf32, #tpu.memory_space<vmem>>, vector<4x32xf32>,
    %c6_220 = arith.constant 6 : index
    %c0_221 = arith.constant 0 : index
    %195 = vector.load %arg10[%c6_220, %c0_221] : memref<72x64xf32, #tpu.memory_space<vmem>>, vector<4x64xf32>
    %c7_222 = arith.constant 7 : index
    %c0_223 = arith.constant 0 : index
    %196 = vector.load %arg10[%c7_222, %c0_223] : memref<72x64xf32, #tpu.memory_space<vmem>>, vector<4x64xf32>
    %c8_224 = arith.constant 8 : index
    %c0_225 = arith.constant 0 : index
    %197 = vector.load %arg10[%c8_224, %c0_225] : memref<72x64xf32, #tpu.memory_space<vmem>>, vector<4x64xf32>
    %c12_226 = arith.constant 12 : index
    %c0_227 = arith.constant 0 : index
    %198 = vector.load %arg10[%c12_226, %c0_227] : memref<72x64xf32, #tpu.memory_space<vmem>>, vector<4x64xf32>
    %c13_228 = arith.constant 13 : index
    %c0_229 = arith.constant 0 : index
    %199 = vector.load %arg10[%c13_228, %c0_229] : memref<72x64xf32, #tpu.memory_space<vmem>>, vector<4x64xf32>
    %c14_230 = arith.constant 14 : index
    %c0_231 = arith.constant 0 : index
    %200 = vector.load %arg10[%c14_230, %c0_231] : memref<72x64xf32, #tpu.memory_space<vmem>>, vector<4x64xf32>
    %c18_232 = arith.constant 18 : index
    %c0_233 = arith.constant 0 : index
    %201 = vector.load %arg10[%c18_232, %c0_233] : memref<72x64xf32, #tpu.memory_space<vmem>>, vector<4x64xf32>
    %c19_234 = arith.constant 19 : index
    %c0_235 = arith.constant 0 : index
    %202 = vector.load %arg10[%c19_234, %c0_235] : memref<72x64xf32, #tpu.memory_space<vmem>>, vector<4x64xf32>
    %c20 = arith.constant 20 : index
    %c0_236 = arith.constant 0 : index
    %203 = vector.load %arg10[%c20, %c0_236] : memref<72x64xf32, #tpu.memory_space<vmem>>, vector<4x64xf32>
    %204 = tpu.concatenate %195, %196, %197, %198, %199, %200, %201, %202, %203 in 1 : vector<4x64xf32>, vector<4x64xf32>, vector<4x64xf32>, vector<4x64xf32>, vector<4x64xf32>, vector<4x64xf32>, vector<4x64xf32>, vector<4x64xf32>, vector<4x64xf32> -> vector<4x576xf32>
    %205 = arith.truncf %204 : vector<4x576xf32> to vector<4x576xbf16>
    %c0_237 = arith.constant 0 : index
    %c0_238 = arith.constant 0 : index
    %206 = vector.load %arg6[%c0_237, %c0_238] : memref<576x32xbf16, #tpu.memory_space<vmem>>, vector<576x32xbf16>
    %cst_239 = arith.constant dense<0.000000e+00> : vector<4x32xf32>
    %207 = tpu.matmul %205, %206, %cst_239 {dimension_numbers = #tpu.dot_dimension_numbers<[1], [0], [0], [1], [0, 0, 1, 1], [], []>} : vector<4x576xbf16>, vector<576x32xbf16>, vector<4x32xf32> -> vector<4x32xf32>
    %208 = vector.broadcast %2 : vector<1x32xf32> to vector<4x32xf32>
    %209 = arith.addf %207, %208 : vector<4x32xf32>
    %cst_240 = arith.constant 0.000000e+00 : f32
    %210 = vector.broadcast %cst_240 : f32 to vector<4x32xf32>
    %211 = arith.maximumf %209, %210 : vector<4x32xf32>
    %c4 = arith.constant 4 : index
    %c0_241 = arith.constant 0 : index
    %212 = vector.load %arg8[%c4, %c0_241] : memref<32x32xf32, #tpu.memory_space<vmem>>, vector<4x32xf32>
    tpu.vector_store %arg8[%c4, %c0_241], %211 {strides = array<i32>} : memref<32x32xf32, #tpu.memory_space<vmem>>, vector<4x32xf32>,
    %c12_242 = arith.constant 12 : index
    %c0_243 = arith.constant 0 : index
    %213 = vector.load %arg10[%c12_242, %c0_243] : memref<72x64xf32, #tpu.memory_space<vmem>>, vector<4x64xf32>
    %c13_244 = arith.constant 13 : index
    %c0_245 = arith.constant 0 : index
    %214 = vector.load %arg10[%c13_244, %c0_245] : memref<72x64xf32, #tpu.memory_space<vmem>>, vector<4x64xf32>
    %c14_246 = arith.constant 14 : index
    %c0_247 = arith.constant 0 : index
    %215 = vector.load %arg10[%c14_246, %c0_247] : memref<72x64xf32, #tpu.memory_space<vmem>>, vector<4x64xf32>
    %c18_248 = arith.constant 18 : index
    %c0_249 = arith.constant 0 : index
    %216 = vector.load %arg10[%c18_248, %c0_249] : memref<72x64xf32, #tpu.memory_space<vmem>>, vector<4x64xf32>
    %c19_250 = arith.constant 19 : index
    %c0_251 = arith.constant 0 : index
    %217 = vector.load %arg10[%c19_250, %c0_251] : memref<72x64xf32, #tpu.memory_space<vmem>>, vector<4x64xf32>
    %c20_252 = arith.constant 20 : index
    %c0_253 = arith.constant 0 : index
    %218 = vector.load %arg10[%c20_252, %c0_253] : memref<72x64xf32, #tpu.memory_space<vmem>>, vector<4x64xf32>
    %c24_254 = arith.constant 24 : index
    %c0_255 = arith.constant 0 : index
    %219 = vector.load %arg10[%c24_254, %c0_255] : memref<72x64xf32, #tpu.memory_space<vmem>>, vector<4x64xf32>
    %c25 = arith.constant 25 : index
    %c0_256 = arith.constant 0 : index
    %220 = vector.load %arg10[%c25, %c0_256] : memref<72x64xf32, #tpu.memory_space<vmem>>, vector<4x64xf32>
    %c26 = arith.constant 26 : index
    %c0_257 = arith.constant 0 : index
    %221 = vector.load %arg10[%c26, %c0_257] : memref<72x64xf32, #tpu.memory_space<vmem>>, vector<4x64xf32>
    %222 = tpu.concatenate %213, %214, %215, %216, %217, %218, %219, %220, %221 in 1 : vector<4x64xf32>, vector<4x64xf32>, vector<4x64xf32>, vector<4x64xf32>, vector<4x64xf32>, vector<4x64xf32>, vector<4x64xf32>, vector<4x64xf32>, vector<4x64xf32> -> vector<4x576xf32>
    %223 = arith.truncf %222 : vector<4x576xf32> to vector<4x576xbf16>
    %c0_258 = arith.constant 0 : index
    %c0_259 = arith.constant 0 : index
    %224 = vector.load %arg6[%c0_258, %c0_259] : memref<576x32xbf16, #tpu.memory_space<vmem>>, vector<576x32xbf16>
    %cst_260 = arith.constant dense<0.000000e+00> : vector<4x32xf32>
    %225 = tpu.matmul %223, %224, %cst_260 {dimension_numbers = #tpu.dot_dimension_numbers<[1], [0], [0], [1], [0, 0, 1, 1], [], []>} : vector<4x576xbf16>, vector<576x32xbf16>, vector<4x32xf32> -> vector<4x32xf32>
    %226 = vector.broadcast %2 : vector<1x32xf32> to vector<4x32xf32>
    %227 = arith.addf %225, %226 : vector<4x32xf32>
    %cst_261 = arith.constant 0.000000e+00 : f32
    %228 = vector.broadcast %cst_261 : f32 to vector<4x32xf32>
    %229 = arith.maximumf %227, %228 : vector<4x32xf32>
    %c8_262 = arith.constant 8 : index
    %c0_263 = arith.constant 0 : index
    %230 = vector.load %arg8[%c8_262, %c0_263] : memref<32x32xf32, #tpu.memory_space<vmem>>, vector<4x32xf32>
    tpu.vector_store %arg8[%c8_262, %c0_263], %229 {strides = array<i32>} : memref<32x32xf32, #tpu.memory_space<vmem>>, vector<4x32xf32>,
    %c18_264 = arith.constant 18 : index
    %c0_265 = arith.constant 0 : index
    %231 = vector.load %arg10[%c18_264, %c0_265] : memref<72x64xf32, #tpu.memory_space<vmem>>, vector<4x64xf32>
    %c19_266 = arith.constant 19 : index
    %c0_267 = arith.constant 0 : index
    %232 = vector.load %arg10[%c19_266, %c0_267] : memref<72x64xf32, #tpu.memory_space<vmem>>, vector<4x64xf32>
    %c20_268 = arith.constant 20 : index
    %c0_269 = arith.constant 0 : index
    %233 = vector.load %arg10[%c20_268, %c0_269] : memref<72x64xf32, #tpu.memory_space<vmem>>, vector<4x64xf32>
    %c24_270 = arith.constant 24 : index
    %c0_271 = arith.constant 0 : index
    %234 = vector.load %arg10[%c24_270, %c0_271] : memref<72x64xf32, #tpu.memory_space<vmem>>, vector<4x64xf32>
    %c25_272 = arith.constant 25 : index
    %c0_273 = arith.constant 0 : index
    %235 = vector.load %arg10[%c25_272, %c0_273] : memref<72x64xf32, #tpu.memory_space<vmem>>, vector<4x64xf32>
    %c26_274 = arith.constant 26 : index
    %c0_275 = arith.constant 0 : index
    %236 = vector.load %arg10[%c26_274, %c0_275] : memref<72x64xf32, #tpu.memory_space<vmem>>, vector<4x64xf32>
    %c30_276 = arith.constant 30 : index
    %c0_277 = arith.constant 0 : index
    %237 = vector.load %arg10[%c30_276, %c0_277] : memref<72x64xf32, #tpu.memory_space<vmem>>, vector<4x64xf32>
    %c31 = arith.constant 31 : index
    %c0_278 = arith.constant 0 : index
    %238 = vector.load %arg10[%c31, %c0_278] : memref<72x64xf32, #tpu.memory_space<vmem>>, vector<4x64xf32>
    %c32_279 = arith.constant 32 : index
    %c0_280 = arith.constant 0 : index
    %239 = vector.load %arg10[%c32_279, %c0_280] : memref<72x64xf32, #tpu.memory_space<vmem>>, vector<4x64xf32>
    %240 = tpu.concatenate %231, %232, %233, %234, %235, %236, %237, %238, %239 in 1 : vector<4x64xf32>, vector<4x64xf32>, vector<4x64xf32>, vector<4x64xf32>, vector<4x64xf32>, vector<4x64xf32>, vector<4x64xf32>, vector<4x64xf32>, vector<4x64xf32> -> vector<4x576xf32>
    %241 = arith.truncf %240 : vector<4x576xf32> to vector<4x576xbf16>
    %c0_281 = arith.constant 0 : index
    %c0_282 = arith.constant 0 : index
    %242 = vector.load %arg6[%c0_281, %c0_282] : memref<576x32xbf16, #tpu.memory_space<vmem>>, vector<576x32xbf16>
    %cst_283 = arith.constant dense<0.000000e+00> : vector<4x32xf32>
    %243 = tpu.matmul %241, %242, %cst_283 {dimension_numbers = #tpu.dot_dimension_numbers<[1], [0], [0], [1], [0, 0, 1, 1], [], []>} : vector<4x576xbf16>, vector<576x32xbf16>, vector<4x32xf32> -> vector<4x32xf32>
    %244 = vector.broadcast %2 : vector<1x32xf32> to vector<4x32xf32>
    %245 = arith.addf %243, %244 : vector<4x32xf32>
    %cst_284 = arith.constant 0.000000e+00 : f32
    %246 = vector.broadcast %cst_284 : f32 to vector<4x32xf32>
    %247 = arith.maximumf %245, %246 : vector<4x32xf32>
    %c12_285 = arith.constant 12 : index
    %c0_286 = arith.constant 0 : index
    %248 = vector.load %arg8[%c12_285, %c0_286] : memref<32x32xf32, #tpu.memory_space<vmem>>, vector<4x32xf32>
    tpu.vector_store %arg8[%c12_285, %c0_286], %247 {strides = array<i32>} : memref<32x32xf32, #tpu.memory_space<vmem>>, vector<4x32xf32>,
    %c272 = arith.constant 272 : index
    %c0_287 = arith.constant 0 : index
    %249 = vector.load %arg1[%c272, %c0_287] : memref<544x48xbf16, #tpu.memory_space<vmem>>, vector<240x48xbf16>
    %c0_288 = arith.constant 0 : index
    %c0_289 = arith.constant 0 : index
    %c0_290 = arith.constant 0 : index
    %250 = vector.load %arg2[%c0_288, %c0_289, %c0_290] : memref<4x48x32xbf16, #tpu.memory_space<vmem>>, vector<1x48x32xbf16>
    %251 = vector.shape_cast %250 : vector<1x48x32xbf16> to vector<48x32xbf16>
    %cst_291 = arith.constant dense<0.000000e+00> : vector<240x32xf32>
    %252 = tpu.matmul %249, %251, %cst_291 {dimension_numbers = #tpu.dot_dimension_numbers<[1], [0], [0], [1], [0, 0, 1, 1], [], []>} : vector<240x48xbf16>, vector<48x32xbf16>, vector<240x32xf32> -> vector<240x32xf32>
    %c273 = arith.constant 273 : index
    %c0_292 = arith.constant 0 : index
    %253 = vector.load %arg1[%c273, %c0_292] : memref<544x48xbf16, #tpu.memory_space<vmem>>, vector<240x48xbf16>
    %c1_293 = arith.constant 1 : index
    %c0_294 = arith.constant 0 : index
    %c0_295 = arith.constant 0 : index
    %254 = vector.load %arg2[%c1_293, %c0_294, %c0_295] : memref<4x48x32xbf16, #tpu.memory_space<vmem>>, vector<1x48x32xbf16>
    %255 = vector.shape_cast %254 : vector<1x48x32xbf16> to vector<48x32xbf16>
    %cst_296 = arith.constant dense<0.000000e+00> : vector<240x32xf32>
    %256 = tpu.matmul %253, %255, %cst_296 {dimension_numbers = #tpu.dot_dimension_numbers<[1], [0], [0], [1], [0, 0, 1, 1], [], []>} : vector<240x48xbf16>, vector<48x32xbf16>, vector<240x32xf32> -> vector<240x32xf32>
    %257 = arith.addf %252, %256 : vector<240x32xf32>
    %c288 = arith.constant 288 : index
    %c0_297 = arith.constant 0 : index
    %258 = vector.load %arg1[%c288, %c0_297] : memref<544x48xbf16, #tpu.memory_space<vmem>>, vector<240x48xbf16>
    %c2_298 = arith.constant 2 : index
    %c0_299 = arith.constant 0 : index
    %c0_300 = arith.constant 0 : index
    %259 = vector.load %arg2[%c2_298, %c0_299, %c0_300] : memref<4x48x32xbf16, #tpu.memory_space<vmem>>, vector<1x48x32xbf16>
    %260 = vector.shape_cast %259 : vector<1x48x32xbf16> to vector<48x32xbf16>
    %cst_301 = arith.constant dense<0.000000e+00> : vector<240x32xf32>
    %261 = tpu.matmul %258, %260, %cst_301 {dimension_numbers = #tpu.dot_dimension_numbers<[1], [0], [0], [1], [0, 0, 1, 1], [], []>} : vector<240x48xbf16>, vector<48x32xbf16>, vector<240x32xf32> -> vector<240x32xf32>
    %262 = arith.addf %257, %261 : vector<240x32xf32>
    %c289 = arith.constant 289 : index
    %c0_302 = arith.constant 0 : index
    %263 = vector.load %arg1[%c289, %c0_302] : memref<544x48xbf16, #tpu.memory_space<vmem>>, vector<240x48xbf16>
    %c3_303 = arith.constant 3 : index
    %c0_304 = arith.constant 0 : index
    %c0_305 = arith.constant 0 : index
    %264 = vector.load %arg2[%c3_303, %c0_304, %c0_305] : memref<4x48x32xbf16, #tpu.memory_space<vmem>>, vector<1x48x32xbf16>
    %265 = vector.shape_cast %264 : vector<1x48x32xbf16> to vector<48x32xbf16>
    %cst_306 = arith.constant dense<0.000000e+00> : vector<240x32xf32>
    %266 = tpu.matmul %263, %265, %cst_306 {dimension_numbers = #tpu.dot_dimension_numbers<[1], [0], [0], [1], [0, 0, 1, 1], [], []>} : vector<240x48xbf16>, vector<48x32xbf16>, vector<240x32xf32> -> vector<240x32xf32>
    %267 = arith.addf %262, %266 : vector<240x32xf32>
    %268 = vector.broadcast %0 : vector<1x32xf32> to vector<240x32xf32>
    %269 = arith.addf %267, %268 : vector<240x32xf32>
    %cst_307 = arith.constant 0.000000e+00 : f32
    %270 = vector.broadcast %cst_307 : f32 to vector<240x32xf32>
    %271 = arith.maximumf %269, %270 : vector<240x32xf32>
    %c240 = arith.constant 240 : index
    %c0_308 = arith.constant 0 : index
    %272 = vector.load %arg9[%c240, %c0_308] : memref<480x32xf32, #tpu.memory_space<vmem>>, vector<240x32xf32>
    tpu.vector_store %arg9[%c240, %c0_308], %271 {strides = array<i32>} : memref<480x32xf32, #tpu.memory_space<vmem>>, vector<240x32xf32>,
    %c240_309 = arith.constant 240 : index
    %c0_310 = arith.constant 0 : index
    %273 = tpu.strided_load %arg9[%c240_309, %c0_310] {strides = array<i32: 2, 1>} : memref<480x32xf32, #tpu.memory_space<vmem>>, vector<6x32xf32>
    %c241 = arith.constant 241 : index
    %c0_311 = arith.constant 0 : index
    %274 = tpu.strided_load %arg9[%c241, %c0_311] {strides = array<i32: 2, 1>} : memref<480x32xf32, #tpu.memory_space<vmem>>, vector<6x32xf32>
    %c242 = arith.constant 242 : index
    %c0_312 = arith.constant 0 : index
    %275 = tpu.strided_load %arg9[%c242, %c0_312] {strides = array<i32: 2, 1>} : memref<480x32xf32, #tpu.memory_space<vmem>>, vector<6x32xf32>
    %c243 = arith.constant 243 : index
    %c0_313 = arith.constant 0 : index
    %276 = tpu.strided_load %arg9[%c243, %c0_313] {strides = array<i32: 2, 1>} : memref<480x32xf32, #tpu.memory_space<vmem>>, vector<6x32xf32>
    %c256 = arith.constant 256 : index
    %c0_314 = arith.constant 0 : index
    %277 = tpu.strided_load %arg9[%c256, %c0_314] {strides = array<i32: 2, 1>} : memref<480x32xf32, #tpu.memory_space<vmem>>, vector<6x32xf32>
    %c257 = arith.constant 257 : index
    %c0_315 = arith.constant 0 : index
    %278 = tpu.strided_load %arg9[%c257, %c0_315] {strides = array<i32: 2, 1>} : memref<480x32xf32, #tpu.memory_space<vmem>>, vector<6x32xf32>
    %c258 = arith.constant 258 : index
    %c0_316 = arith.constant 0 : index
    %279 = tpu.strided_load %arg9[%c258, %c0_316] {strides = array<i32: 2, 1>} : memref<480x32xf32, #tpu.memory_space<vmem>>, vector<6x32xf32>
    %c259 = arith.constant 259 : index
    %c0_317 = arith.constant 0 : index
    %280 = tpu.strided_load %arg9[%c259, %c0_317] {strides = array<i32: 2, 1>} : memref<480x32xf32, #tpu.memory_space<vmem>>, vector<6x32xf32>
    %c272_318 = arith.constant 272 : index
    %c0_319 = arith.constant 0 : index
    %281 = tpu.strided_load %arg9[%c272_318, %c0_319] {strides = array<i32: 2, 1>} : memref<480x32xf32, #tpu.memory_space<vmem>>, vector<6x32xf32>
    %c273_320 = arith.constant 273 : index
    %c0_321 = arith.constant 0 : index
    %282 = tpu.strided_load %arg9[%c273_320, %c0_321] {strides = array<i32: 2, 1>} : memref<480x32xf32, #tpu.memory_space<vmem>>, vector<6x32xf32>
    %c274 = arith.constant 274 : index
    %c0_322 = arith.constant 0 : index
    %283 = tpu.strided_load %arg9[%c274, %c0_322] {strides = array<i32: 2, 1>} : memref<480x32xf32, #tpu.memory_space<vmem>>, vector<6x32xf32>
    %c275 = arith.constant 275 : index
    %c0_323 = arith.constant 0 : index
    %284 = tpu.strided_load %arg9[%c275, %c0_323] {strides = array<i32: 2, 1>} : memref<480x32xf32, #tpu.memory_space<vmem>>, vector<6x32xf32>
    %c288_324 = arith.constant 288 : index
    %c0_325 = arith.constant 0 : index
    %285 = tpu.strided_load %arg9[%c288_324, %c0_325] {strides = array<i32: 2, 1>} : memref<480x32xf32, #tpu.memory_space<vmem>>, vector<6x32xf32>
    %c289_326 = arith.constant 289 : index
    %c0_327 = arith.constant 0 : index
    %286 = tpu.strided_load %arg9[%c289_326, %c0_327] {strides = array<i32: 2, 1>} : memref<480x32xf32, #tpu.memory_space<vmem>>, vector<6x32xf32>
    %c290 = arith.constant 290 : index
    %c0_328 = arith.constant 0 : index
    %287 = tpu.strided_load %arg9[%c290, %c0_328] {strides = array<i32: 2, 1>} : memref<480x32xf32, #tpu.memory_space<vmem>>, vector<6x32xf32>
    %c291 = arith.constant 291 : index
    %c0_329 = arith.constant 0 : index
    %288 = tpu.strided_load %arg9[%c291, %c0_329] {strides = array<i32: 2, 1>} : memref<480x32xf32, #tpu.memory_space<vmem>>, vector<6x32xf32>
    %289 = tpu.concatenate %273, %274, %275, %276, %277, %278, %279, %280, %281, %282, %283, %284, %285, %286, %287, %288 in 1 : vector<6x32xf32>, vector<6x32xf32>, vector<6x32xf32>, vector<6x32xf32>, vector<6x32xf32>, vector<6x32xf32>, vector<6x32xf32>, vector<6x32xf32>, vector<6x32xf32>, vector<6x32xf32>, vector<6x32xf32>, vector<6x32xf32>, vector<6x32xf32>, vector<6x32xf32>, vector<6x32xf32>, vector<6x32xf32> -> vector<6x512xf32>
    %290 = arith.truncf %289 : vector<6x512xf32> to vector<6x512xbf16>
    %c0_330 = arith.constant 0 : index
    %c0_331 = arith.constant 0 : index
    %291 = vector.load %arg4[%c0_330, %c0_331] : memref<512x64xbf16, #tpu.memory_space<vmem>>, vector<512x64xbf16>
    %cst_332 = arith.constant dense<0.000000e+00> : vector<6x64xf32>
    %292 = tpu.matmul %290, %291, %cst_332 {dimension_numbers = #tpu.dot_dimension_numbers<[1], [0], [0], [1], [0, 0, 1, 1], [], []>} : vector<6x512xbf16>, vector<512x64xbf16>, vector<6x64xf32> -> vector<6x64xf32>
    %293 = vector.broadcast %1 : vector<1x64xf32> to vector<6x64xf32>
    %294 = arith.addf %292, %293 : vector<6x64xf32>
    %cst_333 = arith.constant 0.000000e+00 : f32
    %295 = vector.broadcast %cst_333 : f32 to vector<6x64xf32>
    %296 = arith.maximumf %294, %295 : vector<6x64xf32>
    %c36 = arith.constant 36 : index
    %c0_334 = arith.constant 0 : index
    %297 = vector.load %arg10[%c36, %c0_334] : memref<72x64xf32, #tpu.memory_space<vmem>>, vector<6x64xf32>
    tpu.vector_store %arg10[%c36, %c0_334], %296 {strides = array<i32>} : memref<72x64xf32, #tpu.memory_space<vmem>>, vector<6x64xf32>,
    %c272_335 = arith.constant 272 : index
    %c0_336 = arith.constant 0 : index
    %298 = tpu.strided_load %arg9[%c272_335, %c0_336] {strides = array<i32: 2, 1>} : memref<480x32xf32, #tpu.memory_space<vmem>>, vector<6x32xf32>
    %c273_337 = arith.constant 273 : index
    %c0_338 = arith.constant 0 : index
    %299 = tpu.strided_load %arg9[%c273_337, %c0_338] {strides = array<i32: 2, 1>} : memref<480x32xf32, #tpu.memory_space<vmem>>, vector<6x32xf32>
    %c274_339 = arith.constant 274 : index
    %c0_340 = arith.constant 0 : index
    %300 = tpu.strided_load %arg9[%c274_339, %c0_340] {strides = array<i32: 2, 1>} : memref<480x32xf32, #tpu.memory_space<vmem>>, vector<6x32xf32>
    %c275_341 = arith.constant 275 : index
    %c0_342 = arith.constant 0 : index
    %301 = tpu.strided_load %arg9[%c275_341, %c0_342] {strides = array<i32: 2, 1>} : memref<480x32xf32, #tpu.memory_space<vmem>>, vector<6x32xf32>
    %c288_343 = arith.constant 288 : index
    %c0_344 = arith.constant 0 : index
    %302 = tpu.strided_load %arg9[%c288_343, %c0_344] {strides = array<i32: 2, 1>} : memref<480x32xf32, #tpu.memory_space<vmem>>, vector<6x32xf32>
    %c289_345 = arith.constant 289 : index
    %c0_346 = arith.constant 0 : index
    %303 = tpu.strided_load %arg9[%c289_345, %c0_346] {strides = array<i32: 2, 1>} : memref<480x32xf32, #tpu.memory_space<vmem>>, vector<6x32xf32>
    %c290_347 = arith.constant 290 : index
    %c0_348 = arith.constant 0 : index
    %304 = tpu.strided_load %arg9[%c290_347, %c0_348] {strides = array<i32: 2, 1>} : memref<480x32xf32, #tpu.memory_space<vmem>>, vector<6x32xf32>
    %c291_349 = arith.constant 291 : index
    %c0_350 = arith.constant 0 : index
    %305 = tpu.strided_load %arg9[%c291_349, %c0_350] {strides = array<i32: 2, 1>} : memref<480x32xf32, #tpu.memory_space<vmem>>, vector<6x32xf32>
    %c304 = arith.constant 304 : index
    %c0_351 = arith.constant 0 : index
    %306 = tpu.strided_load %arg9[%c304, %c0_351] {strides = array<i32: 2, 1>} : memref<480x32xf32, #tpu.memory_space<vmem>>, vector<6x32xf32>
    %c305 = arith.constant 305 : index
    %c0_352 = arith.constant 0 : index
    %307 = tpu.strided_load %arg9[%c305, %c0_352] {strides = array<i32: 2, 1>} : memref<480x32xf32, #tpu.memory_space<vmem>>, vector<6x32xf32>
    %c306 = arith.constant 306 : index
    %c0_353 = arith.constant 0 : index
    %308 = tpu.strided_load %arg9[%c306, %c0_353] {strides = array<i32: 2, 1>} : memref<480x32xf32, #tpu.memory_space<vmem>>, vector<6x32xf32>
    %c307 = arith.constant 307 : index
    %c0_354 = arith.constant 0 : index
    %309 = tpu.strided_load %arg9[%c307, %c0_354] {strides = array<i32: 2, 1>} : memref<480x32xf32, #tpu.memory_space<vmem>>, vector<6x32xf32>
    %c320 = arith.constant 320 : index
    %c0_355 = arith.constant 0 : index
    %310 = tpu.strided_load %arg9[%c320, %c0_355] {strides = array<i32: 2, 1>} : memref<480x32xf32, #tpu.memory_space<vmem>>, vector<6x32xf32>
    %c321 = arith.constant 321 : index
    %c0_356 = arith.constant 0 : index
    %311 = tpu.strided_load %arg9[%c321, %c0_356] {strides = array<i32: 2, 1>} : memref<480x32xf32, #tpu.memory_space<vmem>>, vector<6x32xf32>
    %c322 = arith.constant 322 : index
    %c0_357 = arith.constant 0 : index
    %312 = tpu.strided_load %arg9[%c322, %c0_357] {strides = array<i32: 2, 1>} : memref<480x32xf32, #tpu.memory_space<vmem>>, vector<6x32xf32>
    %c323 = arith.constant 323 : index
    %c0_358 = arith.constant 0 : index
    %313 = tpu.strided_load %arg9[%c323, %c0_358] {strides = array<i32: 2, 1>} : memref<480x32xf32, #tpu.memory_space<vmem>>, vector<6x32xf32>
    %314 = tpu.concatenate %298, %299, %300, %301, %302, %303, %304, %305, %306, %307, %308, %309, %310, %311, %312, %313 in 1 : vector<6x32xf32>, vector<6x32xf32>, vector<6x32xf32>, vector<6x32xf32>, vector<6x32xf32>, vector<6x32xf32>, vector<6x32xf32>, vector<6x32xf32>, vector<6x32xf32>, vector<6x32xf32>, vector<6x32xf32>, vector<6x32xf32>, vector<6x32xf32>, vector<6x32xf32>, vector<6x32xf32>, vector<6x32xf32> -> vector<6x512xf32>
    %315 = arith.truncf %314 : vector<6x512xf32> to vector<6x512xbf16>
    %c0_359 = arith.constant 0 : index
    %c0_360 = arith.constant 0 : index
    %316 = vector.load %arg4[%c0_359, %c0_360] : memref<512x64xbf16, #tpu.memory_space<vmem>>, vector<512x64xbf16>
    %cst_361 = arith.constant dense<0.000000e+00> : vector<6x64xf32>
    %317 = tpu.matmul %315, %316, %cst_361 {dimension_numbers = #tpu.dot_dimension_numbers<[1], [0], [0], [1], [0, 0, 1, 1], [], []>} : vector<6x512xbf16>, vector<512x64xbf16>, vector<6x64xf32> -> vector<6x64xf32>
    %318 = vector.broadcast %1 : vector<1x64xf32> to vector<6x64xf32>
    %319 = arith.addf %317, %318 : vector<6x64xf32>
    %cst_362 = arith.constant 0.000000e+00 : f32
    %320 = vector.broadcast %cst_362 : f32 to vector<6x64xf32>
    %321 = arith.maximumf %319, %320 : vector<6x64xf32>
    %c42 = arith.constant 42 : index
    %c0_363 = arith.constant 0 : index
    %322 = vector.load %arg10[%c42, %c0_363] : memref<72x64xf32, #tpu.memory_space<vmem>>, vector<6x64xf32>
    tpu.vector_store %arg10[%c42, %c0_363], %321 {strides = array<i32>} : memref<72x64xf32, #tpu.memory_space<vmem>>, vector<6x64xf32>,
    %c304_364 = arith.constant 304 : index
    %c0_365 = arith.constant 0 : index
    %323 = tpu.strided_load %arg9[%c304_364, %c0_365] {strides = array<i32: 2, 1>} : memref<480x32xf32, #tpu.memory_space<vmem>>, vector<6x32xf32>
    %c305_366 = arith.constant 305 : index
    %c0_367 = arith.constant 0 : index
    %324 = tpu.strided_load %arg9[%c305_366, %c0_367] {strides = array<i32: 2, 1>} : memref<480x32xf32, #tpu.memory_space<vmem>>, vector<6x32xf32>
    %c306_368 = arith.constant 306 : index
    %c0_369 = arith.constant 0 : index
    %325 = tpu.strided_load %arg9[%c306_368, %c0_369] {strides = array<i32: 2, 1>} : memref<480x32xf32, #tpu.memory_space<vmem>>, vector<6x32xf32>
    %c307_370 = arith.constant 307 : index
    %c0_371 = arith.constant 0 : index
    %326 = tpu.strided_load %arg9[%c307_370, %c0_371] {strides = array<i32: 2, 1>} : memref<480x32xf32, #tpu.memory_space<vmem>>, vector<6x32xf32>
    %c320_372 = arith.constant 320 : index
    %c0_373 = arith.constant 0 : index
    %327 = tpu.strided_load %arg9[%c320_372, %c0_373] {strides = array<i32: 2, 1>} : memref<480x32xf32, #tpu.memory_space<vmem>>, vector<6x32xf32>
    %c321_374 = arith.constant 321 : index
    %c0_375 = arith.constant 0 : index
    %328 = tpu.strided_load %arg9[%c321_374, %c0_375] {strides = array<i32: 2, 1>} : memref<480x32xf32, #tpu.memory_space<vmem>>, vector<6x32xf32>
    %c322_376 = arith.constant 322 : index
    %c0_377 = arith.constant 0 : index
    %329 = tpu.strided_load %arg9[%c322_376, %c0_377] {strides = array<i32: 2, 1>} : memref<480x32xf32, #tpu.memory_space<vmem>>, vector<6x32xf32>
    %c323_378 = arith.constant 323 : index
    %c0_379 = arith.constant 0 : index
    %330 = tpu.strided_load %arg9[%c323_378, %c0_379] {strides = array<i32: 2, 1>} : memref<480x32xf32, #tpu.memory_space<vmem>>, vector<6x32xf32>
    %c336 = arith.constant 336 : index
    %c0_380 = arith.constant 0 : index
    %331 = tpu.strided_load %arg9[%c336, %c0_380] {strides = array<i32: 2, 1>} : memref<480x32xf32, #tpu.memory_space<vmem>>, vector<6x32xf32>
    %c337 = arith.constant 337 : index
    %c0_381 = arith.constant 0 : index
    %332 = tpu.strided_load %arg9[%c337, %c0_381] {strides = array<i32: 2, 1>} : memref<480x32xf32, #tpu.memory_space<vmem>>, vector<6x32xf32>
    %c338 = arith.constant 338 : index
    %c0_382 = arith.constant 0 : index
    %333 = tpu.strided_load %arg9[%c338, %c0_382] {strides = array<i32: 2, 1>} : memref<480x32xf32, #tpu.memory_space<vmem>>, vector<6x32xf32>
    %c339 = arith.constant 339 : index
    %c0_383 = arith.constant 0 : index
    %334 = tpu.strided_load %arg9[%c339, %c0_383] {strides = array<i32: 2, 1>} : memref<480x32xf32, #tpu.memory_space<vmem>>, vector<6x32xf32>
    %c352 = arith.constant 352 : index
    %c0_384 = arith.constant 0 : index
    %335 = tpu.strided_load %arg9[%c352, %c0_384] {strides = array<i32: 2, 1>} : memref<480x32xf32, #tpu.memory_space<vmem>>, vector<6x32xf32>
    %c353 = arith.constant 353 : index
    %c0_385 = arith.constant 0 : index
    %336 = tpu.strided_load %arg9[%c353, %c0_385] {strides = array<i32: 2, 1>} : memref<480x32xf32, #tpu.memory_space<vmem>>, vector<6x32xf32>
    %c354 = arith.constant 354 : index
    %c0_386 = arith.constant 0 : index
    %337 = tpu.strided_load %arg9[%c354, %c0_386] {strides = array<i32: 2, 1>} : memref<480x32xf32, #tpu.memory_space<vmem>>, vector<6x32xf32>
    %c355 = arith.constant 355 : index
    %c0_387 = arith.constant 0 : index
    %338 = tpu.strided_load %arg9[%c355, %c0_387] {strides = array<i32: 2, 1>} : memref<480x32xf32, #tpu.memory_space<vmem>>, vector<6x32xf32>
    %339 = tpu.concatenate %323, %324, %325, %326, %327, %328, %329, %330, %331, %332, %333, %334, %335, %336, %337, %338 in 1 : vector<6x32xf32>, vector<6x32xf32>, vector<6x32xf32>, vector<6x32xf32>, vector<6x32xf32>, vector<6x32xf32>, vector<6x32xf32>, vector<6x32xf32>, vector<6x32xf32>, vector<6x32xf32>, vector<6x32xf32>, vector<6x32xf32>, vector<6x32xf32>, vector<6x32xf32>, vector<6x32xf32>, vector<6x32xf32> -> vector<6x512xf32>
    %340 = arith.truncf %339 : vector<6x512xf32> to vector<6x512xbf16>
    %c0_388 = arith.constant 0 : index
    %c0_389 = arith.constant 0 : index
    %341 = vector.load %arg4[%c0_388, %c0_389] : memref<512x64xbf16, #tpu.memory_space<vmem>>, vector<512x64xbf16>
    %cst_390 = arith.constant dense<0.000000e+00> : vector<6x64xf32>
    %342 = tpu.matmul %340, %341, %cst_390 {dimension_numbers = #tpu.dot_dimension_numbers<[1], [0], [0], [1], [0, 0, 1, 1], [], []>} : vector<6x512xbf16>, vector<512x64xbf16>, vector<6x64xf32> -> vector<6x64xf32>
    %343 = vector.broadcast %1 : vector<1x64xf32> to vector<6x64xf32>
    %344 = arith.addf %342, %343 : vector<6x64xf32>
    %cst_391 = arith.constant 0.000000e+00 : f32
    %345 = vector.broadcast %cst_391 : f32 to vector<6x64xf32>
    %346 = arith.maximumf %344, %345 : vector<6x64xf32>
    %c48_392 = arith.constant 48 : index
    %c0_393 = arith.constant 0 : index
    %347 = vector.load %arg10[%c48_392, %c0_393] : memref<72x64xf32, #tpu.memory_space<vmem>>, vector<6x64xf32>
    tpu.vector_store %arg10[%c48_392, %c0_393], %346 {strides = array<i32>} : memref<72x64xf32, #tpu.memory_space<vmem>>, vector<6x64xf32>,
    %c336_394 = arith.constant 336 : index
    %c0_395 = arith.constant 0 : index
    %348 = tpu.strided_load %arg9[%c336_394, %c0_395] {strides = array<i32: 2, 1>} : memref<480x32xf32, #tpu.memory_space<vmem>>, vector<6x32xf32>
    %c337_396 = arith.constant 337 : index
    %c0_397 = arith.constant 0 : index
    %349 = tpu.strided_load %arg9[%c337_396, %c0_397] {strides = array<i32: 2, 1>} : memref<480x32xf32, #tpu.memory_space<vmem>>, vector<6x32xf32>
    %c338_398 = arith.constant 338 : index
    %c0_399 = arith.constant 0 : index
    %350 = tpu.strided_load %arg9[%c338_398, %c0_399] {strides = array<i32: 2, 1>} : memref<480x32xf32, #tpu.memory_space<vmem>>, vector<6x32xf32>
    %c339_400 = arith.constant 339 : index
    %c0_401 = arith.constant 0 : index
    %351 = tpu.strided_load %arg9[%c339_400, %c0_401] {strides = array<i32: 2, 1>} : memref<480x32xf32, #tpu.memory_space<vmem>>, vector<6x32xf32>
    %c352_402 = arith.constant 352 : index
    %c0_403 = arith.constant 0 : index
    %352 = tpu.strided_load %arg9[%c352_402, %c0_403] {strides = array<i32: 2, 1>} : memref<480x32xf32, #tpu.memory_space<vmem>>, vector<6x32xf32>
    %c353_404 = arith.constant 353 : index
    %c0_405 = arith.constant 0 : index
    %353 = tpu.strided_load %arg9[%c353_404, %c0_405] {strides = array<i32: 2, 1>} : memref<480x32xf32, #tpu.memory_space<vmem>>, vector<6x32xf32>
    %c354_406 = arith.constant 354 : index
    %c0_407 = arith.constant 0 : index
    %354 = tpu.strided_load %arg9[%c354_406, %c0_407] {strides = array<i32: 2, 1>} : memref<480x32xf32, #tpu.memory_space<vmem>>, vector<6x32xf32>
    %c355_408 = arith.constant 355 : index
    %c0_409 = arith.constant 0 : index
    %355 = tpu.strided_load %arg9[%c355_408, %c0_409] {strides = array<i32: 2, 1>} : memref<480x32xf32, #tpu.memory_space<vmem>>, vector<6x32xf32>
    %c368 = arith.constant 368 : index
    %c0_410 = arith.constant 0 : index
    %356 = tpu.strided_load %arg9[%c368, %c0_410] {strides = array<i32: 2, 1>} : memref<480x32xf32, #tpu.memory_space<vmem>>, vector<6x32xf32>
    %c369 = arith.constant 369 : index
    %c0_411 = arith.constant 0 : index
    %357 = tpu.strided_load %arg9[%c369, %c0_411] {strides = array<i32: 2, 1>} : memref<480x32xf32, #tpu.memory_space<vmem>>, vector<6x32xf32>
    %c370 = arith.constant 370 : index
    %c0_412 = arith.constant 0 : index
    %358 = tpu.strided_load %arg9[%c370, %c0_412] {strides = array<i32: 2, 1>} : memref<480x32xf32, #tpu.memory_space<vmem>>, vector<6x32xf32>
    %c371 = arith.constant 371 : index
    %c0_413 = arith.constant 0 : index
    %359 = tpu.strided_load %arg9[%c371, %c0_413] {strides = array<i32: 2, 1>} : memref<480x32xf32, #tpu.memory_space<vmem>>, vector<6x32xf32>
    %c384 = arith.constant 384 : index
    %c0_414 = arith.constant 0 : index
    %360 = tpu.strided_load %arg9[%c384, %c0_414] {strides = array<i32: 2, 1>} : memref<480x32xf32, #tpu.memory_space<vmem>>, vector<6x32xf32>
    %c385 = arith.constant 385 : index
    %c0_415 = arith.constant 0 : index
    %361 = tpu.strided_load %arg9[%c385, %c0_415] {strides = array<i32: 2, 1>} : memref<480x32xf32, #tpu.memory_space<vmem>>, vector<6x32xf32>
    %c386 = arith.constant 386 : index
    %c0_416 = arith.constant 0 : index
    %362 = tpu.strided_load %arg9[%c386, %c0_416] {strides = array<i32: 2, 1>} : memref<480x32xf32, #tpu.memory_space<vmem>>, vector<6x32xf32>
    %c387 = arith.constant 387 : index
    %c0_417 = arith.constant 0 : index
    %363 = tpu.strided_load %arg9[%c387, %c0_417] {strides = array<i32: 2, 1>} : memref<480x32xf32, #tpu.memory_space<vmem>>, vector<6x32xf32>
    %364 = tpu.concatenate %348, %349, %350, %351, %352, %353, %354, %355, %356, %357, %358, %359, %360, %361, %362, %363 in 1 : vector<6x32xf32>, vector<6x32xf32>, vector<6x32xf32>, vector<6x32xf32>, vector<6x32xf32>, vector<6x32xf32>, vector<6x32xf32>, vector<6x32xf32>, vector<6x32xf32>, vector<6x32xf32>, vector<6x32xf32>, vector<6x32xf32>, vector<6x32xf32>, vector<6x32xf32>, vector<6x32xf32>, vector<6x32xf32> -> vector<6x512xf32>
    %365 = arith.truncf %364 : vector<6x512xf32> to vector<6x512xbf16>
    %c0_418 = arith.constant 0 : index
    %c0_419 = arith.constant 0 : index
    %366 = vector.load %arg4[%c0_418, %c0_419] : memref<512x64xbf16, #tpu.memory_space<vmem>>, vector<512x64xbf16>
    %cst_420 = arith.constant dense<0.000000e+00> : vector<6x64xf32>
    %367 = tpu.matmul %365, %366, %cst_420 {dimension_numbers = #tpu.dot_dimension_numbers<[1], [0], [0], [1], [0, 0, 1, 1], [], []>} : vector<6x512xbf16>, vector<512x64xbf16>, vector<6x64xf32> -> vector<6x64xf32>
    %368 = vector.broadcast %1 : vector<1x64xf32> to vector<6x64xf32>
    %369 = arith.addf %367, %368 : vector<6x64xf32>
    %cst_421 = arith.constant 0.000000e+00 : f32
    %370 = vector.broadcast %cst_421 : f32 to vector<6x64xf32>
    %371 = arith.maximumf %369, %370 : vector<6x64xf32>
    %c54 = arith.constant 54 : index
    %c0_422 = arith.constant 0 : index
    %372 = vector.load %arg10[%c54, %c0_422] : memref<72x64xf32, #tpu.memory_space<vmem>>, vector<6x64xf32>
    tpu.vector_store %arg10[%c54, %c0_422], %371 {strides = array<i32>} : memref<72x64xf32, #tpu.memory_space<vmem>>, vector<6x64xf32>,
    %c368_423 = arith.constant 368 : index
    %c0_424 = arith.constant 0 : index
    %373 = tpu.strided_load %arg9[%c368_423, %c0_424] {strides = array<i32: 2, 1>} : memref<480x32xf32, #tpu.memory_space<vmem>>, vector<6x32xf32>
    %c369_425 = arith.constant 369 : index
    %c0_426 = arith.constant 0 : index
    %374 = tpu.strided_load %arg9[%c369_425, %c0_426] {strides = array<i32: 2, 1>} : memref<480x32xf32, #tpu.memory_space<vmem>>, vector<6x32xf32>
    %c370_427 = arith.constant 370 : index
    %c0_428 = arith.constant 0 : index
    %375 = tpu.strided_load %arg9[%c370_427, %c0_428] {strides = array<i32: 2, 1>} : memref<480x32xf32, #tpu.memory_space<vmem>>, vector<6x32xf32>
    %c371_429 = arith.constant 371 : index
    %c0_430 = arith.constant 0 : index
    %376 = tpu.strided_load %arg9[%c371_429, %c0_430] {strides = array<i32: 2, 1>} : memref<480x32xf32, #tpu.memory_space<vmem>>, vector<6x32xf32>
    %c384_431 = arith.constant 384 : index
    %c0_432 = arith.constant 0 : index
    %377 = tpu.strided_load %arg9[%c384_431, %c0_432] {strides = array<i32: 2, 1>} : memref<480x32xf32, #tpu.memory_space<vmem>>, vector<6x32xf32>
    %c385_433 = arith.constant 385 : index
    %c0_434 = arith.constant 0 : index
    %378 = tpu.strided_load %arg9[%c385_433, %c0_434] {strides = array<i32: 2, 1>} : memref<480x32xf32, #tpu.memory_space<vmem>>, vector<6x32xf32>
    %c386_435 = arith.constant 386 : index
    %c0_436 = arith.constant 0 : index
    %379 = tpu.strided_load %arg9[%c386_435, %c0_436] {strides = array<i32: 2, 1>} : memref<480x32xf32, #tpu.memory_space<vmem>>, vector<6x32xf32>
    %c387_437 = arith.constant 387 : index
    %c0_438 = arith.constant 0 : index
    %380 = tpu.strided_load %arg9[%c387_437, %c0_438] {strides = array<i32: 2, 1>} : memref<480x32xf32, #tpu.memory_space<vmem>>, vector<6x32xf32>
    %c400 = arith.constant 400 : index
    %c0_439 = arith.constant 0 : index
    %381 = tpu.strided_load %arg9[%c400, %c0_439] {strides = array<i32: 2, 1>} : memref<480x32xf32, #tpu.memory_space<vmem>>, vector<6x32xf32>
    %c401 = arith.constant 401 : index
    %c0_440 = arith.constant 0 : index
    %382 = tpu.strided_load %arg9[%c401, %c0_440] {strides = array<i32: 2, 1>} : memref<480x32xf32, #tpu.memory_space<vmem>>, vector<6x32xf32>
    %c402 = arith.constant 402 : index
    %c0_441 = arith.constant 0 : index
    %383 = tpu.strided_load %arg9[%c402, %c0_441] {strides = array<i32: 2, 1>} : memref<480x32xf32, #tpu.memory_space<vmem>>, vector<6x32xf32>
    %c403 = arith.constant 403 : index
    %c0_442 = arith.constant 0 : index
    %384 = tpu.strided_load %arg9[%c403, %c0_442] {strides = array<i32: 2, 1>} : memref<480x32xf32, #tpu.memory_space<vmem>>, vector<6x32xf32>
    %c416 = arith.constant 416 : index
    %c0_443 = arith.constant 0 : index
    %385 = tpu.strided_load %arg9[%c416, %c0_443] {strides = array<i32: 2, 1>} : memref<480x32xf32, #tpu.memory_space<vmem>>, vector<6x32xf32>
    %c417 = arith.constant 417 : index
    %c0_444 = arith.constant 0 : index
    %386 = tpu.strided_load %arg9[%c417, %c0_444] {strides = array<i32: 2, 1>} : memref<480x32xf32, #tpu.memory_space<vmem>>, vector<6x32xf32>
    %c418 = arith.constant 418 : index
    %c0_445 = arith.constant 0 : index
    %387 = tpu.strided_load %arg9[%c418, %c0_445] {strides = array<i32: 2, 1>} : memref<480x32xf32, #tpu.memory_space<vmem>>, vector<6x32xf32>
    %c419 = arith.constant 419 : index
    %c0_446 = arith.constant 0 : index
    %388 = tpu.strided_load %arg9[%c419, %c0_446] {strides = array<i32: 2, 1>} : memref<480x32xf32, #tpu.memory_space<vmem>>, vector<6x32xf32>
    %389 = tpu.concatenate %373, %374, %375, %376, %377, %378, %379, %380, %381, %382, %383, %384, %385, %386, %387, %388 in 1 : vector<6x32xf32>, vector<6x32xf32>, vector<6x32xf32>, vector<6x32xf32>, vector<6x32xf32>, vector<6x32xf32>, vector<6x32xf32>, vector<6x32xf32>, vector<6x32xf32>, vector<6x32xf32>, vector<6x32xf32>, vector<6x32xf32>, vector<6x32xf32>, vector<6x32xf32>, vector<6x32xf32>, vector<6x32xf32> -> vector<6x512xf32>
    %390 = arith.truncf %389 : vector<6x512xf32> to vector<6x512xbf16>
    %c0_447 = arith.constant 0 : index
    %c0_448 = arith.constant 0 : index
    %391 = vector.load %arg4[%c0_447, %c0_448] : memref<512x64xbf16, #tpu.memory_space<vmem>>, vector<512x64xbf16>
    %cst_449 = arith.constant dense<0.000000e+00> : vector<6x64xf32>
    %392 = tpu.matmul %390, %391, %cst_449 {dimension_numbers = #tpu.dot_dimension_numbers<[1], [0], [0], [1], [0, 0, 1, 1], [], []>} : vector<6x512xbf16>, vector<512x64xbf16>, vector<6x64xf32> -> vector<6x64xf32>
    %393 = vector.broadcast %1 : vector<1x64xf32> to vector<6x64xf32>
    %394 = arith.addf %392, %393 : vector<6x64xf32>
    %cst_450 = arith.constant 0.000000e+00 : f32
    %395 = vector.broadcast %cst_450 : f32 to vector<6x64xf32>
    %396 = arith.maximumf %394, %395 : vector<6x64xf32>
    %c60 = arith.constant 60 : index
    %c0_451 = arith.constant 0 : index
    %397 = vector.load %arg10[%c60, %c0_451] : memref<72x64xf32, #tpu.memory_space<vmem>>, vector<6x64xf32>
    tpu.vector_store %arg10[%c60, %c0_451], %396 {strides = array<i32>} : memref<72x64xf32, #tpu.memory_space<vmem>>, vector<6x64xf32>,
    %c400_452 = arith.constant 400 : index
    %c0_453 = arith.constant 0 : index
    %398 = tpu.strided_load %arg9[%c400_452, %c0_453] {strides = array<i32: 2, 1>} : memref<480x32xf32, #tpu.memory_space<vmem>>, vector<6x32xf32>
    %c401_454 = arith.constant 401 : index
    %c0_455 = arith.constant 0 : index
    %399 = tpu.strided_load %arg9[%c401_454, %c0_455] {strides = array<i32: 2, 1>} : memref<480x32xf32, #tpu.memory_space<vmem>>, vector<6x32xf32>
    %c402_456 = arith.constant 402 : index
    %c0_457 = arith.constant 0 : index
    %400 = tpu.strided_load %arg9[%c402_456, %c0_457] {strides = array<i32: 2, 1>} : memref<480x32xf32, #tpu.memory_space<vmem>>, vector<6x32xf32>
    %c403_458 = arith.constant 403 : index
    %c0_459 = arith.constant 0 : index
    %401 = tpu.strided_load %arg9[%c403_458, %c0_459] {strides = array<i32: 2, 1>} : memref<480x32xf32, #tpu.memory_space<vmem>>, vector<6x32xf32>
    %c416_460 = arith.constant 416 : index
    %c0_461 = arith.constant 0 : index
    %402 = tpu.strided_load %arg9[%c416_460, %c0_461] {strides = array<i32: 2, 1>} : memref<480x32xf32, #tpu.memory_space<vmem>>, vector<6x32xf32>
    %c417_462 = arith.constant 417 : index
    %c0_463 = arith.constant 0 : index
    %403 = tpu.strided_load %arg9[%c417_462, %c0_463] {strides = array<i32: 2, 1>} : memref<480x32xf32, #tpu.memory_space<vmem>>, vector<6x32xf32>
    %c418_464 = arith.constant 418 : index
    %c0_465 = arith.constant 0 : index
    %404 = tpu.strided_load %arg9[%c418_464, %c0_465] {strides = array<i32: 2, 1>} : memref<480x32xf32, #tpu.memory_space<vmem>>, vector<6x32xf32>
    %c419_466 = arith.constant 419 : index
    %c0_467 = arith.constant 0 : index
    %405 = tpu.strided_load %arg9[%c419_466, %c0_467] {strides = array<i32: 2, 1>} : memref<480x32xf32, #tpu.memory_space<vmem>>, vector<6x32xf32>
    %c432 = arith.constant 432 : index
    %c0_468 = arith.constant 0 : index
    %406 = tpu.strided_load %arg9[%c432, %c0_468] {strides = array<i32: 2, 1>} : memref<480x32xf32, #tpu.memory_space<vmem>>, vector<6x32xf32>
    %c433 = arith.constant 433 : index
    %c0_469 = arith.constant 0 : index
    %407 = tpu.strided_load %arg9[%c433, %c0_469] {strides = array<i32: 2, 1>} : memref<480x32xf32, #tpu.memory_space<vmem>>, vector<6x32xf32>
    %c434 = arith.constant 434 : index
    %c0_470 = arith.constant 0 : index
    %408 = tpu.strided_load %arg9[%c434, %c0_470] {strides = array<i32: 2, 1>} : memref<480x32xf32, #tpu.memory_space<vmem>>, vector<6x32xf32>
    %c435 = arith.constant 435 : index
    %c0_471 = arith.constant 0 : index
    %409 = tpu.strided_load %arg9[%c435, %c0_471] {strides = array<i32: 2, 1>} : memref<480x32xf32, #tpu.memory_space<vmem>>, vector<6x32xf32>
    %c448 = arith.constant 448 : index
    %c0_472 = arith.constant 0 : index
    %410 = tpu.strided_load %arg9[%c448, %c0_472] {strides = array<i32: 2, 1>} : memref<480x32xf32, #tpu.memory_space<vmem>>, vector<6x32xf32>
    %c449 = arith.constant 449 : index
    %c0_473 = arith.constant 0 : index
    %411 = tpu.strided_load %arg9[%c449, %c0_473] {strides = array<i32: 2, 1>} : memref<480x32xf32, #tpu.memory_space<vmem>>, vector<6x32xf32>
    %c450 = arith.constant 450 : index
    %c0_474 = arith.constant 0 : index
    %412 = tpu.strided_load %arg9[%c450, %c0_474] {strides = array<i32: 2, 1>} : memref<480x32xf32, #tpu.memory_space<vmem>>, vector<6x32xf32>
    %c451 = arith.constant 451 : index
    %c0_475 = arith.constant 0 : index
    %413 = tpu.strided_load %arg9[%c451, %c0_475] {strides = array<i32: 2, 1>} : memref<480x32xf32, #tpu.memory_space<vmem>>, vector<6x32xf32>
    %414 = tpu.concatenate %398, %399, %400, %401, %402, %403, %404, %405, %406, %407, %408, %409, %410, %411, %412, %413 in 1 : vector<6x32xf32>, vector<6x32xf32>, vector<6x32xf32>, vector<6x32xf32>, vector<6x32xf32>, vector<6x32xf32>, vector<6x32xf32>, vector<6x32xf32>, vector<6x32xf32>, vector<6x32xf32>, vector<6x32xf32>, vector<6x32xf32>, vector<6x32xf32>, vector<6x32xf32>, vector<6x32xf32>, vector<6x32xf32> -> vector<6x512xf32>
    %415 = arith.truncf %414 : vector<6x512xf32> to vector<6x512xbf16>
    %c0_476 = arith.constant 0 : index
    %c0_477 = arith.constant 0 : index
    %416 = vector.load %arg4[%c0_476, %c0_477] : memref<512x64xbf16, #tpu.memory_space<vmem>>, vector<512x64xbf16>
    %cst_478 = arith.constant dense<0.000000e+00> : vector<6x64xf32>
    %417 = tpu.matmul %415, %416, %cst_478 {dimension_numbers = #tpu.dot_dimension_numbers<[1], [0], [0], [1], [0, 0, 1, 1], [], []>} : vector<6x512xbf16>, vector<512x64xbf16>, vector<6x64xf32> -> vector<6x64xf32>
    %418 = vector.broadcast %1 : vector<1x64xf32> to vector<6x64xf32>
    %419 = arith.addf %417, %418 : vector<6x64xf32>
    %cst_479 = arith.constant 0.000000e+00 : f32
    %420 = vector.broadcast %cst_479 : f32 to vector<6x64xf32>
    %421 = arith.maximumf %419, %420 : vector<6x64xf32>
    %c66_480 = arith.constant 66 : index
    %c0_481 = arith.constant 0 : index
    %422 = vector.load %arg10[%c66_480, %c0_481] : memref<72x64xf32, #tpu.memory_space<vmem>>, vector<6x64xf32>
    tpu.vector_store %arg10[%c66_480, %c0_481], %421 {strides = array<i32>} : memref<72x64xf32, #tpu.memory_space<vmem>>, vector<6x64xf32>,
    %c36_482 = arith.constant 36 : index
    %c0_483 = arith.constant 0 : index
    %423 = vector.load %arg10[%c36_482, %c0_483] : memref<72x64xf32, #tpu.memory_space<vmem>>, vector<4x64xf32>
    %c37 = arith.constant 37 : index
    %c0_484 = arith.constant 0 : index
    %424 = vector.load %arg10[%c37, %c0_484] : memref<72x64xf32, #tpu.memory_space<vmem>>, vector<4x64xf32>
    %c38 = arith.constant 38 : index
    %c0_485 = arith.constant 0 : index
    %425 = vector.load %arg10[%c38, %c0_485] : memref<72x64xf32, #tpu.memory_space<vmem>>, vector<4x64xf32>
    %c42_486 = arith.constant 42 : index
    %c0_487 = arith.constant 0 : index
    %426 = vector.load %arg10[%c42_486, %c0_487] : memref<72x64xf32, #tpu.memory_space<vmem>>, vector<4x64xf32>
    %c43 = arith.constant 43 : index
    %c0_488 = arith.constant 0 : index
    %427 = vector.load %arg10[%c43, %c0_488] : memref<72x64xf32, #tpu.memory_space<vmem>>, vector<4x64xf32>
    %c44 = arith.constant 44 : index
    %c0_489 = arith.constant 0 : index
    %428 = vector.load %arg10[%c44, %c0_489] : memref<72x64xf32, #tpu.memory_space<vmem>>, vector<4x64xf32>
    %c48_490 = arith.constant 48 : index
    %c0_491 = arith.constant 0 : index
    %429 = vector.load %arg10[%c48_490, %c0_491] : memref<72x64xf32, #tpu.memory_space<vmem>>, vector<4x64xf32>
    %c49_492 = arith.constant 49 : index
    %c0_493 = arith.constant 0 : index
    %430 = vector.load %arg10[%c49_492, %c0_493] : memref<72x64xf32, #tpu.memory_space<vmem>>, vector<4x64xf32>
    %c50_494 = arith.constant 50 : index
    %c0_495 = arith.constant 0 : index
    %431 = vector.load %arg10[%c50_494, %c0_495] : memref<72x64xf32, #tpu.memory_space<vmem>>, vector<4x64xf32>
    %432 = tpu.concatenate %423, %424, %425, %426, %427, %428, %429, %430, %431 in 1 : vector<4x64xf32>, vector<4x64xf32>, vector<4x64xf32>, vector<4x64xf32>, vector<4x64xf32>, vector<4x64xf32>, vector<4x64xf32>, vector<4x64xf32>, vector<4x64xf32> -> vector<4x576xf32>
    %433 = arith.truncf %432 : vector<4x576xf32> to vector<4x576xbf16>
    %c0_496 = arith.constant 0 : index
    %c0_497 = arith.constant 0 : index
    %434 = vector.load %arg6[%c0_496, %c0_497] : memref<576x32xbf16, #tpu.memory_space<vmem>>, vector<576x32xbf16>
    %cst_498 = arith.constant dense<0.000000e+00> : vector<4x32xf32>
    %435 = tpu.matmul %433, %434, %cst_498 {dimension_numbers = #tpu.dot_dimension_numbers<[1], [0], [0], [1], [0, 0, 1, 1], [], []>} : vector<4x576xbf16>, vector<576x32xbf16>, vector<4x32xf32> -> vector<4x32xf32>
    %436 = vector.broadcast %2 : vector<1x32xf32> to vector<4x32xf32>
    %437 = arith.addf %435, %436 : vector<4x32xf32>
    %cst_499 = arith.constant 0.000000e+00 : f32
    %438 = vector.broadcast %cst_499 : f32 to vector<4x32xf32>
    %439 = arith.maximumf %437, %438 : vector<4x32xf32>
    %c16_500 = arith.constant 16 : index
    %c0_501 = arith.constant 0 : index
    %440 = vector.load %arg8[%c16_500, %c0_501] : memref<32x32xf32, #tpu.memory_space<vmem>>, vector<4x32xf32>
    tpu.vector_store %arg8[%c16_500, %c0_501], %439 {strides = array<i32>} : memref<32x32xf32, #tpu.memory_space<vmem>>, vector<4x32xf32>,
    %c42_502 = arith.constant 42 : index
    %c0_503 = arith.constant 0 : index
    %441 = vector.load %arg10[%c42_502, %c0_503] : memref<72x64xf32, #tpu.memory_space<vmem>>, vector<4x64xf32>
    %c43_504 = arith.constant 43 : index
    %c0_505 = arith.constant 0 : index
    %442 = vector.load %arg10[%c43_504, %c0_505] : memref<72x64xf32, #tpu.memory_space<vmem>>, vector<4x64xf32>
    %c44_506 = arith.constant 44 : index
    %c0_507 = arith.constant 0 : index
    %443 = vector.load %arg10[%c44_506, %c0_507] : memref<72x64xf32, #tpu.memory_space<vmem>>, vector<4x64xf32>
    %c48_508 = arith.constant 48 : index
    %c0_509 = arith.constant 0 : index
    %444 = vector.load %arg10[%c48_508, %c0_509] : memref<72x64xf32, #tpu.memory_space<vmem>>, vector<4x64xf32>
    %c49_510 = arith.constant 49 : index
    %c0_511 = arith.constant 0 : index
    %445 = vector.load %arg10[%c49_510, %c0_511] : memref<72x64xf32, #tpu.memory_space<vmem>>, vector<4x64xf32>
    %c50_512 = arith.constant 50 : index
    %c0_513 = arith.constant 0 : index
    %446 = vector.load %arg10[%c50_512, %c0_513] : memref<72x64xf32, #tpu.memory_space<vmem>>, vector<4x64xf32>
    %c54_514 = arith.constant 54 : index
    %c0_515 = arith.constant 0 : index
    %447 = vector.load %arg10[%c54_514, %c0_515] : memref<72x64xf32, #tpu.memory_space<vmem>>, vector<4x64xf32>
    %c55 = arith.constant 55 : index
    %c0_516 = arith.constant 0 : index
    %448 = vector.load %arg10[%c55, %c0_516] : memref<72x64xf32, #tpu.memory_space<vmem>>, vector<4x64xf32>
    %c56 = arith.constant 56 : index
    %c0_517 = arith.constant 0 : index
    %449 = vector.load %arg10[%c56, %c0_517] : memref<72x64xf32, #tpu.memory_space<vmem>>, vector<4x64xf32>
    %450 = tpu.concatenate %441, %442, %443, %444, %445, %446, %447, %448, %449 in 1 : vector<4x64xf32>, vector<4x64xf32>, vector<4x64xf32>, vector<4x64xf32>, vector<4x64xf32>, vector<4x64xf32>, vector<4x64xf32>, vector<4x64xf32>, vector<4x64xf32> -> vector<4x576xf32>
    %451 = arith.truncf %450 : vector<4x576xf32> to vector<4x576xbf16>
    %c0_518 = arith.constant 0 : index
    %c0_519 = arith.constant 0 : index
    %452 = vector.load %arg6[%c0_518, %c0_519] : memref<576x32xbf16, #tpu.memory_space<vmem>>, vector<576x32xbf16>
    %cst_520 = arith.constant dense<0.000000e+00> : vector<4x32xf32>
    %453 = tpu.matmul %451, %452, %cst_520 {dimension_numbers = #tpu.dot_dimension_numbers<[1], [0], [0], [1], [0, 0, 1, 1], [], []>} : vector<4x576xbf16>, vector<576x32xbf16>, vector<4x32xf32> -> vector<4x32xf32>
    %454 = vector.broadcast %2 : vector<1x32xf32> to vector<4x32xf32>
    %455 = arith.addf %453, %454 : vector<4x32xf32>
    %cst_521 = arith.constant 0.000000e+00 : f32
    %456 = vector.broadcast %cst_521 : f32 to vector<4x32xf32>
    %457 = arith.maximumf %455, %456 : vector<4x32xf32>
    %c20_522 = arith.constant 20 : index
    %c0_523 = arith.constant 0 : index
    %458 = vector.load %arg8[%c20_522, %c0_523] : memref<32x32xf32, #tpu.memory_space<vmem>>, vector<4x32xf32>
    tpu.vector_store %arg8[%c20_522, %c0_523], %457 {strides = array<i32>} : memref<32x32xf32, #tpu.memory_space<vmem>>, vector<4x32xf32>,
    %c48_524 = arith.constant 48 : index
    %c0_525 = arith.constant 0 : index
    %459 = vector.load %arg10[%c48_524, %c0_525] : memref<72x64xf32, #tpu.memory_space<vmem>>, vector<4x64xf32>
    %c49_526 = arith.constant 49 : index
    %c0_527 = arith.constant 0 : index
    %460 = vector.load %arg10[%c49_526, %c0_527] : memref<72x64xf32, #tpu.memory_space<vmem>>, vector<4x64xf32>
    %c50_528 = arith.constant 50 : index
    %c0_529 = arith.constant 0 : index
    %461 = vector.load %arg10[%c50_528, %c0_529] : memref<72x64xf32, #tpu.memory_space<vmem>>, vector<4x64xf32>
    %c54_530 = arith.constant 54 : index
    %c0_531 = arith.constant 0 : index
    %462 = vector.load %arg10[%c54_530, %c0_531] : memref<72x64xf32, #tpu.memory_space<vmem>>, vector<4x64xf32>
    %c55_532 = arith.constant 55 : index
    %c0_533 = arith.constant 0 : index
    %463 = vector.load %arg10[%c55_532, %c0_533] : memref<72x64xf32, #tpu.memory_space<vmem>>, vector<4x64xf32>
    %c56_534 = arith.constant 56 : index
    %c0_535 = arith.constant 0 : index
    %464 = vector.load %arg10[%c56_534, %c0_535] : memref<72x64xf32, #tpu.memory_space<vmem>>, vector<4x64xf32>
    %c60_536 = arith.constant 60 : index
    %c0_537 = arith.constant 0 : index
    %465 = vector.load %arg10[%c60_536, %c0_537] : memref<72x64xf32, #tpu.memory_space<vmem>>, vector<4x64xf32>
    %c61 = arith.constant 61 : index
    %c0_538 = arith.constant 0 : index
    %466 = vector.load %arg10[%c61, %c0_538] : memref<72x64xf32, #tpu.memory_space<vmem>>, vector<4x64xf32>
    %c62 = arith.constant 62 : index
    %c0_539 = arith.constant 0 : index
    %467 = vector.load %arg10[%c62, %c0_539] : memref<72x64xf32, #tpu.memory_space<vmem>>, vector<4x64xf32>
    %468 = tpu.concatenate %459, %460, %461, %462, %463, %464, %465, %466, %467 in 1 : vector<4x64xf32>, vector<4x64xf32>, vector<4x64xf32>, vector<4x64xf32>, vector<4x64xf32>, vector<4x64xf32>, vector<4x64xf32>, vector<4x64xf32>, vector<4x64xf32> -> vector<4x576xf32>
    %469 = arith.truncf %468 : vector<4x576xf32> to vector<4x576xbf16>
    %c0_540 = arith.constant 0 : index
    %c0_541 = arith.constant 0 : index
    %470 = vector.load %arg6[%c0_540, %c0_541] : memref<576x32xbf16, #tpu.memory_space<vmem>>, vector<576x32xbf16>
    %cst_542 = arith.constant dense<0.000000e+00> : vector<4x32xf32>
    %471 = tpu.matmul %469, %470, %cst_542 {dimension_numbers = #tpu.dot_dimension_numbers<[1], [0], [0], [1], [0, 0, 1, 1], [], []>} : vector<4x576xbf16>, vector<576x32xbf16>, vector<4x32xf32> -> vector<4x32xf32>
    %472 = vector.broadcast %2 : vector<1x32xf32> to vector<4x32xf32>
    %473 = arith.addf %471, %472 : vector<4x32xf32>
    %cst_543 = arith.constant 0.000000e+00 : f32
    %474 = vector.broadcast %cst_543 : f32 to vector<4x32xf32>
    %475 = arith.maximumf %473, %474 : vector<4x32xf32>
    %c24_544 = arith.constant 24 : index
    %c0_545 = arith.constant 0 : index
    %476 = vector.load %arg8[%c24_544, %c0_545] : memref<32x32xf32, #tpu.memory_space<vmem>>, vector<4x32xf32>
    tpu.vector_store %arg8[%c24_544, %c0_545], %475 {strides = array<i32>} : memref<32x32xf32, #tpu.memory_space<vmem>>, vector<4x32xf32>,
    %c54_546 = arith.constant 54 : index
    %c0_547 = arith.constant 0 : index
    %477 = vector.load %arg10[%c54_546, %c0_547] : memref<72x64xf32, #tpu.memory_space<vmem>>, vector<4x64xf32>
    %c55_548 = arith.constant 55 : index
    %c0_549 = arith.constant 0 : index
    %478 = vector.load %arg10[%c55_548, %c0_549] : memref<72x64xf32, #tpu.memory_space<vmem>>, vector<4x64xf32>
    %c56_550 = arith.constant 56 : index
    %c0_551 = arith.constant 0 : index
    %479 = vector.load %arg10[%c56_550, %c0_551] : memref<72x64xf32, #tpu.memory_space<vmem>>, vector<4x64xf32>
    %c60_552 = arith.constant 60 : index
    %c0_553 = arith.constant 0 : index
    %480 = vector.load %arg10[%c60_552, %c0_553] : memref<72x64xf32, #tpu.memory_space<vmem>>, vector<4x64xf32>
    %c61_554 = arith.constant 61 : index
    %c0_555 = arith.constant 0 : index
    %481 = vector.load %arg10[%c61_554, %c0_555] : memref<72x64xf32, #tpu.memory_space<vmem>>, vector<4x64xf32>
    %c62_556 = arith.constant 62 : index
    %c0_557 = arith.constant 0 : index
    %482 = vector.load %arg10[%c62_556, %c0_557] : memref<72x64xf32, #tpu.memory_space<vmem>>, vector<4x64xf32>
    %c66_558 = arith.constant 66 : index
    %c0_559 = arith.constant 0 : index
    %483 = vector.load %arg10[%c66_558, %c0_559] : memref<72x64xf32, #tpu.memory_space<vmem>>, vector<4x64xf32>
    %c67_560 = arith.constant 67 : index
    %c0_561 = arith.constant 0 : index
    %484 = vector.load %arg10[%c67_560, %c0_561] : memref<72x64xf32, #tpu.memory_space<vmem>>, vector<4x64xf32>
    %c68 = arith.constant 68 : index
    %c0_562 = arith.constant 0 : index
    %485 = vector.load %arg10[%c68, %c0_562] : memref<72x64xf32, #tpu.memory_space<vmem>>, vector<4x64xf32>
    %486 = tpu.concatenate %477, %478, %479, %480, %481, %482, %483, %484, %485 in 1 : vector<4x64xf32>, vector<4x64xf32>, vector<4x64xf32>, vector<4x64xf32>, vector<4x64xf32>, vector<4x64xf32>, vector<4x64xf32>, vector<4x64xf32>, vector<4x64xf32> -> vector<4x576xf32>
    %487 = arith.truncf %486 : vector<4x576xf32> to vector<4x576xbf16>
    %c0_563 = arith.constant 0 : index
    %c0_564 = arith.constant 0 : index
    %488 = vector.load %arg6[%c0_563, %c0_564] : memref<576x32xbf16, #tpu.memory_space<vmem>>, vector<576x32xbf16>
    %cst_565 = arith.constant dense<0.000000e+00> : vector<4x32xf32>
    %489 = tpu.matmul %487, %488, %cst_565 {dimension_numbers = #tpu.dot_dimension_numbers<[1], [0], [0], [1], [0, 0, 1, 1], [], []>} : vector<4x576xbf16>, vector<576x32xbf16>, vector<4x32xf32> -> vector<4x32xf32>
    %490 = vector.broadcast %2 : vector<1x32xf32> to vector<4x32xf32>
    %491 = arith.addf %489, %490 : vector<4x32xf32>
    %cst_566 = arith.constant 0.000000e+00 : f32
    %492 = vector.broadcast %cst_566 : f32 to vector<4x32xf32>
    %493 = arith.maximumf %491, %492 : vector<4x32xf32>
    %c28 = arith.constant 28 : index
    %c0_567 = arith.constant 0 : index
    %494 = vector.load %arg8[%c28, %c0_567] : memref<32x32xf32, #tpu.memory_space<vmem>>, vector<4x32xf32>
    tpu.vector_store %arg8[%c28, %c0_567], %493 {strides = array<i32>} : memref<32x32xf32, #tpu.memory_space<vmem>>, vector<4x32xf32>,
    return
  }
  func.func @transform_0(%arg0: i32) -> (i32, i32) {
    %c0_i32 = arith.constant 0 : i32
    %c0_i32_0 = arith.constant 0 : i32
    return %arg0, %c0_i32 : i32, i32
  }
  func.func @transform_1(%arg0: i32) -> (i32, i32, i32) {
    %c0_i32 = arith.constant 0 : i32
    %c0_i32_0 = arith.constant 0 : i32
    %c0_i32_1 = arith.constant 0 : i32
    %c0_i32_2 = arith.constant 0 : i32
    return %c0_i32, %c0_i32_0, %c0_i32_1 : i32, i32, i32
  }
  func.func @transform_2(%arg0: i32) -> (i32, i32) {
    %c0_i32 = arith.constant 0 : i32
    %c0_i32_0 = arith.constant 0 : i32
    %c0_i32_1 = arith.constant 0 : i32
    return %c0_i32, %c0_i32_0 : i32, i32
  }
  func.func @transform_3(%arg0: i32) -> (i32, i32) {
    %c0_i32 = arith.constant 0 : i32
    %c0_i32_0 = arith.constant 0 : i32
    %c0_i32_1 = arith.constant 0 : i32
    return %c0_i32, %c0_i32_0 : i32, i32
  }
  func.func @transform_4(%arg0: i32) -> (i32, i32) {
    %c0_i32 = arith.constant 0 : i32
    %c0_i32_0 = arith.constant 0 : i32
    %c0_i32_1 = arith.constant 0 : i32
    return %c0_i32, %c0_i32_0 : i32, i32
  }
  func.func @transform_5(%arg0: i32) -> (i32, i32) {
    %c0_i32 = arith.constant 0 : i32
    %c0_i32_0 = arith.constant 0 : i32
    %c0_i32_1 = arith.constant 0 : i32
    return %c0_i32, %c0_i32_0 : i32, i32
  }
  func.func @transform_6(%arg0: i32) -> (i32, i32) {
    %c0_i32 = arith.constant 0 : i32
    %c0_i32_0 = arith.constant 0 : i32
    %c0_i32_1 = arith.constant 0 : i32
    return %c0_i32, %c0_i32_0 : i32, i32
  }
  func.func @transform_7(%arg0: i32) -> (i32, i32) {
    %c0_i32 = arith.constant 0 : i32
    %c0_i32_0 = arith.constant 0 : i32
    return %arg0, %c0_i32 : i32, i32
  }
}

</mosaic_0001>

<bundles_post_ra>
// kernel: _fused_forward.1
= control target key start
LH: loop header
LB: loop body
LE: loop exit
PB: predicated region body
PF: predicated region fallthrough
CT: control target
= control target key end

     0   :  { %v15876_v1 = vmov 0.0   ;;  %vm15877_vm0 = vmmov 0   ;;  %vm296_vm1 = vcmask 392192   ;;  %vm153_vm2 = vsmask.f32 7424  ;;  %s15878_s22 = smov 96   ;;  %s19873_s0 = inlined_call_operand.vmem [shape: bf16[544,48], index: 0, kind: input, shape index: {}]   ;;  %s19874_s1 = inlined_call_operand.vmem [shape: bf16[4,48,32], index: 1, kind: input, shape index: {}]   ;;  %s19875_s2 = inlined_call_operand.vmem [shape: f32[1,32], index: 2, kind: input, shape index: {}]   ;;  %s19876_s3 = inlined_call_operand.vmem [shape: bf16[512,64], index: 3, kind: input, shape index: {}]   ;;  %s19877_s4 = inlined_call_operand.vmem [shape: f32[1,64], index: 4, kind: input, shape index: {}]   ;;  %s19878_s5 = inlined_call_operand.vmem [shape: bf16[576,32], index: 5, kind: input, shape index: {}]   ;;  %s19879_s6 = inlined_call_operand.vmem [shape: f32[1,32], index: 6, kind: input, shape index: {}]   ;;  %s19880_s7 = inlined_call_operand.hbm [shape: f32[32,32], index: 7, kind: output, shape index: {}]  }
   0x1   :  { %v15059_v0 = vld [vmem:[%s19874_s1 + $0x18] sm:$0xff]   ;;  %13987 = vmatprep.subr.bf16.mxu0 %v15876_v1  ;;  %14053 = vmatprep.subr.bf16.mxu1 %v15876_v1  ;;  %v15060_v2 = vld [vmem:[%s19874_s1] sm:$0xff]   ;;  %v15062_v4 = vld [vmem:[%s19874_s1 + $0x8] sm:$0xff]   ;;  %vm1606_vm3 = vcmask 261120   ;;  %s15879_s27 = smov 32   ;;  %s15880_s28 = smov 64  }
   0x2   :  { %13988 = vmatpush3.bf16.msra.mxu0 %v15059_v0  ;;  %v15061_v3 = vld [vmem:[%s19874_s1 + $0x20] sm:$0xff]   ;;  %13993 = vmatprep.mubr.msk.bf16.mxu0 %vm15877_vm0, %v15876_v1  ;;  %v15063_v5 = vld [vmem:[%s19874_s1 + $0x28] sm:$0xff]   ;;  %v15064_v6 = vld [vmem:[%s19874_s1 + $0x10] sm:$0xff]   ;;  %vm1717_vm4 = vcmask 523264   ;;  %vm1719_vm5 = vcmask 785408  }
   0x3   :  { %14054 = vmatpush3.bf16.msra.mxu1 %v15060_v2  ;;  %13989 = vmatprep.subr.bf16.mxu0 %v15876_v1  ;;  %v15065_v7 = vld [vmem:[%s19873_s0] sm:$0xff]   ;;  %v15066_v8 = vld [vmem:[%s19873_s0 + $0x8] sm:$0xff]   ;;  %v15069_v15 = vld [vmem:[%s19873_s0 + $0x10] sm:$0xff]  }
   0x4   :  { %14055 = vmatprep.subr.bf16.mxu1 %v15876_v1  ;;  %14059 = vmatprep.mubr.msk.bf16.mxu1 %vm15877_vm0, %v15876_v1  ;;  %v155_v9 = vshrl.u32 %v15065_v7, 16  ;;  %v157_v10 = vshll.u32 %v15065_v7, 16  ;;  %v162_v11 = vshll.u32 %v15066_v8, 16  ;;  %v15068_v14 = vld [vmem:[%s19874_s1 + $0x48] sm:$0xff]   ;;  %v15067_v17 = vld [vmem:[%s19874_s1 + $0x30] sm:$0xff]   ;;  %v166_v18 = vshrl.u32 %v15066_v8, 16 }
   0x5   :  { %v170_v19 = vshll.u32 %v15069_v15, 16  ;;  %v15070_v21 = vld [vmem:[%s19873_s0 + $0x18] sm:$0xff]   ;;  %v15075_v25 = vld [vmem:[%s19874_s1 + $0x50] sm:$0xff]   ;;  %v174_v27 = vshrl.u32 %v15069_v15, 16  ;;  %v15071_v31 = vld [vmem:[%s19873_s0 + $0x20] sm:$0xff]  }
   0x6   :  { %13990 = vmatpush3.bf16.msra.mxu0 %v15061_v3  ;;  %v159_v12 = vrot.slane %v157_v10, 1  ;;  %v164_v13 = vrot.slane %v162_v11, 1  ;;  %v15074_v24 = vld [vmem:[%s19874_s1 + $0x38] sm:$0xff]   ;;  %v178_v28 = vshll.u32 %v15070_v21, 16  ;;  %v15081_v32 = vld [vmem:[%s19874_s1 + $0x40] sm:$0xff]   ;;  %v182_v35 = vshrl.u32 %v15070_v21, 16 }
   0x7   :  { %14056 = vmatpush3.bf16.msra.mxu1 %v15062_v4  ;;  %13991 = vmatprep.subr.bf16.mxu0 %v15876_v1  ;;  %v172_v23 = vrot.slane %v170_v19, 1  ;;  %v15082_v33 = vld [vmem:[%s19874_s1 + $0x58] sm:$0xff]   ;;  %v186_v36 = vshll.u32 %v15071_v31, 16  ;;  %v15072_v39 = vld [vmem:[%s19873_s0 + $0x28] sm:$0xff]   ;;  %v15073_v40 = vld [vmem:[%s19873_s0 + $0x30] sm:$0xff]   ;;  %v190_v42 = vshrl.u32 %v15071_v31, 16 }
   0x8   :  { %14057 = vmatprep.subr.bf16.mxu1 %v15876_v1  ;;  %v160_v16 = vor.u32 %v159_v12, %v155_v9  ;;  %v168_v22 = vor.u32 %v166_v18, %v164_v13  ;;  %v180_v30 = vrot.slane %v178_v28, 1  ;;  %v194_v43 = vshll.u32 %v15072_v39, 16  ;;  %v15076_v45 = vld [vmem:[%s19873_s0 + $0x38] sm:$0xff]   ;;  %v16031_v48 = vld [vmem:[%s19873_s0 + $0x40] sm:$0xff]   ;;  %v16036_v52 = vld [vmem:[%s19873_s0 + $0x48] sm:$0xff]  }
   0x9   :  { %v176_v29 = vor.u32 %v174_v27, %v172_v23  ;;  %v188_v38 = vrot.slane %v186_v36, 1  ;;  %v202_v44 = vshll.u32 %v15073_v40, 16  ;;  %v198_v49 = vshrl.u32 %v15072_v39, 16  ;;  %v16044_v57 = vld [vmem:[%s19873_s0 + $0x50] sm:$0xff]   ;;  %v16056_v62 = vld [vmem:[%s19873_s0 + $0x58] sm:$0xff]   ;;  %v16079_v11 = vld [vmem:[%s19873_s0 + $0x68] sm:$0xff]  }
   0xa   :  { %13992 = vmatpush3.bf16.msra.mxu0 %v15063_v5  ;;  %v165_v20 = vsel %vm153_vm2, %v160_v16, %v164_v13  ;;  %v173_v26 = vsel %vm153_vm2, %v168_v22, %v172_v23  ;;  %v184_v37 = vor.u32 %v182_v35, %v180_v30  ;;  %v196_v47 = vrot.slane %v194_v43, 1  ;;  %v16094_v18 = vld [vmem:[%s19873_s0 + $0x70] sm:$0xff]   ;;  %v15086_v19 = vld [vmem:[%s19873_s0 + $0x78] ss:$0 sps:$4 sm:$0x11]   ;;  %v16111_v27 = vld [vmem:[%s19873_s0 + $0x8] sm:$0xff]  }
   0xb   :  { %14058 = vmatpush3.bf16.msra.mxu1 %v15064_v6  ;;  %14119 = vmatprep.subr.bf16.mxu0 %v15876_v1  ;;  %v181_v34 = vsel %vm153_vm2, %v176_v29, %v180_v30  ;;  %v192_v46 = vor.u32 %v190_v42, %v188_v38  ;;  %v204_v50 = vrot.slane %v202_v44, 1  ;;  %v210_v51 = vshll.u32 %v15076_v45, 16  ;;  %v16121_v29 = vld [vmem:[%s19873_s0 + $0x10] sm:$0xff]  }
   0xc   :  { %14185 = vmatprep.subr.bf16.mxu1 %v15876_v1  ;;  %v189_v41 = vsel %vm153_vm2, %v184_v37, %v188_v38  ;;  %v206_v54 = vshrl.u32 %v15073_v40, 16  ;;  %v214_v55 = vshrl.u32 %v15076_v45, 16  ;;  %v218_v56 = vshll.u32 %v16031_v48, 16  ;;  %v16137_v37 = vld [vmem:[%s19873_s0 + $0x18] sm:$0xff]  }
   0xd   :  { %13994 = vmatmul.mubr.msk.bf16.vlgmr.msra.gmra.mrb[0].mxu0 %vm296_vm1, %v165_v20  ;;  %v197_v53 = vsel %vm153_vm2, %v192_v46, %v196_v47  ;;  %v212_v58 = vrot.slane %v210_v51, 1  ;;  %v222_v59 = vshrl.u32 %v16031_v48, 16  ;;  %v200_v60 = vor.u32 %v198_v49, %v196_v47  ;;  %v16163_v47 = vld [vmem:[%s19873_s0 + $0x28] sm:$0xff]  }
   0xe   :  { %14060 = vmatmul.mubr.msk.bf16.vlgmr.msra.gmra.mrb[0].mxu1 %vm296_vm1, %v15065_v7  ;;  %14120 = vmatpush3.bf16.msra.mxu0 %v15067_v17  ;;  %v226_v61 = vshll.u32 %v16036_v52, 16  ;;  %v220_v63 = vrot.slane %v218_v56, 1  ;;  %v230_v0 = vshrl.u32 %v16036_v52, 16  ;;  %v234_v2 = vshll.u32 %v16044_v57, 16 }
   0xf   :  { %14186 = vmatpush3.bf16.msra.mxu1 %v15068_v14  ;;  %14063 = vmatprep.mubr.msk.bf16.mxu1 %vm15877_vm0, %v15876_v1  ;;  %v238_v3 = vshrl.u32 %v16044_v57, 16  ;;  %v205_v4 = vsel %vm153_vm2, %v200_v60, %v204_v50  ;;  %v242_v6 = vshll.u32 %v16056_v62, 16  ;;  %v208_v9 = vor.u32 %v206_v54, %v204_v50  ;;  %v16187_v54 = vld [vmem:[%s19873_s0 + $0x38] sm:$0xff]   ;;  %v16202_v60 = vld [vmem:[%s19873_s0 + $0x40] sm:$0xff]  }
  0x10   :  { %14187 = vmatprep.subr.bf16.mxu1 %v15876_v1  ;;  %13997 = vmatprep.mubr.msk.bf16.mxu0 %vm15877_vm0, %v15876_v1  ;;  %v228_v5 = vrot.slane %v226_v61, 1  ;;  %v236_v7 = vrot.slane %v234_v2, 1  ;;  %v246_v12 = vshrl.u32 %v16056_v62, 16  ;;  %v258_v16 = vshll.u32 %v16079_v11, 16 }
  0x11   :  { %14121 = vmatprep.subr.bf16.mxu0 %v15876_v1  ;;  %v16074_v10 = vrot.slane %v242_v6, 1  ;;  %v213_v14 = vsel %vm153_vm2, %v208_v9, %v212_v58  ;;  %v216_v20 = vor.u32 %v214_v55, %v212_v58  ;;  %v262_v22 = vshrl.u32 %v16079_v11, 16  ;;  %v16235_v9 = vld [vmem:[%s19873_s0 + $0x50] sm:$0xff]  }
  0x12   :  { %14122 = vmatpush3.bf16.msra.mxu0 %v15074_v24  ;;  %v266_v23 = vshll.u32 %v16094_v18, 16  ;;  %v270_v24 = vshrl.u32 %v16094_v18, 16  ;;  %v224_v30 = vor.u32 %v222_v59, %v220_v63  ;;  %v1186_v42 = vshll.u32 %v16137_v37, 16 }
  0x13   :  { %14188 = vmatpush3.bf16.msra.mxu1 %v15075_v25  ;;  %14123 = vmatprep.subr.bf16.mxu0 %v15876_v1  ;;  %v221_v25 = vsel %vm153_vm2, %v216_v20, %v220_v63  ;;  %v1190_v43 = vshrl.u32 %v16137_v37, 16  ;;  %v240_v50 = vor.u32 %v238_v3, %v236_v7  ;;  %v1202_v51 = vshll.u32 %v16163_v47, 16  ;;  %v16214_v63 = vld [vmem:[%s19873_s0 + $0x48] sm:$0xff]  }
  0x14   :  { %14189 = vmatprep.subr.bf16.mxu1 %v15876_v1  ;;  %v16116_v28 = vrot.slane %v266_v23, 1  ;;  %v229_v35 = vsel %vm153_vm2, %v224_v30, %v228_v5  ;;  %v16158_v46 = vrot.slane %v1186_v42, 1  ;;  %v1218_v59 = vshll.u32 %v16187_v54, 16 }
  0x15   :  { %13998 = vmatmul.mubr.msk.bf16.gmra.mrb[4].mxu0 %vm296_vm1, %v173_v26  ;;  %v274_v26 = vshll.u32 %v15086_v19, 16  ;;  %v245_v55 = vsel %vm153_vm2, %v240_v50, %v16074_v10  ;;  %v16191_v56 = vrot.slane %v1202_v51, 1  ;;  %v248_v61 = vor.u32 %v246_v12, %v16074_v10  ;;  %v16250_v12 = vld [vmem:[%s19873_s0 + $0x60] sm:$0xff]  }
  0x16   :  { %14064 = vmatmul.mubr.msk.bf16.gmra.mrb[4].mxu1 %vm296_vm1, %v15066_v8  ;;  %14001 = vmatprep.mubr.msk.bf16.mxu0 %vm15877_vm0, %v15876_v1  ;;  %v16069_v8 = vld [vmem:[%s19873_s0 + $0x60] sm:$0xff]   ;;  %v1238_v20 = vshrl.u32 %v16214_v63, 16  ;;  %v1258_v23 = vshll.u32 %v16250_v12, 16  ;;  %v1246_v30 = vshrl.u32 %v16235_v9, 16 }
  0x17   :  { %14067 = vmatprep.mubr.msk.bf16.mxu1 %vm15877_vm0, %v15876_v1  ;;  %14124 = vmatpush3.bf16.msra.mxu0 %v15081_v32  ;;  %v250_v13 = vshll.u32 %v16069_v8, 16  ;;  %v1173_v32 = vshll.u32 %v16111_v27, 16 }
  0x18   :  { %14190 = vmatpush3.bf16.msra.mxu1 %v15082_v33  ;;  %v16128_v33 = vrot.slane %v274_v26, 1  ;;  %v16290_v42 = vrot.slane %v1258_v23, 1 }
  0x19   :  { %v16089_v17 = vrot.slane %v250_v13, 1  ;;  %v16132_v36 = vrot.slane %v1173_v32, 1  ;;  %v1230_v13 = vshrl.u32 %v16202_v60, 16 }
  0x1d   :  { %14002 = vmatmul.mubr.msk.bf16.gmra.mrb[8].mxu0 %vm296_vm1, %v181_v34  ;;  %v1178_v34 = vshll.u32 %v16121_v29, 16 }
  0x1e   :  { %14068 = vmatmul.mubr.msk.bf16.gmra.mrb[8].mxu1 %vm296_vm1, %v15069_v15  ;;  %14005 = vmatprep.mubr.msk.bf16.mxu0 %vm15877_vm0, %v15876_v1  ;;  %v254_v15 = vshrl.u32 %v16069_v8, 16 }
  0x1f   :  { %14071 = vmatprep.mubr.msk.bf16.mxu1 %vm15877_vm0, %v15876_v1  ;;  %v16143_v38 = vrot.slane %v1178_v34, 1  ;;  %v16285_v34 = vld [vmem:[%s19873_s0 + $0x70] sm:$0xff]  }
  0x20   :  { %v256_v10 = vor.u32 %v254_v15, %v16089_v17  ;;  %v1242_v15 = vshll.u32 %v16235_v9, 16 }
  0x22   :  { %v16277_v26 = vrot.slane %v1242_v15, 1 }
  0x25   :  { %14006 = vmatmul.mubr.msk.bf16.gmra.mrb[12].mxu0 %vm296_vm1, %v189_v41  ;;  %v1182_v41 = vshrl.u32 %v16121_v29, 16  ;;  %v1192_v29 = vor.u32 %v1190_v43, %v16158_v46  ;;  %v15096_v43 = vld [vmem:[%s19873_s0 + $0x28] sm:$0xff]  }
  0x26   :  { %14072 = vmatmul.mubr.msk.bf16.gmra.mrb[12].mxu1 %vm296_vm1, %v15070_v21  ;;  %14009 = vmatprep.mubr.msk.bf16.mxu0 %vm15877_vm0, %v15876_v1  ;;  %v16102_v21 = vrot.slane %v258_v16, 1 }
  0x27   :  { %14075 = vmatprep.mubr.msk.bf16.mxu1 %vm15877_vm0, %v15876_v1 }
  0x28   :  { %v261_v16 = vsel %vm153_vm2, %v256_v10, %v16102_v21 }
  0x2d   :  { %14010 = vmatmul.mubr.msk.bf16.gmra.mrb[16].mxu0 %vm296_vm1, %v197_v53  ;;  %v1206_v53 = vshrl.u32 %v16163_v47, 16 }
  0x2e   :  { %14076 = vmatmul.mubr.msk.bf16.gmra.mrb[16].mxu1 %vm296_vm1, %v15071_v31  ;;  %14013 = vmatprep.mubr.msk.bf16.mxu0 %vm15877_vm0, %v15876_v1  ;;  %v1171_v31 = vshrl.u32 %v16111_v27, 16  ;;  %v15090_v27 = vld [vmem:[%s19873_s0 + $0x10] sm:$0xff]  }
  0x2f   :  { %14079 = vmatprep.mubr.msk.bf16.mxu1 %vm15877_vm0, %v15876_v1 }
  0x30   :  { %v1176_v51 = vor.u32 %v16132_v36, %v1171_v31 }
  0x35   :  { %14014 = vmatmul.mubr.msk.bf16.gmra.mrb[20].mxu0 %vm296_vm1, %v205_v4  ;;  %v16223_v4 = vrot.slane %v1218_v59, 1 }
  0x36   :  { %14080 = vmatmul.mubr.msk.bf16.gmra.mrb[20].mxu1 %vm296_vm1, %v15072_v39  ;;  %14017 = vmatprep.mubr.msk.bf16.mxu0 %vm15877_vm0, %v15876_v1  ;;  %v16148_v39 = vld [vmem:[%s19873_s0 + $0x20] sm:$0xff]  }
  0x37   :  { %14083 = vmatprep.mubr.msk.bf16.mxu1 %vm15877_vm0, %v15876_v1  ;;  %v1194_v44 = vshll.u32 %v16148_v39, 16  ;;  %v1198_v49 = vshrl.u32 %v16148_v39, 16  ;;  %v1208_v39 = vor.u32 %v1206_v53, %v16191_v56  ;;  %v15100_v53 = vld [vmem:[%s19873_s0 + $0x38] sm:$0xff]  }
  0x3d   :  { %14018 = vmatmul.mubr.msk.bf16.gmra.mrb[24].mxu0 %vm296_vm1, %v213_v14  ;;  %v16256_v14 = vld [vmem:[%s19873_s0 + $0x68] sm:$0xff]  }
  0x3e   :  { %14084 = vmatmul.mubr.msk.bf16.gmra.mrb[24].mxu1 %vm296_vm1, %v15073_v40  ;;  %14021 = vmatprep.mubr.msk.bf16.mxu0 %vm15877_vm0, %v15876_v1  ;;  %v232_v40 = vor.u32 %v230_v0, %v228_v5  ;;  %v253_v0 = vsel %vm153_vm2, %v248_v61, %v16089_v17  ;;  %v1222_v5 = vshrl.u32 %v16187_v54, 16 }
  0x3f   :  { %14087 = vmatprep.mubr.msk.bf16.mxu1 %vm15877_vm0, %v15876_v1 }
  0x45   :  { %14022 = vmatmul.mubr.msk.bf16.gmra.mrb[28].mxu0 %vm296_vm1, %v221_v25  ;;  %v1266_v25 = vshll.u32 %v16256_v14, 16 }
  0x46   :  { %14088 = vmatmul.mubr.msk.bf16.gmra.mrb[28].mxu1 %vm296_vm1, %v15076_v45  ;;  %14025 = vmatprep.mubr.msk.bf16.mxu0 %vm15877_vm0, %v15876_v1  ;;  %v237_v45 = vsel %vm153_vm2, %v232_v40, %v236_v7  ;;  %v1234_v7 = vshll.u32 %v16214_v63, 16  ;;  %v15106_v63 = vld [vmem:[%s19873_s0 + $0x50] sm:$0xff]  }
  0x47   :  { %14091 = vmatprep.mubr.msk.bf16.mxu1 %vm15877_vm0, %v15876_v1 }
  0x48   :  { %v16260_v19 = vrot.slane %v1234_v7, 1 }
  0x4a   :  { %v1240_v59 = vor.u32 %v1238_v20, %v16260_v19 }
  0x4c   :  { %v1245_v61 = vsel %vm153_vm2, %v1240_v59, %v16277_v26 }
  0x4d   :  { %14026 = vmatmul.mubr.msk.bf16.gmra.mrb[32].mxu0 %vm296_vm1, %v229_v35 }
  0x4e   :  { %14092 = vmatmul.mubr.msk.bf16.gmra.mrb[32].mxu1 %vm296_vm1, %v16031_v48  ;;  %14029 = vmatprep.mubr.msk.bf16.mxu0 %vm15877_vm0, %v15876_v1  ;;  %v16169_v48 = vrot.slane %v1194_v44, 1  ;;  %v1270_v44 = vshrl.u32 %v16256_v14, 16 }
  0x4f   :  { %14095 = vmatprep.mubr.msk.bf16.mxu1 %vm15877_vm0, %v15876_v1 }
  0x50   :  { %v1197_v36 = vsel %vm153_vm2, %v1192_v29, %v16169_v48  ;;  %v1200_v37 = vor.u32 %v1198_v49, %v16169_v48  ;;  %v15098_v48 = vld [vmem:[%s19873_s0 + $0x30] sm:$0xff]  }
  0x55   :  { %14030 = vmatmul.mubr.msk.bf16.gmra.mrb[36].mxu0 %vm296_vm1, %v237_v45  ;;  %v1274_v45 = vshll.u32 %v16285_v34, 16 }
  0x56   :  { %14096 = vmatmul.mubr.msk.bf16.gmra.mrb[36].mxu1 %vm296_vm1, %v16036_v52  ;;  %14033 = vmatprep.mubr.msk.bf16.mxu0 %vm15877_vm0, %v15876_v1  ;;  %v16181_v52 = vld [vmem:[%s19873_s0 + $0x30] sm:$0xff]  }
  0x57   :  { %14099 = vmatprep.mubr.msk.bf16.mxu1 %vm15877_vm0, %v15876_v1  ;;  %v1210_v58 = vshll.u32 %v16181_v52, 16  ;;  %v1214_v3 = vshrl.u32 %v16181_v52, 16  ;;  %v1224_v52 = vor.u32 %v1222_v5, %v16223_v4  ;;  %v1276_v9 = vrot.slane %v1274_v45, 1 }
  0x59   :  { %v16218_v2 = vrot.slane %v1210_v58, 1 }
  0x5b   :  { %v1216_v47 = vor.u32 %v1214_v3, %v16218_v2  ;;  %v15108_v3 = vld [vmem:[%s19873_s0 + $0x58] sm:$0xff]  }
  0x5d   :  { %14034 = vmatmul.mubr.msk.bf16.gmra.mrb[40].mxu0 %vm296_vm1, %v245_v55  ;;  %v1221_v49 = vsel %vm153_vm2, %v1216_v47, %v16223_v4 }
  0x5e   :  { %14100 = vmatmul.mubr.msk.bf16.gmra.mrb[40].mxu1 %vm296_vm1, %v16044_v57  ;;  %14037 = vmatprep.mubr.msk.bf16.mxu0 %vm15877_vm0, %v15876_v1  ;;  %v1226_v57 = vshll.u32 %v16202_v60, 16  ;;  %v15104_v60 = vld [vmem:[%s19873_s0 + $0x48] sm:$0xff]  }
  0x5f   :  { %14103 = vmatprep.mubr.msk.bf16.mxu1 %vm15877_vm0, %v15876_v1 }
  0x60   :  { %v16228_v6 = vrot.slane %v1226_v57, 1  ;;  %v1248_v57 = vor.u32 %v1246_v30, %v16277_v26  ;;  %v15117_v26 = vld [vmem:[%s19873_s0 + $0x80] ss:$0 sps:$4 sm:$0x11]  }
  0x61   :  { %v1290_v45 = vshll.u32 %v15117_v26, 16 }
  0x62   :  { %v1229_v55 = vsel %vm153_vm2, %v1224_v52, %v16228_v6  ;;  %v1232_v54 = vor.u32 %v1230_v13, %v16228_v6  ;;  %v15110_v6 = vld [vmem:[%s19873_s0 + $0x60] sm:$0xff]   ;;  %v1278_v13 = vshrl.u32 %v16285_v34, 16 }
  0x64   :  { %v1237_v58 = vsel %vm153_vm2, %v1232_v54, %v16260_v19  ;;  %v15112_v19 = vld [vmem:[%s19873_s0 + $0x68] sm:$0xff]  }
  0x65   :  { %14038 = vmatmul.mubr.msk.bf16.gmra.mrb[44].mxu0 %vm296_vm1, %v253_v0 }
  0x66   :  { %14104 = vmatmul.mubr.msk.bf16.gmra.mrb[44].mxu1 %vm296_vm1, %v16056_v62  ;;  %v16240_v62 = vld [vmem:[%s19873_s0 + $0x58] sm:$0xff]   ;;  %14041 = vmatprep.mubr.msk.bf16.mxu0 %vm15877_vm0, %v15876_v1 }
  0x67   :  { %14107 = vmatprep.mubr.msk.bf16.mxu1 %vm15877_vm0, %v15876_v1  ;;  %v1250_v17 = vshll.u32 %v16240_v62, 16  ;;  %v1254_v40 = vshrl.u32 %v16240_v62, 16  ;;  %v15115_v62 = vld [vmem:[%s19873_s0 + $0x78] sm:$0xff]  }
  0x68   :  { %v1282_v20 = vshll.u32 %v15115_v62, 16 }
  0x69   :  { %v16280_v32 = vrot.slane %v1250_v17, 1 }
  0x6b   :  { %v1253_v0 = vsel %vm153_vm2, %v1248_v57, %v16280_v32 }
  0x6d   :  { %14042 = vmatmul.mubr.msk.bf16.gmra.mrb[48].mxu0 %vm296_vm1, %v261_v16 }
  0x6e   :  { %14108 = vmatmul.mubr.msk.bf16.gmra.mrb[48].mxu1 %vm296_vm1, %v16069_v8  ;;  %14045 = vmatprep.mubr.msk.bf16.mxu0 %vm15877_vm0, %v15876_v1  ;;  %v264_v8 = vor.u32 %v262_v22, %v16102_v21  ;;  %v1262_v21 = vshrl.u32 %v16250_v12, 16  ;;  %v16295_v22 = vrot.slane %v1266_v25, 1 }
  0x6f   :  { %14111 = vmatprep.mubr.msk.bf16.mxu1 %vm15877_vm0, %v15876_v1 }
  0x70   :  { %v269_v35 = vsel %vm153_vm2, %v264_v8, %v16116_v28  ;;  %v1264_v5 = vor.u32 %v1262_v21, %v16290_v42  ;;  %v1272_v10 = vor.u32 %v1270_v44, %v16295_v22  ;;  %v1286_v21 = vshrl.u32 %v15115_v62, 16  ;;  %v15114_v44 = vld [vmem:[%s19873_s0 + $0x70] sm:$0xff]  }
  0x72   :  { %v1269_v7 = vsel %vm153_vm2, %v1264_v5, %v16295_v22  ;;  %v1277_v23 = vsel %vm153_vm2, %v1272_v10, %v1276_v9 }
  0x75   :  { %14046 = vmatmul.mubr.msk.bf16.gmra.mrb[52].mxu0 %vm296_vm1, %v269_v35  ;;  %v1284_v35 = vrot.slane %v1282_v20, 1 }
  0x76   :  { %14112 = vmatmul.mubr.msk.bf16.gmra.mrb[52].mxu1 %vm296_vm1, %v16079_v11  ;;  %14049 = vmatprep.mubr.msk.bf16.mxu0 %vm15877_vm0, %v15876_v1  ;;  %v272_v11 = vor.u32 %v270_v24, %v16116_v28  ;;  %v15087_v24 = vld [vmem:[%s19873_s0 + $0x8] sm:$0xff]   ;;  %v1181_v28 = vsel %vm153_vm2, %v1176_v51, %v16143_v38 }
  0x77   :  { %14115 = vmatprep.mubr.msk.bf16.mxu1 %vm15877_vm0, %v15876_v1 }
  0x78   :  { %v277_v50 = vsel %vm153_vm2, %v272_v11, %v16128_v33  ;;  %v15092_v33 = vld [vmem:[%s19873_s0 + $0x18] sm:$0xff]  }
  0x7d   :  { %14050 = vmatmul.mubr.msk.bf16.gmra.mrb[56].mxu0 %vm296_vm1, %v277_v50 }
  0x7e   :  { %14116 = vmatmul.mubr.msk.bf16.gmra.mrb[56].mxu1 %vm296_vm1, %v16094_v18  ;;  %14125 = vmatprep.mubr.msk.bf16.mxu0 %vm15877_vm0, %v15876_v1  ;;  %v1184_v18 = vor.u32 %v1182_v41, %v16143_v38  ;;  %v15094_v38 = vld [vmem:[%s19873_s0 + $0x20] sm:$0xff]   ;;  %v1205_v41 = vsel %vm153_vm2, %v1200_v37, %v16191_v56 }
  0x7f   :  { %14191 = vmatprep.mubr.msk.bf16.mxu1 %vm15877_vm0, %v15876_v1  ;;  %v15102_v56 = vld [vmem:[%s19873_s0 + $0x40] sm:$0xff]  }
  0x80   :  { %v1189_v31 = vsel %vm153_vm2, %v1184_v18, %v16158_v46  ;;  %v1213_v46 = vsel %vm153_vm2, %v1208_v39, %v16218_v2  ;;  %v1256_v2 = vor.u32 %v1254_v40, %v16280_v32  ;;  %v1280_v40 = vor.u32 %v1278_v13, %v1276_v9 }
  0x82   :  { %v1261_v4 = vsel %vm153_vm2, %v1256_v2, %v16290_v42  ;;  %v1285_v51 = vsel %vm153_vm2, %v1280_v40, %v1284_v35 }
  0x85   :  { %14126 = vmatmul.mubr.msk.bf16.vlgmr.msra.gmra.mrb[60].mxu0 %vm296_vm1, %v15087_v24 }
  0x86   :  { %14192 = vmatmul.mubr.msk.bf16.vlgmr.msra.gmra.mrb[60].mxu1 %vm296_vm1, %v1181_v28  ;;  %14129 = vmatprep.mubr.msk.bf16.mxu0 %vm15877_vm0, %v15876_v1 }
  0x87   :  { %14195 = vmatprep.mubr.msk.bf16.mxu1 %vm15877_vm0, %v15876_v1 }
  0x8d   :  { %14130 = vmatmul.mubr.msk.bf16.gmra.mrb[64].mxu0 %vm296_vm1, %v15090_v27 }
  0x8e   :  { %14196 = vmatmul.mubr.msk.bf16.gmra.mrb[64].mxu1 %vm296_vm1, %v1189_v31  ;;  %14133 = vmatprep.mubr.msk.bf16.mxu0 %vm15877_vm0, %v15876_v1 }
  0x8f   :  { %14199 = vmatprep.mubr.msk.bf16.mxu1 %vm15877_vm0, %v15876_v1 }
  0x95   :  { %14134 = vmatmul.mubr.msk.bf16.gmra.mrb[68].mxu0 %vm296_vm1, %v15092_v33  ;;  %v1292_v33 = vrot.slane %v1290_v45, 1 }
  0x96   :  { %14200 = vmatmul.mubr.msk.bf16.gmra.mrb[68].mxu1 %vm296_vm1, %v1197_v36  ;;  %14137 = vmatprep.mubr.msk.bf16.mxu0 %vm15877_vm0, %v15876_v1  ;;  %v1288_v36 = vor.u32 %v1286_v21, %v1284_v35  ;;  %v15119_v35 = vld [vmem:[%s19876_s3] sm:$0xff]  }
  0x97   :  { %14203 = vmatprep.mubr.msk.bf16.mxu1 %vm15877_vm0, %v15876_v1 }
  0x9d   :  { %14138 = vmatmul.mubr.msk.bf16.gmra.mrb[72].mxu0 %vm296_vm1, %v15094_v38 }
  0x9e   :  { %14204 = vmatmul.mubr.msk.bf16.gmra.mrb[72].mxu1 %vm296_vm1, %v1205_v41  ;;  %14141 = vmatprep.mubr.msk.bf16.mxu0 %vm15877_vm0, %v15876_v1  ;;  %v15116_v41 = vld [vmem:[%s19873_s0 + $0x78] sm:$0xff]  }
  0x9f   :  { %14207 = vmatprep.mubr.msk.bf16.mxu1 %vm15877_vm0, %v15876_v1 }
  0xa5   :  { %14142 = vmatmul.mubr.msk.bf16.gmra.mrb[76].mxu0 %vm296_vm1, %v15096_v43 }
  0xa6   :  { %14208 = vmatmul.mubr.msk.bf16.gmra.mrb[76].mxu1 %vm296_vm1, %v1213_v46  ;;  %14145 = vmatprep.mubr.msk.bf16.mxu0 %vm15877_vm0, %v15876_v1  ;;  %v1293_v46 = vsel %vm153_vm2, %v1288_v36, %v1292_v33 }
  0xa7   :  { %14211 = vmatprep.mubr.msk.bf16.mxu1 %vm15877_vm0, %v15876_v1 }
  0xad   :  { %14146 = vmatmul.mubr.msk.bf16.gmra.mrb[80].mxu0 %vm296_vm1, %v15098_v48 }
  0xae   :  { %14212 = vmatmul.mubr.msk.bf16.gmra.mrb[80].mxu1 %vm296_vm1, %v1221_v49  ;;  %14149 = vmatprep.mubr.msk.bf16.mxu0 %vm15877_vm0, %v15876_v1 }
  0xaf   :  { %14215 = vmatprep.mubr.msk.bf16.mxu1 %vm15877_vm0, %v15876_v1 }
  0xb5   :  { %14150 = vmatmul.mubr.msk.bf16.gmra.mrb[84].mxu0 %vm296_vm1, %v15100_v53 }
  0xb6   :  { %14216 = vmatmul.mubr.msk.bf16.gmra.mrb[84].mxu1 %vm296_vm1, %v1229_v55  ;;  %14153 = vmatprep.mubr.msk.bf16.mxu0 %vm15877_vm0, %v15876_v1 }
  0xb7   :  { %14219 = vmatprep.mubr.msk.bf16.mxu1 %vm15877_vm0, %v15876_v1 }
  0xbd   :  { %14154 = vmatmul.mubr.msk.bf16.gmra.mrb[88].mxu0 %vm296_vm1, %v15102_v56 }
  0xbe   :  { %14220 = vmatmul.mubr.msk.bf16.gmra.mrb[88].mxu1 %vm296_vm1, %v1237_v58  ;;  %14157 = vmatprep.mubr.msk.bf16.mxu0 %vm15877_vm0, %v15876_v1 }
  0xbf   :  { %14223 = vmatprep.mubr.msk.bf16.mxu1 %vm15877_vm0, %v15876_v1 }
  0xc5   :  { %14158 = vmatmul.mubr.msk.bf16.gmra.mrb[92].mxu0 %vm296_vm1, %v15104_v60 }
  0xc6   :  { %14224 = vmatmul.mubr.msk.bf16.gmra.mrb[92].mxu1 %vm296_vm1, %v1245_v61  ;;  %14161 = vmatprep.mubr.msk.bf16.mxu0 %vm15877_vm0, %v15876_v1 }
  0xc7   :  { %14227 = vmatprep.mubr.msk.bf16.mxu1 %vm15877_vm0, %v15876_v1 }
  0xcd   :  { %14162 = vmatmul.mubr.msk.bf16.gmra.mrb[96].mxu0 %vm296_vm1, %v15106_v63 }
  0xce   :  { %14228 = vmatmul.mubr.msk.bf16.gmra.mrb[96].mxu1 %vm296_vm1, %v1253_v0  ;;  %14165 = vmatprep.mubr.msk.bf16.mxu0 %vm15877_vm0, %v15876_v1 }
  0xcf   :  { %14231 = vmatprep.mubr.msk.bf16.mxu1 %vm15877_vm0, %v15876_v1 }
  0xd5   :  { %14166 = vmatmul.mubr.msk.bf16.gmra.mrb[100].mxu0 %vm296_vm1, %v15108_v3 }
  0xd6   :  { %14232 = vmatmul.mubr.msk.bf16.gmra.mrb[100].mxu1 %vm296_vm1, %v1261_v4  ;;  %14169 = vmatprep.mubr.msk.bf16.mxu0 %vm15877_vm0, %v15876_v1 }
  0xd7   :  { %14235 = vmatprep.mubr.msk.bf16.mxu1 %vm15877_vm0, %v15876_v1 }
  0xdd   :  { %14170 = vmatmul.mubr.msk.bf16.gmra.mrb[104].mxu0 %vm296_vm1, %v15110_v6 }
  0xde   :  { %14236 = vmatmul.mubr.msk.bf16.gmra.mrb[104].mxu1 %vm296_vm1, %v1269_v7  ;;  %14173 = vmatprep.mubr.msk.bf16.mxu0 %vm15877_vm0, %v15876_v1 }
  0xdf   :  { %14239 = vmatprep.mubr.msk.bf16.mxu1 %vm15877_vm0, %v15876_v1 }
  0xe0   :  { %v376_v15 = vpop.f32.mrb[0].mxu0 }
  0xe1   :  { %v577_v12 = vpop.f32.mrb[0].mxu1  ;;  %v13995_v25 = vpop.f32.mrb[1].mxu0 }
  0xe2   :  { %v14061_v16 = vpop.f32.mrb[1].mxu1  ;;  %v16497_v14 = vadd.f32 %v577_v12, %v376_v15  ;;  %v379_v30 = vpop.f32.mrb[2].mxu0 }
  0xe3   :  { %v580_v17 = vpop.f32.mrb[2].mxu1  ;;  %v13996_v34 = vpop.f32.mrb[3].mxu0 }
  0xe4   :  { %v14062_v8 = vpop.f32.mrb[3].mxu1  ;;  %v16502_v32 = vadd.f32 %v580_v17, %v379_v30  ;;  %v15118_v34 = vld [vmem:[%s19876_s3 + $0x40] sm:$0xff]  }
  0xe5   :  { %14174 = vmatmul.mubr.msk.bf16.gmra.mrb[108].mxu0 %vm296_vm1, %v15112_v19  ;;  %12995 = vmatprep.subr.bf16.mxu0 %v15118_v34  ;;  %v15129_v34 = vld [vmem:[%s19876_s3 + $0x90] sm:$0xff]  }
  0xe6   :  { %14240 = vmatmul.mubr.msk.bf16.gmra.mrb[108].mxu1 %vm296_vm1, %v1277_v23  ;;  %14177 = vmatprep.mubr.msk.bf16.mxu0 %vm15877_vm0, %v15876_v1 }
  0xe7   :  { %14243 = vmatprep.mubr.msk.bf16.mxu1 %vm15877_vm0, %v15876_v1  ;;  %12996 = vmatpush3.bf16.msra.mxu0 %v15119_v35 }
  0xe8   :  { %v384_v11 = vpop.f32.mrb[4].mxu0 }
  0xe9   :  { %v585_v42 = vpop.f32.mrb[4].mxu1  ;;  %v13999_v28 = vpop.f32.mrb[5].mxu0 }
  0xea   :  { %v14065_v22 = vpop.f32.mrb[5].mxu1  ;;  %v16514_v24 = vadd.f32 %v585_v42, %v384_v11  ;;  %v387_v27 = vpop.f32.mrb[6].mxu0 }
  0xeb   :  { %v588_v50 = vpop.f32.mrb[6].mxu1  ;;  %v14000_v29 = vpop.f32.mrb[7].mxu0 }
  0xec   :  { %v14066_v18 = vpop.f32.mrb[7].mxu1  ;;  %v16516_v31 = vadd.f32 %v588_v50, %v387_v27  ;;  %v15120_v50 = vld [vmem:[%s19876_s3 + $0xc0] sm:$0xff]  }
  0xed   :  { %14178 = vmatmul.mubr.msk.bf16.gmra.mrb[112].mxu0 %vm296_vm1, %v15114_v44  ;;  %13017 = vmatprep.subr.bf16.mxu1 %v15120_v50 }
  0xee   :  { %14244 = vmatmul.mubr.msk.bf16.gmra.mrb[112].mxu1 %vm296_vm1, %v1285_v51  ;;  %14181 = vmatprep.mubr.msk.bf16.mxu0 %vm15877_vm0, %v15876_v1  ;;  %v15121_v51 = vld [vmem:[%s19876_s3 + $0x80] sm:$0xff]  }
  0xef   :  { %14247 = vmatprep.mubr.msk.bf16.mxu1 %vm15877_vm0, %v15876_v1  ;;  %13018 = vmatpush3.bf16.msra.mxu1 %v15121_v51 }
  0xf0   :  { %v392_v39 = vpop.f32.mrb[8].mxu0 }
  0xf1   :  { %v593_v37 = vpop.f32.mrb[8].mxu1  ;;  %v14003_v48 = vpop.f32.mrb[9].mxu0 }
  0xf2   :  { %v14069_v38 = vpop.f32.mrb[9].mxu1  ;;  %v16528_v47 = vadd.f32 %v593_v37, %v392_v39  ;;  %v395_v52 = vpop.f32.mrb[10].mxu0 }
  0xf3   :  { %v596_v43 = vpop.f32.mrb[10].mxu1  ;;  %v14004_v55 = vpop.f32.mrb[11].mxu0 }
  0xf4   :  { %v14070_v49 = vpop.f32.mrb[11].mxu1  ;;  %v16530_v53 = vadd.f32 %v596_v43, %v395_v52  ;;  %v15123_v52 = vld [vmem:[%s19876_s3 + $0x8] sm:$0xff]  }
  0xf5   :  { %14182 = vmatmul.mubr.msk.bf16.gmra.mrb[116].mxu0 %vm296_vm1, %v15116_v41  ;;  %v15122_v49 = vld [vmem:[%s19876_s3 + $0x48] sm:$0xff]  }
  0xf6   :  { %14248 = vmatmul.mubr.msk.bf16.gmra.mrb[116].mxu1 %vm296_vm1, %v1293_v46  ;;  %v15124_v55 = vld [vmem:[%s19876_s3 + $0xc8] sm:$0xff]   ;;  %12997 = vmatprep.subr.bf16.mxu0 %v15122_v49 }
  0xf7   :  { %13019 = vmatprep.subr.bf16.mxu1 %v15124_v55  ;;  %12998 = vmatpush3.bf16.msra.mxu0 %v15123_v52  ;;  %v15130_v52 = vld [vmem:[%s19876_s3 + $0x58] sm:$0xff]  }
  0xf8   :  { %v400_v58 = vpop.f32.mrb[12].mxu0  ;;  %v15131_v55 = vld [vmem:[%s19876_s3 + $0x18] sm:$0xff]  }
  0xf9   :  { %v601_v54 = vpop.f32.mrb[12].mxu1  ;;  %v14007_v61 = vpop.f32.mrb[13].mxu0 }
  0xfa   :  { %v14073_v56 = vpop.f32.mrb[13].mxu1  ;;  %v16534_v60 = vadd.f32 %v601_v54, %v400_v58  ;;  %v403_v63 = vpop.f32.mrb[14].mxu0 }
  0xfb   :  { %v604_v59 = vpop.f32.mrb[14].mxu1  ;;  %v14008_v2 = vpop.f32.mrb[15].mxu0 }
  0xfc   :  { %v14074_v57 = vpop.f32.mrb[15].mxu1  ;;  %v16536_v0 = vadd.f32 %v604_v59, %v403_v63  ;;  %v15125_v2 = vld [vmem:[%s19876_s3 + $0x88] sm:$0xff]  }
  0xfd   :  { %13020 = vmatpush3.bf16.msra.mxu1 %v15125_v2 }
 0x100   :  { %v408_v5 = vpop.f32.mrb[16].mxu0 }
 0x101   :  { %v609_v3 = vpop.f32.mrb[16].mxu1  ;;  %v14011_v9 = vpop.f32.mrb[17].mxu0 }
 0x102   :  { %v14077_v4 = vpop.f32.mrb[17].mxu1  ;;  %v16538_v7 = vadd.f32 %v609_v3, %v408_v5  ;;  %v411_v10 = vpop.f32.mrb[18].mxu0 }
 0x103   :  { %v612_v6 = vpop.f32.mrb[18].mxu1  ;;  %v14012_v13 = vpop.f32.mrb[19].mxu0 }
 0x104   :  { %v14078_v62 = vpop.f32.mrb[19].mxu1  ;;  %v16540_v12 = vadd.f32 %v612_v6, %v411_v10 }
 0x108   :  { %v416_v20 = vpop.f32.mrb[20].mxu0 }
 0x109   :  { %v617_v16 = vpop.f32.mrb[20].mxu1  ;;  %v14015_v17 = vpop.f32.mrb[21].mxu0 }
 0x10a   :  { %v14081_v19 = vpop.f32.mrb[21].mxu1  ;;  %v16542_v25 = vadd.f32 %v617_v16, %v416_v20  ;;  %v419_v8 = vpop.f32.mrb[22].mxu0 }
 0x10b   :  { %v620_v15 = vpop.f32.mrb[22].mxu1  ;;  %v14016_v26 = vpop.f32.mrb[23].mxu0 }
 0x10c   :  { %v14082_v23 = vpop.f32.mrb[23].mxu1  ;;  %v16544_v30 = vadd.f32 %v620_v15, %v419_v8  ;;  %v15127_v8 = vld [vmem:[%s19876_s3 + $0x10] sm:$0xff]  }
 0x10d   :  { %v15126_v23 = vld [vmem:[%s19876_s3 + $0x50] sm:$0xff]  }
 0x10e   :  { %v15128_v26 = vld [vmem:[%s19876_s3 + $0xd0] sm:$0xff]   ;;  %12999 = vmatprep.subr.bf16.mxu0 %v15126_v23 }
 0x10f   :  { %13021 = vmatprep.subr.bf16.mxu1 %v15128_v26  ;;  %13000 = vmatpush3.bf16.msra.mxu0 %v15127_v8 }
 0x110   :  { %v424_v21 = vpop.f32.mrb[24].mxu0  ;;  %13022 = vmatpush3.bf16.msra.mxu1 %v15129_v34  ;;  %13001 = vmatprep.subr.bf16.mxu0 %v15130_v52  ;;  %v15141_v52 = vld [vmem:[%s19876_s3 + $0xa8] sm:$0xff]  }
 0x111   :  { %v625_v40 = vpop.f32.mrb[24].mxu1  ;;  %v14019_v44 = vpop.f32.mrb[25].mxu0 }
 0x112   :  { %v14085_v42 = vpop.f32.mrb[25].mxu1  ;;  %v16552_v11 = vadd.f32 %v625_v40, %v424_v21  ;;  %v427_v28 = vpop.f32.mrb[26].mxu0 }
 0x113   :  { %v628_v22 = vpop.f32.mrb[26].mxu1  ;;  %v14020_v18 = vpop.f32.mrb[27].mxu0  ;;  %13002 = vmatpush3.bf16.msra.mxu0 %v15131_v55 }
 0x114   :  { %v14086_v45 = vpop.f32.mrb[27].mxu1  ;;  %v16560_v27 = vadd.f32 %v628_v22, %v427_v28 }
 0x118   :  { %v432_v36 = vpop.f32.mrb[28].mxu0 }
 0x119   :  { %v633_v29 = vpop.f32.mrb[28].mxu1  ;;  %v14023_v38 = vpop.f32.mrb[29].mxu0 }
 0x11a   :  { %v14089_v33 = vpop.f32.mrb[29].mxu1  ;;  %v16562_v39 = vadd.f32 %v633_v29, %v432_v36  ;;  %v435_v43 = vpop.f32.mrb[30].mxu0 }
 0x11b   :  { %v636_v37 = vpop.f32.mrb[30].mxu1  ;;  %v14024_v46 = vpop.f32.mrb[31].mxu0 }
 0x11c   :  { %v14090_v41 = vpop.f32.mrb[31].mxu1  ;;  %v16564_v48 = vadd.f32 %v636_v37, %v435_v43 }
 0x120   :  { %v440_v58 = vpop.f32.mrb[32].mxu0 }
 0x121   :  { %v641_v54 = vpop.f32.mrb[32].mxu1  ;;  %v14027_v61 = vpop.f32.mrb[33].mxu0 }
 0x122   :  { %v14093_v56 = vpop.f32.mrb[33].mxu1  ;;  %v16575_v63 = vadd.f32 %v641_v54, %v440_v58  ;;  %v443_v3 = vpop.f32.mrb[34].mxu0  ;;  %v15132_v54 = vld [vmem:[%s19876_s3 + $0xd8] sm:$0xff]  }
 0x123   :  { %v644_v59 = vpop.f32.mrb[34].mxu1  ;;  %v14028_v4 = vpop.f32.mrb[35].mxu0  ;;  %v15133_v56 = vld [vmem:[%s19876_s3 + $0x98] sm:$0xff]   ;;  %13023 = vmatprep.subr.bf16.mxu1 %v15132_v54 }
 0x124   :  { %v14094_v57 = vpop.f32.mrb[35].mxu1  ;;  %v16580_v5 = vadd.f32 %v644_v59, %v443_v3  ;;  %13024 = vmatpush3.bf16.msra.mxu1 %v15133_v56 }
 0x128   :  { %v448_v62 = vpop.f32.mrb[36].mxu0 }
 0x129   :  { %v649_v6 = vpop.f32.mrb[36].mxu1  ;;  %v14031_v13 = vpop.f32.mrb[37].mxu0 }
 0x12a   :  { %v14097_v9 = vpop.f32.mrb[37].mxu1  ;;  %v16582_v19 = vadd.f32 %v649_v6, %v448_v62  ;;  %v451_v20 = vpop.f32.mrb[38].mxu0 }
 0x12b   :  { %v652_v10 = vpop.f32.mrb[38].mxu1  ;;  %v14032_v15 = vpop.f32.mrb[39].mxu0 }
 0x12c   :  { %v14098_v16 = vpop.f32.mrb[39].mxu1  ;;  %v16584_v17 = vadd.f32 %v652_v10, %v451_v20 }
 0x130   :  { %v456_v42 = vpop.f32.mrb[40].mxu0 }
 0x131   :  { %v657_v35 = vpop.f32.mrb[40].mxu1  ;;  %v14035_v22 = vpop.f32.mrb[41].mxu0 }
 0x132   :  { %v14101_v40 = vpop.f32.mrb[41].mxu1  ;;  %v16598_v45 = vadd.f32 %v657_v35, %v456_v42  ;;  %v459_v50 = vpop.f32.mrb[42].mxu0  ;;  %v15135_v42 = vld [vmem:[%s19876_s3 + $0x20] sm:$0xff]  }
 0x133   :  { %v660_v21 = vpop.f32.mrb[42].mxu1  ;;  %v14036_v51 = vpop.f32.mrb[43].mxu0  ;;  %v15134_v40 = vld [vmem:[%s19876_s3 + $0x60] sm:$0xff]  }
 0x134   :  { %v14102_v44 = vpop.f32.mrb[43].mxu1  ;;  %v16600_v28 = vadd.f32 %v660_v21, %v459_v50  ;;  %v15136_v21 = vld [vmem:[%s19876_s3 + $0xe0] sm:$0xff]   ;;  %13003 = vmatprep.subr.bf16.mxu0 %v15134_v40 }
 0x135   :  { %v15137_v22 = vld [vmem:[%s19876_s3 + $0xa0] sm:$0xff]   ;;  %13025 = vmatprep.subr.bf16.mxu1 %v15136_v21  ;;  %13004 = vmatpush3.bf16.msra.mxu0 %v15135_v42 }
 0x136   :  { %13026 = vmatpush3.bf16.msra.mxu1 %v15137_v22 }
 0x138   :  { %v464_v33 = vpop.f32.mrb[44].mxu0 }
 0x139   :  { %v665_v18 = vpop.f32.mrb[44].mxu1  ;;  %v14039_v37 = vpop.f32.mrb[45].mxu0 }
 0x13a   :  { %v14105_v29 = vpop.f32.mrb[45].mxu1  ;;  %v16602_v41 = vadd.f32 %v665_v18, %v464_v33  ;;  %v467_v43 = vpop.f32.mrb[46].mxu0 }
 0x13b   :  { %v668_v36 = vpop.f32.mrb[46].mxu1  ;;  %v14040_v46 = vpop.f32.mrb[47].mxu0 }
 0x13c   :  { %v14106_v38 = vpop.f32.mrb[47].mxu1  ;;  %v16604_v49 = vadd.f32 %v668_v36, %v467_v43  ;;  %v15139_v43 = vld [vmem:[%s19876_s3 + $0x28] sm:$0xff]  }
 0x13d   :  { %v15138_v38 = vld [vmem:[%s19876_s3 + $0x68] sm:$0xff]  }
 0x13e   :  { %v15140_v46 = vld [vmem:[%s19876_s3 + $0xe8] sm:$0xff]   ;;  %13005 = vmatprep.subr.bf16.mxu0 %v15138_v38 }
 0x13f   :  { %13027 = vmatprep.subr.bf16.mxu1 %v15140_v46  ;;  %13006 = vmatpush3.bf16.msra.mxu0 %v15139_v43 }
 0x140   :  { %v472_v61 = vpop.f32.mrb[48].mxu0  ;;  %13028 = vmatpush3.bf16.msra.mxu1 %v15141_v52 }
 0x141   :  { %v673_v58 = vpop.f32.mrb[48].mxu1  ;;  %v14043_v2 = vpop.f32.mrb[49].mxu0 }
 0x142   :  { %v14109_v59 = vpop.f32.mrb[49].mxu1  ;;  %v16618_v4 = vadd.f32 %v673_v58, %v472_v61  ;;  %v475_v6 = vpop.f32.mrb[50].mxu0  ;;  %v16653_v58 = vld [vmem:[%s19875_s2] ss:$0 sm:$0xff] }
 0x143   :  { %v676_v57 = vpop.f32.mrb[50].mxu1  ;;  %v14044_v9 = vpop.f32.mrb[51].mxu0 }
 0x144   :  { %v14110_v3 = vpop.f32.mrb[51].mxu1  ;;  %v16620_v62 = vadd.f32 %v676_v57, %v475_v6  ;;  %v15143_v6 = vld [vmem:[%s19876_s3 + $0x30] sm:$0xff]  }
 0x145   :  { %v15142_v3 = vld [vmem:[%s19876_s3 + $0x70] sm:$0xff]  }
 0x146   :  { %v15144_v9 = vld [vmem:[%s19876_s3 + $0xf0] sm:$0xff]   ;;  %13007 = vmatprep.subr.bf16.mxu0 %v15142_v3 }
 0x147   :  { %13029 = vmatprep.subr.bf16.mxu1 %v15144_v9  ;;  %13008 = vmatpush3.bf16.msra.mxu0 %v15143_v6 }
 0x148   :  { %v480_v16 = vpop.f32.mrb[52].mxu0 }
 0x149   :  { %v681_v10 = vpop.f32.mrb[52].mxu1  ;;  %v14047_v15 = vpop.f32.mrb[53].mxu0 }
 0x14a   :  { %v14113_v13 = vpop.f32.mrb[53].mxu1  ;;  %v16622_v8 = vadd.f32 %v681_v10, %v480_v16  ;;  %v483_v26 = vpop.f32.mrb[54].mxu0 }
 0x14b   :  { %v684_v20 = vpop.f32.mrb[54].mxu1  ;;  %v14048_v34 = vpop.f32.mrb[55].mxu0  ;;  %v15145_v13 = vld [vmem:[%s19876_s3 + $0xb0] sm:$0xff]  }
 0x14c   :  { %v14114_v23 = vpop.f32.mrb[55].mxu1  ;;  %v16624_v35 = vadd.f32 %v684_v20, %v483_v26  ;;  %13030 = vmatpush3.bf16.msra.mxu1 %v15145_v13 }
 0x150   :  { %v488_v51 = vpop.f32.mrb[56].mxu0 }
 0x151   :  { %v689_v44 = vpop.f32.mrb[56].mxu1  ;;  %v14051_v29 = vpop.f32.mrb[57].mxu0 }
 0x152   :  { %v14117_v50 = vpop.f32.mrb[57].mxu1  ;;  %v491_v36 = vpop.f32.mrb[58].mxu0 }
 0x153   :  { %v692_v18 = vpop.f32.mrb[58].mxu1  ;;  %v14052_v37 = vpop.f32.mrb[59].mxu0 }
 0x154   :  { %v14118_v33 = vpop.f32.mrb[59].mxu1 }
 0x158   :  { %v905_v56 = vpop.f32.mrb[60].mxu0 }
 0x159   :  { %v1391_v55 = vpop.f32.mrb[60].mxu1  ;;  %v1024_v61 = vadd.f32 %v905_v56, %v16497_v14  ;;  %v14127_v57 = vpop.f32.mrb[61].mxu0 }
 0x15a   :  { %v14193_v54 = vpop.f32.mrb[61].mxu1  ;;  %v908_v10 = vpop.f32.mrb[62].mxu0 }
 0x15b   :  { %v1394_v59 = vpop.f32.mrb[62].mxu1  ;;  %v1510_v14 = vadd.f32 %v1391_v55, %v1024_v61  ;;  %v1025_v16 = vadd.f32 %v908_v10, %v16502_v32  ;;  %v14128_v20 = vpop.f32.mrb[63].mxu0 }
 0x15c   :  { %v14194_v2 = vpop.f32.mrb[63].mxu1 }
 0x15d   :  { %v1546_v15 = vadd.f32 %v16653_v58, %v1510_v14  ;;  %v1511_v23 = vadd.f32 %v1394_v59, %v1025_v16 }
 0x15f   :  { %v1576_v34 = vmax.f32 %v1546_v15, 0.0  ;;  %v1547_v40 = vadd.f32 %v16653_v58, %v1511_v23 }
 0x160   :  { %v913_v21 = vpop.f32.mrb[64].mxu0 }
 0x161   :  { %v1399_v26 = vpop.f32.mrb[64].mxu1  ;;  %1607 = vst.msk [vmem:[#allocation2] sm:$0xff] %vm1606_vm3, %v1576_v34  ;;  %v1577_v44 = vmax.f32 %v1547_v40, 0.0  ;;  %v1026_v32 = vadd.f32 %v913_v21, %v16514_v24  ;;  %v14131_v50 = vpop.f32.mrb[65].mxu0 }
 0x162   :  { %v14197_v42 = vpop.f32.mrb[65].mxu1  ;;  %v916_v18 = vpop.f32.mrb[66].mxu0 }
 0x163   :  { %v1402_v22 = vpop.f32.mrb[66].mxu1  ;;  %1608 = vst.msk [vmem:[#allocation2 + $0x8] sm:$0xff] %vm1606_vm3, %v1577_v44  ;;  %v1512_v29 = vadd.f32 %v1399_v26, %v1026_v32  ;;  %v1027_v33 = vadd.f32 %v916_v18, %v16516_v31  ;;  %v14132_v36 = vpop.f32.mrb[67].mxu0 }
 0x164   :  { %v14198_v51 = vpop.f32.mrb[67].mxu1  ;;  %v15148_v36 = vld [vmem:[%s19876_s3 + $0x40] sm:$0xff]  }
 0x165   :  { %v1548_v37 = vadd.f32 %v16653_v58, %v1512_v29  ;;  %v1513_v38 = vadd.f32 %v1402_v22, %v1027_v33 }
 0x167   :  { %v1578_v46 = vmax.f32 %v1548_v37, 0.0  ;;  %v1549_v52 = vadd.f32 %v16653_v58, %v1513_v38 }
 0x168   :  { %v921_v54 = vpop.f32.mrb[68].mxu0 }
 0x169   :  { %v1407_v43 = vpop.f32.mrb[68].mxu1  ;;  %1609 = vst.msk [vmem:[#allocation2 + $0x10] sm:$0xff] %vm1606_vm3, %v1578_v46  ;;  %v1579_v24 = vmax.f32 %v1549_v52, 0.0  ;;  %v1028_v59 = vadd.f32 %v921_v54, %v16528_v47  ;;  %v14135_v61 = vpop.f32.mrb[69].mxu0  ;;  %v15146_v47 = vld [vmem:[%s19876_s3 + $0x78] sm:$0xff]  }
 0x16a   :  { %v14201_v55 = vpop.f32.mrb[69].mxu1  ;;  %v924_v2 = vpop.f32.mrb[70].mxu0  ;;  %v1643_v26 = vld [vmem:[#allocation2 + $0x3] ss:$2 sm:$0x3f]  ;;  %13009 = vmatprep.subr.bf16.mxu0 %v15146_v47  ;;  %v15151_v52 = vld [vmem:[%s19876_s3 + $0xb8] sm:$0xff]  }
 0x16b   :  { %v1410_v56 = vpop.f32.mrb[70].mxu1  ;;  %1610 = vst.msk [vmem:[#allocation2 + $0x18] sm:$0xff] %vm1606_vm3, %v1579_v24  ;;  %v1514_v31 = vadd.f32 %v1407_v43, %v1028_v59  ;;  %v1029_v3 = vadd.f32 %v924_v2, %v16530_v53  ;;  %v14136_v6 = vpop.f32.mrb[71].mxu0  ;;  %v15147_v53 = vld [vmem:[%s19876_s3 + $0x38] sm:$0xff]  }
 0x16c   :  { %v14202_v57 = vpop.f32.mrb[71].mxu1  ;;  %v1639_v22 = vld [vmem:[#allocation2 + $0x1] ss:$2 sm:$0x3f]  ;;  %13010 = vmatpush3.bf16.msra.mxu0 %v15147_v53 }
 0x16d   :  { %v1550_v9 = vadd.f32 %v16653_v58, %v1514_v31  ;;  %v1515_v10 = vadd.f32 %v1410_v56, %v1029_v3  ;;  %v1641_v43 = vld [vmem:[#allocation2 + $0x2] ss:$2 sm:$0x3f]  ;;  %13039 = vmatprep.subr.bf16.mxu0 %v15148_v36 }
 0x16f   :  { %v1580_v14 = vmax.f32 %v1550_v9, 0.0  ;;  %v1551_v16 = vadd.f32 %v16653_v58, %v1515_v10 }
 0x170   :  { %v929_v15 = vpop.f32.mrb[72].mxu0 }
 0x171   :  { %v1415_v13 = vpop.f32.mrb[72].mxu1  ;;  %1611 = vst.msk [vmem:[#allocation2 + $0x20] sm:$0xff] %vm1606_vm3, %v1580_v14  ;;  %v1581_v34 = vmax.f32 %v1551_v16, 0.0  ;;  %v1030_v40 = vadd.f32 %v929_v15, %v16534_v60  ;;  %v14139_v42 = vpop.f32.mrb[73].mxu0 }
 0x172   :  { %v14205_v20 = vpop.f32.mrb[73].mxu1  ;;  %v932_v44 = vpop.f32.mrb[74].mxu0  ;;  %v1651_v32 = vld [vmem:[#allocation2 + $0x13] ss:$2 sm:$0x3f] }
 0x173   :  { %v1418_v23 = vpop.f32.mrb[74].mxu1  ;;  %1612 = vst.msk [vmem:[#allocation2 + $0x28] sm:$0xff] %vm1606_vm3, %v1581_v34  ;;  %v1516_v50 = vadd.f32 %v1415_v13, %v1030_v40  ;;  %v1031_v51 = vadd.f32 %v932_v44, %v16536_v0  ;;  %v14140_v18 = vpop.f32.mrb[75].mxu0  ;;  %v14629_v29 = vpack.i.bf16 %v1643_v26, %v1651_v32  ;;  %v1647_v33 = vld [vmem:[#allocation2 + $0x11] ss:$2 sm:$0x3f] }
 0x174   :  { %v14206_v21 = vpop.f32.mrb[75].mxu1  ;;  %v14619_v60 = vpack.i.bf16 %v1639_v22, %v1647_v33  ;;  %v1649_v46 = vld [vmem:[#allocation2 + $0x12] ss:$2 sm:$0x3f] }
 0x175   :  { %v1552_v37 = vadd.f32 %v16653_v58, %v1516_v50  ;;  %v1517_v38 = vadd.f32 %v1418_v23, %v1031_v51  ;;  %14630 = vrot.lane.b32.xlu1 %v14629_v29, %s15878_s22  ;;  %v15149_v0 = vld [vmem:[%s19876_s3 + $0xf8] sm:$0xff]   ;;  %v14624_v61 = vpack.i.bf16 %v1641_v43, %v1649_v46 }
 0x176   :  { %14620 = vrot.lane.b32.xlu0 %v14619_v60, %s15879_s27  ;;  %13031 = vmatprep.subr.bf16.mxu1 %v15149_v0 }
 0x177   :  { %v1582_v54 = vmax.f32 %v1552_v37, 0.0  ;;  %v1553_v56 = vadd.f32 %v16653_v58, %v1517_v38  ;;  %13032 = vmatpush3.bf16.msra.mxu1 %v15151_v52 }
 0x178   :  { %v937_v59 = vpop.f32.mrb[76].mxu0 }
 0x179   :  { %v1423_v55 = vpop.f32.mrb[76].mxu1  ;;  %1613 = vst.msk [vmem:[#allocation2 + $0x30] sm:$0xff] %vm1606_vm3, %v1582_v54  ;;  %v1583_v2 = vmax.f32 %v1553_v56, 0.0  ;;  %v1032_v31 = vadd.f32 %v937_v59, %v16538_v7  ;;  %v14143_v3 = vpop.f32.mrb[77].mxu0 }
 0x17a   :  { %v14209_v24 = vpop.f32.mrb[77].mxu1  ;;  %14625 = vrot.lane.b32.xlu0 %v14624_v61, %s15880_s28  ;;  %v940_v9 = vpop.f32.mrb[78].mxu0  ;;  %v1655_v34 = vld [vmem:[#allocation2 + $0x21] ss:$2 sm:$0x3f] }
 0x17b   :  { %v1426_v57 = vpop.f32.mrb[78].mxu1  ;;  %1614 = vst.msk [vmem:[#allocation2 + $0x38] sm:$0xff] %vm1606_vm3, %v1583_v2  ;;  %v1033_v10 = vadd.f32 %v940_v9, %v16540_v12  ;;  %v1518_v13 = vadd.f32 %v1423_v55, %v1032_v31  ;;  %v14144_v14 = vpop.f32.mrb[79].mxu0  ;;  %v1657_v12 = vld [vmem:[#allocation2 + $0x22] ss:$2 sm:$0x3f] }
 0x17c   :  { %v14210_v6 = vpop.f32.mrb[79].mxu1  ;;  %v2080_v46 = vld [vmem:[#allocation2 + $0x21] ss:$2 sm:$0x3f] }
 0x17d   :  { %v1554_v16 = vadd.f32 %v16653_v58, %v1518_v13  ;;  %v1519_v20 = vadd.f32 %v1426_v57, %v1033_v10  ;;  %v2081_v13 = vld [vmem:[#allocation2 + $0x22] ss:$2 sm:$0x3f] }
 0x17f   :  { %v1584_v15 = vmax.f32 %v1554_v16, 0.0  ;;  %v1555_v23 = vadd.f32 %v16653_v58, %v1519_v20 }
 0x180   :  { %v945_v26 = vpop.f32.mrb[80].mxu0 }
 0x181   :  { %v1431_v47 = vpop.f32.mrb[80].mxu1  ;;  %1615 = vst.msk [vmem:[#allocation2 + $0x40] sm:$0xff] %vm1606_vm3, %v1584_v15  ;;  %v1585_v40 = vmax.f32 %v1555_v23, 0.0  ;;  %v1034_v42 = vadd.f32 %v945_v26, %v16542_v25  ;;  %v14147_v21 = vpop.f32.mrb[81].mxu0 }
 0x182   :  { %v14213_v7 = vpop.f32.mrb[81].mxu1  ;;  %v948_v44 = vpop.f32.mrb[82].mxu0  ;;  %v1663_v32 = vld [vmem:[#allocation2 + $0x31] ss:$2 sm:$0x3f] }
 0x183   :  { %v1434_v53 = vpop.f32.mrb[82].mxu1  ;;  %1616 = vst.msk [vmem:[#allocation2 + $0x48] sm:$0xff] %vm1606_vm3, %v1585_v40  ;;  %v1035_v50 = vadd.f32 %v948_v44, %v16544_v30  ;;  %v1520_v51 = vadd.f32 %v1431_v47, %v1034_v42  ;;  %v14634_v18 = vpack.i.bf16 %v1655_v34, %v1663_v32  ;;  %v1665_v29 = vld [vmem:[#allocation2 + $0x32] ss:$2 sm:$0x3f]  ;;  %v14148_v33 = vpop.f32.mrb[83].mxu0 }
 0x184   :  { %v14214_v22 = vpop.f32.mrb[83].mxu1  ;;  %v14639_v36 = vpack.i.bf16 %v1657_v12, %v1665_v29  ;;  %v1667_v60 = vld [vmem:[#allocation2 + $0x33] ss:$2 sm:$0x3f]  ;;  %v15158_v30 = vld [vmem:[%s19876_s3 + $0xc0] sm:$0xff]  }
 0x185   :  { %v1556_v37 = vadd.f32 %v16653_v58, %v1520_v51  ;;  %v1521_v38 = vadd.f32 %v1434_v53, %v1035_v50  ;;  %14635 = vrot.lane.b32.xlu1 %v14634_v18, %s15879_s27  ;;  %v1659_v25 = vld [vmem:[#allocation2 + $0x23] ss:$2 sm:$0x3f]  ;;  %v2084_v43 = vld [vmem:[#allocation2 + $0x31] ss:$2 sm:$0x3f]  ;;  %13061 = vmatprep.subr.bf16.mxu1 %v15158_v30 }
 0x186   :  { %14640 = vrot.lane.b32.xlu0 %v14639_v36, %s15880_s28  ;;  %v14644_v54 = vpack.i.bf16 %v1659_v25, %v1667_v60  ;;  %v2085_v24 = vld [vmem:[#allocation2 + $0x32] ss:$2 sm:$0x3f]  ;;  %v14649_v61 = vpack.i.bf16 %v2080_v46, %v2084_v43  ;;  %v2086_v2 = vld [vmem:[#allocation2 + $0x33] ss:$2 sm:$0x3f] }
 0x187   :  { %v1586_v52 = vmax.f32 %v1556_v37, 0.0  ;;  %v1557_v55 = vadd.f32 %v16653_v58, %v1521_v38  ;;  %v14654_v20 = vpack.i.bf16 %v2081_v13, %v2085_v24  ;;  %v2082_v47 = vld [vmem:[#allocation2 + $0x23] ss:$2 sm:$0x3f] }
 0x188   :  { %v953_v59 = vpop.f32.mrb[84].mxu0  ;;  %v14659_v23 = vpack.i.bf16 %v2082_v47, %v2086_v2 }
 0x189   :  { %v1439_v0 = vpop.f32.mrb[84].mxu1  ;;  %1617 = vst.msk [vmem:[#allocation2 + $0x50] sm:$0xff] %vm1606_vm3, %v1586_v52  ;;  %v1587_v31 = vmax.f32 %v1557_v55, 0.0  ;;  %v1036_v3 = vadd.f32 %v953_v59, %v16552_v11  ;;  %v14151_v6 = vpop.f32.mrb[85].mxu0  ;;  %14645 = vrot.lane.b32.xlu1 %v14644_v54, %s15878_s22 }
 0x18a   :  { %v14217_v56 = vpop.f32.mrb[85].mxu1  ;;  %14650 = vrot.lane.b32.xlu0 %v14649_v61, %s15879_s27  ;;  %v956_v10 = vpop.f32.mrb[86].mxu0  ;;  %v2092_v32 = vld [vmem:[#allocation2 + $0x42] ss:$2 sm:$0x3f] }
 0x18b   :  { %v1442_v57 = vpop.f32.mrb[86].mxu1  ;;  %1618 = vst.msk [vmem:[#allocation2 + $0x58] sm:$0xff] %vm1606_vm3, %v1587_v31  ;;  %v1037_v14 = vadd.f32 %v956_v10, %v16560_v27  ;;  %v1522_v16 = vadd.f32 %v1439_v0, %v1036_v3  ;;  %v14152_v15 = vpop.f32.mrb[87].mxu0  ;;  %v2090_v27 = vld [vmem:[#allocation2 + $0x41] ss:$2 sm:$0x3f] }
 0x18c   :  { %v14218_v9 = vpop.f32.mrb[87].mxu1  ;;  %v2506_v30 = vld [vmem:[#allocation2 + $0x41] ss:$2 sm:$0x3f] }
 0x18d   :  { %v1558_v7 = vadd.f32 %v16653_v58, %v1522_v16  ;;  %v1523_v11 = vadd.f32 %v1442_v57, %v1037_v14  ;;  %14655 = vrot.lane.b32.xlu1 %v14654_v20, %s15880_s28  ;;  %v2507_v13 = vld [vmem:[#allocation2 + $0x42] ss:$2 sm:$0x3f]  ;;  %v2508_v47 = vld [vmem:[#allocation2 + $0x43] ss:$2 sm:$0x3f] }
 0x18e   :  { %14660 = vrot.lane.b32.xlu0 %v14659_v23, %s15878_s22 }
 0x18f   :  { %v1588_v53 = vmax.f32 %v1558_v7, 0.0  ;;  %v1559_v34 = vadd.f32 %v16653_v58, %v1523_v11 }
 0x190   :  { %v961_v42 = vpop.f32.mrb[88].mxu0 }
 0x191   :  { %v1447_v26 = vpop.f32.mrb[88].mxu1  ;;  %1619 = vst.msk [vmem:[#allocation2 + $0x60] sm:$0xff] %vm1606_vm3, %v1588_v53  ;;  %v1589_v12 = vmax.f32 %v1559_v34, 0.0  ;;  %v1038_v22 = vadd.f32 %v961_v42, %v16562_v39  ;;  %v14155_v44 = vpop.f32.mrb[89].mxu0 }
 0x192   :  { %v14221_v40 = vpop.f32.mrb[89].mxu1  ;;  %v964_v51 = vpop.f32.mrb[90].mxu0  ;;  %v2098_v18 = vld [vmem:[#allocation2 + $0x51] ss:$2 sm:$0x3f] }
 0x193   :  { %v1450_v21 = vpop.f32.mrb[90].mxu1  ;;  %1620 = vst.msk [vmem:[#allocation2 + $0x68] sm:$0xff] %vm1606_vm3, %v1589_v12  ;;  %v1039_v29 = vadd.f32 %v964_v51, %v16564_v48  ;;  %v1524_v33 = vadd.f32 %v1447_v26, %v1038_v22  ;;  %v14664_v36 = vpack.i.bf16 %v2090_v27, %v2098_v18  ;;  %v2100_v60 = vld [vmem:[#allocation2 + $0x52] ss:$2 sm:$0x3f]  ;;  %v14156_v37 = vpop.f32.mrb[91].mxu0 }
 0x194   :  { %v14222_v50 = vpop.f32.mrb[91].mxu1  ;;  %v14669_v38 = vpack.i.bf16 %v2092_v32, %v2100_v60  ;;  %v2102_v25 = vld [vmem:[#allocation2 + $0x53] ss:$2 sm:$0x3f] }
 0x195   :  { %v1560_v43 = vadd.f32 %v16653_v58, %v1524_v33  ;;  %v1525_v46 = vadd.f32 %v1450_v21, %v1039_v29  ;;  %14665 = vrot.lane.b32.xlu1 %v14664_v36, %s15879_s27  ;;  %v2094_v39 = vld [vmem:[#allocation2 + $0x43] ss:$2 sm:$0x3f]  ;;  %v2510_v0 = vld [vmem:[#allocation2 + $0x51] ss:$2 sm:$0x3f] }
 0x196   :  { %14670 = vrot.lane.b32.xlu0 %v14669_v38, %s15880_s28  ;;  %v14674_v54 = vpack.i.bf16 %v2094_v39, %v2102_v25  ;;  %v2511_v24 = vld [vmem:[#allocation2 + $0x52] ss:$2 sm:$0x3f]  ;;  %v14679_v61 = vpack.i.bf16 %v2506_v30, %v2510_v0  ;;  %v2512_v2 = vld [vmem:[#allocation2 + $0x53] ss:$2 sm:$0x3f] }
 0x197   :  { %v1590_v55 = vmax.f32 %v1560_v43, 0.0  ;;  %v1561_v48 = vadd.f32 %v16653_v58, %v1525_v46  ;;  %v14684_v20 = vpack.i.bf16 %v2507_v13, %v2511_v24  ;;  %v14689_v23 = vpack.i.bf16 %v2508_v47, %v2512_v2 }
 0x198   :  { %v969_v59 = vpop.f32.mrb[92].mxu0 }
 0x199   :  { %v1455_v52 = vpop.f32.mrb[92].mxu1  ;;  %1621 = vst.msk [vmem:[#allocation2 + $0x70] sm:$0xff] %vm1606_vm3, %v1590_v55  ;;  %v1591_v31 = vmax.f32 %v1561_v48, 0.0  ;;  %v1040_v3 = vadd.f32 %v969_v59, %v16575_v63  ;;  %v14159_v6 = vpop.f32.mrb[93].mxu0  ;;  %14675 = vrot.lane.b32.xlu1 %v14674_v54, %s15878_s22 }
 0x19a   :  { %v14225_v56 = vpop.f32.mrb[93].mxu1  ;;  %14680 = vrot.lane.b32.xlu0 %v14679_v61, %s15879_s27  ;;  %v972_v10 = vpop.f32.mrb[94].mxu0  ;;  %v2518_v22 = vld [vmem:[#allocation2 + $0x62] ss:$2 sm:$0x3f] }
 0x19b   :  { %v1458_v57 = vpop.f32.mrb[94].mxu1  ;;  %1622 = vst.msk [vmem:[#allocation2 + $0x78] sm:$0xff] %vm1606_vm3, %v1591_v31  ;;  %v1041_v14 = vadd.f32 %v972_v10, %v16580_v5  ;;  %v1526_v16 = vadd.f32 %v1455_v52, %v1040_v3  ;;  %v14160_v15 = vpop.f32.mrb[95].mxu0  ;;  %v2516_v5 = vld [vmem:[#allocation2 + $0x61] ss:$2 sm:$0x3f] }
 0x19c   :  { %v14226_v9 = vpop.f32.mrb[95].mxu1  ;;  %v2932_v46 = vld [vmem:[#allocation2 + $0x61] ss:$2 sm:$0x3f] }
 0x19d   :  { %v1562_v7 = vadd.f32 %v16653_v58, %v1526_v16  ;;  %v1527_v63 = vadd.f32 %v1458_v57, %v1041_v14  ;;  %14685 = vrot.lane.b32.xlu1 %v14684_v20, %s15880_s28  ;;  %v2933_v3 = vld [vmem:[#allocation2 + $0x62] ss:$2 sm:$0x3f]  ;;  %v2934_v13 = vld [vmem:[#allocation2 + $0x63] ss:$2 sm:$0x3f] }
 0x19e   :  { %14690 = vrot.lane.b32.xlu0 %v14689_v23, %s15878_s22 }
 0x19f   :  { %v1592_v26 = vmax.f32 %v1562_v7, 0.0  ;;  %v1563_v53 = vadd.f32 %v16653_v58, %v1527_v63 }
 0x1a0   :  { %v977_v40 = vpop.f32.mrb[96].mxu0 }
 0x1a1   :  { %v1463_v11 = vpop.f32.mrb[96].mxu1  ;;  %1623 = vst.msk [vmem:[#allocation2 + $0x80] sm:$0xff] %vm1606_vm3, %v1592_v26  ;;  %v1593_v21 = vmax.f32 %v1563_v53, 0.0  ;;  %v1042_v27 = vadd.f32 %v977_v40, %v16582_v19  ;;  %v14163_v12 = vpop.f32.mrb[97].mxu0 }
 0x1a2   :  { %v14229_v34 = vpop.f32.mrb[97].mxu1  ;;  %v980_v32 = vpop.f32.mrb[98].mxu0  ;;  %v2524_v50 = vld [vmem:[#allocation2 + $0x71] ss:$2 sm:$0x3f] }
 0x1a3   :  { %v1466_v42 = vpop.f32.mrb[98].mxu1  ;;  %1624 = vst.msk [vmem:[#allocation2 + $0x88] sm:$0xff] %vm1606_vm3, %v1593_v21  ;;  %v1043_v51 = vadd.f32 %v980_v32, %v16584_v17  ;;  %v1528_v18 = vadd.f32 %v1463_v11, %v1042_v27  ;;  %v14694_v29 = vpack.i.bf16 %v2516_v5, %v2524_v50  ;;  %v2526_v33 = vld [vmem:[#allocation2 + $0x72] ss:$2 sm:$0x3f]  ;;  %v14164_v36 = vpop.f32.mrb[99].mxu0 }
 0x1a4   :  { %v14230_v44 = vpop.f32.mrb[99].mxu1  ;;  %v14699_v60 = vpack.i.bf16 %v2518_v22, %v2526_v33  ;;  %v2528_v37 = vld [vmem:[#allocation2 + $0x73] ss:$2 sm:$0x3f] }
 0x1a5   :  { %v1564_v38 = vadd.f32 %v16653_v58, %v1528_v18  ;;  %v1529_v25 = vadd.f32 %v1466_v42, %v1043_v51  ;;  %14695 = vrot.lane.b32.xlu1 %v14694_v29, %s15879_s27  ;;  %v2520_v19 = vld [vmem:[#allocation2 + $0x63] ss:$2 sm:$0x3f]  ;;  %v2936_v43 = vld [vmem:[#allocation2 + $0x71] ss:$2 sm:$0x3f] }
 0x1a6   :  { %14700 = vrot.lane.b32.xlu0 %v14699_v60, %s15880_s28  ;;  %v14704_v30 = vpack.i.bf16 %v2520_v19, %v2528_v37  ;;  %v2937_v55 = vld [vmem:[#allocation2 + $0x72] ss:$2 sm:$0x3f]  ;;  %v14709_v54 = vpack.i.bf16 %v2932_v46, %v2936_v43  ;;  %v2938_v24 = vld [vmem:[#allocation2 + $0x73] ss:$2 sm:$0x3f] }
 0x1a7   :  { %v1594_v0 = vmax.f32 %v1564_v38, 0.0  ;;  %v1565_v17 = vadd.f32 %v16653_v58, %v1529_v25  ;;  %v14714_v10 = vpack.i.bf16 %v2933_v3, %v2937_v55  ;;  %v14719_v16 = vpack.i.bf16 %v2934_v13, %v2938_v24 }
 0x1a8   :  { %v985_v48 = vpop.f32.mrb[100].mxu0 }
 0x1a9   :  { %v1471_v39 = vpop.f32.mrb[100].mxu1  ;;  %1625 = vst.msk [vmem:[#allocation2 + $0x90] sm:$0xff] %vm1606_vm3, %v1594_v0  ;;  %v1595_v59 = vmax.f32 %v1565_v17, 0.0  ;;  %v1044_v61 = vadd.f32 %v985_v48, %v16598_v45  ;;  %v14167_v57 = vpop.f32.mrb[101].mxu0  ;;  %14705 = vrot.lane.b32.xlu1 %v14704_v30, %s15878_s22 }
 0x1aa   :  { %v14233_v52 = vpop.f32.mrb[101].mxu1  ;;  %14710 = vrot.lane.b32.xlu0 %v14709_v54, %s15879_s27  ;;  %v988_v31 = vpop.f32.mrb[102].mxu0  ;;  %v2944_v40 = vld [vmem:[#allocation2 + $0x82] ss:$2 sm:$0x3f] }
 0x1ab   :  { %v1474_v56 = vpop.f32.mrb[102].mxu1  ;;  %1626 = vst.msk [vmem:[#allocation2 + $0x98] sm:$0xff] %vm1606_vm3, %v1595_v59  ;;  %v1045_v6 = vadd.f32 %v988_v31, %v16600_v28  ;;  %v1530_v9 = vadd.f32 %v1471_v39, %v1044_v61  ;;  %v14168_v14 = vpop.f32.mrb[103].mxu0  ;;  %v2942_v28 = vld [vmem:[#allocation2 + $0x81] ss:$2 sm:$0x3f] }
 0x1ac   :  { %v14234_v2 = vpop.f32.mrb[103].mxu1  ;;  %v3358_v36 = vld [vmem:[#allocation2 + $0x81] ss:$2 sm:$0x3f] }
 0x1ad   :  { %v1566_v20 = vadd.f32 %v16653_v58, %v1530_v9  ;;  %v1531_v45 = vadd.f32 %v1474_v56, %v1045_v6  ;;  %14715 = vrot.lane.b32.xlu1 %v14714_v10, %s15880_s28  ;;  %v3359_v54 = vld [vmem:[#allocation2 + $0x82] ss:$2 sm:$0x3f]  ;;  %v3360_v61 = vld [vmem:[#allocation2 + $0x83] ss:$2 sm:$0x3f] }
 0x1ae   :  { %14720 = vrot.lane.b32.xlu0 %v14719_v16, %s15878_s22 }
 0x1af   :  { %v1596_v15 = vmax.f32 %v1566_v20, 0.0  ;;  %v1567_v23 = vadd.f32 %v16653_v58, %v1531_v45 }
 0x1b0   :  { %v993_v63 = vpop.f32.mrb[104].mxu0 }
 0x1b1   :  { %v1479_v47 = vpop.f32.mrb[104].mxu1  ;;  %1627 = vst.msk [vmem:[#allocation2 + $0xa0] sm:$0xff] %vm1606_vm3, %v1596_v15  ;;  %v1597_v26 = vmax.f32 %v1567_v23, 0.0  ;;  %v1046_v53 = vadd.f32 %v993_v63, %v16602_v41  ;;  %v14171_v34 = vpop.f32.mrb[105].mxu0 }
 0x1b2   :  { %v14237_v7 = vpop.f32.mrb[105].mxu1  ;;  %v996_v5 = vpop.f32.mrb[106].mxu0  ;;  %v2950_v21 = vld [vmem:[#allocation2 + $0x91] ss:$2 sm:$0x3f] }
 0x1b3   :  { %v1482_v11 = vpop.f32.mrb[106].mxu1  ;;  %1628 = vst.msk [vmem:[#allocation2 + $0xa8] sm:$0xff] %vm1606_vm3, %v1597_v26  ;;  %v1047_v27 = vadd.f32 %v996_v5, %v16604_v49  ;;  %v1532_v12 = vadd.f32 %v1479_v47, %v1046_v53  ;;  %v14724_v22 = vpack.i.bf16 %v2942_v28, %v2950_v21  ;;  %v2952_v44 = vld [vmem:[#allocation2 + $0x92] ss:$2 sm:$0x3f]  ;;  %v14172_v32 = vpop.f32.mrb[107].mxu0 }
 0x1b4   :  { %v14238_v42 = vpop.f32.mrb[107].mxu1  ;;  %v14729_v50 = vpack.i.bf16 %v2944_v40, %v2952_v44  ;;  %v2954_v51 = vld [vmem:[#allocation2 + $0x93] ss:$2 sm:$0x3f] }
 0x1b5   :  { %v1568_v18 = vadd.f32 %v16653_v58, %v1532_v12  ;;  %v1533_v29 = vadd.f32 %v1482_v11, %v1047_v27  ;;  %14725 = vrot.lane.b32.xlu1 %v14724_v22, %s15879_s27  ;;  %v2946_v41 = vld [vmem:[#allocation2 + $0x83] ss:$2 sm:$0x3f]  ;;  %v3362_v33 = vld [vmem:[#allocation2 + $0x91] ss:$2 sm:$0x3f] }
 0x1b6   :  { %14730 = vrot.lane.b32.xlu0 %v14729_v50, %s15880_s28  ;;  %v14734_v38 = vpack.i.bf16 %v2946_v41, %v2954_v51  ;;  %v3363_v19 = vld [vmem:[#allocation2 + $0x92] ss:$2 sm:$0x3f]  ;;  %v14739_v46 = vpack.i.bf16 %v3358_v36, %v3362_v33  ;;  %v3364_v0 = vld [vmem:[#allocation2 + $0x93] ss:$2 sm:$0x3f] }
 0x1b7   :  { %v1598_v37 = vmax.f32 %v1568_v18, 0.0  ;;  %v1569_v49 = vadd.f32 %v16653_v58, %v1533_v29  ;;  %v14744_v59 = vpack.i.bf16 %v3359_v54, %v3363_v19  ;;  %v14749_v2 = vpack.i.bf16 %v3360_v61, %v3364_v0  ;;  %v1637_v61 = vld [vmem:[#allocation2] ss:$2 sm:$0x3f] }
 0x1b8   :  { %v1001_v43 = vpop.f32.mrb[108].mxu0 }
 0x1b9   :  { %v1487_v60 = vpop.f32.mrb[108].mxu1  ;;  %1629 = vst.msk [vmem:[#allocation2 + $0xb0] sm:$0xff] %vm1606_vm3, %v1598_v37  ;;  %v1599_v17 = vmax.f32 %v1569_v49, 0.0  ;;  %v1048_v30 = vadd.f32 %v1001_v43, %v16618_v4  ;;  %v14175_v52 = vpop.f32.mrb[109].mxu0  ;;  %14735 = vrot.lane.b32.xlu1 %v14734_v38, %s15878_s22 }
 0x1ba   :  { %v14241_v25 = vpop.f32.mrb[109].mxu1  ;;  %14740 = vrot.lane.b32.xlu0 %v14739_v46, %s15879_s27  ;;  %v1004_v48 = vpop.f32.mrb[110].mxu0  ;;  %v3370_v47 = vld [vmem:[#allocation2 + $0xa2] ss:$2 sm:$0x3f] }
 0x1bb   :  { %v1490_v39 = vpop.f32.mrb[110].mxu1  ;;  %1630 = vst.msk [vmem:[#allocation2 + $0xb8] sm:$0xff] %vm1606_vm3, %v1599_v17  ;;  %v1049_v56 = vadd.f32 %v1004_v48, %v16620_v62  ;;  %v1534_v24 = vadd.f32 %v1487_v60, %v1048_v30  ;;  %v14176_v57 = vpop.f32.mrb[111].mxu0  ;;  %v3368_v62 = vld [vmem:[#allocation2 + $0xa1] ss:$2 sm:$0x3f] }
 0x1bc   :  { %v14242_v55 = vpop.f32.mrb[111].mxu1  ;;  %v3784_v27 = vld [vmem:[#allocation2 + $0xa1] ss:$2 sm:$0x3f] }
 0x1bd   :  { %v1570_v31 = vadd.f32 %v16653_v58, %v1534_v24  ;;  %v1535_v4 = vadd.f32 %v1490_v39, %v1049_v56  ;;  %14745 = vrot.lane.b32.xlu1 %v14744_v59, %s15880_s28  ;;  %v3785_v49 = vld [vmem:[#allocation2 + $0xa2] ss:$2 sm:$0x3f]  ;;  %v3786_v38 = vld [vmem:[#allocation2 + $0xa3] ss:$2 sm:$0x3f] }
 0x1be   :  { %14750 = vrot.lane.b32.xlu0 %v14749_v2, %s15878_s22  ;;  %v1645_v2 = vld [vmem:[#allocation2 + $0x10] ss:$2 sm:$0x3f] }
 0x1bf   :  { %v1600_v6 = vmax.f32 %v1570_v31, 0.0  ;;  %v1571_v9 = vadd.f32 %v16653_v58, %v1535_v4 }
 0x1c0   :  { %v1009_v13 = vpop.f32.mrb[112].mxu0 }
 0x1c1   :  { %v1495_v3 = vpop.f32.mrb[112].mxu1  ;;  %1631 = vst.msk [vmem:[#allocation2 + $0xc0] sm:$0xff] %vm1606_vm3, %v1600_v6  ;;  %v1601_v16 = vmax.f32 %v1571_v9, 0.0  ;;  %v1050_v20 = vadd.f32 %v1009_v13, %v16622_v8  ;;  %v14179_v45 = vpop.f32.mrb[113].mxu0 }
 0x1c2   :  { %v14245_v10 = vpop.f32.mrb[113].mxu1  ;;  %v1012_v23 = vpop.f32.mrb[114].mxu0  ;;  %v3376_v7 = vld [vmem:[#allocation2 + $0xb1] ss:$2 sm:$0x3f] }
 0x1c3   :  { %v1498_v14 = vpop.f32.mrb[114].mxu1  ;;  %1632 = vst.msk [vmem:[#allocation2 + $0xc8] sm:$0xff] %vm1606_vm3, %v1601_v16  ;;  %v1051_v63 = vadd.f32 %v1012_v23, %v16624_v35  ;;  %v1536_v11 = vadd.f32 %v1495_v3, %v1050_v20  ;;  %v14754_v28 = vpack.i.bf16 %v3368_v62, %v3376_v7  ;;  %v3378_v26 = vld [vmem:[#allocation2 + $0xb2] ss:$2 sm:$0x3f]  ;;  %v14180_v53 = vpop.f32.mrb[115].mxu0 }
 0x1c4   :  { %v14246_v15 = vpop.f32.mrb[115].mxu1  ;;  %v14759_v34 = vpack.i.bf16 %v3370_v47, %v3378_v26  ;;  %v3380_v40 = vld [vmem:[#allocation2 + $0xb3] ss:$2 sm:$0x3f]  ;;  %v15150_v62 = vld [vmem:[%s19876_s3] sm:$0xff]   ;;  %v15153_v23 = vld [vmem:[%s19876_s3 + $0x8] sm:$0xff]  }
 0x1c5   :  { %v1572_v42 = vadd.f32 %v16653_v58, %v1536_v11  ;;  %v1537_v5 = vadd.f32 %v1498_v14, %v1051_v63  ;;  %14755 = vrot.lane.b32.xlu1 %v14754_v28, %s15879_s27  ;;  %v3372_v8 = vld [vmem:[#allocation2 + $0xa3] ss:$2 sm:$0x3f]  ;;  %v3788_v21 = vld [vmem:[#allocation2 + $0xb1] ss:$2 sm:$0x3f] }
 0x1c6   :  { %14760 = vrot.lane.b32.xlu0 %v14759_v34, %s15880_s28  ;;  %v14764_v44 = vpack.i.bf16 %v3372_v8, %v3380_v40  ;;  %v3789_v50 = vld [vmem:[#allocation2 + $0xb2] ss:$2 sm:$0x3f]  ;;  %v14769_v18 = vpack.i.bf16 %v3784_v27, %v3788_v21  ;;  %v3790_v41 = vld [vmem:[#allocation2 + $0xb3] ss:$2 sm:$0x3f] }
 0x1c7   :  { %v1602_v22 = vmax.f32 %v1572_v42, 0.0  ;;  %v1573_v35 = vadd.f32 %v16653_v58, %v1537_v5  ;;  %v14774_v58 = vpack.i.bf16 %v3785_v49, %v3789_v50  ;;  %v14779_v25 = vpack.i.bf16 %v3786_v38, %v3790_v41  ;;  %v15152_v15 = vld [vmem:[%s19876_s3 + $0x48] sm:$0xff]   ;;  %v15154_v7 = vld [vmem:[%s19876_s3 + $0x50] sm:$0xff]   ;;  %v15156_v8 = vld [vmem:[%s19876_s3 + $0x58] sm:$0xff]  }
 0x1c8   :  { %v1017_v51 = vpop.f32.mrb[116].mxu0  ;;  %v1653_v63 = vld [vmem:[#allocation2 + $0x20] ss:$2 sm:$0x3f]  ;;  %v15155_v28 = vld [vmem:[%s19876_s3 + $0x10] sm:$0xff]  }
 0x1c9   :  { %v1503_v12 = vpop.f32.mrb[116].mxu1  ;;  %1633 = vst.msk [vmem:[#allocation2 + $0xd0] sm:$0xff] %vm1606_vm3, %v1602_v22  ;;  %v1603_v33 = vmax.f32 %v1573_v35, 0.0  ;;  %v14183_v36 = vpop.f32.mrb[117].mxu0  ;;  %14765 = vrot.lane.b32.xlu1 %v14764_v44, %s15878_s22  ;;  %v15157_v22 = vld [vmem:[%s19876_s3 + $0x18] sm:$0xff]   ;;  %v15160_v41 = vld [vmem:[%s19876_s3 + $0x80] sm:$0xff]  }
 0x1ca   :  { %v14249_v32 = vpop.f32.mrb[117].mxu1  ;;  %14770 = vrot.lane.b32.xlu0 %v14769_v18, %s15879_s27  ;;  %v1020_v37 = vpop.f32.mrb[118].mxu0  ;;  %v3794_v43 = vld [vmem:[#allocation2 + $0xc1] ss:$2 sm:$0x3f] }
 0x1cb   :  { %v1506_v29 = vpop.f32.mrb[118].mxu1  ;;  %1634 = vst.msk [vmem:[#allocation2 + $0xd8] sm:$0xff] %vm1606_vm3, %v1603_v33  ;;  %v14184_v19 = vpop.f32.mrb[119].mxu0  ;;  %v3796_v46 = vld [vmem:[#allocation2 + $0xc2] ss:$2 sm:$0x3f] }
 0x1cc   :  { %v14250_v60 = vpop.f32.mrb[119].mxu1  ;;  %v3798_v55 = vld [vmem:[#allocation2 + $0xc3] ss:$2 sm:$0x3f] }
 0x1cd   :  { %14775 = vrot.lane.b32.xlu1 %v14774_v58, %s15880_s28  ;;  %v1661_v40 = vld [vmem:[#allocation2 + $0x30] ss:$2 sm:$0x3f]  ;;  %v15159_v29 = vld [vmem:[%s19876_s3 + $0x60] sm:$0xff]  }
 0x1ce   :  { %14780 = vrot.lane.b32.xlu0 %v14779_v25, %s15878_s22  ;;  %v2083_v36 = vld [vmem:[#allocation2 + $0x30] ss:$2 sm:$0x3f]  ;;  %v15161_v38 = vld [vmem:[%s19876_s3 + $0x20] sm:$0xff]   ;;  %v15162_v25 = vld [vmem:[%s19876_s3 + $0xc8] sm:$0xff]  }
 0x1d2   :  { %v3802_v39 = vld [vmem:[#allocation2 + $0xd1] ss:$2 sm:$0x3f]  ;;  %v3804_v0 = vld [vmem:[#allocation2 + $0xd2] ss:$2 sm:$0x3f] }
 0x1d3   :  { %v14784_v17 = vpack.i.bf16 %v3794_v43, %v3802_v39  ;;  %v14789_v30 = vpack.i.bf16 %v3796_v46, %v3804_v0  ;;  %v3806_v52 = vld [vmem:[#allocation2 + $0xd3] ss:$2 sm:$0x3f] }
 0x1d4   :  { %v14794_v48 = vpack.i.bf16 %v3798_v55, %v3806_v52  ;;  %v15166_v55 = vld [vmem:[%s19876_s3 + $0xd0] sm:$0xff]  }
 0x1d5   :  { %14785 = vrot.lane.b32.xlu1 %v14784_v17, %s15879_s27  ;;  %14790 = vrot.lane.b32.xlu0 %v14789_v30, %s15880_s28  ;;  %v15163_v17 = vld [vmem:[%s19876_s3 + $0x68] sm:$0xff]  }
 0x1d6   :  { %v15164_v30 = vld [vmem:[%s19876_s3 + $0x88] sm:$0xff]  }
 0x1d9   :  { %14795 = vrot.lane.b32.xlu1 %v14794_v48, %s15878_s22 }
 0x1e7   :  { %v14631_v59 = vpop.permute.xlu1 %14630 }
 0x1e8   :  { %v14621_v54 = vpop.permute.xlu0 %14620  ;;  %v14633_v3 = vunpack.i.h.bf16 %v14631_v59  ;;  %v14632_v6 = vunpack.i.l.bf16 %v14631_v59 }
 0x1e9   :  { %v14623_v56 = vunpack.i.h.bf16 %v14621_v54  ;;  %v14622_v24 = vunpack.i.l.bf16 %v14621_v54  ;;  %v15165_v54 = vld [vmem:[%s19876_s3 + $0x28] sm:$0xff]  }
 0x1eb   :  { %v1716_v9 = vsel %vm1606_vm3, %v1637_v61, %v14623_v56  ;;  %v1721_v10 = vsel %vm1606_vm3, %v1645_v2, %v14622_v24  ;;  %v15167_v56 = vld [vmem:[%s19876_s3 + $0x70] sm:$0xff]   ;;  %v15170_v2 = vld [vmem:[%s19876_s3 + $0xd8] sm:$0xff]  }
 0x1ec   :  { %v14626_v57 = vpop.permute.xlu0 %14625  ;;  %v15168_v24 = vld [vmem:[%s19876_s3 + $0x90] sm:$0xff]  }
 0x1ed   :  { %v14628_v31 = vunpack.i.h.bf16 %v14626_v57  ;;  %v14627_v4 = vunpack.i.l.bf16 %v14626_v57  ;;  %v15169_v57 = vld [vmem:[%s19876_s3 + $0x30] sm:$0xff]  }
 0x1ef   :  { %v1718_v13 = vsel %vm1717_vm4, %v1716_v9, %v14628_v31  ;;  %v1722_v14 = vsel %vm1717_vm4, %v1721_v10, %v14627_v4  ;;  %v2079_v31 = vld [vmem:[#allocation2 + $0x20] ss:$2 sm:$0x3f]  ;;  %v2096_v9 = vld [vmem:[#allocation2 + $0x50] ss:$2 sm:$0x3f] }
 0x1f0   :  { %v1720_v16 = vsel %vm1719_vm5, %v1718_v13, %v14633_v3  ;;  %v1723_v20 = vsel %vm1719_vm5, %v1722_v14, %v14632_v6  ;;  %v15171_v13 = vld [vmem:[%s19876_s3 + $0x78] sm:$0xff]  }
 0x1f1   :  { %v1730_v45 = vpack.c.bf16 %v1720_v16, %v1720_v16  ;;  %v1731_v47 = vpack.c.bf16 %v1723_v20, %v1723_v20 }
 0x1f3   :  { %2028 = vmatprep.mubr.bf16.mxu0 %v1731_v47  ;;  %v15174_v47 = vld [vmem:[%s19876_s3 + $0xe0] sm:$0xff]  }
 0x1f4   :  { %2029 = vmatmul.mubr.bf16.vlgmr.msra.gmra.mrb[120].mxu0 %v1730_v45 }
 0x1f5   :  { %13040 = vmatpush3.bf16.msra.mxu0 %v15150_v62  ;;  %v15172_v62 = vld [vmem:[%s19876_s3 + $0x98] sm:$0xff]  }
 0x1f6   :  { %13041 = vmatprep.subr.bf16.mxu0 %v15152_v15 }
 0x1f7   :  { %v14636_v11 = vpop.permute.xlu1 %14635 }
 0x1f8   :  { %v14638_v26 = vunpack.i.h.bf16 %v14636_v11  ;;  %v14637_v53 = vunpack.i.l.bf16 %v14636_v11  ;;  %v14641_v34 = vpop.permute.xlu0 %14640 }
 0x1f9   :  { %v14643_v42 = vunpack.i.h.bf16 %v14641_v34  ;;  %v14642_v5 = vunpack.i.l.bf16 %v14641_v34  ;;  %13042 = vmatpush3.bf16.msra.mxu0 %v15153_v23 }
 0x1fa   :  { %v1724_v21 = vsel %vm1606_vm3, %v1653_v63, %v14638_v26  ;;  %v1727_v27 = vsel %vm1606_vm3, %v1661_v40, %v14637_v53  ;;  %13043 = vmatprep.subr.bf16.mxu0 %v15154_v7  ;;  %v15175_v26 = vld [vmem:[%s19876_s3 + $0xa0] sm:$0xff]   ;;  %v2509_v53 = vld [vmem:[#allocation2 + $0x50] ss:$2 sm:$0x3f] }
 0x1fb   :  { %v14646_v12 = vpop.permute.xlu1 %14645  ;;  %v1725_v50 = vsel %vm1717_vm4, %v1724_v21, %v14643_v42  ;;  %v1728_v51 = vsel %vm1717_vm4, %v1727_v27, %v14642_v5  ;;  %v15176_v40 = vld [vmem:[%s19876_s3 + $0x40] sm:$0xff]   ;;  %v15178_v27 = vld [vmem:[%s19876_s3 + $0xe8] sm:$0xff]  }
 0x1fc   :  { %v14648_v35 = vunpack.i.h.bf16 %v14646_v12  ;;  %v14647_v44 = vunpack.i.l.bf16 %v14646_v12  ;;  %v14651_v32 = vpop.permute.xlu0 %14650  ;;  %v15177_v21 = vld [vmem:[%s19876_s3] sm:$0xff]  }
 0x1fd   :  { %v14652_v18 = vunpack.i.l.bf16 %v14651_v32  ;;  %13044 = vmatpush3.bf16.msra.mxu0 %v15155_v28  ;;  %v14653_v59 = vunpack.i.h.bf16 %v14651_v32  ;;  %v15173_v28 = vld [vmem:[%s19876_s3 + $0x38] sm:$0xff]   ;;  %v15179_v32 = vld [vmem:[%s19876_s3 + $0xa8] sm:$0xff]  }
 0x1fe   :  { %v1726_v33 = vsel %vm1719_vm5, %v1725_v50, %v14648_v35  ;;  %13045 = vmatprep.subr.bf16.mxu0 %v15156_v8  ;;  %v1729_v60 = vsel %vm1719_vm5, %v1728_v51, %v14647_v44  ;;  %v15180_v50 = vld [vmem:[%s19876_s3 + $0x48] sm:$0xff]  }
 0x1ff   :  { %v1732_v37 = vpack.c.bf16 %v1726_v33, %v1726_v33  ;;  %v14656_v49 = vpop.permute.xlu1 %14655  ;;  %v1733_v58 = vpack.c.bf16 %v1729_v60, %v1729_v60  ;;  %v2154_v46 = vsel %vm1606_vm3, %v2083_v36, %v14652_v18  ;;  %v2151_v16 = vsel %vm1606_vm3, %v2079_v31, %v14653_v59  ;;  %v15181_v33 = vld [vmem:[%s19876_s3 + $0x8] sm:$0xff]   ;;  %v15182_v36 = vld [vmem:[%s19876_s3 + $0xf0] sm:$0xff]   ;;  %v15190_v59 = vld [vmem:[%s19876_s3 + $0xc0] sm:$0xff]  }
 0x200   :  { %v14657_v19 = vunpack.i.l.bf16 %v14656_v49  ;;  %v14661_v43 = vpop.permute.xlu0 %14660  ;;  %v14658_v4 = vunpack.i.h.bf16 %v14656_v49  ;;  %v15184_v60 = vld [vmem:[%s19876_s3 + $0x50] sm:$0xff]  }
 0x201   :  { %v14662_v39 = vunpack.i.l.bf16 %v14661_v43  ;;  %13046 = vmatpush3.bf16.msra.mxu0 %v15157_v22  ;;  %2068 = vmatprep.mubr.bf16.mxu1 %v1733_v58  ;;  %v14663_v20 = vunpack.i.h.bf16 %v14661_v43  ;;  %v15183_v49 = vld [vmem:[%s19876_s3 + $0xb0] sm:$0xff]   ;;  %v2088_v58 = vld [vmem:[#allocation2 + $0x40] ss:$2 sm:$0x3f]  ;;  %v15186_v43 = vld [vmem:[%s19876_s3 + $0xf8] sm:$0xff]  }
 0x202   :  { %v2155_v0 = vsel %vm1717_vm4, %v2154_v46, %v14657_v19  ;;  %2069 = vmatmul.mubr.bf16.vlgmr.msra.gmra.mrb[120].mxu1 %v1732_v37  ;;  %13047 = vmatprep.subr.bf16.mxu0 %v15159_v29  ;;  %v2152_v15 = vsel %vm1717_vm4, %v2151_v16, %v14658_v4  ;;  %v15185_v19 = vld [vmem:[%s19876_s3 + $0x10] sm:$0xff]   ;;  %v15196_v16 = vld [vmem:[%s19876_s3 + $0x88] sm:$0xff]  }
 0x203   :  { %13062 = vmatpush3.bf16.msra.mxu1 %v15160_v41  ;;  %v2156_v52 = vsel %vm1719_vm5, %v2155_v0, %v14662_v39  ;;  %v2153_v42 = vsel %vm1719_vm5, %v2152_v15, %v14663_v20  ;;  %v15198_v20 = vld [vmem:[%s19876_s3 + $0xd0] sm:$0xff]  }
 0x204   :  { %13063 = vmatprep.subr.bf16.mxu1 %v15162_v25  ;;  %v2164_v48 = vpack.c.bf16 %v2156_v52, %v2156_v52  ;;  %v2163_v51 = vpack.c.bf16 %v2153_v42, %v2153_v42  ;;  %v15199_v15 = vld [vmem:[%s19876_s3 + $0x70] sm:$0xff]   ;;  %v15203_v42 = vld [vmem:[%s19876_s3 + $0x78] sm:$0xff]  }
 0x205   :  { %13048 = vmatpush3.bf16.msra.mxu0 %v15161_v38  ;;  %v2522_v38 = vld [vmem:[#allocation2 + $0x70] ss:$2 sm:$0x3f] }
 0x206   :  { %13049 = vmatprep.subr.bf16.mxu0 %v15163_v17  ;;  %2455 = vmatprep.mubr.bf16.mxu0 %v2164_v48  ;;  %v15188_v17 = vld [vmem:[%s19876_s3 + $0x58] sm:$0xff]  }
 0x207   :  { %13064 = vmatpush3.bf16.msra.mxu1 %v15164_v30  ;;  %v16871_v61 = vpop.permute.xlu1 %14665  ;;  %v15187_v48 = vld [vmem:[%s19876_s3 + $0xb8] sm:$0xff]  }
 0x208   :  { %v14667_v3 = vunpack.i.l.bf16 %v16871_v61  ;;  %v16880_v6 = vpop.permute.xlu0 %14670  ;;  %13065 = vmatprep.subr.bf16.mxu1 %v15166_v55  ;;  %v14668_v37 = vunpack.i.h.bf16 %v16871_v61 }
 0x209   :  { %v14672_v10 = vunpack.i.l.bf16 %v16880_v6  ;;  %13050 = vmatpush3.bf16.msra.mxu0 %v15165_v54  ;;  %v14673_v46 = vunpack.i.h.bf16 %v16880_v6 }
 0x20a   :  { %v2160_v14 = vsel %vm1606_vm3, %v2096_v9, %v14667_v3  ;;  %13051 = vmatprep.subr.bf16.mxu0 %v15167_v56  ;;  %v2157_v30 = vsel %vm1606_vm3, %v2088_v58, %v14668_v37  ;;  %v15192_v3 = vld [vmem:[%s19876_s3 + $0x80] sm:$0xff]   ;;  %v15194_v9 = vld [vmem:[%s19876_s3 + $0xc8] sm:$0xff]  }
 0x20b   :  { %13066 = vmatpush3.bf16.msra.mxu1 %v15168_v24  ;;  %v16891_v45 = vpop.permute.xlu1 %14675  ;;  %v2161_v63 = vsel %vm1717_vm4, %v2160_v14, %v14672_v10  ;;  %v15189_v24 = vld [vmem:[%s19876_s3 + $0x18] sm:$0xff]   ;;  %v2158_v61 = vsel %vm1717_vm4, %v2157_v30, %v14673_v46  ;;  %v15212_v37 = vld [vmem:[%s19876_s3 + $0x48] sm:$0xff]   ;;  %v15215_v30 = vld [vmem:[%s19876_s3 + $0xb0] sm:$0xff]  }
 0x20c   :  { %v14677_v23 = vunpack.i.l.bf16 %v16891_v45  ;;  %v16898_v7 = vpop.permute.xlu0 %14680  ;;  %13067 = vmatprep.subr.bf16.mxu1 %v15170_v2  ;;  %v14678_v52 = vunpack.i.h.bf16 %v16891_v45  ;;  %v15191_v2 = vld [vmem:[%s19876_s3 + $0x60] sm:$0xff]   ;;  %v15211_v58 = vld [vmem:[%s19876_s3 + $0xa8] sm:$0xff]  }
 0x20d   :  { %v14682_v11 = vunpack.i.l.bf16 %v16898_v7  ;;  %13052 = vmatpush3.bf16.msra.mxu0 %v15169_v57  ;;  %v15213_v46 = vld [vmem:[%s19876_s3 + $0x8] sm:$0xff]  }
 0x20e   :  { %13053 = vmatprep.subr.bf16.mxu0 %v15171_v13  ;;  %v2162_v34 = vsel %vm1719_vm5, %v2161_v63, %v14677_v23  ;;  %v2159_v31 = vsel %vm1719_vm5, %v2158_v61, %v14678_v52  ;;  %v15193_v13 = vld [vmem:[%s19876_s3 + $0x20] sm:$0xff]   ;;  %v15200_v23 = vld [vmem:[%s19876_s3 + $0x90] sm:$0xff]  }
 0x20f   :  { %13068 = vmatpush3.bf16.msra.mxu1 %v15172_v62  ;;  %v16913_v5 = vpop.permute.xlu1 %14685  ;;  %v2166_v8 = vpack.c.bf16 %v2162_v34, %v2162_v34  ;;  %v2580_v35 = vsel %vm1606_vm3, %v2509_v53, %v14682_v11  ;;  %v2165_v14 = vpack.c.bf16 %v2159_v31, %v2159_v31  ;;  %v15195_v62 = vld [vmem:[%s19876_s3 + $0x68] sm:$0xff]   ;;  %v15202_v11 = vld [vmem:[%s19876_s3 + $0xd8] sm:$0xff]  }
 0x210   :  { %v14687_v12 = vunpack.i.l.bf16 %v16913_v5  ;;  %v16922_v22 = vpop.permute.xlu0 %14690  ;;  %13069 = vmatprep.subr.bf16.mxu1 %v15174_v47  ;;  %v15197_v47 = vld [vmem:[%s19876_s3 + $0x28] sm:$0xff]   ;;  %v14688_v34 = vunpack.i.h.bf16 %v16913_v5  ;;  %v15206_v5 = vld [vmem:[%s19876_s3 + $0xe0] sm:$0xff]  }
 0x211   :  { %v14692_v44 = vunpack.i.l.bf16 %v16922_v22  ;;  %13054 = vmatpush3.bf16.msra.mxu0 %v15173_v28  ;;  %2495 = vmatprep.mubr.bf16.mxu1 %v2166_v8  ;;  %v14683_v28 = vunpack.i.h.bf16 %v16898_v7  ;;  %v2505_v53 = vld [vmem:[#allocation2 + $0x40] ss:$2 sm:$0x3f]  ;;  %v2935_v8 = vld [vmem:[#allocation2 + $0x70] ss:$2 sm:$0x3f] }
 0x212   :  { %v2581_v18 = vsel %vm1717_vm4, %v2580_v35, %v14687_v12  ;;  %13083 = vmatprep.subr.bf16.mxu0 %v15176_v40  ;;  %v15204_v7 = vld [vmem:[%s19876_s3 + $0x98] sm:$0xff]   ;;  %v14693_v35 = vunpack.i.h.bf16 %v16922_v22  ;;  %v15207_v22 = vld [vmem:[%s19876_s3 + $0xa0] sm:$0xff]  }
 0x213   :  { %13070 = vmatpush3.bf16.msra.mxu1 %v15175_v26  ;;  %v2582_v29 = vsel %vm1719_vm5, %v2581_v18, %v14692_v44  ;;  %v15201_v26 = vld [vmem:[%s19876_s3 + $0x30] sm:$0xff]   ;;  %v2577_v12 = vsel %vm1606_vm3, %v2505_v53, %v14683_v28  ;;  %v15205_v44 = vld [vmem:[%s19876_s3 + $0x38] sm:$0xff]   ;;  %v15208_v18 = vld [vmem:[%s19876_s3 + $0x40] sm:$0xff]  }
 0x214   :  { %2456 = vmatmul.mubr.bf16.vlgmr.msra.gmra.mrb[124].mxu0 %v2163_v51  ;;  %13071 = vmatprep.subr.bf16.mxu1 %v15178_v27  ;;  %v2590_v41 = vpack.c.bf16 %v2582_v29, %v2582_v29  ;;  %v2514_v52 = vld [vmem:[#allocation2 + $0x60] ss:$2 sm:$0x3f]  ;;  %v15230_v53 = vld [vmem:[%s19876_s3 + $0xd0] sm:$0xff]  }
 0x215   :  { %13084 = vmatpush3.bf16.msra.mxu0 %v15177_v21 }
 0x216   :  { %13085 = vmatprep.subr.bf16.mxu0 %v15180_v50  ;;  %2881 = vmatprep.mubr.bf16.mxu0 %v2590_v41  ;;  %v15210_v41 = vld [vmem:[%s19876_s3 + $0xe8] sm:$0xff]  }
 0x217   :  { %13072 = vmatpush3.bf16.msra.mxu1 %v15179_v32  ;;  %v16947_v25 = vpop.permute.xlu1 %14695  ;;  %v2578_v32 = vsel %vm1717_vm4, %v2577_v12, %v14688_v34  ;;  %v15234_v12 = vld [vmem:[%s19876_s3 + $0xd8] sm:$0xff]  }
 0x218   :  { %v14697_v39 = vunpack.i.l.bf16 %v16947_v25  ;;  %v16957_v0 = vpop.permute.xlu0 %14700  ;;  %13073 = vmatprep.subr.bf16.mxu1 %v15182_v36  ;;  %v15209_v36 = vld [vmem:[%s19876_s3] sm:$0xff]  }
 0x219   :  { %v14702_v55 = vunpack.i.l.bf16 %v16957_v0  ;;  %13086 = vmatpush3.bf16.msra.mxu0 %v15181_v33  ;;  %v2579_v33 = vsel %vm1719_vm5, %v2578_v32, %v14693_v35  ;;  %v14703_v61 = vunpack.i.h.bf16 %v16957_v0  ;;  %v2931_v35 = vld [vmem:[#allocation2 + $0x60] ss:$2 sm:$0x3f] }
 0x21a   :  { %v2586_v54 = vsel %vm1606_vm3, %v2522_v38, %v14697_v39  ;;  %13087 = vmatprep.subr.bf16.mxu0 %v15184_v60  ;;  %v2589_v38 = vpack.c.bf16 %v2579_v33, %v2579_v33  ;;  %v15216_v39 = vld [vmem:[%s19876_s3 + $0x50] sm:$0xff]   ;;  %v15237_v33 = vld [vmem:[%s19876_s3 + $0x38] sm:$0xff]  }
 0x21b   :  { %13074 = vmatpush3.bf16.msra.mxu1 %v15183_v49  ;;  %v16969_v56 = vpop.permute.xlu1 %14705  ;;  %v2587_v4 = vsel %vm1717_vm4, %v2586_v54, %v14702_v55  ;;  %v15218_v54 = vld [vmem:[%s19876_s3 + $0xf8] sm:$0xff]  }
 0x21c   :  { %v14707_v57 = vunpack.i.l.bf16 %v16969_v56  ;;  %13075 = vmatprep.subr.bf16.mxu1 %v15186_v43  ;;  %v17003_v45 = vpop.permute.xlu0 %14710  ;;  %v14708_v31 = vunpack.i.h.bf16 %v16969_v56  ;;  %v15221_v56 = vld [vmem:[%s19876_s3 + $0x18] sm:$0xff]  }
 0x21d   :  { %13088 = vmatpush3.bf16.msra.mxu0 %v15185_v19  ;;  %v14712_v40 = vunpack.i.l.bf16 %v17003_v45  ;;  %v15214_v19 = vld [vmem:[%s19876_s3 + $0xf0] sm:$0xff]  }
 0x21e   :  { %13089 = vmatprep.subr.bf16.mxu0 %v15188_v17  ;;  %v2588_v6 = vsel %vm1719_vm5, %v2587_v4, %v14707_v57  ;;  %v14698_v17 = vunpack.i.h.bf16 %v16947_v25  ;;  %v15217_v25 = vld [vmem:[%s19876_s3 + $0x10] sm:$0xff]   ;;  %v15220_v57 = vld [vmem:[%s19876_s3 + $0x58] sm:$0xff]  }
 0x21f   :  { %13076 = vmatpush3.bf16.msra.mxu1 %v15187_v48  ;;  %v2592_v10 = vpack.c.bf16 %v2588_v6, %v2588_v6  ;;  %v17014_v63 = vpop.permute.xlu1 %14715  ;;  %v3006_v50 = vsel %vm1606_vm3, %v2935_v8, %v14712_v40  ;;  %v15229_v40 = vld [vmem:[%s19876_s3 + $0x28] sm:$0xff]   ;;  %v15232_v8 = vld [vmem:[%s19876_s3 + $0x90] sm:$0xff]  }
 0x220   :  { %13105 = vmatprep.subr.bf16.mxu1 %v15190_v59  ;;  %v14717_v21 = vunpack.i.l.bf16 %v17014_v63  ;;  %v17029_v27 = vpop.permute.xlu0 %14720 }
 0x221   :  { %13090 = vmatpush3.bf16.msra.mxu0 %v15189_v24  ;;  %v14722_v51 = vunpack.i.l.bf16 %v17029_v27  ;;  %v2948_v24 = vld [vmem:[#allocation2 + $0x90] ss:$2 sm:$0x3f] }
 0x222   :  { %2496 = vmatmul.mubr.bf16.vlgmr.msra.gmra.mrb[124].mxu1 %v2165_v14  ;;  %13091 = vmatprep.subr.bf16.mxu0 %v15191_v2  ;;  %v3007_v29 = vsel %vm1717_vm4, %v3006_v50, %v14717_v21  ;;  %v2583_v2 = vsel %vm1606_vm3, %v2514_v52, %v14698_v17  ;;  %v15235_v50 = vld [vmem:[%s19876_s3 + $0x78] sm:$0xff]   ;;  %v15244_v17 = vld [vmem:[%s19876_s3 + $0x48] sm:$0xff]  }
 0x223   :  { %13106 = vmatpush3.bf16.msra.mxu1 %v15192_v3  ;;  %2921 = vmatprep.mubr.bf16.mxu1 %v2592_v10  ;;  %v3008_v60 = vsel %vm1719_vm5, %v3007_v29, %v14722_v51  ;;  %v15219_v3 = vld [vmem:[%s19876_s3 + $0xb8] sm:$0xff]   ;;  %v2584_v10 = vsel %vm1717_vm4, %v2583_v2, %v14703_v61  ;;  %v15243_v52 = vld [vmem:[%s19876_s3 + $0xa8] sm:$0xff]   ;;  %v15248_v61 = vld [vmem:[%s19876_s3 + $0x50] sm:$0xff]  }
 0x224   :  { %13107 = vmatprep.subr.bf16.mxu1 %v15194_v9  ;;  %v3016_v43 = vpack.c.bf16 %v3008_v60, %v3008_v60  ;;  %v15222_v9 = vld [vmem:[%s19876_s3 + $0xc0] sm:$0xff]   ;;  %v2585_v14 = vsel %vm1719_vm5, %v2584_v10, %v14708_v31  ;;  %v15236_v29 = vld [vmem:[%s19876_s3 + $0x98] sm:$0xff]   ;;  %v15247_v2 = vld [vmem:[%s19876_s3 + $0xb0] sm:$0xff]  }
 0x225   :  { %13092 = vmatpush3.bf16.msra.mxu0 %v15193_v13  ;;  %v15223_v13 = vld [vmem:[%s19876_s3 + $0x60] sm:$0xff]   ;;  %v15252_v10 = vld [vmem:[%s19876_s3 + $0x58] sm:$0xff]  }
 0x226   :  { %13093 = vmatprep.subr.bf16.mxu0 %v15195_v62  ;;  %v2940_v31 = vld [vmem:[#allocation2 + $0x80] ss:$2 sm:$0x3f] }
 0x227   :  { %13108 = vmatpush3.bf16.msra.mxu1 %v15196_v16  ;;  %v17063_v49 = vpop.permute.xlu1 %14725  ;;  %v15224_v16 = vld [vmem:[%s19876_s3 + $0x80] sm:$0xff]  }
 0x228   :  { %13109 = vmatprep.subr.bf16.mxu1 %v15198_v20  ;;  %v14727_v55 = vunpack.i.l.bf16 %v17063_v49  ;;  %v17082_v48 = vpop.permute.xlu0 %14730 }
 0x229   :  { %13094 = vmatpush3.bf16.msra.mxu0 %v15197_v47  ;;  %v14732_v4 = vunpack.i.l.bf16 %v17082_v48  ;;  %v15226_v47 = vld [vmem:[%s19876_s3 + $0xc8] sm:$0xff]  }
 0x22a   :  { %13095 = vmatprep.subr.bf16.mxu0 %v15199_v15  ;;  %v3012_v6 = vsel %vm1606_vm3, %v2948_v24, %v14727_v55  ;;  %v15225_v15 = vld [vmem:[%s19876_s3 + $0x20] sm:$0xff]  }
 0x22b   :  { %13110 = vmatpush3.bf16.msra.mxu1 %v15200_v23  ;;  %v17087_v59 = vpop.permute.xlu1 %14735  ;;  %v3013_v62 = vsel %vm1717_vm4, %v3012_v6, %v14732_v4  ;;  %v2591_v23 = vpack.c.bf16 %v2585_v14, %v2585_v14  ;;  %v15250_v6 = vld [vmem:[%s19876_s3 + $0xf8] sm:$0xff]  }
 0x22c   :  { %13111 = vmatprep.subr.bf16.mxu1 %v15202_v11  ;;  %v14737_v0 = vunpack.i.l.bf16 %v17087_v59  ;;  %v15227_v11 = vld [vmem:[%s19876_s3 + $0x68] sm:$0xff]   ;;  %v17135_v34 = vpop.permute.xlu0 %14740  ;;  %v14738_v14 = vunpack.i.h.bf16 %v17087_v59  ;;  %v15254_v59 = vld [vmem:[%s19876_s3 + $0xc0] sm:$0xff]  }
 0x22d   :  { %13096 = vmatpush3.bf16.msra.mxu0 %v15201_v26  ;;  %v15228_v26 = vld [vmem:[%s19876_s3 + $0x88] sm:$0xff]   ;;  %v14742_v32 = vunpack.i.l.bf16 %v17135_v34 }
 0x22e   :  { %13097 = vmatprep.subr.bf16.mxu0 %v15203_v42  ;;  %v3014_v20 = vsel %vm1719_vm5, %v3013_v62, %v14737_v0  ;;  %v15231_v42 = vld [vmem:[%s19876_s3 + $0x70] sm:$0xff]  }
 0x22f   :  { %13112 = vmatpush3.bf16.msra.mxu1 %v15204_v7  ;;  %v3018_v28 = vpack.c.bf16 %v3014_v20, %v3014_v20  ;;  %v17146_v21 = vpop.permute.xlu1 %14745  ;;  %v14713_v7 = vunpack.i.h.bf16 %v17003_v45  ;;  %v3361_v45 = vld [vmem:[#allocation2 + $0x90] ss:$2 sm:$0x3f] }
 0x230   :  { %13113 = vmatprep.subr.bf16.mxu1 %v15206_v5  ;;  %v15233_v5 = vld [vmem:[%s19876_s3 + $0x30] sm:$0xff]   ;;  %v14747_v51 = vunpack.i.l.bf16 %v17146_v21  ;;  %v3432_v60 = vsel %vm1606_vm3, %v3361_v45, %v14742_v32  ;;  %v15261_v32 = vld [vmem:[%s19876_s3 + $0x28] sm:$0xff]  }
 0x231   :  { %13098 = vmatpush3.bf16.msra.mxu0 %v15205_v44  ;;  %v14718_v44 = vunpack.i.h.bf16 %v17014_v63  ;;  %v15238_v63 = vld [vmem:[%s19876_s3 + $0xe0] sm:$0xff]   ;;  %v3374_v0 = vld [vmem:[#allocation2 + $0xb0] ss:$2 sm:$0x3f] }
 0x232   :  { %13127 = vmatprep.subr.bf16.mxu0 %v15208_v18  ;;  %v17161_v18 = vpop.permute.xlu0 %14750  ;;  %v15264_v45 = vld [vmem:[%s19876_s3 + $0x90] sm:$0xff]  }
 0x233   :  { %13114 = vmatpush3.bf16.msra.mxu1 %v15207_v22  ;;  %v3003_v22 = vsel %vm1606_vm3, %v2931_v35, %v14713_v7  ;;  %v15259_v7 = vld [vmem:[%s19876_s3 + $0x68] sm:$0xff]   ;;  %v15262_v35 = vld [vmem:[%s19876_s3 + $0xd0] sm:$0xff]  }
 0x234   :  { %2882 = vmatmul.mubr.bf16.vlgmr.msra.gmra.mrb[128].mxu0 %v2589_v38  ;;  %13115 = vmatprep.subr.bf16.mxu1 %v15210_v41  ;;  %v14723_v41 = vunpack.i.h.bf16 %v17029_v27  ;;  %v3433_v38 = vsel %vm1717_vm4, %v3432_v60, %v14747_v51  ;;  %v15239_v27 = vld [vmem:[%s19876_s3 + $0xa0] sm:$0xff]   ;;  %v15267_v60 = vld [vmem:[%s19876_s3 + $0x78] sm:$0xff]  }
 0x235   :  { %13128 = vmatpush3.bf16.msra.mxu0 %v15209_v36  ;;  %3307 = vmatprep.mubr.bf16.mxu0 %v3016_v43  ;;  %v3004_v36 = vsel %vm1717_vm4, %v3003_v22, %v14718_v44  ;;  %v15265_v22 = vld [vmem:[%s19876_s3 + $0x30] sm:$0xff]  }
 0x236   :  { %13129 = vmatprep.subr.bf16.mxu0 %v15212_v37  ;;  %v14752_v37 = vunpack.i.l.bf16 %v17161_v18  ;;  %v3005_v43 = vsel %vm1719_vm5, %v3004_v36, %v14723_v41  ;;  %v3357_v41 = vld [vmem:[#allocation2 + $0x80] ss:$2 sm:$0x3f] }
 0x237   :  { %13116 = vmatpush3.bf16.msra.mxu1 %v15211_v58  ;;  %v15240_v58 = vld [vmem:[%s19876_s3 + $0x40] sm:$0xff]   ;;  %v3015_v55 = vpack.c.bf16 %v3005_v43, %v3005_v43  ;;  %v15269_v43 = vld [vmem:[%s19876_s3 + $0x38] sm:$0xff]  }
 0x238   :  { %13117 = vmatprep.subr.bf16.mxu1 %v15214_v19  ;;  %v15242_v19 = vld [vmem:[%s19876_s3 + $0xe8] sm:$0xff]  }
 0x239   :  { %13130 = vmatpush3.bf16.msra.mxu0 %v15213_v46  ;;  %v15241_v46 = vld [vmem:[%s19876_s3] sm:$0xff]  }
 0x23a   :  { %13131 = vmatprep.subr.bf16.mxu0 %v15216_v39  ;;  %v3434_v39 = vsel %vm1719_vm5, %v3433_v38, %v14752_v37  ;;  %v3787_v37 = vld [vmem:[#allocation2 + $0xb0] ss:$2 sm:$0x3f] }
 0x23b   :  { %13118 = vmatpush3.bf16.msra.mxu1 %v15215_v30  ;;  %v17195_v30 = vpop.permute.xlu1 %14755  ;;  %v3442_v24 = vpack.c.bf16 %v3434_v39, %v3434_v39 }
 0x23c   :  { %13119 = vmatprep.subr.bf16.mxu1 %v15218_v54  ;;  %v15246_v54 = vld [vmem:[%s19876_s3 + $0xf0] sm:$0xff]   ;;  %v14757_v4 = vunpack.i.l.bf16 %v17195_v30 }
 0x23d   :  { %13132 = vmatpush3.bf16.msra.mxu0 %v15217_v25  ;;  %v15245_v25 = vld [vmem:[%s19876_s3 + $0x8] sm:$0xff]  }
 0x23e   :  { %13133 = vmatprep.subr.bf16.mxu0 %v15220_v57  ;;  %v14728_v57 = vunpack.i.h.bf16 %v17063_v49  ;;  %v15249_v49 = vld [vmem:[%s19876_s3 + $0x10] sm:$0xff]   ;;  %v3438_v20 = vsel %vm1606_vm3, %v3374_v0, %v14757_v4 }
 0x23f   :  { %13120 = vmatpush3.bf16.msra.mxu1 %v15219_v3  ;;  %v17214_v3 = vpop.permute.xlu0 %14760 }
 0x240   :  { %13149 = vmatprep.subr.bf16.mxu1 %v15222_v9  ;;  %v17219_v9 = vpop.permute.xlu1 %14765  ;;  %v14762_v62 = vunpack.i.l.bf16 %v17214_v3 }
 0x241   :  { %13134 = vmatpush3.bf16.msra.mxu0 %v15221_v56  ;;  %v14733_v56 = vunpack.i.h.bf16 %v17082_v48  ;;  %v14767_v48 = vunpack.i.l.bf16 %v17219_v9 }
 0x242   :  { %2922 = vmatmul.mubr.bf16.vlgmr.msra.gmra.mrb[128].mxu1 %v2591_v23  ;;  %13135 = vmatprep.subr.bf16.mxu0 %v15223_v13  ;;  %v3009_v13 = vsel %vm1606_vm3, %v2940_v31, %v14728_v57  ;;  %v15255_v23 = vld [vmem:[%s19876_s3 + $0x60] sm:$0xff]   ;;  %v15276_v57 = vld [vmem:[%s19876_s3 + $0x48] sm:$0xff]  }
 0x243   :  { %13150 = vmatpush3.bf16.msra.mxu1 %v15224_v16  ;;  %3347 = vmatprep.mubr.bf16.mxu1 %v3018_v28  ;;  %v15251_v16 = vld [vmem:[%s19876_s3 + $0xb8] sm:$0xff]   ;;  %v3439_v28 = vsel %vm1717_vm4, %v3438_v20, %v14762_v62  ;;  %v17267_v44 = vpop.permute.xlu0 %14770  ;;  %v15275_v31 = vld [vmem:[%s19876_s3 + $0xa8] sm:$0xff]  }
 0x244   :  { %13151 = vmatprep.subr.bf16.mxu1 %v15226_v47  ;;  %v15253_v47 = vld [vmem:[%s19876_s3 + $0x18] sm:$0xff]   ;;  %v17278_v51 = vpop.permute.xlu1 %14775  ;;  %v14772_v36 = vunpack.i.l.bf16 %v17267_v44 }
 0x245   :  { %13136 = vmatpush3.bf16.msra.mxu0 %v15225_v15  ;;  %v3010_v15 = vsel %vm1717_vm4, %v3009_v13, %v14733_v56  ;;  %v15280_v56 = vld [vmem:[%s19876_s3 + $0x50] sm:$0xff]   ;;  %v15282_v20 = vld [vmem:[%s19876_s3 + $0xf8] sm:$0xff]  }
 0x246   :  { %13137 = vmatprep.subr.bf16.mxu0 %v15227_v11  ;;  %v3011_v11 = vsel %vm1719_vm5, %v3010_v15, %v14738_v14  ;;  %v3858_v39 = vsel %vm1606_vm3, %v3787_v37, %v14772_v36  ;;  %v15279_v13 = vld [vmem:[%s19876_s3 + $0xb0] sm:$0xff]   ;;  %v3366_v14 = vld [vmem:[#allocation2 + $0xa0] ss:$2 sm:$0x3f]  ;;  %v15284_v15 = vld [vmem:[%s19876_s3 + $0x58] sm:$0xff]  }
 0x247   :  { %13152 = vmatpush3.bf16.msra.mxu1 %v15228_v26  ;;  %v15256_v26 = vld [vmem:[%s19876_s3 + $0x80] sm:$0xff]   ;;  %v17293_v38 = vpop.permute.xlu0 %14780  ;;  %v15295_v36 = vld [vmem:[%s19876_s3 + $0x70] sm:$0xff]   ;;  %v15298_v37 = vld [vmem:[%s19876_s3 + $0xd8] sm:$0xff]  }
 0x248   :  { %13153 = vmatprep.subr.bf16.mxu1 %v15230_v53  ;;  %v3440_v53 = vsel %vm1719_vm5, %v3439_v28, %v14767_v48  ;;  %v3800_v48 = vld [vmem:[#allocation2 + $0xd0] ss:$2 sm:$0x3f] }
 0x249   :  { %13138 = vmatpush3.bf16.msra.mxu0 %v15229_v40  ;;  %v15258_v40 = vld [vmem:[%s19876_s3 + $0xc8] sm:$0xff]  }
 0x24a   :  { %13139 = vmatprep.subr.bf16.mxu0 %v15231_v42  ;;  %v15257_v42 = vld [vmem:[%s19876_s3 + $0x20] sm:$0xff]  }
 0x24b   :  { %13154 = vmatpush3.bf16.msra.mxu1 %v15232_v8  ;;  %v3017_v8 = vpack.c.bf16 %v3011_v11, %v3011_v11  ;;  %v14768_v11 = vunpack.i.h.bf16 %v17219_v9  ;;  %v15285_v9 = vld [vmem:[%s19876_s3 + $0x18] sm:$0xff]  }
 0x24c   :  { %13155 = vmatprep.subr.bf16.mxu1 %v15234_v12  ;;  %v15260_v12 = vld [vmem:[%s19876_s3 + $0x88] sm:$0xff]  }
 0x24d   :  { %13140 = vmatpush3.bf16.msra.mxu0 %v15233_v5  ;;  %v3444_v5 = vpack.c.bf16 %v3440_v53, %v3440_v53 }
 0x24e   :  { %13141 = vmatprep.subr.bf16.mxu0 %v15235_v50  ;;  %v15263_v50 = vld [vmem:[%s19876_s3 + $0x70] sm:$0xff]  }
 0x24f   :  { %13156 = vmatpush3.bf16.msra.mxu1 %v15236_v29  ;;  %v15266_v29 = vld [vmem:[%s19876_s3 + $0xd8] sm:$0xff]  }
 0x250   :  { %13157 = vmatprep.subr.bf16.mxu1 %v15238_v63  ;;  %v14743_v63 = vunpack.i.h.bf16 %v17135_v34  ;;  %v15268_v34 = vld [vmem:[%s19876_s3 + $0x98] sm:$0xff]  }
 0x251   :  { %13142 = vmatpush3.bf16.msra.mxu0 %v15237_v33  ;;  %v14748_v33 = vunpack.i.h.bf16 %v17146_v21  ;;  %v15270_v21 = vld [vmem:[%s19876_s3 + $0xe0] sm:$0xff]  }
 0x252   :  { %13171 = vmatprep.subr.bf16.mxu0 %v15240_v58  ;;  %v14777_v58 = vunpack.i.l.bf16 %v17278_v51 }
 0x253   :  { %13158 = vmatpush3.bf16.msra.mxu1 %v15239_v27  ;;  %v3429_v27 = vsel %vm1606_vm3, %v3357_v41, %v14743_v63  ;;  %v15294_v41 = vld [vmem:[%s19876_s3 + $0xd0] sm:$0xff]  }
 0x254   :  { %3308 = vmatmul.mubr.bf16.vlgmr.msra.gmra.mrb[132].mxu0 %v3015_v55  ;;  %13159 = vmatprep.subr.bf16.mxu1 %v15242_v19  ;;  %v14753_v19 = vunpack.i.h.bf16 %v17161_v18  ;;  %v3859_v55 = vsel %vm1717_vm4, %v3858_v39, %v14777_v58  ;;  %v15271_v18 = vld [vmem:[%s19876_s3 + $0xa0] sm:$0xff]   ;;  %v14773_v58 = vunpack.i.h.bf16 %v17267_v44  ;;  %v14783_v39 = vunpack.i.h.bf16 %v17293_v38 }
 0x255   :  { %13172 = vmatpush3.bf16.msra.mxu0 %v15241_v46  ;;  %3733 = vmatprep.mubr.bf16.mxu0 %v3442_v24  ;;  %v3430_v46 = vsel %vm1717_vm4, %v3429_v27, %v14748_v33  ;;  %v15293_v33 = vld [vmem:[%s19876_s3 + $0x28] sm:$0xff]   ;;  %v14778_v27 = vunpack.i.h.bf16 %v17278_v51  ;;  %v15302_v44 = vld [vmem:[%s19876_s3 + $0xe0] sm:$0xff]   ;;  %v15301_v51 = vld [vmem:[%s19876_s3 + $0x38] sm:$0xff]  }
 0x256   :  { %13173 = vmatprep.subr.bf16.mxu0 %v15244_v17  ;;  %v14782_v17 = vunpack.i.l.bf16 %v17293_v38  ;;  %v3431_v24 = vsel %vm1719_vm5, %v3430_v46, %v14753_v19  ;;  %v15299_v19 = vld [vmem:[%s19876_s3 + $0x78] sm:$0xff]  }
 0x257   :  { %13160 = vmatpush3.bf16.msra.mxu1 %v15243_v52  ;;  %v15272_v52 = vld [vmem:[%s19876_s3 + $0x40] sm:$0xff]   ;;  %v3441_v4 = vpack.c.bf16 %v3431_v24, %v3431_v24  ;;  %v15306_v24 = vld [vmem:[%s19876_s3 + $0xf0] sm:$0xff]  }
 0x258   :  { %13161 = vmatprep.subr.bf16.mxu1 %v15246_v54  ;;  %v15274_v54 = vld [vmem:[%s19876_s3 + $0xe8] sm:$0xff]  }
 0x259   :  { %13174 = vmatpush3.bf16.msra.mxu0 %v15245_v25  ;;  %v15273_v25 = vld [vmem:[%s19876_s3] sm:$0xff]  }
 0x25a   :  { %13175 = vmatprep.subr.bf16.mxu0 %v15248_v61  ;;  %v3860_v61 = vsel %vm1719_vm5, %v3859_v55, %v14782_v17  ;;  %v15304_v55 = vld [vmem:[%s19876_s3 + $0xe8] sm:$0xff]  }
 0x25b   :  { %13162 = vmatpush3.bf16.msra.mxu1 %v15247_v2  ;;  %v17327_v2 = vpop.permute.xlu1 %14785  ;;  %v3868_v0 = vpack.c.bf16 %v3860_v61, %v3860_v61  ;;  %v15307_v61 = vld [vmem:[%s19876_s3 + $0xb0] sm:$0xff]  }
 0x25c   :  { %13163 = vmatprep.subr.bf16.mxu1 %v15250_v6  ;;  %v15278_v6 = vld [vmem:[%s19876_s3 + $0xf0] sm:$0xff]   ;;  %v14787_v62 = vunpack.i.l.bf16 %v17327_v2 }
 0x25d   :  { %13176 = vmatpush3.bf16.msra.mxu0 %v15249_v49  ;;  %v15277_v49 = vld [vmem:[%s19876_s3 + $0x8] sm:$0xff]  }
 0x25e   :  { %13177 = vmatprep.subr.bf16.mxu0 %v15252_v10  ;;  %v14758_v10 = vunpack.i.h.bf16 %v17195_v30  ;;  %v15281_v30 = vld [vmem:[%s19876_s3 + $0x10] sm:$0xff]   ;;  %v3864_v53 = vsel %vm1606_vm3, %v3800_v48, %v14787_v62 }
 0x25f   :  { %13164 = vmatpush3.bf16.msra.mxu1 %v15251_v16  ;;  %v17346_v16 = vpop.permute.xlu0 %14790 }
 0x260   :  { %13193 = vmatprep.subr.bf16.mxu1 %v15254_v59  ;;  %v14763_v59 = vunpack.i.h.bf16 %v17214_v3  ;;  %v14792_v28 = vunpack.i.l.bf16 %v17346_v16 }
 0x261   :  { %13178 = vmatpush3.bf16.msra.mxu0 %v15253_v47  ;;  %v17351_v47 = vpop.permute.xlu1 %14795 }
 0x262   :  { %3348 = vmatmul.mubr.bf16.vlgmr.msra.gmra.mrb[132].mxu1 %v3017_v8  ;;  %13179 = vmatprep.subr.bf16.mxu0 %v15255_v23  ;;  %v3435_v23 = vsel %vm1606_vm3, %v3366_v14, %v14758_v10  ;;  %v14797_v3 = vunpack.i.l.bf16 %v17351_v47  ;;  %v15287_v8 = vld [vmem:[%s19876_s3 + $0x60] sm:$0xff]  }
 0x263   :  { %13194 = vmatpush3.bf16.msra.mxu1 %v15256_v26  ;;  %3773 = vmatprep.mubr.bf16.mxu1 %v3444_v5  ;;  %v15283_v26 = vld [vmem:[%s19876_s3 + $0xb8] sm:$0xff]   ;;  %v3865_v5 = vsel %vm1717_vm4, %v3864_v53, %v14792_v28 }
 0x264   :  { %13195 = vmatprep.subr.bf16.mxu1 %v15258_v40  ;;  %v15286_v40 = vld [vmem:[%s19876_s3 + $0xc0] sm:$0xff]  }
 0x265   :  { %13180 = vmatpush3.bf16.msra.mxu0 %v15257_v42  ;;  %v3436_v42 = vsel %vm1717_vm4, %v3435_v23, %v14763_v59 }
 0x266   :  { %13181 = vmatprep.subr.bf16.mxu0 %v15259_v7  ;;  %v3437_v7 = vsel %vm1719_vm5, %v3436_v42, %v14768_v11 }
 0x267   :  { %13196 = vmatpush3.bf16.msra.mxu1 %v15260_v12  ;;  %v15288_v12 = vld [vmem:[%s19876_s3 + $0x80] sm:$0xff]  }
 0x268   :  { %13197 = vmatprep.subr.bf16.mxu1 %v15262_v35  ;;  %v3866_v35 = vsel %vm1719_vm5, %v3865_v5, %v14797_v3 }
 0x269   :  { %13182 = vmatpush3.bf16.msra.mxu0 %v15261_v32  ;;  %v15290_v32 = vld [vmem:[%s19876_s3 + $0xc8] sm:$0xff]   ;;  %v3870_v63 = vpack.c.bf16 %v3866_v35, %v3866_v35 }
 0x26a   :  { %13183 = vmatprep.subr.bf16.mxu0 %v15263_v50  ;;  %v15289_v50 = vld [vmem:[%s19876_s3 + $0x20] sm:$0xff]  }
 0x26b   :  { %13198 = vmatpush3.bf16.msra.mxu1 %v15264_v45  ;;  %v3443_v45 = vpack.c.bf16 %v3437_v7, %v3437_v7 }
 0x26c   :  { %13199 = vmatprep.subr.bf16.mxu1 %v15266_v29  ;;  %v15291_v29 = vld [vmem:[%s19876_s3 + $0x68] sm:$0xff]  }
 0x26d   :  { %13184 = vmatpush3.bf16.msra.mxu0 %v15265_v22  ;;  %v15292_v22 = vld [vmem:[%s19876_s3 + $0x88] sm:$0xff]  }
 0x26e   :  { %13185 = vmatprep.subr.bf16.mxu0 %v15267_v60  ;;  %v15296_v60 = vld [vmem:[%s19876_s3 + $0x90] sm:$0xff]  }
 0x26f   :  { %13200 = vmatpush3.bf16.msra.mxu1 %v15268_v34  ;;  %v15297_v34 = vld [vmem:[%s19876_s3 + $0x30] sm:$0xff]  }
 0x270   :  { %13201 = vmatprep.subr.bf16.mxu1 %v15270_v21  ;;  %v3783_v21 = vld [vmem:[#allocation2 + $0xa0] ss:$2 sm:$0x3f] }
 0x271   :  { %13186 = vmatpush3.bf16.msra.mxu0 %v15269_v43  ;;  %v15300_v43 = vld [vmem:[%s19876_s3 + $0x98] sm:$0xff]   ;;  %v3855_v46 = vsel %vm1606_vm3, %v3783_v21, %v14773_v58 }
 0x272   :  { %13215 = vmatprep.subr.bf16.mxu0 %v15272_v52  ;;  %v3856_v17 = vsel %vm1717_vm4, %v3855_v46, %v14778_v27  ;;  %v15303_v52 = vld [vmem:[%s19876_s3 + $0xa0] sm:$0xff]  }
 0x273   :  { %13202 = vmatpush3.bf16.msra.mxu1 %v15271_v18  ;;  %v3857_v38 = vsel %vm1719_vm5, %v3856_v17, %v14783_v39  ;;  %v15305_v18 = vld [vmem:[%s19876_s3 + $0xa8] sm:$0xff]  }
 0x274   :  { %3734 = vmatmul.mubr.bf16.vlgmr.msra.gmra.mrb[136].mxu0 %v3441_v4  ;;  %13203 = vmatprep.subr.bf16.mxu1 %v15274_v54  ;;  %v3867_v54 = vpack.c.bf16 %v3857_v38, %v3857_v38  ;;  %v14793_v4 = vunpack.i.h.bf16 %v17346_v16 }
 0x275   :  { %13216 = vmatpush3.bf16.msra.mxu0 %v15273_v25  ;;  %4159 = vmatprep.mubr.bf16.mxu0 %v3868_v0  ;;  %v14788_v25 = vunpack.i.h.bf16 %v17327_v2  ;;  %v14798_v0 = vunpack.i.h.bf16 %v17351_v47  ;;  %v15309_v2 = vld [vmem:[%s19876_s3 + $0xb8] sm:$0xff]  }
 0x276   :  { %13217 = vmatprep.subr.bf16.mxu0 %v15276_v57  ;;  %v3792_v57 = vld [vmem:[#allocation2 + $0xc0] ss:$2 sm:$0x3f] }
 0x277   :  { %13204 = vmatpush3.bf16.msra.mxu1 %v15275_v31  ;;  %v15308_v31 = vld [vmem:[%s19876_s3 + $0xf8] sm:$0xff]  }
 0x278   :  { %13205 = vmatprep.subr.bf16.mxu1 %v15278_v6  ;;  %v3861_v6 = vsel %vm1606_vm3, %v3792_v57, %v14788_v25 }
 0x279   :  { %13218 = vmatpush3.bf16.msra.mxu0 %v15277_v49  ;;  %v3862_v49 = vsel %vm1717_vm4, %v3861_v6, %v14793_v4 }
 0x27a   :  { %13219 = vmatprep.subr.bf16.mxu0 %v15280_v56  ;;  %v3863_v56 = vsel %vm1719_vm5, %v3862_v49, %v14798_v0 }
 0x27b   :  { %13206 = vmatpush3.bf16.msra.mxu1 %v15279_v13  ;;  %v3869_v10 = vpack.c.bf16 %v3863_v56, %v3863_v56 }
 0x27c   :  { %13207 = vmatprep.subr.bf16.mxu1 %v15282_v20 }
 0x27d   :  { %13220 = vmatpush3.bf16.msra.mxu0 %v15281_v30 }
 0x27e   :  { %13221 = vmatprep.subr.bf16.mxu0 %v15284_v15 }
 0x27f   :  { %13208 = vmatpush3.bf16.msra.mxu1 %v15283_v26 }
 0x280   :  { %13237 = vmatprep.subr.bf16.mxu1 %v15286_v40 }
 0x281   :  { %13222 = vmatpush3.bf16.msra.mxu0 %v15285_v9 }
 0x282   :  { %3774 = vmatmul.mubr.bf16.vlgmr.msra.gmra.mrb[136].mxu1 %v3443_v45  ;;  %13223 = vmatprep.subr.bf16.mxu0 %v15287_v8 }
 0x283   :  { %13238 = vmatpush3.bf16.msra.mxu1 %v15288_v12  ;;  %4199 = vmatprep.mubr.bf16.mxu1 %v3870_v63 }
 0x284   :  { %13239 = vmatprep.subr.bf16.mxu1 %v15290_v32 }
 0x285   :  { %13224 = vmatpush3.bf16.msra.mxu0 %v15289_v50 }
 0x286   :  { %13225 = vmatprep.subr.bf16.mxu0 %v15291_v29 }
 0x287   :  { %13240 = vmatpush3.bf16.msra.mxu1 %v15292_v22 }
 0x288   :  { %13241 = vmatprep.subr.bf16.mxu1 %v15294_v41 }
 0x289   :  { %13226 = vmatpush3.bf16.msra.mxu0 %v15293_v33 }
 0x28a   :  { %13227 = vmatprep.subr.bf16.mxu0 %v15295_v36 }
 0x28b   :  { %13242 = vmatpush3.bf16.msra.mxu1 %v15296_v60 }
 0x28c   :  { %13243 = vmatprep.subr.bf16.mxu1 %v15298_v37 }
 0x28d   :  { %13228 = vmatpush3.bf16.msra.mxu0 %v15297_v34 }
 0x28e   :  { %13229 = vmatprep.subr.bf16.mxu0 %v15299_v19 }
 0x28f   :  { %13244 = vmatpush3.bf16.msra.mxu1 %v15300_v43 }
 0x290   :  { %13245 = vmatprep.subr.bf16.mxu1 %v15302_v44 }
 0x291   :  { %13230 = vmatpush3.bf16.msra.mxu0 %v15301_v51 }
 0x293   :  { %13246 = vmatpush3.bf16.msra.mxu1 %v15303_v52 }
 0x294   :  { %4160 = vmatmul.mubr.bf16.vlgmr.msra.gmra.mrb[140].mxu0 %v3867_v54  ;;  %13247 = vmatprep.subr.bf16.mxu1 %v15304_v55 }
 0x297   :  { %13248 = vmatpush3.bf16.msra.mxu1 %v15305_v18 }
 0x298   :  { %13249 = vmatprep.subr.bf16.mxu1 %v15306_v24 }
 0x29b   :  { %13250 = vmatpush3.bf16.msra.mxu1 %v15307_v61 }
 0x29c   :  { %13251 = vmatprep.subr.bf16.mxu1 %v15308_v31 }
 0x29f   :  { %13252 = vmatpush3.bf16.msra.mxu1 %v15309_v2 }
 0x2a2   :  { %4200 = vmatmul.mubr.bf16.vlgmr.msra.gmra.mrb[140].mxu1 %v3869_v10 }
 0x2c7   :  { %v13011_v13 = vpop.f32.mrb[120].mxu0 }
 0x2c8   :  { %v13012_v14 = vpop.f32.mrb[121].mxu0 }
 0x2c9   :  { %v13013_v62 = vadd.f32 %v13012_v14, %v13011_v13  ;;  %v13014_v16 = vpop.f32.mrb[122].mxu0 }
 0x2ca   :  { %v13015_v20 = vpop.f32.mrb[123].mxu0 }
 0x2cb   :  { %12 = vsyncpa [#allocation5], 0  ;;  %v17462_v48 = vld [vmem:[%s19877_s4] ss:$0 sm:$0xff]  ;;  %vm2077_vm6 = vcmask 521216   ;;  %v15312_v40 = vld [vmem:[%s19878_s5 + $0x48] sm:$0xff]  }
 0x2cc   :  { %v2031_v59 = vadd.f32 %v13013_v62, %v17462_v48  ;;  %v15310_v53 = vld [vmem:[%s19878_s5 + $0x40] sm:$0xff]   ;;  %v15313_v9 = vld [vmem:[%s19878_s5 + $0x8] sm:$0xff]   ;;  %v15314_v12 = vld [vmem:[%s19878_s5 + $0x50] sm:$0xff]   ;;  %vm4661_vm7 = vcmask 257024  }
 0x2cd   :  { %v15311_v3 = vld [vmem:[%s19878_s5] sm:$0xff]   ;;  %13259 = vmatprep.subr.bf16.mxu0 %v15310_v53  ;;  %v15315_v32 = vld [vmem:[%s19878_s5 + $0x10] sm:$0xff]   ;;  %v15316_v50 = vld [vmem:[%s19878_s5 + $0x58] sm:$0xff]  }
 0x2ce   :  { %13260 = vmatpush3.bf16.msra.mxu0 %v15311_v3  ;;  %v15317_v45 = vld [vmem:[%s19878_s5 + $0x18] sm:$0xff]   ;;  %v15318_v29 = vld [vmem:[%s19878_s5 + $0x60] sm:$0xff]   ;;  %v15320_v22 = vld [vmem:[%s19878_s5 + $0x68] sm:$0xff]  }
 0x2cf   :  { %13261 = vmatprep.subr.bf16.mxu0 %v15312_v40  ;;  %v15319_v63 = vld [vmem:[%s19878_s5 + $0x20] sm:$0xff]   ;;  %v15321_v41 = vld [vmem:[%s19878_s5 + $0x28] sm:$0xff]   ;;  %v15322_v27 = vld [vmem:[%s19878_s5 + $0x70] sm:$0xff]  }
 0x2d0   :  { %v15323_v19 = vld [vmem:[%s19878_s5 + $0x30] sm:$0xff]   ;;  %v15324_v44 = vld [vmem:[%s19878_s5 + $0x78] sm:$0xff]   ;;  %v15326_v39 = vld [vmem:[%s19878_s5 + $0xc0] sm:$0xff]  }
 0x2d1   :  { %v15325_v46 = vld [vmem:[%s19878_s5 + $0x38] sm:$0xff]   ;;  %v15327_v51 = vld [vmem:[%s19878_s5 + $0x80] sm:$0xff]   ;;  %13281 = vmatprep.subr.bf16.mxu1 %v15326_v39  ;;  %v15329_v17 = vld [vmem:[%s19878_s5 + $0xc8] sm:$0xff]  }
 0x2d2   :  { %13262 = vmatpush3.bf16.msra.mxu0 %v15313_v9  ;;  %13282 = vmatpush3.bf16.msra.mxu1 %v15327_v51  ;;  %v15330_v52 = vld [vmem:[%s19878_s5 + $0x88] sm:$0xff]   ;;  %v15332_v54 = vld [vmem:[%s19878_s5 + $0xd0] sm:$0xff]   ;;  %v15335_v4 = vld [vmem:[%s19878_s5 + $0xd8] sm:$0xff]  }
 0x2d3   :  { %13263 = vmatprep.subr.bf16.mxu0 %v15314_v12  ;;  %13283 = vmatprep.subr.bf16.mxu1 %v15329_v17  ;;  %v15333_v25 = vld [vmem:[%s19878_s5 + $0x90] sm:$0xff]   ;;  %v15336_v0 = vld [vmem:[%s19878_s5 + $0x98] sm:$0xff]   ;;  %v15338_v2 = vld [vmem:[%s19878_s5 + $0xe0] sm:$0xff]  }
 0x2d4   :  { %v15339_v49 = vld [vmem:[%s19878_s5 + $0xa0] sm:$0xff]   ;;  %v15340_v56 = vld [vmem:[%s19878_s5 + $0xe8] sm:$0xff]   ;;  %v15342_v13 = vld [vmem:[%s19878_s5 + $0xf0] sm:$0xff]  }
 0x2d5   :  { %v13033_v47 = vpop.f32.mrb[120].mxu1  ;;  %v15341_v10 = vld [vmem:[%s19878_s5 + $0xa8] sm:$0xff]   ;;  %v15343_v16 = vld [vmem:[%s19878_s5 + $0xb0] sm:$0xff]  }
 0x2d6   :  { %v13034_v30 = vpop.f32.mrb[121].mxu1  ;;  %13264 = vmatpush3.bf16.msra.mxu0 %v15315_v32  ;;  %13284 = vmatpush3.bf16.msra.mxu1 %v15330_v52 }
 0x2d7   :  { %v13035_v15 = vadd.f32 %v13034_v30, %v13033_v47  ;;  %v13036_v23 = vpop.f32.mrb[122].mxu1  ;;  %13265 = vmatprep.subr.bf16.mxu0 %v15316_v50  ;;  %13285 = vmatprep.subr.bf16.mxu1 %v15332_v54 }
 0x2d8   :  { %v13037_v11 = vpop.f32.mrb[123].mxu1 }
 0x2d9   :  { %v2071_v28 = vadd.f32 %v13035_v15, %v2031_v59  ;;  %v15344_v11 = vld [vmem:[%s19878_s5 + $0xf8] sm:$0xff]  }
 0x2da   :  { %13266 = vmatpush3.bf16.msra.mxu0 %v15317_v45  ;;  %13286 = vmatpush3.bf16.msra.mxu1 %v15333_v25 }
 0x2db   :  { %v2076_v26 = vmax.f32 %v2071_v28, 0.0  ;;  %13267 = vmatprep.subr.bf16.mxu0 %v15318_v29  ;;  %13287 = vmatprep.subr.bf16.mxu1 %v15335_v4  ;;  %v15345_v28 = vld [vmem:[%s19878_s5 + $0xb8] sm:$0xff]  }
 0x2dd   :  { %2078 = vst.msk [vmem:[#allocation3] sm:$0x3f] %vm2077_vm6, %v2076_v26  ;;  %v15346_v26 = vld [vmem:[%s19878_s5 + $0x40] sm:$0xff]  }
 0x2de   :  { %13268 = vmatpush3.bf16.msra.mxu0 %v15319_v63  ;;  %13288 = vmatpush3.bf16.msra.mxu1 %v15336_v0 }
 0x2df   :  { %13269 = vmatprep.subr.bf16.mxu0 %v15320_v22  ;;  %13289 = vmatprep.subr.bf16.mxu1 %v15338_v2 }
 0x2e2   :  { %13270 = vmatpush3.bf16.msra.mxu0 %v15321_v41  ;;  %13290 = vmatpush3.bf16.msra.mxu1 %v15339_v49 }
 0x2e3   :  { %13271 = vmatprep.subr.bf16.mxu0 %v15322_v27  ;;  %13291 = vmatprep.subr.bf16.mxu1 %v15340_v56 }
 0x2e4   :  { %v4210_v55 = vld [vmem:[#allocation3 + $0x1] sm:$0xf] }
 0x2e6   :  { %13272 = vmatpush3.bf16.msra.mxu0 %v15323_v19  ;;  %13292 = vmatpush3.bf16.msra.mxu1 %v15341_v10 }
 0x2e7   :  { %v13055_v42 = vpop.f32.mrb[124].mxu0  ;;  %13273 = vmatprep.subr.bf16.mxu0 %v15324_v44  ;;  %13293 = vmatprep.subr.bf16.mxu1 %v15342_v13 }
 0x2e8   :  { %v13056_v8 = vpop.f32.mrb[125].mxu0 }
 0x2e9   :  { %v13057_v7 = vadd.f32 %v13056_v8, %v13055_v42  ;;  %v13058_v5 = vpop.f32.mrb[126].mxu0 }
 0x2ea   :  { %v13059_v35 = vpop.f32.mrb[127].mxu0  ;;  %13274 = vmatpush3.bf16.msra.mxu0 %v15325_v46  ;;  %13294 = vmatpush3.bf16.msra.mxu1 %v15343_v16 }
 0x2eb   :  { %v2458_v60 = vadd.f32 %v13057_v7, %v17462_v48  ;;  %14251 = vmatprep.subr.bf16.mxu0 %v15876_v1  ;;  %13295 = vmatprep.subr.bf16.mxu1 %v15344_v11 }
 0x2ee   :  { %13296 = vmatpush3.bf16.msra.mxu1 %v15345_v28  ;;  %v4209_v28 = vld [vmem:[#allocation3] sm:$0xf] }
 0x2ef   :  { %13308 = vmatprep.subr.bf16.mxu1 %v15346_v26  ;;  %v4211_v26 = vld [vmem:[#allocation3 + $0x2] sm:$0xf] }
 0x2f5   :  { %v13077_v33 = vpop.f32.mrb[124].mxu1 }
 0x2f6   :  { %v13078_v36 = vpop.f32.mrb[125].mxu1 }
 0x2f7   :  { %v13079_v37 = vadd.f32 %v13078_v36, %v13077_v33  ;;  %v13080_v58 = vpop.f32.mrb[126].mxu1 }
 0x2f8   :  { %v13081_v34 = vpop.f32.mrb[127].mxu1 }
 0x2f9   :  { %v2498_v21 = vadd.f32 %v13079_v37, %v2458_v60 }
 0x2fb   :  { %v2503_v43 = vmax.f32 %v2498_v21, 0.0 }
 0x2fd   :  { %2504 = vst.msk [vmem:[#allocation3 + $0x6] sm:$0x3f] %vm2077_vm6, %v2503_v43 }
 0x304   :  { %v4212_v38 = vld [vmem:[#allocation3 + $0x6] sm:$0xf] }
 0x305   :  { %v14799_v18 = vpack.i.bf16 %v4210_v55, %v4212_v38  ;;  %v4214_v53 = vld [vmem:[#allocation3 + $0x8] sm:$0xf] }
 0x306   :  { %v4664_v40 = vld [vmem:[#allocation3 + $0x7] sm:$0xf] }
 0x307   :  { %v13099_v24 = vpop.f32.mrb[128].mxu0  ;;  %14800 = vrot.lane.b32.xlu0 %v14799_v18, %s15880_s28 }
 0x308   :  { %v13100_v61 = vpop.f32.mrb[129].mxu0 }
 0x309   :  { %v13101_v57 = vadd.f32 %v13100_v61, %v13099_v24  ;;  %v13102_v31 = vpop.f32.mrb[130].mxu0 }
 0x30a   :  { %v13103_v6 = vpop.f32.mrb[131].mxu0 }
 0x30b   :  { %v2884_v20 = vadd.f32 %v13101_v57, %v17462_v48 }
 0x315   :  { %v13121_v14 = vpop.f32.mrb[128].mxu1 }
 0x316   :  { %v13122_v62 = vpop.f32.mrb[129].mxu1 }
 0x317   :  { %v13123_v47 = vadd.f32 %v13122_v62, %v13121_v14  ;;  %v13124_v30 = vpop.f32.mrb[130].mxu1 }
 0x318   :  { %v13125_v59 = vpop.f32.mrb[131].mxu1 }
 0x319   :  { %v2924_v15 = vadd.f32 %v13123_v47, %v2884_v20 }
 0x31b   :  { %v2929_v23 = vmax.f32 %v2924_v15, 0.0 }
 0x31d   :  { %2930 = vst.msk [vmem:[#allocation3 + $0xc] sm:$0x3f] %vm2077_vm6, %v2929_v23 }
 0x324   :  { %v4216_v3 = vld [vmem:[#allocation3 + $0xd] sm:$0xf] }
 0x325   :  { %v4666_v9 = vld [vmem:[#allocation3 + $0xc] sm:$0xf]  ;;  %v14804_v42 = vpack.i.bf16 %v4214_v53, %v4216_v3 }
 0x326   :  { %v14809_v8 = vpack.i.bf16 %v4664_v40, %v4666_v9  ;;  %v4668_v60 = vld [vmem:[#allocation3 + $0xe] sm:$0xf] }
 0x327   :  { %v13143_v7 = vpop.f32.mrb[132].mxu0  ;;  %14805 = vrot.lane.b32.xlu1 %v14804_v42, %s15880_s28  ;;  %v5111_v58 = vld [vmem:[#allocation3 + $0xd] sm:$0xf] }
 0x328   :  { %14810 = vrot.lane.b32.xlu0 %v14809_v8, %s15880_s28  ;;  %v13144_v5 = vpop.f32.mrb[133].mxu0  ;;  %v15331_v42 = vld [vmem:[%s19878_s5 + $0x108] sm:$0xff]  }
 0x329   :  { %v13145_v12 = vadd.f32 %v13144_v5, %v13143_v7  ;;  %v13146_v35 = vpop.f32.mrb[134].mxu0 }
 0x32a   :  { %v13147_v32 = vpop.f32.mrb[135].mxu0  ;;  %v15337_v35 = vld [vmem:[%s19878_s5 + $0x118] sm:$0xff]  }
 0x32b   :  { %v3310_v29 = vadd.f32 %v13145_v12, %v17462_v48  ;;  %v15334_v12 = vld [vmem:[%s19878_s5 + $0x110] sm:$0xff]   ;;  %v15347_v32 = vld [vmem:[%s19878_s5 + $0xc0] sm:$0xff]  }
 0x335   :  { %v13165_v50 = vpop.f32.mrb[132].mxu1 }
 0x336   :  { %v13166_v45 = vpop.f32.mrb[133].mxu1 }
 0x337   :  { %v13167_v63 = vadd.f32 %v13166_v45, %v13165_v50  ;;  %v13168_v22 = vpop.f32.mrb[134].mxu1  ;;  %v4217_v50 = vld [vmem:[#allocation3 + $0xe] sm:$0xf]  ;;  %v15349_v45 = vld [vmem:[%s19878_s5 + $0x80] sm:$0xff]  }
 0x338   :  { %v13169_v41 = vpop.f32.mrb[135].mxu1  ;;  %v15353_v22 = vld [vmem:[%s19878_s5 + $0x88] sm:$0xff]  }
 0x339   :  { %v3350_v33 = vadd.f32 %v13167_v63, %v3310_v29  ;;  %v4242_v29 = vpack.c.bf16 %v4217_v50, %v4217_v50  ;;  %v15351_v63 = vld [vmem:[%s19878_s5 + $0xc8] sm:$0xff]   ;;  %v15355_v41 = vld [vmem:[%s19878_s5 + $0xd0] sm:$0xff]   ;;  %v15380_v50 = vld [vmem:[%s19878_s5] sm:$0xff]  }
 0x33b   :  { %v3355_v36 = vmax.f32 %v3350_v33, 0.0  ;;  %v15357_v33 = vld [vmem:[%s19878_s5 + $0x90] sm:$0xff]  }
 0x33d   :  { %3356 = vst.msk [vmem:[#allocation3 + $0x12] sm:$0x3f] %vm2077_vm6, %v3355_v36  ;;  %v15359_v36 = vld [vmem:[%s19878_s5 + $0xd8] sm:$0xff]  }
 0x344   :  { %v4670_v37 = vld [vmem:[#allocation3 + $0x13] sm:$0xf] }
 0x345   :  { %v5113_v34 = vld [vmem:[#allocation3 + $0x12] sm:$0xf]  ;;  %v14814_v21 = vpack.i.bf16 %v4668_v60, %v4670_v37 }
 0x346   :  { %v14819_v27 = vpack.i.bf16 %v5111_v58, %v5113_v34  ;;  %v5115_v25 = vld [vmem:[#allocation3 + $0x14] sm:$0xf]  ;;  %v15361_v58 = vld [vmem:[%s19878_s5 + $0x98] sm:$0xff]  }
 0x347   :  { %v13187_v19 = vpop.f32.mrb[136].mxu0  ;;  %14815 = vrot.lane.b32.xlu1 %v14814_v21, %s15880_s28  ;;  %v5558_v57 = vld [vmem:[#allocation3 + $0x13] sm:$0xf] }
 0x348   :  { %14820 = vrot.lane.b32.xlu0 %v14819_v27, %s15880_s28  ;;  %v13188_v43 = vpop.f32.mrb[137].mxu0 }
 0x349   :  { %v13189_v44 = vadd.f32 %v13188_v43, %v13187_v19  ;;  %v13190_v46 = vpop.f32.mrb[138].mxu0  ;;  %v15363_v19 = vld [vmem:[%s19878_s5 + $0xe0] sm:$0xff]  }
 0x34a   :  { %v13191_v39 = vpop.f32.mrb[139].mxu0  ;;  %v4213_v43 = vld [vmem:[#allocation3 + $0x7] sm:$0xf] }
 0x34b   :  { %v3736_v52 = vadd.f32 %v13189_v44, %v17462_v48  ;;  %v4215_v44 = vld [vmem:[#allocation3 + $0xc] sm:$0xf]  ;;  %v4665_v46 = vld [vmem:[#allocation3 + $0x8] sm:$0xf] }
 0x355   :  { %v13209_v51 = vpop.f32.mrb[136].mxu1 }
 0x356   :  { %v13210_v17 = vpop.f32.mrb[137].mxu1 }
 0x357   :  { %v13211_v55 = vadd.f32 %v13210_v17, %v13209_v51  ;;  %v13212_v38 = vpop.f32.mrb[138].mxu1 }
 0x358   :  { %v13213_v18 = vpop.f32.mrb[139].mxu1  ;;  %v15348_v38 = vld [vmem:[%s19878_s5] sm:$0xff]  }
 0x359   :  { %v3776_v54 = vadd.f32 %v13211_v55, %v3736_v52  ;;  %v15350_v18 = vld [vmem:[%s19878_s5 + $0x48] sm:$0xff]  }
 0x35b   :  { %v3781_v24 = vmax.f32 %v3776_v54, 0.0  ;;  %v15365_v54 = vld [vmem:[%s19878_s5 + $0xa0] sm:$0xff]  }
 0x35d   :  { %3782 = vst.msk [vmem:[#allocation3 + $0x18] sm:$0x3f] %vm2077_vm6, %v3781_v24 }
 0x364   :  { %v5117_v61 = vld [vmem:[#allocation3 + $0x19] sm:$0xf] }
 0x365   :  { %v5560_v31 = vld [vmem:[#allocation3 + $0x18] sm:$0xf]  ;;  %v14824_v4 = vpack.i.bf16 %v5115_v25, %v5117_v61  ;;  %v15367_v25 = vld [vmem:[%s19878_s5 + $0xe8] sm:$0xff]  }
 0x366   :  { %v14829_v6 = vpack.i.bf16 %v5558_v57, %v5560_v31  ;;  %v5562_v8 = vld [vmem:[#allocation3 + $0x1a] sm:$0xf]  ;;  %v15352_v61 = vld [vmem:[%s19878_s5 + $0x8] sm:$0xff]   ;;  %v15354_v57 = vld [vmem:[%s19878_s5 + $0x50] sm:$0xff]  }
 0x367   :  { %v13231_v0 = vpop.f32.mrb[140].mxu0  ;;  %14825 = vrot.lane.b32.xlu1 %v14824_v4, %s15880_s28  ;;  %v15369_v31 = vld [vmem:[%s19878_s5 + $0xa8] sm:$0xff]   ;;  %v15371_v4 = vld [vmem:[%s19878_s5 + $0xf0] sm:$0xff]  }
 0x368   :  { %14830 = vrot.lane.b32.xlu0 %v14829_v6, %s15880_s28  ;;  %v13232_v2 = vpop.f32.mrb[141].mxu0  ;;  %v15356_v6 = vld [vmem:[%s19878_s5 + $0x10] sm:$0xff]  }
 0x369   :  { %v13233_v49 = vadd.f32 %v13232_v2, %v13231_v0  ;;  %v13234_v56 = vpop.f32.mrb[142].mxu0  ;;  %v15358_v0 = vld [vmem:[%s19878_s5 + $0x58] sm:$0xff]   ;;  %v15373_v2 = vld [vmem:[%s19878_s5 + $0xb0] sm:$0xff]  }
 0x36a   :  { %v13235_v10 = vpop.f32.mrb[143].mxu0  ;;  %v15360_v56 = vld [vmem:[%s19878_s5 + $0x18] sm:$0xff]  }
 0x36b   :  { %v4162_v62 = vadd.f32 %v13233_v49, %v17462_v48  ;;  %v15328_v48 = vld [vmem:[%s19878_s5 + $0x100] sm:$0xff]   ;;  %v15375_v49 = vld [vmem:[%s19878_s5 + $0xf8] sm:$0xff]  }
 0x36c   :  { %v15362_v10 = vld [vmem:[%s19878_s5 + $0x60] sm:$0xff]  }
 0x375   :  { %v13253_v13 = vpop.f32.mrb[140].mxu1 }
 0x376   :  { %v13254_v14 = vpop.f32.mrb[141].mxu1 }
 0x377   :  { %v13255_v16 = vadd.f32 %v13254_v14, %v13253_v13  ;;  %v13256_v20 = vpop.f32.mrb[142].mxu1  ;;  %v15377_v13 = vld [vmem:[%s19878_s5 + $0xb8] sm:$0xff]   ;;  %v15378_v14 = vld [vmem:[%s19878_s5 + $0x40] sm:$0xff]  }
 0x378   :  { %v13257_v47 = vpop.f32.mrb[143].mxu1  ;;  %v15368_v20 = vld [vmem:[%s19878_s5 + $0x28] sm:$0xff]  }
 0x379   :  { %v4202_v30 = vadd.f32 %v13255_v16, %v4162_v62  ;;  %v14801_v59 = vpop.permute.xlu0 %14800  ;;  %v15364_v62 = vld [vmem:[%s19878_s5 + $0x20] sm:$0xff]   ;;  %v15366_v16 = vld [vmem:[%s19878_s5 + $0x68] sm:$0xff]   ;;  %v15370_v47 = vld [vmem:[%s19878_s5 + $0x70] sm:$0xff]  }
 0x37a   :  { %v14803_v15 = vunpack.i.h.bf16 %v14801_v59  ;;  %v14802_v23 = vunpack.i.l.bf16 %v14801_v59  ;;  %v15374_v59 = vld [vmem:[%s19878_s5 + $0x78] sm:$0xff]  }
 0x37b   :  { %v4207_v11 = vmax.f32 %v4202_v30, 0.0  ;;  %v15372_v30 = vld [vmem:[%s19878_s5 + $0x30] sm:$0xff]  }
 0x37c   :  { %v4234_v53 = vsel %vm1717_vm4, %v4209_v28, %v14803_v15  ;;  %v4235_v3 = vsel %vm1717_vm4, %v4211_v26, %v14802_v23  ;;  %v15376_v28 = vld [vmem:[%s19878_s5 + $0x38] sm:$0xff]   ;;  %v4663_v26 = vld [vmem:[#allocation3 + $0x6] sm:$0xf] }
 0x37d   :  { %4208 = vst.msk [vmem:[#allocation3 + $0x1e] sm:$0x3f] %vm2077_vm6, %v4207_v11  ;;  %v4238_v40 = vpack.c.bf16 %v4234_v53, %v4234_v53  ;;  %v4239_v9 = vpack.c.bf16 %v4235_v3, %v4235_v3 }
 0x37f   :  { %4572 = vmatprep.mubr.bf16.mxu0 %v4239_v9 }
 0x380   :  { %4573 = vmatmul.mubr.bf16.vlgmr.msra.gmra.mrb[144].mxu0 %v4238_v40 }
 0x381   :  { %14252 = vmatpush3.bf16.msra.mxu0 %v15328_v48  ;;  %14259 = vmatprep.mubr.msk.bf16.mxu0 %vm15877_vm0, %v15876_v1  ;;  %v4667_v48 = vld [vmem:[#allocation3 + $0xd] sm:$0xf] }
 0x382   :  { %14253 = vmatprep.subr.bf16.mxu0 %v15876_v1 }
 0x384   :  { %v5564_v7 = vld [vmem:[#allocation3 + $0x1f] sm:$0xf] }
 0x385   :  { %14254 = vmatpush3.bf16.msra.mxu0 %v15331_v42  ;;  %v14834_v5 = vpack.i.bf16 %v5562_v8, %v5564_v7  ;;  %v4669_v42 = vld [vmem:[#allocation3 + $0x12] sm:$0xf] }
 0x386   :  { %14255 = vmatprep.subr.bf16.mxu0 %v15876_v1 }
 0x387   :  { %14835 = vrot.lane.b32.xlu1 %v14834_v5, %s15880_s28  ;;  %v5112_v5 = vld [vmem:[#allocation3 + $0xe] sm:$0xf] }
 0x389   :  { %14256 = vmatpush3.bf16.msra.mxu0 %v15334_v12 }
 0x38a   :  { %14257 = vmatprep.subr.bf16.mxu0 %v15876_v1 }
 0x38d   :  { %14258 = vmatpush3.bf16.msra.mxu0 %v15337_v35 }
 0x38e   :  { %13330 = vmatprep.subr.bf16.mxu0 %v15347_v32  ;;  %v15379_v32 = vld [vmem:[%s19878_s5 + $0x100] sm:$0xff]  }
 0x390   :  { %14260 = vmatmul.mubr.msk.bf16.vlgmr.msra.gmra.mrb[148].mxu0 %vm1717_vm4, %v4242_v29 }
 0x391   :  { %13331 = vmatpush3.bf16.msra.mxu0 %v15349_v45 }
 0x392   :  { %13332 = vmatprep.subr.bf16.mxu0 %v15351_v63  ;;  %v15381_v63 = vld [vmem:[%s19878_s5 + $0x48] sm:$0xff]  }
 0x395   :  { %13333 = vmatpush3.bf16.msra.mxu0 %v15353_v22 }
 0x396   :  { %13334 = vmatprep.subr.bf16.mxu0 %v15355_v41  ;;  %v15382_v41 = vld [vmem:[%s19878_s5 + $0x108] sm:$0xff]  }
 0x399   :  { %v14806_v60 = vpop.permute.xlu1 %14805  ;;  %13335 = vmatpush3.bf16.msra.mxu0 %v15357_v33  ;;  %v15383_v33 = vld [vmem:[%s19878_s5 + $0x8] sm:$0xff]  }
 0x39a   :  { %v17625_v37 = vpop.permute.xlu0 %14810  ;;  %v14808_v34 = vunpack.i.h.bf16 %v14806_v60  ;;  %v14807_v21 = vunpack.i.l.bf16 %v14806_v60  ;;  %13336 = vmatprep.subr.bf16.mxu0 %v15359_v36  ;;  %v15384_v36 = vld [vmem:[%s19878_s5 + $0x50] sm:$0xff]  }
 0x39b   :  { %v14812_v27 = vunpack.i.l.bf16 %v17625_v37  ;;  %v14813_v15 = vunpack.i.h.bf16 %v17625_v37  ;;  %v15385_v60 = vld [vmem:[%s19878_s5 + $0x110] sm:$0xff]  }
 0x39c   :  { %v4236_v39 = vsel %vm1717_vm4, %v4213_v43, %v14808_v34  ;;  %v4237_v51 = vsel %vm1717_vm4, %v4215_v44, %v14807_v21  ;;  %v15386_v37 = vld [vmem:[%s19878_s5 + $0x10] sm:$0xff]   ;;  %v15388_v34 = vld [vmem:[%s19878_s5 + $0x118] sm:$0xff]   ;;  %v15392_v44 = vld [vmem:[%s19878_s5 + $0x20] sm:$0xff]  }
 0x39d   :  { %v4689_v17 = vsel %vm1717_vm4, %v4665_v46, %v14812_v27  ;;  %v4240_v52 = vpack.c.bf16 %v4236_v39, %v4236_v39  ;;  %v4241_v55 = vpack.c.bf16 %v4237_v51, %v4237_v51  ;;  %13337 = vmatpush3.bf16.msra.mxu0 %v15361_v58  ;;  %v4688_v9 = vsel %vm1717_vm4, %v4663_v26, %v14813_v15  ;;  %v15387_v58 = vld [vmem:[%s19878_s5 + $0x58] sm:$0xff]   ;;  %v15390_v27 = vld [vmem:[%s19878_s5 + $0x60] sm:$0xff]   ;;  %v4671_v43 = vld [vmem:[#allocation3 + $0x14] sm:$0xf] }
 0x39e   :  { %13338 = vmatprep.subr.bf16.mxu0 %v15363_v19  ;;  %v4693_v24 = vpack.c.bf16 %v4689_v17, %v4689_v17  ;;  %v4692_v29 = vpack.c.bf16 %v4688_v9, %v4688_v9  ;;  %v15389_v21 = vld [vmem:[%s19878_s5 + $0x18] sm:$0xff]   ;;  %v15391_v19 = vld [vmem:[%s19878_s5 + $0xc0] sm:$0xff]   ;;  %v4696_v39 = vpack.c.bf16 %v4671_v43, %v4671_v43  ;;  %v15394_v51 = vld [vmem:[%s19878_s5 + $0x68] sm:$0xff]  }
 0x39f   :  { %4612 = vmatprep.mubr.bf16.mxu1 %v4241_v55  ;;  %v15393_v46 = vld [vmem:[%s19878_s5 + $0x80] sm:$0xff]   ;;  %v15395_v17 = vld [vmem:[%s19878_s5 + $0xc8] sm:$0xff]   ;;  %v15412_v15 = vld [vmem:[%s19878_s5 + $0xf0] sm:$0xff]  }
 0x3a0   :  { %4613 = vmatmul.mubr.bf16.vlgmr.msra.gmra.mrb[144].mxu1 %v4240_v52  ;;  %v15396_v52 = vld [vmem:[%s19878_s5 + $0x28] sm:$0xff]   ;;  %v15415_v26 = vld [vmem:[%s19878_s5 + $0xf8] sm:$0xff]  }
 0x3a1   :  { %13309 = vmatpush3.bf16.msra.mxu1 %v15348_v38  ;;  %5020 = vmatprep.mubr.bf16.mxu1 %v4693_v24  ;;  %v15397_v55 = vld [vmem:[%s19878_s5 + $0x88] sm:$0xff]   ;;  %v15398_v38 = vld [vmem:[%s19878_s5 + $0x70] sm:$0xff]   ;;  %v15417_v9 = vld [vmem:[%s19878_s5 + $0x118] sm:$0xff]  }
 0x3a2   :  { %13310 = vmatprep.subr.bf16.mxu1 %v15350_v18  ;;  %13339 = vmatpush3.bf16.msra.mxu0 %v15365_v54  ;;  %v15399_v18 = vld [vmem:[%s19878_s5 + $0xd0] sm:$0xff]   ;;  %v15432_v43 = vld [vmem:[%s19878_s5 + $0x18] sm:$0xff]  }
 0x3a3   :  { %13340 = vmatprep.subr.bf16.mxu0 %v15367_v25  ;;  %v15400_v54 = vld [vmem:[%s19878_s5 + $0x30] sm:$0xff]   ;;  %v15402_v25 = vld [vmem:[%s19878_s5 + $0x78] sm:$0xff]  }
 0x3a4   :  { %v15401_v24 = vld [vmem:[%s19878_s5 + $0x90] sm:$0xff]  }
 0x3a5   :  { %13311 = vmatpush3.bf16.msra.mxu1 %v15352_v61  ;;  %v15403_v61 = vld [vmem:[%s19878_s5 + $0xd8] sm:$0xff]  }
 0x3a6   :  { %13312 = vmatprep.subr.bf16.mxu1 %v15354_v57  ;;  %13341 = vmatpush3.bf16.msra.mxu0 %v15369_v31 }
 0x3a7   :  { %13342 = vmatprep.subr.bf16.mxu0 %v15371_v4  ;;  %v15404_v4 = vld [vmem:[%s19878_s5 + $0x38] sm:$0xff]  }
 0x3a9   :  { %13313 = vmatpush3.bf16.msra.mxu1 %v15356_v6  ;;  %v15405_v6 = vld [vmem:[%s19878_s5 + $0x98] sm:$0xff]  }
 0x3aa   :  { %13314 = vmatprep.subr.bf16.mxu1 %v15358_v0  ;;  %13343 = vmatpush3.bf16.msra.mxu0 %v15373_v2  ;;  %v5110_v0 = vld [vmem:[#allocation3 + $0xc] sm:$0xf] }
 0x3ab   :  { %13344 = vmatprep.subr.bf16.mxu0 %v15375_v49  ;;  %v15406_v49 = vld [vmem:[%s19878_s5 + $0xe0] sm:$0xff]  }
 0x3ad   :  { %13315 = vmatpush3.bf16.msra.mxu1 %v15360_v56 }
 0x3ae   :  { %13316 = vmatprep.subr.bf16.mxu1 %v15362_v10  ;;  %13345 = vmatpush3.bf16.msra.mxu0 %v15377_v13  ;;  %v5116_v10 = vld [vmem:[#allocation3 + $0x18] sm:$0xf] }
 0x3af   :  { %13357 = vmatprep.subr.bf16.mxu0 %v15378_v14 }
 0x3b1   :  { %13317 = vmatpush3.bf16.msra.mxu1 %v15364_v62  ;;  %v15407_v62 = vld [vmem:[%s19878_s5 + $0xa0] sm:$0xff]  }
 0x3b2   :  { %13318 = vmatprep.subr.bf16.mxu1 %v15366_v16  ;;  %v15408_v16 = vld [vmem:[%s19878_s5 + $0x100] sm:$0xff]  }
 0x3b5   :  { %13319 = vmatpush3.bf16.msra.mxu1 %v15368_v20 }
 0x3b6   :  { %13320 = vmatprep.subr.bf16.mxu1 %v15370_v47  ;;  %v15409_v47 = vld [vmem:[%s19878_s5 + $0xe8] sm:$0xff]  }
 0x3b9   :  { %13321 = vmatpush3.bf16.msra.mxu1 %v15372_v30  ;;  %v14816_v23 = vpop.permute.xlu1 %14815  ;;  %v15410_v30 = vld [vmem:[%s19878_s5 + $0xa8] sm:$0xff]  }
 0x3ba   :  { %v17704_v11 = vpop.permute.xlu0 %14820  ;;  %v14818_v53 = vunpack.i.h.bf16 %v14816_v23  ;;  %v14817_v3 = vunpack.i.l.bf16 %v14816_v23  ;;  %13322 = vmatprep.subr.bf16.mxu1 %v15374_v59  ;;  %v15411_v59 = vld [vmem:[%s19878_s5 + $0x108] sm:$0xff]  }
 0x3bb   :  { %v14822_v40 = vunpack.i.l.bf16 %v17704_v11  ;;  %v14823_v57 = vunpack.i.h.bf16 %v17704_v11  ;;  %v15413_v11 = vld [vmem:[%s19878_s5 + $0xb0] sm:$0xff]  }
 0x3bc   :  { %v4690_v8 = vsel %vm1717_vm4, %v4667_v48, %v14818_v53  ;;  %v4691_v7 = vsel %vm1717_vm4, %v4669_v42, %v14817_v3  ;;  %v5114_v48 = vld [vmem:[#allocation3 + $0x13] sm:$0xf]  ;;  %v15418_v42 = vld [vmem:[%s19878_s5 + $0x40] sm:$0xff]  }
 0x3bd   :  { %v4694_v12 = vpack.c.bf16 %v4690_v8, %v4690_v8  ;;  %13323 = vmatpush3.bf16.msra.mxu1 %v15376_v28  ;;  %v4695_v35 = vpack.c.bf16 %v4691_v7, %v4691_v7  ;;  %v5136_v45 = vsel %vm1717_vm4, %v5112_v5, %v14822_v40  ;;  %v5135_v56 = vsel %vm1717_vm4, %v5110_v0, %v14823_v57  ;;  %v15414_v28 = vld [vmem:[%s19878_s5 + $0x110] sm:$0xff]   ;;  %v15416_v40 = vld [vmem:[%s19878_s5 + $0xb8] sm:$0xff]   ;;  %v15419_v8 = vld [vmem:[%s19878_s5 + $0xc0] sm:$0xff]  }
 0x3be   :  { %14263 = vmatprep.subr.bf16.mxu1 %v15876_v1  ;;  %v5140_v22 = vpack.c.bf16 %v5136_v45, %v5136_v45  ;;  %v5139_v20 = vpack.c.bf16 %v5135_v56, %v5135_v56  ;;  %v5118_v5 = vld [vmem:[#allocation3 + $0x1a] sm:$0xf]  ;;  %v15442_v57 = vld [vmem:[%s19878_s5 + $0x70] sm:$0xff]  }
 0x3bf   :  { %5060 = vmatprep.mubr.bf16.mxu0 %v4695_v35  ;;  %v5143_v45 = vpack.c.bf16 %v5118_v5, %v5118_v5  ;;  %v15446_v0 = vld [vmem:[%s19878_s5 + $0x78] sm:$0xff]  }
 0x3c0   :  { %5021 = vmatmul.mubr.bf16.vlgmr.msra.gmra.mrb[148].mxu1 %v4692_v29  ;;  %5061 = vmatmul.mubr.bf16.vlgmr.msra.gmra.mrb[152].mxu0 %v4694_v12  ;;  %v5559_v12 = vld [vmem:[#allocation3 + $0x14] sm:$0xf]  ;;  %v15421_v29 = vld [vmem:[%s19878_s5 + $0x80] sm:$0xff]   ;;  %v17996_v5 = vld [vmem:[%s19873_s0 + $0x98] sm:$0xff]  }
 0x3c1   :  { %14264 = vmatpush3.bf16.msra.mxu1 %v15379_v32  ;;  %13358 = vmatpush3.bf16.msra.mxu0 %v15380_v50  ;;  %v15420_v32 = vld [vmem:[%s19878_s5] sm:$0xff]  }
 0x3c2   :  { %5467 = vmatprep.mubr.bf16.mxu0 %v5140_v22  ;;  %14265 = vmatprep.subr.bf16.mxu1 %v15876_v1 }
 0x3c3   :  { %13359 = vmatprep.subr.bf16.mxu0 %v15381_v63  ;;  %14271 = vmatprep.mubr.msk.bf16.mxu1 %vm15877_vm0, %v15876_v1  ;;  %v15422_v63 = vld [vmem:[%s19878_s5 + $0x48] sm:$0xff]  }
 0x3c5   :  { %14266 = vmatpush3.bf16.msra.mxu1 %v15382_v41  ;;  %13360 = vmatpush3.bf16.msra.mxu0 %v15383_v33  ;;  %v15423_v41 = vld [vmem:[%s19878_s5 + $0xc8] sm:$0xff]  }
 0x3c6   :  { %14267 = vmatprep.subr.bf16.mxu1 %v15876_v1  ;;  %13361 = vmatprep.subr.bf16.mxu0 %v15384_v36  ;;  %v15424_v33 = vld [vmem:[%s19878_s5 + $0x8] sm:$0xff]  }
 0x3c7   :  { %v15425_v36 = vld [vmem:[%s19878_s5 + $0x88] sm:$0xff]  }
 0x3c9   :  { %14268 = vmatpush3.bf16.msra.mxu1 %v15385_v60  ;;  %13362 = vmatpush3.bf16.msra.mxu0 %v15386_v37  ;;  %v15426_v60 = vld [vmem:[%s19878_s5 + $0x50] sm:$0xff]  }
 0x3ca   :  { %14269 = vmatprep.subr.bf16.mxu1 %v15876_v1  ;;  %13363 = vmatprep.subr.bf16.mxu0 %v15387_v58  ;;  %v15427_v37 = vld [vmem:[%s19878_s5 + $0xd0] sm:$0xff]  }
 0x3cb   :  { %v15428_v58 = vld [vmem:[%s19878_s5 + $0x10] sm:$0xff]  }
 0x3cd   :  { %14270 = vmatpush3.bf16.msra.mxu1 %v15388_v34  ;;  %13364 = vmatpush3.bf16.msra.mxu0 %v15389_v21  ;;  %v15429_v34 = vld [vmem:[%s19878_s5 + $0x90] sm:$0xff]   ;;  %v15430_v21 = vld [vmem:[%s19878_s5 + $0x58] sm:$0xff]  }
 0x3ce   :  { %13365 = vmatprep.subr.bf16.mxu0 %v15390_v27  ;;  %13379 = vmatprep.subr.bf16.mxu1 %v15391_v19  ;;  %v15431_v27 = vld [vmem:[%s19878_s5 + $0xd8] sm:$0xff]  }
 0x3d0   :  { %14272 = vmatmul.mubr.msk.bf16.vlgmr.msra.gmra.mrb[152].mxu1 %vm1717_vm4, %v4696_v39  ;;  %v15434_v39 = vld [vmem:[%s19878_s5 + $0x60] sm:$0xff]  }
 0x3d1   :  { %13366 = vmatpush3.bf16.msra.mxu0 %v15392_v44  ;;  %13380 = vmatpush3.bf16.msra.mxu1 %v15393_v46  ;;  %v15433_v46 = vld [vmem:[%s19878_s5 + $0x98] sm:$0xff]  }
 0x3d2   :  { %13367 = vmatprep.subr.bf16.mxu0 %v15394_v51  ;;  %13381 = vmatprep.subr.bf16.mxu1 %v15395_v17  ;;  %v15435_v51 = vld [vmem:[%s19878_s5 + $0xe0] sm:$0xff]  }
 0x3d3   :  { %v5563_v17 = vld [vmem:[#allocation3 + $0x1e] sm:$0xf] }
 0x3d5   :  { %13368 = vmatpush3.bf16.msra.mxu0 %v15396_v52  ;;  %13382 = vmatpush3.bf16.msra.mxu1 %v15397_v55 }
 0x3d6   :  { %13369 = vmatprep.subr.bf16.mxu0 %v15398_v38  ;;  %13383 = vmatprep.subr.bf16.mxu1 %v15399_v18  ;;  %v15436_v38 = vld [vmem:[%s19878_s5 + $0x20] sm:$0xff]  }
 0x3d7   :  { %v15437_v18 = vld [vmem:[%s19878_s5 + $0xa0] sm:$0xff]  }
 0x3d9   :  { %13370 = vmatpush3.bf16.msra.mxu0 %v15400_v54  ;;  %13384 = vmatpush3.bf16.msra.mxu1 %v15401_v24  ;;  %v14826_v31 = vpop.permute.xlu1 %14825  ;;  %v15438_v54 = vld [vmem:[%s19878_s5 + $0x68] sm:$0xff]  }
 0x3da   :  { %v14827_v2 = vunpack.i.l.bf16 %v14826_v31  ;;  %13371 = vmatprep.subr.bf16.mxu0 %v15402_v25  ;;  %13385 = vmatprep.subr.bf16.mxu1 %v15403_v61  ;;  %v17830_v23 = vpop.permute.xlu0 %14830  ;;  %v14828_v53 = vunpack.i.h.bf16 %v14826_v31  ;;  %v15439_v24 = vld [vmem:[%s19878_s5 + $0xe8] sm:$0xff]   ;;  %v15443_v31 = vld [vmem:[%s19878_s5 + $0xf0] sm:$0xff]  }
 0x3db   :  { %v14832_v3 = vunpack.i.l.bf16 %v17830_v23  ;;  %v15440_v25 = vld [vmem:[%s19878_s5 + $0x28] sm:$0xff]  }
 0x3dc   :  { %v5138_v13 = vsel %vm1717_vm4, %v5116_v10, %v14827_v2  ;;  %v5137_v7 = vsel %vm1717_vm4, %v5114_v48, %v14828_v53  ;;  %v15441_v61 = vld [vmem:[%s19878_s5 + $0xa8] sm:$0xff]   ;;  %v14833_v2 = vunpack.i.h.bf16 %v17830_v23  ;;  %v15448_v10 = vld [vmem:[%s19878_s5 + $0x38] sm:$0xff]   ;;  %v17968_v23 = vld [vmem:[%s19873_s0 + $0x90] sm:$0xff]  }
 0x3dd   :  { %13372 = vmatpush3.bf16.msra.mxu0 %v15404_v4  ;;  %13386 = vmatpush3.bf16.msra.mxu1 %v15405_v6  ;;  %v5142_v14 = vpack.c.bf16 %v5138_v13, %v5138_v13  ;;  %v5583_v35 = vsel %vm1717_vm4, %v5559_v12, %v14832_v3  ;;  %v5141_v50 = vpack.c.bf16 %v5137_v7, %v5137_v7  ;;  %v15444_v4 = vld [vmem:[%s19878_s5 + $0x30] sm:$0xff]   ;;  %v15453_v53 = vld [vmem:[%s19874_s1 + $0x20] sm:$0xff]   ;;  %v15458_v12 = vld [vmem:[%s19878_s5 + $0x118] sm:$0xff]  }
 0x3de   :  { %13387 = vmatprep.subr.bf16.mxu1 %v15406_v49  ;;  %14275 = vmatprep.subr.bf16.mxu0 %v15876_v1  ;;  %v5587_v22 = vpack.c.bf16 %v5583_v35, %v5583_v35  ;;  %v15445_v6 = vld [vmem:[%s19878_s5 + $0xb0] sm:$0xff]   ;;  %v15447_v49 = vld [vmem:[%s19878_s5 + $0xf8] sm:$0xff]  }
 0x3df   :  { %5507 = vmatprep.mubr.bf16.mxu1 %v5142_v14  ;;  %v5557_v13 = vld [vmem:[#allocation3 + $0x12] sm:$0xf]  ;;  %v15449_v14 = vld [vmem:[%s19878_s5 + $0xb8] sm:$0xff]  }
 0x3e0   :  { %5468 = vmatmul.mubr.bf16.vlgmr.msra.gmra.mrb[156].mxu0 %v5139_v20  ;;  %v5561_v20 = vld [vmem:[#allocation3 + $0x19] sm:$0xf]  ;;  %v15454_v48 = vld [vmem:[%s19878_s5 + $0x110] sm:$0xff]  }
 0x3e1   :  { %13388 = vmatpush3.bf16.msra.mxu1 %v15407_v62  ;;  %14276 = vmatpush3.bf16.msra.mxu0 %v15408_v16  ;;  %v17954_v62 = vld [vmem:[%s19873_s0 + $0x88] sm:$0xff]   ;;  %v5582_v16 = vsel %vm1717_vm4, %v5557_v13, %v14833_v2  ;;  %v15469_v13 = vld [vmem:[%s19873_s0 + $0xc0] sm:$0xff]  }
 0x3e2   :  { %13389 = vmatprep.subr.bf16.mxu1 %v15409_v47  ;;  %14277 = vmatprep.subr.bf16.mxu0 %v15876_v1  ;;  %v6126_v3 = vshrl.u32 %v17954_v62, 16 }
 0x3e3   :  { %14283 = vmatprep.mubr.msk.bf16.mxu0 %vm15877_vm0, %v15876_v1 }
 0x3e5   :  { %13390 = vmatpush3.bf16.msra.mxu1 %v15410_v30  ;;  %14278 = vmatpush3.bf16.msra.mxu0 %v15411_v59  ;;  %v15450_v30 = vld [vmem:[%s19878_s5 + $0x100] sm:$0xff]   ;;  %v5586_v59 = vpack.c.bf16 %v5582_v16, %v5582_v16  ;;  %v6181_v16 = vshll.u32 %v15469_v13, 16 }
 0x3e6   :  { %13391 = vmatprep.subr.bf16.mxu1 %v15412_v15  ;;  %14279 = vmatprep.subr.bf16.mxu0 %v15876_v1  ;;  %v15451_v15 = vld [vmem:[%s19874_s1 + $0x18] sm:$0xff]  }
 0x3e9   :  { %13392 = vmatpush3.bf16.msra.mxu1 %v15413_v11  ;;  %14280 = vmatpush3.bf16.msra.mxu0 %v15414_v28  ;;  %v6128_v11 = vshll.u32 %v17954_v62, 16 }
 0x3ea   :  { %13393 = vmatprep.subr.bf16.mxu1 %v15415_v26  ;;  %14281 = vmatprep.subr.bf16.mxu0 %v15876_v1  ;;  %v15452_v26 = vld [vmem:[%s19878_s5 + $0x108] sm:$0xff]  }
 0x3ed   :  { %13394 = vmatpush3.bf16.msra.mxu1 %v15416_v40  ;;  %14282 = vmatpush3.bf16.msra.mxu0 %v15417_v9  ;;  %v6130_v40 = vrot.slane %v6128_v11, 1  ;;  %v6133_v9 = vshll.u32 %v17968_v23, 16 }
 0x3ee   :  { %13406 = vmatprep.subr.bf16.mxu1 %v15418_v42  ;;  %13428 = vmatprep.subr.bf16.mxu0 %v15419_v8  ;;  %v15455_v42 = vld [vmem:[%s19874_s1 + $0x28] sm:$0xff]  }
 0x3ef   :  { %v6131_v8 = vor.u32 %v6130_v40, %v6126_v3  ;;  %v6135_v7 = vrot.slane %v6133_v9, 1 }
 0x3f0   :  { %5508 = vmatmul.mubr.bf16.vlgmr.msra.gmra.mrb[156].mxu1 %v5141_v50  ;;  %14284 = vmatmul.mubr.msk.bf16.vlgmr.msra.gmra.mrb[160].mxu0 %vm1717_vm4, %v5143_v45  ;;  %v6141_v50 = vshll.u32 %v17996_v5, 16  ;;  %v5565_v45 = vld [vmem:[#allocation3 + $0x20] sm:$0xf] }
 0x3f1   :  { %13407 = vmatpush3.bf16.msra.mxu1 %v15420_v32  ;;  %5914 = vmatprep.mubr.bf16.mxu1 %v5587_v22  ;;  %v6136_v35 = vsel %vm153_vm2, %v6131_v8, %v6135_v7  ;;  %v6137_v32 = vshrl.u32 %v17968_v23, 16  ;;  %v5590_v22 = vpack.c.bf16 %v5565_v45, %v5565_v45 }
 0x3f2   :  { %13429 = vmatpush3.bf16.msra.mxu0 %v15421_v29  ;;  %13408 = vmatprep.subr.bf16.mxu1 %v15422_v63  ;;  %v15463_v29 = vld [vmem:[%s19874_s1 + $0x30] sm:$0xff]   ;;  %v15459_v63 = vld [vmem:[%s19874_s1] sm:$0xff]  }
 0x3f3   :  { %13430 = vmatprep.subr.bf16.mxu0 %v15423_v41  ;;  %v6139_v41 = vor.u32 %v6137_v32, %v6135_v7 }
 0x3f5   :  { %13409 = vmatpush3.bf16.msra.mxu1 %v15424_v33  ;;  %v6143_v33 = vrot.slane %v6141_v50, 1 }
 0x3f6   :  { %13431 = vmatpush3.bf16.msra.mxu0 %v15425_v36  ;;  %13410 = vmatprep.subr.bf16.mxu1 %v15426_v60  ;;  %v18020_v36 = vld [vmem:[%s19873_s0 + $0xa0] sm:$0xff]   ;;  %v15470_v60 = vld [vmem:[%s19874_s1 + $0x38] sm:$0xff]  }
 0x3f7   :  { %13432 = vmatprep.subr.bf16.mxu0 %v15427_v37  ;;  %v15461_v37 = vld [vmem:[%s19874_s1 + $0x8] sm:$0xff]  }
 0x3f9   :  { %13411 = vmatpush3.bf16.msra.mxu1 %v15428_v58  ;;  %v14836_v19 = vpop.permute.xlu1 %14835  ;;  %v6144_v58 = vsel %vm153_vm2, %v6139_v41, %v6143_v33 }
 0x3fa   :  { %13433 = vmatpush3.bf16.msra.mxu0 %v15429_v34  ;;  %v14837_v44 = vunpack.i.l.bf16 %v14836_v19  ;;  %13412 = vmatprep.subr.bf16.mxu1 %v15430_v21  ;;  %v14838_v56 = vunpack.i.h.bf16 %v14836_v19  ;;  %v6145_v34 = vshrl.u32 %v17996_v5, 16  ;;  %v6149_v21 = vshll.u32 %v18020_v36, 16  ;;  %v15462_v19 = vld [vmem:[%s19874_s1 + $0x10] sm:$0xff]  }
 0x3fb   :  { %13434 = vmatprep.subr.bf16.mxu0 %v15431_v27  ;;  %v15477_v27 = vld [vmem:[%s19874_s1 + $0x40] sm:$0xff]  }
 0x3fc   :  { %v5585_v52 = vsel %vm1717_vm4, %v5563_v17, %v14837_v44  ;;  %v5584_v47 = vsel %vm1717_vm4, %v5561_v20, %v14838_v56  ;;  %v6151_v44 = vrot.slane %v6149_v21, 1  ;;  %v6153_v17 = vshrl.u32 %v18020_v36, 16 }
 0x3fd   :  { %13413 = vmatpush3.bf16.msra.mxu1 %v15432_v43  ;;  %v5589_v55 = vpack.c.bf16 %v5585_v52, %v5585_v52  ;;  %v5588_v28 = vpack.c.bf16 %v5584_v47, %v5584_v47  ;;  %v6147_v43 = vor.u32 %v6145_v34, %v6143_v33  ;;  %v6183_v47 = vrot.slane %v6181_v16, 1 }
 0x3fe   :  { %13435 = vmatpush3.bf16.msra.mxu0 %v15433_v46  ;;  %13414 = vmatprep.subr.bf16.mxu1 %v15434_v39  ;;  %v15466_v46 = vld [vmem:[%s19873_s0 + $0xa8] sm:$0xff]  }
 0x3ff   :  { %13436 = vmatprep.subr.bf16.mxu0 %v15435_v51  ;;  %5954 = vmatprep.mubr.bf16.mxu0 %v5589_v55  ;;  %v15465_v39 = vld [vmem:[%s19874_s1 + $0x48] sm:$0xff]   ;;  %v6152_v51 = vsel %vm153_vm2, %v6147_v43, %v6151_v44  ;;  %v6157_v52 = vshll.u32 %v15466_v46, 16  ;;  %v15472_v55 = vld [vmem:[%s19874_s1 + $0x50] sm:$0xff]  }
 0x401   :  { %13415 = vmatpush3.bf16.msra.mxu1 %v15436_v38  ;;  %v6155_v38 = vor.u32 %v6153_v17, %v6151_v44  ;;  %v15478_v17 = vld [vmem:[%s19873_s0 + $0xf0] sm:$0xff]  }
 0x402   :  { %13437 = vmatpush3.bf16.msra.mxu0 %v15437_v18  ;;  %13416 = vmatprep.subr.bf16.mxu1 %v15438_v54  ;;  %v6159_v18 = vrot.slane %v6157_v52, 1  ;;  %v15467_v54 = vld [vmem:[%s19873_s0 + $0xb0] sm:$0xff]   ;;  %v18160_v52 = vld [vmem:[%s19879_s6] ss:$0 sm:$0xff] }
 0x403   :  { %13438 = vmatprep.subr.bf16.mxu0 %v15439_v24  ;;  %v6169_v2 = vshrl.u32 %v15467_v54, 16 }
 0x404   :  { %v6160_v24 = vsel %vm153_vm2, %v6155_v38, %v6159_v18 }
 0x405   :  { %13417 = vmatpush3.bf16.msra.mxu1 %v15440_v25  ;;  %v6161_v25 = vshrl.u32 %v15466_v46, 16 }
 0x406   :  { %13439 = vmatpush3.bf16.msra.mxu0 %v15441_v61  ;;  %13418 = vmatprep.subr.bf16.mxu1 %v15442_v57  ;;  %v6165_v61 = vshll.u32 %v15467_v54, 16  ;;  %v15479_v57 = vld [vmem:[%s19874_s1 + $0x58] sm:$0xff]  }
 0x407   :  { %13440 = vmatprep.subr.bf16.mxu0 %v15443_v31  ;;  %v6163_v31 = vor.u32 %v6161_v25, %v6159_v18  ;;  %v6229_v18 = vshll.u32 %v15478_v17, 16 }
 0x409   :  { %13419 = vmatpush3.bf16.msra.mxu1 %v15444_v4  ;;  %v6167_v4 = vrot.slane %v6165_v61, 1 }
 0x40a   :  { %13441 = vmatpush3.bf16.msra.mxu0 %v15445_v6  ;;  %13420 = vmatprep.subr.bf16.mxu1 %v15446_v0  ;;  %v15468_v6 = vld [vmem:[%s19873_s0 + $0xb8] sm:$0xff]  }
 0x40b   :  { %13442 = vmatprep.subr.bf16.mxu0 %v15447_v49  ;;  %v6168_v0 = vsel %vm153_vm2, %v6163_v31, %v6167_v4  ;;  %v6173_v49 = vshll.u32 %v15468_v6, 16  ;;  %v6171_v56 = vor.u32 %v6169_v2, %v6167_v4 }
 0x40d   :  { %13421 = vmatpush3.bf16.msra.mxu1 %v15448_v10  ;;  %v6175_v10 = vrot.slane %v6173_v49, 1 }
 0x40e   :  { %13443 = vmatpush3.bf16.msra.mxu0 %v15449_v14  ;;  %14287 = vmatprep.subr.bf16.mxu1 %v15876_v1 }
 0x40f   :  { %14299 = vmatprep.subr.bf16.mxu0 %v15876_v1  ;;  %v6176_v14 = vsel %vm153_vm2, %v6171_v56, %v6175_v10 }
 0x410   :  { %5915 = vmatmul.mubr.bf16.vlgmr.msra.gmra.mrb[160].mxu1 %v5586_v59 }
 0x411   :  { %5955 = vmatmul.mubr.bf16.vlgmr.msra.gmra.mrb[164].mxu0 %v5588_v28  ;;  %14288 = vmatpush3.bf16.msra.mxu1 %v15450_v30  ;;  %v15471_v30 = vld [vmem:[%s19873_s0 + $0xc8] sm:$0xff]  }
 0x412   :  { %14300 = vmatpush3.bf16.msra.mxu0 %v15451_v15  ;;  %14289 = vmatprep.subr.bf16.mxu1 %v15876_v1  ;;  %v6185_v15 = vshrl.u32 %v15469_v13, 16  ;;  %v6193_v3 = vshrl.u32 %v15471_v30, 16 }
 0x413   :  { %14301 = vmatprep.subr.bf16.mxu0 %v15876_v1  ;;  %14305 = vmatprep.mubr.msk.bf16.mxu0 %vm15877_vm0, %v15876_v1 }
 0x414   :  { %14295 = vmatprep.mubr.msk.bf16.mxu1 %vm15877_vm0, %v15876_v1  ;;  %v6187_v11 = vor.u32 %v6185_v15, %v6183_v47 }
 0x415   :  { %14290 = vmatpush3.bf16.msra.mxu1 %v15452_v26  ;;  %v15473_v26 = vld [vmem:[%s19873_s0 + $0xd0] sm:$0xff]  }
 0x416   :  { %14302 = vmatpush3.bf16.msra.mxu0 %v15453_v53  ;;  %14291 = vmatprep.subr.bf16.mxu1 %v15876_v1  ;;  %v6197_v40 = vshll.u32 %v15473_v26, 16  ;;  %v6201_v50 = vshrl.u32 %v15473_v26, 16 }
 0x417   :  { %14303 = vmatprep.subr.bf16.mxu0 %v15876_v1 }
 0x419   :  { %14292 = vmatpush3.bf16.msra.mxu1 %v15454_v48 }
 0x41a   :  { %14304 = vmatpush3.bf16.msra.mxu0 %v15455_v42  ;;  %14293 = vmatprep.subr.bf16.mxu1 %v15876_v1 }
 0x41b   :  { %14431 = vmatprep.subr.bf16.mxu0 %v15876_v1 }
 0x41d   :  { %14306 = vmatmul.mubr.msk.bf16.vlgmr.msra.gmra.mrb[168].mxu0 %vm296_vm1, %v6136_v35  ;;  %14294 = vmatpush3.bf16.msra.mxu1 %v15458_v12  ;;  %v6199_v12 = vrot.slane %v6197_v40, 1  ;;  %v15474_v35 = vld [vmem:[%s19873_s0 + $0xd8] sm:$0xff]  }
 0x41e   :  { %14365 = vmatprep.subr.bf16.mxu1 %v15876_v1  ;;  %14309 = vmatprep.mubr.msk.bf16.mxu0 %vm15877_vm0, %v15876_v1  ;;  %v6205_v45 = vshll.u32 %v15474_v35, 16  ;;  %v6209_v33 = vshrl.u32 %v15474_v35, 16 }
 0x41f   :  { %14432 = vmatpush3.bf16.msra.mxu0 %v15463_v29  ;;  %v6203_v29 = vor.u32 %v6201_v50, %v6199_v12 }
 0x420   :  { %14296 = vmatmul.mubr.msk.bf16.vlgmr.msra.gmra.mrb[164].mxu1 %vm1717_vm4, %v5590_v22  ;;  %14433 = vmatprep.subr.bf16.mxu0 %v15876_v1  ;;  %v15475_v22 = vld [vmem:[%s19873_s0 + $0xe0] sm:$0xff]  }
 0x421   :  { %14366 = vmatpush3.bf16.msra.mxu1 %v15459_v63  ;;  %14371 = vmatprep.mubr.msk.bf16.mxu1 %vm15877_vm0, %v15876_v1  ;;  %v6207_v63 = vrot.slane %v6205_v45, 1  ;;  %v6217_v44 = vshrl.u32 %v15475_v22, 16  ;;  %v15483_v45 = vld [vmem:[%s19873_s0 + $0x98] sm:$0xff]  }
 0x422   :  { %14367 = vmatprep.subr.bf16.mxu1 %v15876_v1 }
 0x423   :  { %14434 = vmatpush3.bf16.msra.mxu0 %v15470_v60  ;;  %v6208_v41 = vsel %vm153_vm2, %v6203_v29, %v6207_v63  ;;  %v6211_v21 = vor.u32 %v6209_v33, %v6207_v63 }
 0x424   :  { %14435 = vmatprep.subr.bf16.mxu0 %v15876_v1 }
 0x425   :  { %14310 = vmatmul.mubr.msk.bf16.gmra.mrb[172].mxu0 %vm296_vm1, %v6144_v58  ;;  %14368 = vmatpush3.bf16.msra.mxu1 %v15461_v37 }
 0x426   :  { %14369 = vmatprep.subr.bf16.mxu1 %v15876_v1  ;;  %14313 = vmatprep.mubr.msk.bf16.mxu0 %vm15877_vm0, %v15876_v1 }
 0x427   :  { %14436 = vmatpush3.bf16.msra.mxu0 %v15477_v27 }
 0x429   :  { %14370 = vmatpush3.bf16.msra.mxu1 %v15462_v19  ;;  %v15476_v19 = vld [vmem:[%s19873_s0 + $0xe8] sm:$0xff]  }
 0x42a   :  { %14497 = vmatprep.subr.bf16.mxu1 %v15876_v1  ;;  %v6225_v38 = vshrl.u32 %v15476_v19, 16 }
 0x42c   :  { %14372 = vmatmul.mubr.msk.bf16.vlgmr.msra.gmra.mrb[168].mxu1 %vm296_vm1, %v17954_v62  ;;  %v6177_v62 = vshrl.u32 %v15468_v6, 16 }
 0x42d   :  { %14314 = vmatmul.mubr.msk.bf16.gmra.mrb[176].mxu0 %vm296_vm1, %v6152_v51  ;;  %14498 = vmatpush3.bf16.msra.mxu1 %v15465_v39 }
 0x42e   :  { %14317 = vmatprep.mubr.msk.bf16.mxu0 %vm15877_vm0, %v15876_v1  ;;  %14375 = vmatprep.mubr.msk.bf16.mxu1 %vm15877_vm0, %v15876_v1  ;;  %v6179_v20 = vor.u32 %v6177_v62, %v6175_v10  ;;  %v6233_v10 = vshrl.u32 %v15478_v17, 16 }
 0x42f   :  { %14499 = vmatprep.subr.bf16.mxu1 %v15876_v1 }
 0x430   :  { %v6184_v59 = vsel %vm153_vm2, %v6179_v20, %v6183_v47  ;;  %v15481_v20 = vld [vmem:[%s19873_s0 + $0x100] ss:$0 sps:$4 sm:$0x11]  }
 0x431   :  { %14500 = vmatpush3.bf16.msra.mxu1 %v15472_v55 }
 0x432   :  { %14501 = vmatprep.subr.bf16.mxu1 %v15876_v1 }
 0x434   :  { %14376 = vmatmul.mubr.msk.bf16.gmra.mrb[172].mxu1 %vm296_vm1, %v17968_v23  ;;  %v6189_v23 = vshll.u32 %v15471_v30, 16 }
 0x435   :  { %14318 = vmatmul.mubr.msk.bf16.gmra.mrb[180].mxu0 %vm296_vm1, %v6160_v24  ;;  %14379 = vmatprep.mubr.msk.bf16.mxu1 %vm15877_vm0, %v15876_v1 }
 0x436   :  { %14321 = vmatprep.mubr.msk.bf16.mxu0 %vm15877_vm0, %v15876_v1  ;;  %14502 = vmatpush3.bf16.msra.mxu1 %v15479_v57  ;;  %v6191_v28 = vrot.slane %v6189_v23, 1 }
 0x438   :  { %v6192_v53 = vsel %vm153_vm2, %v6187_v11, %v6191_v28 }
 0x43c   :  { %14380 = vmatmul.mubr.msk.bf16.gmra.mrb[176].mxu1 %vm296_vm1, %v17996_v5  ;;  %v6195_v5 = vor.u32 %v6193_v3, %v6191_v28  ;;  %v15482_v28 = vld [vmem:[%s19873_s0 + $0x90] sm:$0xff]  }
 0x43d   :  { %14322 = vmatmul.mubr.msk.bf16.gmra.mrb[184].mxu0 %vm296_vm1, %v6168_v0  ;;  %14383 = vmatprep.mubr.msk.bf16.mxu1 %vm15877_vm0, %v15876_v1  ;;  %v15480_v0 = vld [vmem:[%s19873_s0 + $0xf8] sm:$0xff]  }
 0x43e   :  { %14325 = vmatprep.mubr.msk.bf16.mxu0 %vm15877_vm0, %v15876_v1  ;;  %v6200_v32 = vsel %vm153_vm2, %v6195_v5, %v6199_v12  ;;  %v15486_v5 = vld [vmem:[%s19873_s0 + $0x98] sm:$0xff]  }
 0x444   :  { %14384 = vmatmul.mubr.msk.bf16.gmra.mrb[180].mxu1 %vm296_vm1, %v18020_v36  ;;  %v6213_v36 = vshll.u32 %v15475_v22, 16 }
 0x445   :  { %14326 = vmatmul.mubr.msk.bf16.gmra.mrb[188].mxu0 %vm296_vm1, %v6176_v14  ;;  %14387 = vmatprep.mubr.msk.bf16.mxu1 %vm15877_vm0, %v15876_v1 }
 0x446   :  { %14329 = vmatprep.mubr.msk.bf16.mxu0 %vm15877_vm0, %v15876_v1  ;;  %v6215_v27 = vrot.slane %v6213_v36, 1 }
 0x448   :  { %v6216_v43 = vsel %vm153_vm2, %v6211_v21, %v6215_v27  ;;  %v6219_v39 = vor.u32 %v6217_v44, %v6215_v27 }
 0x44c   :  { %14388 = vmatmul.mubr.msk.bf16.gmra.mrb[184].mxu1 %vm296_vm1, %v15466_v46  ;;  %v6221_v46 = vshll.u32 %v15476_v19, 16 }
 0x44d   :  { %14330 = vmatmul.mubr.msk.bf16.gmra.mrb[192].mxu0 %vm296_vm1, %v6184_v59  ;;  %14391 = vmatprep.mubr.msk.bf16.mxu1 %vm15877_vm0, %v15876_v1  ;;  %v6245_v59 = vshll.u32 %v15481_v20, 16  ;;  %v15491_v20 = vld [vmem:[%s19873_s0 + $0xb8] sm:$0xff]  }
 0x44e   :  { %14333 = vmatprep.mubr.msk.bf16.mxu0 %vm15877_vm0, %v15876_v1  ;;  %v6223_v51 = vrot.slane %v6221_v46, 1 }
 0x44f   :  { %v6247_v23 = vrot.slane %v6245_v59, 1 }
 0x450   :  { %v6224_v55 = vsel %vm153_vm2, %v6219_v39, %v6223_v51  ;;  %v6227_v4 = vor.u32 %v6225_v38, %v6223_v51  ;;  %v15490_v51 = vld [vmem:[%s19873_s0 + $0xa8] sm:$0xff]  }
 0x451   :  { %v15487_v38 = vld [vmem:[%s19873_s0 + $0xa8] sm:$0xff]  }
 0x453   :  { %v13275_v9 = vpop.f32.mrb[144].mxu0 }
 0x454   :  { %14392 = vmatmul.mubr.msk.bf16.gmra.mrb[188].mxu1 %vm296_vm1, %v15467_v54  ;;  %v13276_v48 = vpop.f32.mrb[145].mxu0 }
 0x455   :  { %14334 = vmatmul.mubr.msk.bf16.gmra.mrb[196].mxu0 %vm296_vm1, %v6192_v53  ;;  %v13277_v42 = vadd.f32 %v13276_v48, %v13275_v9  ;;  %v13278_v8 = vpop.f32.mrb[146].mxu0  ;;  %14395 = vmatprep.mubr.msk.bf16.mxu1 %vm15877_vm0, %v15876_v1 }
 0x456   :  { %v13279_v7 = vpop.f32.mrb[147].mxu0  ;;  %14337 = vmatprep.mubr.msk.bf16.mxu0 %vm15877_vm0, %v15876_v1 }
 0x457   :  { %v4575_v25 = vadd.f32 %v13277_v42, %v18160_v52 }
 0x45c   :  { %14396 = vmatmul.mubr.msk.bf16.gmra.mrb[192].mxu1 %vm296_vm1, %v15468_v6  ;;  %v6231_v6 = vrot.slane %v6229_v18, 1 }
 0x45d   :  { %14338 = vmatmul.mubr.msk.bf16.gmra.mrb[200].mxu0 %vm296_vm1, %v6200_v32  ;;  %14399 = vmatprep.mubr.msk.bf16.mxu1 %vm15877_vm0, %v15876_v1 }
 0x45e   :  { %14341 = vmatprep.mubr.msk.bf16.mxu0 %vm15877_vm0, %v15876_v1  ;;  %v6232_v56 = vsel %vm153_vm2, %v6227_v4, %v6231_v6  ;;  %v6235_v62 = vor.u32 %v6233_v10, %v6231_v6  ;;  %v7166_v6 = vshrl.u32 %v15490_v51, 16 }
 0x463   :  { %v4654_v60 = vpop.f32.mrb[148].mxu0 }
 0x464   :  { %v14261_v37 = vpop.f32.mrb[149].mxu0  ;;  %14400 = vmatmul.mubr.msk.bf16.gmra.mrb[196].mxu1 %vm296_vm1, %v15469_v13  ;;  %v6237_v13 = vshll.u32 %v15480_v0, 16 }
 0x465   :  { %14342 = vmatmul.mubr.msk.bf16.gmra.mrb[204].mxu0 %vm296_vm1, %v6208_v41  ;;  %v4657_v58 = vpop.f32.mrb[150].mxu0  ;;  %14403 = vmatprep.mubr.msk.bf16.mxu1 %vm15877_vm0, %v15876_v1  ;;  %v7146_v41 = vshll.u32 %v15486_v5, 16  ;;  %v15484_v37 = vld [vmem:[%s19873_s0 + $0xa0] sm:$0xff]  }
 0x466   :  { %v14262_v34 = vpop.f32.mrb[151].mxu0  ;;  %14345 = vmatprep.mubr.msk.bf16.mxu0 %vm15877_vm0, %v15876_v1  ;;  %v6239_v16 = vrot.slane %v6237_v13, 1 }
 0x467   :  { %v7148_v36 = vrot.slane %v7146_v41, 1  ;;  %v7150_v34 = vshrl.u32 %v15486_v5, 16  ;;  %v15495_v41 = vld [vmem:[%s19873_s0 + $0xc8] sm:$0xff]  }
 0x468   :  { %v6240_v47 = vsel %vm153_vm2, %v6235_v62, %v6239_v16  ;;  %v15494_v62 = vld [vmem:[%s19873_s0 + $0xb8] sm:$0xff]  }
 0x469   :  { %v7152_v46 = vor.u32 %v7150_v34, %v7148_v36  ;;  %v7178_v59 = vshll.u32 %v15494_v62, 16 }
 0x46c   :  { %14404 = vmatmul.mubr.msk.bf16.gmra.mrb[200].mxu1 %vm296_vm1, %v15471_v30  ;;  %v6241_v30 = vshrl.u32 %v15480_v0, 16 }
 0x46d   :  { %14346 = vmatmul.mubr.msk.bf16.gmra.mrb[208].mxu0 %vm296_vm1, %v6216_v43  ;;  %14407 = vmatprep.mubr.msk.bf16.mxu1 %vm15877_vm0, %v15876_v1 }
 0x46e   :  { %14349 = vmatprep.mubr.msk.bf16.mxu0 %vm15877_vm0, %v15876_v1  ;;  %v6243_v15 = vor.u32 %v6241_v30, %v6239_v16 }
 0x470   :  { %v6248_v11 = vsel %vm153_vm2, %v6243_v15, %v6247_v23  ;;  %v7180_v23 = vrot.slane %v7178_v59, 1 }
 0x473   :  { %v13297_v54 = vpop.f32.mrb[144].mxu1 }
 0x474   :  { %14408 = vmatmul.mubr.msk.bf16.gmra.mrb[204].mxu1 %vm296_vm1, %v15473_v26  ;;  %v13298_v24 = vpop.f32.mrb[145].mxu1  ;;  %v15485_v26 = vld [vmem:[%s19873_s0 + $0x90] sm:$0xff]  }
 0x475   :  { %14350 = vmatmul.mubr.msk.bf16.gmra.mrb[212].mxu0 %vm296_vm1, %v6224_v55  ;;  %v13299_v61 = vadd.f32 %v13298_v24, %v13297_v54  ;;  %v13300_v57 = vpop.f32.mrb[146].mxu1  ;;  %14411 = vmatprep.mubr.msk.bf16.mxu1 %vm15877_vm0, %v15876_v1  ;;  %v7141_v12 = vshll.u32 %v15485_v26, 16  ;;  %v7139_v63 = vshrl.u32 %v15485_v26, 16  ;;  %v7162_v24 = vshll.u32 %v15490_v51, 16  ;;  %v15502_v51 = vld [vmem:[%s19873_s0 + $0xd8] sm:$0xff]  }
 0x476   :  { %v13301_v31 = vpop.f32.mrb[147].mxu1  ;;  %14353 = vmatprep.mubr.msk.bf16.mxu0 %vm15877_vm0, %v15876_v1  ;;  %v15492_v57 = vld [vmem:[%s19873_s0 + $0xb0] sm:$0xff]  }
 0x477   :  { %v4615_v2 = vadd.f32 %v13299_v61, %v4575_v25  ;;  %v7164_v61 = vrot.slane %v7162_v24, 1  ;;  %v15489_v31 = vld [vmem:[%s19873_s0 + $0xb0] sm:$0xff]   ;;  %v7174_v30 = vshrl.u32 %v15492_v57, 16 }
 0x479   :  { %v4655_v49 = vadd.f32 %v4654_v60, %v4615_v2  ;;  %v15488_v60 = vld [vmem:[%s19873_s0 + $0xa0] sm:$0xff]   ;;  %v7168_v13 = vor.u32 %v7166_v6, %v7164_v61 }
 0x47a   :  { %v7154_v21 = vshll.u32 %v15488_v60, 16  ;;  %v7158_v54 = vshrl.u32 %v15488_v60, 16 }
 0x47b   :  { %v4660_v14 = vmax.f32 %v4655_v49, 0.0 }
 0x47c   :  { %14412 = vmatmul.mubr.msk.bf16.gmra.mrb[208].mxu1 %vm296_vm1, %v15474_v35  ;;  %v7156_v39 = vrot.slane %v7154_v21, 1 }
 0x47d   :  { %4662 = vst.msk [vmem:[#allocation4] sm:$0xf] %vm4661_vm7, %v4660_v14  ;;  %14354 = vmatmul.mubr.msk.bf16.gmra.mrb[216].mxu0 %vm296_vm1, %v6232_v56  ;;  %14415 = vmatprep.mubr.msk.bf16.mxu1 %vm15877_vm0, %v15876_v1 }
 0x47e   :  { %14357 = vmatprep.mubr.msk.bf16.mxu0 %vm15877_vm0, %v15876_v1  ;;  %v7157_v18 = vsel %vm153_vm2, %v7152_v46, %v7156_v39  ;;  %v7160_v25 = vor.u32 %v7158_v54, %v7156_v39 }
 0x480   :  { %v7165_v4 = vsel %vm153_vm2, %v7160_v25, %v7164_v61  ;;  %v15504_v25 = vld [vmem:[%s19873_s0 + $0xe0] sm:$0xff]  }
 0x481   :  { %v15501_v61 = vld [vmem:[%s19873_s0 + $0xe0] sm:$0xff]  }
 0x484   :  { %14416 = vmatmul.mubr.msk.bf16.gmra.mrb[212].mxu1 %vm296_vm1, %v15475_v22  ;;  %v7143_v22 = vrot.slane %v7141_v12, 1 }
 0x485   :  { %14358 = vmatmul.mubr.msk.bf16.gmra.mrb[220].mxu0 %vm296_vm1, %v6240_v47  ;;  %14419 = vmatprep.mubr.msk.bf16.mxu1 %vm15877_vm0, %v15876_v1 }
 0x486   :  { %14361 = vmatprep.mubr.msk.bf16.mxu0 %vm15877_vm0, %v15876_v1  ;;  %v7144_v33 = vor.u32 %v7143_v22, %v7139_v63 }
 0x488   :  { %v7149_v58 = vsel %vm153_vm2, %v7144_v33, %v7148_v36 }
 0x48c   :  { %14420 = vmatmul.mubr.msk.bf16.gmra.mrb[216].mxu1 %vm296_vm1, %v15476_v19 }
 0x48d   :  { %14362 = vmatmul.mubr.msk.bf16.gmra.mrb[224].mxu0 %vm296_vm1, %v6248_v11  ;;  %14423 = vmatprep.mubr.msk.bf16.mxu1 %vm15877_vm0, %v15876_v1  ;;  %v15496_v11 = vld [vmem:[%s19873_s0 + $0xc0] sm:$0xff]  }
 0x48e   :  { %14437 = vmatprep.mubr.msk.bf16.mxu0 %vm15877_vm0, %v15876_v1  ;;  %v7190_v36 = vshrl.u32 %v15496_v11, 16 }
 0x493   :  { %v13324_v53 = vpop.f32.mrb[148].mxu1  ;;  %v13346_v3 = vpop.f32.mrb[152].mxu0 }
 0x494   :  { %v13325_v40 = vpop.f32.mrb[149].mxu1  ;;  %14424 = vmatmul.mubr.msk.bf16.gmra.mrb[220].mxu1 %vm296_vm1, %v15478_v17  ;;  %v13347_v9 = vpop.f32.mrb[153].mxu0 }
 0x495   :  { %v13326_v48 = vadd.f32 %v13325_v40, %v13324_v53  ;;  %14438 = vmatmul.mubr.msk.bf16.vlgmr.msra.gmra.mrb[228].mxu0 %vm296_vm1, %v15482_v28  ;;  %v13327_v42 = vpop.f32.mrb[150].mxu1  ;;  %v13348_v8 = vadd.f32 %v13347_v9, %v13346_v3  ;;  %v13349_v7 = vpop.f32.mrb[154].mxu0  ;;  %14427 = vmatprep.mubr.msk.bf16.mxu1 %vm15877_vm0, %v15876_v1  ;;  %v15493_v28 = vld [vmem:[%s19873_s0 + $0xc0] sm:$0xff]   ;;  %v7182_v53 = vshrl.u32 %v15494_v62, 16  ;;  %v7186_v3 = vshll.u32 %v15496_v11, 16  ;;  %v15506_v62 = vld [vmem:[%s19873_s0 + $0xe8] sm:$0xff]  }
 0x496   :  { %v13328_v35 = vpop.f32.mrb[151].mxu1  ;;  %v13350_v32 = vpop.f32.mrb[155].mxu0  ;;  %14441 = vmatprep.mubr.msk.bf16.mxu0 %vm15877_vm0, %v15876_v1 }
 0x497   :  { %v5023_v50 = vadd.f32 %v13326_v48, %v18160_v52  ;;  %v7184_v35 = vor.u32 %v7182_v53, %v7180_v23  ;;  %v7188_v32 = vrot.slane %v7186_v3, 1 }
 0x499   :  { %v5063_v29 = vadd.f32 %v13348_v8, %v5023_v50  ;;  %v15498_v50 = vld [vmem:[%s19873_s0 + $0xc8] sm:$0xff]   ;;  %v7189_v33 = vsel %vm153_vm2, %v7184_v35, %v7188_v32  ;;  %v7192_v34 = vor.u32 %v7190_v36, %v7188_v32 }
 0x49a   :  { %v7194_v60 = vshll.u32 %v15498_v50, 16 }
 0x49c   :  { %14428 = vmatmul.mubr.msk.bf16.gmra.mrb[224].mxu1 %vm296_vm1, %v15480_v0  ;;  %v7170_v0 = vshll.u32 %v15492_v57, 16  ;;  %v7196_v21 = vrot.slane %v7194_v60, 1  ;;  %v15507_v60 = vld [vmem:[%s19873_s0 + $0xf8] sm:$0xff]  }
 0x49d   :  { %14442 = vmatmul.mubr.msk.bf16.gmra.mrb[232].mxu0 %vm296_vm1, %v15483_v45  ;;  %14503 = vmatprep.mubr.msk.bf16.mxu1 %vm15877_vm0, %v15876_v1 }
 0x49e   :  { %14445 = vmatprep.mubr.msk.bf16.mxu0 %vm15877_vm0, %v15876_v1  ;;  %v7172_v14 = vrot.slane %v7170_v0, 1 }
 0x4a0   :  { %v7173_v47 = vsel %vm153_vm2, %v7168_v13, %v7172_v14  ;;  %v7176_v15 = vor.u32 %v7174_v30, %v7172_v14 }
 0x4a2   :  { %v7181_v26 = vsel %vm153_vm2, %v7176_v15, %v7180_v23  ;;  %v15503_v15 = vld [vmem:[%s19873_s0 + $0xe8] sm:$0xff]  }
 0x4a3   :  { %v5102_v27 = vpop.f32.mrb[152].mxu1 }
 0x4a4   :  { %v5103_v19 = vadd.f32 %v5102_v27, %v5063_v29  ;;  %v14273_v43 = vpop.f32.mrb[153].mxu1  ;;  %14504 = vmatmul.mubr.msk.bf16.vlgmr.msra.gmra.mrb[228].mxu1 %vm296_vm1, %v7149_v58  ;;  %v15499_v58 = vld [vmem:[%s19873_s0 + $0xd0] sm:$0xff]  }
 0x4a5   :  { %14446 = vmatmul.mubr.msk.bf16.gmra.mrb[236].mxu0 %vm296_vm1, %v15484_v37  ;;  %v5105_v44 = vpop.f32.mrb[154].mxu1  ;;  %14507 = vmatprep.mubr.msk.bf16.mxu1 %vm15877_vm0, %v15876_v1  ;;  %v15497_v27 = vld [vmem:[%s19873_s0 + $0xd0] sm:$0xff]   ;;  %v7198_v43 = vshrl.u32 %v15498_v50, 16 }
 0x4a6   :  { %v5108_v17 = vmax.f32 %v5103_v19, 0.0  ;;  %v14274_v55 = vpop.f32.mrb[155].mxu1  ;;  %14449 = vmatprep.mubr.msk.bf16.mxu0 %vm15877_vm0, %v15876_v1  ;;  %v7197_v19 = vsel %vm153_vm2, %v7192_v34, %v7196_v21  ;;  %v7202_v44 = vshll.u32 %v15499_v58, 16 }
 0x4a7   :  { %v7200_v46 = vor.u32 %v7198_v43, %v7196_v21  ;;  %v15500_v55 = vld [vmem:[%s19873_s0 + $0xd8] sm:$0xff]  }
 0x4a8   :  { %5109 = vst.msk [vmem:[#allocation4 + $0x4] sm:$0xf] %vm4661_vm7, %v5108_v17  ;;  %v7204_v39 = vrot.slane %v7202_v44, 1 }
 0x4aa   :  { %v7205_v17 = vsel %vm153_vm2, %v7200_v46, %v7204_v39  ;;  %v15511_v46 = vld [vmem:[%s19873_s0 + $0x100] sm:$0xff]  }
 0x4ac   :  { %14508 = vmatmul.mubr.msk.bf16.gmra.mrb[232].mxu1 %vm296_vm1, %v7157_v18  ;;  %v7210_v18 = vshll.u32 %v15502_v51, 16 }
 0x4ad   :  { %14450 = vmatmul.mubr.msk.bf16.gmra.mrb[240].mxu0 %vm296_vm1, %v15487_v38  ;;  %14511 = vmatprep.mubr.msk.bf16.mxu1 %vm15877_vm0, %v15876_v1  ;;  %v7206_v38 = vshrl.u32 %v15499_v58, 16 }
 0x4ae   :  { %14453 = vmatprep.mubr.msk.bf16.mxu0 %vm15877_vm0, %v15876_v1  ;;  %v7212_v24 = vrot.slane %v7210_v18, 1  ;;  %v15509_v18 = vld [vmem:[%s19873_s0 + $0x100] sm:$0xff]  }
 0x4af   :  { %v7208_v54 = vor.u32 %v7206_v38, %v7204_v39 }
 0x4b1   :  { %v7213_v57 = vsel %vm153_vm2, %v7208_v54, %v7212_v24 }
 0x4b3   :  { %v13373_v2 = vpop.f32.mrb[156].mxu0 }
 0x4b4   :  { %v13374_v49 = vpop.f32.mrb[157].mxu0  ;;  %14512 = vmatmul.mubr.msk.bf16.gmra.mrb[236].mxu1 %vm296_vm1, %v7165_v4  ;;  %v7218_v4 = vshll.u32 %v15504_v25, 16 }
 0x4b5   :  { %v13375_v56 = vadd.f32 %v13374_v49, %v13373_v2  ;;  %14454 = vmatmul.mubr.msk.bf16.gmra.mrb[244].mxu0 %vm296_vm1, %v15489_v31  ;;  %v13376_v10 = vpop.f32.mrb[158].mxu0  ;;  %14515 = vmatprep.mubr.msk.bf16.mxu1 %vm15877_vm0, %v15876_v1  ;;  %v7214_v31 = vshrl.u32 %v15502_v51, 16 }
 0x4b6   :  { %v13377_v16 = vpop.f32.mrb[159].mxu0  ;;  %14457 = vmatprep.mubr.msk.bf16.mxu0 %vm15877_vm0, %v15876_v1  ;;  %v7220_v14 = vrot.slane %v7218_v4, 1 }
 0x4b7   :  { %v5470_v8 = vadd.f32 %v13375_v56, %v18160_v52  ;;  %v7216_v13 = vor.u32 %v7214_v31, %v7212_v24 }
 0x4b9   :  { %v7221_v23 = vsel %vm153_vm2, %v7216_v13, %v7220_v14 }
 0x4bc   :  { %14516 = vmatmul.mubr.msk.bf16.gmra.mrb[240].mxu1 %vm296_vm1, %v7173_v47 }
 0x4bd   :  { %14458 = vmatmul.mubr.msk.bf16.gmra.mrb[248].mxu0 %vm296_vm1, %v15491_v20  ;;  %14519 = vmatprep.mubr.msk.bf16.mxu1 %vm15877_vm0, %v15876_v1 }
 0x4be   :  { %14461 = vmatprep.mubr.msk.bf16.mxu0 %vm15877_vm0, %v15876_v1 }
 0x4c3   :  { %v13395_v40 = vpop.f32.mrb[156].mxu1  ;;  %v5549_v9 = vpop.f32.mrb[160].mxu0 }
 0x4c4   :  { %v13396_v48 = vpop.f32.mrb[157].mxu1  ;;  %v14285_v42 = vpop.f32.mrb[161].mxu0  ;;  %14520 = vmatmul.mubr.msk.bf16.gmra.mrb[244].mxu1 %vm296_vm1, %v7181_v26  ;;  %v7226_v26 = vshll.u32 %v15506_v62, 16 }
 0x4c5   :  { %v13397_v7 = vadd.f32 %v13396_v48, %v13395_v40  ;;  %14462 = vmatmul.mubr.msk.bf16.gmra.mrb[252].mxu0 %vm296_vm1, %v15493_v28  ;;  %v13398_v5 = vpop.f32.mrb[158].mxu1  ;;  %v5552_v12 = vpop.f32.mrb[162].mxu0  ;;  %14523 = vmatprep.mubr.msk.bf16.mxu1 %vm15877_vm0, %v15876_v1  ;;  %v7222_v28 = vshrl.u32 %v15504_v25, 16 }
 0x4c6   :  { %v13399_v45 = vpop.f32.mrb[159].mxu1  ;;  %v14286_v29 = vpop.f32.mrb[163].mxu0  ;;  %14465 = vmatprep.mubr.msk.bf16.mxu0 %vm15877_vm0, %v15876_v1  ;;  %v7228_v3 = vrot.slane %v7226_v26, 1 }
 0x4c7   :  { %v5510_v63 = vadd.f32 %v13397_v7, %v5470_v8  ;;  %v7224_v53 = vor.u32 %v7222_v28, %v7220_v14  ;;  %v7230_v8 = vshrl.u32 %v15506_v62, 16 }
 0x4c9   :  { %v5550_v22 = vadd.f32 %v5549_v9, %v5510_v63  ;;  %v15505_v9 = vld [vmem:[%s19873_s0 + $0xf0] sm:$0xff]   ;;  %v7229_v48 = vsel %vm153_vm2, %v7224_v53, %v7228_v3  ;;  %v7232_v29 = vor.u32 %v7230_v8, %v7228_v3 }
 0x4cb   :  { %v5555_v37 = vmax.f32 %v5550_v22, 0.0  ;;  %v15510_v22 = vld [vmem:[%s19873_s0 + $0xf8] sm:$0xff]  }
 0x4cc   :  { %14524 = vmatmul.mubr.msk.bf16.gmra.mrb[248].mxu1 %vm296_vm1, %v7189_v33  ;;  %v7242_v21 = vshll.u32 %v15510_v22, 16  ;;  %v7246_v25 = vshrl.u32 %v15510_v22, 16 }
 0x4cd   :  { %5556 = vst.msk [vmem:[#allocation4 + $0x8] sm:$0xf] %vm4661_vm7, %v5555_v37  ;;  %14466 = vmatmul.mubr.msk.bf16.gmra.mrb[0].mxu0 %vm296_vm1, %v15495_v41  ;;  %14527 = vmatprep.mubr.msk.bf16.mxu1 %vm15877_vm0, %v15876_v1 }
 0x4ce   :  { %14469 = vmatprep.mubr.msk.bf16.mxu0 %vm15877_vm0, %v15876_v1  ;;  %v7244_v44 = vrot.slane %v7242_v21, 1 }
 0x4d4   :  { %14528 = vmatmul.mubr.msk.bf16.gmra.mrb[252].mxu1 %vm296_vm1, %v7197_v19 }
 0x4d5   :  { %14470 = vmatmul.mubr.msk.bf16.gmra.mrb[4].mxu0 %vm296_vm1, %v15497_v27  ;;  %14531 = vmatprep.mubr.msk.bf16.mxu1 %vm15877_vm0, %v15876_v1 }
 0x4d6   :  { %14473 = vmatprep.mubr.msk.bf16.mxu0 %vm15877_vm0, %v15876_v1 }
 0x4dc   :  { %14532 = vmatmul.mubr.msk.bf16.gmra.mrb[0].mxu1 %vm296_vm1, %v7205_v17 }
 0x4dd   :  { %14474 = vmatmul.mubr.msk.bf16.gmra.mrb[8].mxu0 %vm296_vm1, %v15500_v55  ;;  %14535 = vmatprep.mubr.msk.bf16.mxu1 %vm15877_vm0, %v15876_v1 }
 0x4de   :  { %14477 = vmatprep.mubr.msk.bf16.mxu0 %vm15877_vm0, %v15876_v1 }
 0x4e3   :  { %v13422_v6 = vpop.f32.mrb[160].mxu1 }
 0x4e4   :  { %v13444_v0 = vpop.f32.mrb[164].mxu0  ;;  %v13423_v2 = vpop.f32.mrb[161].mxu1  ;;  %14536 = vmatmul.mubr.msk.bf16.gmra.mrb[4].mxu1 %vm296_vm1, %v7213_v57 }
 0x4e5   :  { %v13424_v49 = vadd.f32 %v13423_v2, %v13422_v6  ;;  %v13445_v56 = vpop.f32.mrb[165].mxu0  ;;  %14478 = vmatmul.mubr.msk.bf16.gmra.mrb[12].mxu0 %vm296_vm1, %v15501_v61  ;;  %v13425_v10 = vpop.f32.mrb[162].mxu1  ;;  %14539 = vmatprep.mubr.msk.bf16.mxu1 %vm15877_vm0, %v15876_v1  ;;  %v7250_v61 = vshll.u32 %v15511_v46, 16 }
 0x4e6   :  { %v13446_v16 = vadd.f32 %v13445_v56, %v13444_v0  ;;  %v13447_v20 = vpop.f32.mrb[166].mxu0  ;;  %v13426_v47 = vpop.f32.mrb[163].mxu1  ;;  %14481 = vmatprep.mubr.msk.bf16.mxu0 %vm15877_vm0, %v15876_v1  ;;  %v7248_v0 = vor.u32 %v7246_v25, %v7244_v44 }
 0x4e7   :  { %v5917_v30 = vadd.f32 %v13424_v49, %v18160_v52  ;;  %v13448_v59 = vpop.f32.mrb[167].mxu0  ;;  %v15508_v52 = vld [vmem:[%s19873_s0 + $0xf0] sm:$0xff]   ;;  %v7252_v2 = vrot.slane %v7250_v61, 1  ;;  %v15512_v49 = vld [vmem:[%s19873_s0 + $0x108] ss:$0 sps:$4 sm:$0x11]  }
 0x4e8   :  { %v7234_v7 = vshll.u32 %v15508_v52, 16  ;;  %v7238_v34 = vshrl.u32 %v15508_v52, 16  ;;  %v7254_v47 = vshrl.u32 %v15511_v46, 16 }
 0x4e9   :  { %v5957_v11 = vadd.f32 %v13446_v16, %v5917_v30  ;;  %v7253_v16 = vsel %vm153_vm2, %v7248_v0, %v7252_v2  ;;  %v7258_v30 = vshll.u32 %v15512_v49, 16  ;;  %v15515_v0 = vld [vmem:[%s19876_s3 + $0xc0] sm:$0xff]  }
 0x4ea   :  { %v7236_v63 = vrot.slane %v7234_v7, 1  ;;  %v7256_v28 = vor.u32 %v7254_v47, %v7252_v2  ;;  %v15516_v2 = vld [vmem:[%s19876_s3 + $0x80] sm:$0xff]   ;;  %13549 = vmatprep.subr.bf16.mxu1 %v15515_v0 }
 0x4eb   :  { %v7260_v26 = vrot.slane %v7258_v30, 1  ;;  %13550 = vmatpush3.bf16.msra.mxu1 %v15516_v2 }
 0x4ec   :  { %14540 = vmatmul.mubr.msk.bf16.gmra.mrb[8].mxu1 %vm296_vm1, %v7221_v23  ;;  %v7237_v37 = vsel %vm153_vm2, %v7232_v29, %v7236_v63  ;;  %v7240_v43 = vor.u32 %v7238_v34, %v7236_v63 }
 0x4ed   :  { %14482 = vmatmul.mubr.msk.bf16.gmra.mrb[16].mxu0 %vm296_vm1, %v15503_v15  ;;  %14543 = vmatprep.mubr.msk.bf16.mxu1 %vm15877_vm0, %v15876_v1 }
 0x4ee   :  { %14485 = vmatprep.mubr.msk.bf16.mxu0 %vm15877_vm0, %v15876_v1  ;;  %v7245_v54 = vsel %vm153_vm2, %v7240_v43, %v7244_v44 }
 0x4f0   :  { %v6346_v40 = vpop.f32.mrb[168].mxu0 }
 0x4f1   :  { %v14307_v42 = vpop.f32.mrb[169].mxu0 }
 0x4f2   :  { %v6349_v5 = vpop.f32.mrb[170].mxu0 }
 0x4f3   :  { %v5996_v12 = vpop.f32.mrb[164].mxu1  ;;  %v14308_v35 = vpop.f32.mrb[171].mxu0 }
 0x4f4   :  { %v5997_v32 = vadd.f32 %v5996_v12, %v5957_v11  ;;  %v14297_v50 = vpop.f32.mrb[165].mxu1  ;;  %14544 = vmatmul.mubr.msk.bf16.gmra.mrb[12].mxu1 %vm296_vm1, %v7229_v48  ;;  %v7261_v48 = vsel %vm153_vm2, %v7256_v28, %v7260_v26 }
 0x4f5   :  { %14486 = vmatmul.mubr.msk.bf16.gmra.mrb[20].mxu0 %vm296_vm1, %v15505_v9  ;;  %v5999_v45 = vpop.f32.mrb[166].mxu1  ;;  %14547 = vmatprep.mubr.msk.bf16.mxu1 %vm15877_vm0, %v15876_v1 }
 0x4f6   :  { %v6002_v41 = vmax.f32 %v5997_v32, 0.0  ;;  %v14298_v33 = vpop.f32.mrb[167].mxu1  ;;  %14489 = vmatprep.mubr.msk.bf16.mxu0 %vm15877_vm0, %v15876_v1 }
 0x4f8   :  { %6003 = vst.msk [vmem:[#allocation4 + $0xc] sm:$0xf] %vm4661_vm7, %v6002_v41  ;;  %v6354_v36 = vpop.f32.mrb[172].mxu0 }
 0x4f9   :  { %v14311_v58 = vpop.f32.mrb[173].mxu0 }
 0x4fa   :  { %v6357_v27 = vpop.f32.mrb[174].mxu0 }
 0x4fb   :  { %v14312_v19 = vpop.f32.mrb[175].mxu0 }
 0x4fc   :  { %14548 = vmatmul.mubr.msk.bf16.gmra.mrb[16].mxu1 %vm296_vm1, %v7237_v37 }
 0x4fd   :  { %14490 = vmatmul.mubr.msk.bf16.gmra.mrb[24].mxu0 %vm296_vm1, %v15507_v60  ;;  %14551 = vmatprep.mubr.msk.bf16.mxu1 %vm15877_vm0, %v15876_v1 }
 0x4fe   :  { %14493 = vmatprep.mubr.msk.bf16.mxu0 %vm15877_vm0, %v15876_v1 }
 0x4ff   :  { %v6547_v39 = vpop.f32.mrb[168].mxu1 }
 0x500   :  { %v18387_v51 = vadd.f32 %v6547_v39, %v6346_v40  ;;  %v14373_v17 = vpop.f32.mrb[169].mxu1  ;;  %v6362_v55 = vpop.f32.mrb[176].mxu0 }
 0x501   :  { %v6550_v38 = vpop.f32.mrb[170].mxu1  ;;  %v14315_v24 = vpop.f32.mrb[177].mxu0 }
 0x502   :  { %v18393_v57 = vadd.f32 %v6550_v38, %v6349_v5  ;;  %v14374_v31 = vpop.f32.mrb[171].mxu1  ;;  %v6365_v4 = vpop.f32.mrb[178].mxu0 }
 0x503   :  { %v14316_v6 = vpop.f32.mrb[179].mxu0 }
 0x504   :  { %14552 = vmatmul.mubr.msk.bf16.gmra.mrb[20].mxu1 %vm296_vm1, %v7245_v54  ;;  %v15514_v54 = vld [vmem:[%s19876_s3] sm:$0xff]  }
 0x505   :  { %14494 = vmatmul.mubr.msk.bf16.gmra.mrb[28].mxu0 %vm296_vm1, %v15509_v18  ;;  %14555 = vmatprep.mubr.msk.bf16.mxu1 %vm15877_vm0, %v15876_v1  ;;  %v15513_v18 = vld [vmem:[%s19876_s3 + $0x40] sm:$0xff]  }
 0x506   :  { %13527 = vmatprep.subr.bf16.mxu0 %v15513_v18 }
 0x507   :  { %v6555_v56 = vpop.f32.mrb[172].mxu1  ;;  %13528 = vmatpush3.bf16.msra.mxu0 %v15514_v54  ;;  %v15524_v54 = vld [vmem:[%s19876_s3 + $0x90] sm:$0xff]  }
 0x508   :  { %v18402_v10 = vadd.f32 %v6555_v56, %v6354_v36  ;;  %v14377_v13 = vpop.f32.mrb[173].mxu1  ;;  %v6370_v14 = vpop.f32.mrb[180].mxu0 }
 0x509   :  { %v6558_v62 = vpop.f32.mrb[174].mxu1  ;;  %v14319_v20 = vpop.f32.mrb[181].mxu0 }
 0x50a   :  { %v18405_v59 = vadd.f32 %v6558_v62, %v6357_v27  ;;  %v14378_v15 = vpop.f32.mrb[175].mxu1  ;;  %v6373_v23 = vpop.f32.mrb[182].mxu0 }
 0x50b   :  { %v14320_v11 = vpop.f32.mrb[183].mxu0 }
 0x50c   :  { %14556 = vmatmul.mubr.msk.bf16.gmra.mrb[24].mxu1 %vm296_vm1, %v7253_v16 }
 0x50d   :  { %14559 = vmatprep.mubr.msk.bf16.mxu1 %vm15877_vm0, %v15876_v1 }
 0x50f   :  { %v6563_v53 = vpop.f32.mrb[176].mxu1 }
 0x510   :  { %v18410_v3 = vadd.f32 %v6563_v53, %v6362_v55  ;;  %v14381_v52 = vpop.f32.mrb[177].mxu1  ;;  %v6378_v40 = vpop.f32.mrb[184].mxu0  ;;  %v15517_v53 = vld [vmem:[%s19876_s3 + $0x48] sm:$0xff]  }
 0x511   :  { %v6566_v9 = vpop.f32.mrb[178].mxu1  ;;  %v14323_v42 = vpop.f32.mrb[185].mxu0  ;;  %v15518_v52 = vld [vmem:[%s19876_s3 + $0x8] sm:$0xff]   ;;  %13529 = vmatprep.subr.bf16.mxu0 %v15517_v53  ;;  %v15525_v53 = vld [vmem:[%s19876_s3 + $0x58] sm:$0xff]  }
 0x512   :  { %v18413_v8 = vadd.f32 %v6566_v9, %v6365_v4  ;;  %v14382_v7 = vpop.f32.mrb[179].mxu1  ;;  %v6381_v5 = vpop.f32.mrb[186].mxu0  ;;  %13530 = vmatpush3.bf16.msra.mxu0 %v15518_v52  ;;  %v15526_v52 = vld [vmem:[%s19876_s3 + $0x18] sm:$0xff]  }
 0x513   :  { %v14324_v12 = vpop.f32.mrb[187].mxu0 }
 0x514   :  { %14560 = vmatmul.mubr.msk.bf16.gmra.mrb[28].mxu1 %vm296_vm1, %v7261_v48 }
 0x517   :  { %v6571_v35 = vpop.f32.mrb[180].mxu1 }
 0x518   :  { %v18416_v32 = vadd.f32 %v6571_v35, %v6370_v14  ;;  %v14385_v50 = vpop.f32.mrb[181].mxu1  ;;  %v6386_v45 = vpop.f32.mrb[188].mxu0  ;;  %v15520_v35 = vld [vmem:[%s19876_s3 + $0x88] sm:$0xff]  }
 0x519   :  { %v6574_v29 = vpop.f32.mrb[182].mxu1  ;;  %v14327_v63 = vpop.f32.mrb[189].mxu0 }
 0x51a   :  { %v18418_v22 = vadd.f32 %v6574_v29, %v6373_v23  ;;  %v14386_v41 = vpop.f32.mrb[183].mxu1  ;;  %v6389_v33 = vpop.f32.mrb[190].mxu0 }
 0x51b   :  { %v14328_v36 = vpop.f32.mrb[191].mxu0 }
 0x51f   :  { %v6579_v60 = vpop.f32.mrb[184].mxu1 }
 0x520   :  { %v18420_v37 = vadd.f32 %v6579_v60, %v6378_v40  ;;  %v14389_v58 = vpop.f32.mrb[185].mxu1  ;;  %v6394_v34 = vpop.f32.mrb[192].mxu0  ;;  %v15519_v40 = vld [vmem:[%s19876_s3 + $0xc8] sm:$0xff]  }
 0x521   :  { %v6582_v21 = vpop.f32.mrb[186].mxu1  ;;  %v14331_v27 = vpop.f32.mrb[193].mxu0  ;;  %13551 = vmatprep.subr.bf16.mxu1 %v15519_v40  ;;  %v15527_v40 = vld [vmem:[%s19876_s3 + $0xd8] sm:$0xff]  }
 0x522   :  { %v18422_v19 = vadd.f32 %v6582_v21, %v6381_v5  ;;  %v14390_v43 = vpop.f32.mrb[187].mxu1  ;;  %v6397_v44 = vpop.f32.mrb[194].mxu0  ;;  %13552 = vmatpush3.bf16.msra.mxu1 %v15520_v35 }
 0x523   :  { %v14332_v46 = vpop.f32.mrb[195].mxu0 }
 0x524   :  { %v15521_v46 = vld [vmem:[%s19876_s3 + $0x50] sm:$0xff]  }
 0x525   :  { %13531 = vmatprep.subr.bf16.mxu0 %v15521_v46 }
 0x527   :  { %v6587_v39 = vpop.f32.mrb[188].mxu1 }
 0x528   :  { %v18424_v17 = vadd.f32 %v6587_v39, %v6386_v45  ;;  %v14393_v55 = vpop.f32.mrb[189].mxu1  ;;  %v6402_v38 = vpop.f32.mrb[196].mxu0  ;;  %v15522_v39 = vld [vmem:[%s19876_s3 + $0x10] sm:$0xff]  }
 0x529   :  { %v6590_v24 = vpop.f32.mrb[190].mxu1  ;;  %v14335_v25 = vpop.f32.mrb[197].mxu0  ;;  %v15523_v55 = vld [vmem:[%s19876_s3 + $0xd0] sm:$0xff]   ;;  %13532 = vmatpush3.bf16.msra.mxu0 %v15522_v39 }
 0x52a   :  { %v18432_v61 = vadd.f32 %v6590_v24, %v6389_v33  ;;  %v14394_v31 = vpop.f32.mrb[191].mxu1  ;;  %v6405_v4 = vpop.f32.mrb[198].mxu0  ;;  %13553 = vmatprep.subr.bf16.mxu1 %v15523_v55  ;;  %13533 = vmatprep.subr.bf16.mxu0 %v15525_v53  ;;  %v15535_v53 = vld [vmem:[%s19876_s3 + $0xe8] sm:$0xff]  }
 0x52b   :  { %v14336_v6 = vpop.f32.mrb[199].mxu0  ;;  %13554 = vmatpush3.bf16.msra.mxu1 %v15524_v54  ;;  %v15530_v54 = vld [vmem:[%s19876_s3 + $0x20] sm:$0xff]  }
 0x52c   :  { %13555 = vmatprep.subr.bf16.mxu1 %v15527_v40 }
 0x52d   :  { %13534 = vmatpush3.bf16.msra.mxu0 %v15526_v52 }
 0x52f   :  { %v6595_v49 = vpop.f32.mrb[192].mxu1 }
 0x530   :  { %v18440_v56 = vadd.f32 %v6595_v49, %v6394_v34  ;;  %v14397_v13 = vpop.f32.mrb[193].mxu1  ;;  %v6410_v14 = vpop.f32.mrb[200].mxu0 }
 0x531   :  { %v6598_v62 = vpop.f32.mrb[194].mxu1  ;;  %v14339_v16 = vpop.f32.mrb[201].mxu0 }
 0x532   :  { %v18442_v20 = vadd.f32 %v6598_v62, %v6397_v44  ;;  %v14398_v47 = vpop.f32.mrb[195].mxu1  ;;  %v6413_v30 = vpop.f32.mrb[202].mxu0 }
 0x533   :  { %v14340_v15 = vpop.f32.mrb[203].mxu0 }
 0x537   :  { %v6603_v23 = vpop.f32.mrb[196].mxu1 }
 0x538   :  { %v18444_v11 = vadd.f32 %v6603_v23, %v6402_v38  ;;  %v14401_v28 = vpop.f32.mrb[197].mxu1  ;;  %v6418_v26 = vpop.f32.mrb[204].mxu0 }
 0x539   :  { %v6606_v9 = vpop.f32.mrb[198].mxu1  ;;  %v14343_v48 = vpop.f32.mrb[205].mxu0 }
 0x53a   :  { %v18455_v42 = vadd.f32 %v6606_v9, %v6405_v4  ;;  %v14402_v7 = vpop.f32.mrb[199].mxu1  ;;  %v6421_v5 = vpop.f32.mrb[206].mxu0 }
 0x53b   :  { %v14344_v12 = vpop.f32.mrb[207].mxu0  ;;  %v15528_v7 = vld [vmem:[%s19876_s3 + $0x98] sm:$0xff]  }
 0x53c   :  { %13556 = vmatpush3.bf16.msra.mxu1 %v15528_v7  ;;  %v15536_v7 = vld [vmem:[%s19876_s3 + $0xa8] sm:$0xff]  }
 0x53f   :  { %v6611_v50 = vpop.f32.mrb[200].mxu1 }
 0x540   :  { %v18460_v45 = vadd.f32 %v6611_v50, %v6410_v14  ;;  %v14405_v29 = vpop.f32.mrb[201].mxu1  ;;  %v6426_v63 = vpop.f32.mrb[208].mxu0 }
 0x541   :  { %v6614_v41 = vpop.f32.mrb[202].mxu1  ;;  %v14347_v33 = vpop.f32.mrb[209].mxu0 }
 0x542   :  { %v18462_v36 = vadd.f32 %v6614_v41, %v6413_v30  ;;  %v14406_v60 = vpop.f32.mrb[203].mxu1  ;;  %v6429_v58 = vpop.f32.mrb[210].mxu0 }
 0x543   :  { %v14348_v34 = vpop.f32.mrb[211].mxu0 }
 0x547   :  { %v6619_v21 = vpop.f32.mrb[204].mxu1 }
 0x548   :  { %v18464_v27 = vadd.f32 %v6619_v21, %v6418_v26  ;;  %v14409_v43 = vpop.f32.mrb[205].mxu1  ;;  %v6434_v44 = vpop.f32.mrb[212].mxu0 }
 0x549   :  { %v6622_v38 = vpop.f32.mrb[206].mxu1  ;;  %v14351_v18 = vpop.f32.mrb[213].mxu0 }
 0x54a   :  { %v18478_v24 = vadd.f32 %v6622_v38, %v6421_v5  ;;  %v14410_v25 = vpop.f32.mrb[207].mxu1  ;;  %v6437_v31 = vpop.f32.mrb[214].mxu0  ;;  %v15529_v18 = vld [vmem:[%s19876_s3 + $0x60] sm:$0xff]  }
 0x54b   :  { %v14352_v4 = vpop.f32.mrb[215].mxu0  ;;  %v15531_v25 = vld [vmem:[%s19876_s3 + $0xe0] sm:$0xff]   ;;  %13535 = vmatprep.subr.bf16.mxu0 %v15529_v18 }
 0x54c   :  { %13557 = vmatprep.subr.bf16.mxu1 %v15531_v25  ;;  %13536 = vmatpush3.bf16.msra.mxu0 %v15530_v54 }
 0x54f   :  { %v6627_v6 = vpop.f32.mrb[208].mxu1 }
 0x550   :  { %v18480_v0 = vadd.f32 %v6627_v6, %v6426_v63  ;;  %v14413_v2 = vpop.f32.mrb[209].mxu1  ;;  %v6442_v49 = vpop.f32.mrb[216].mxu0 }
 0x551   :  { %v6630_v13 = vpop.f32.mrb[210].mxu1  ;;  %v14355_v14 = vpop.f32.mrb[217].mxu0  ;;  %v15532_v2 = vld [vmem:[%s19876_s3 + $0xa0] sm:$0xff]  }
 0x552   :  { %v18482_v62 = vadd.f32 %v6630_v13, %v6429_v58  ;;  %v14414_v16 = vpop.f32.mrb[211].mxu1  ;;  %v6445_v47 = vpop.f32.mrb[218].mxu0  ;;  %13558 = vmatpush3.bf16.msra.mxu1 %v15532_v2 }
 0x553   :  { %v14356_v30 = vpop.f32.mrb[219].mxu0  ;;  %13559 = vmatprep.subr.bf16.mxu1 %v15535_v53 }
 0x556   :  { %13560 = vmatpush3.bf16.msra.mxu1 %v15536_v7 }
 0x557   :  { %v6635_v15 = vpop.f32.mrb[212].mxu1 }
 0x558   :  { %v18484_v23 = vadd.f32 %v6635_v15, %v6434_v44  ;;  %v14417_v28 = vpop.f32.mrb[213].mxu1  ;;  %v6450_v26 = vpop.f32.mrb[220].mxu0 }
 0x559   :  { %v6638_v9 = vpop.f32.mrb[214].mxu1  ;;  %v14359_v48 = vpop.f32.mrb[221].mxu0  ;;  %v15533_v28 = vld [vmem:[%s19876_s3 + $0x68] sm:$0xff]  }
 0x55a   :  { %v18498_v5 = vadd.f32 %v6638_v9, %v6437_v31  ;;  %v14418_v12 = vpop.f32.mrb[215].mxu1  ;;  %v6453_v35 = vpop.f32.mrb[222].mxu0  ;;  %13537 = vmatprep.subr.bf16.mxu0 %v15533_v28 }
 0x55b   :  { %v14360_v50 = vpop.f32.mrb[223].mxu0 }
 0x55c   :  { %v15537_v50 = vld [vmem:[%s19876_s3 + $0x70] sm:$0xff]  }
 0x55f   :  { %v6643_v29 = vpop.f32.mrb[216].mxu1 }
 0x560   :  { %v18500_v63 = vadd.f32 %v6643_v29, %v6442_v49  ;;  %v14421_v41 = vpop.f32.mrb[217].mxu1  ;;  %v6458_v33 = vpop.f32.mrb[224].mxu0  ;;  %v15539_v29 = vld [vmem:[%s19876_s3 + $0xf0] sm:$0xff]  }
 0x561   :  { %v6646_v60 = vpop.f32.mrb[218].mxu1  ;;  %v14363_v58 = vpop.f32.mrb[225].mxu0  ;;  %13561 = vmatprep.subr.bf16.mxu1 %v15539_v29 }
 0x562   :  { %v18502_v34 = vadd.f32 %v6646_v60, %v6445_v47  ;;  %v14422_v21 = vpop.f32.mrb[219].mxu1  ;;  %v6461_v43 = vpop.f32.mrb[226].mxu0 }
 0x563   :  { %v14364_v44 = vpop.f32.mrb[227].mxu0 }
 0x567   :  { %v6651_v46 = vpop.f32.mrb[220].mxu1 }
 0x568   :  { %v18504_v39 = vadd.f32 %v6651_v46, %v6450_v26  ;;  %v6874_v55 = vpop.f32.mrb[228].mxu0  ;;  %v14425_v38 = vpop.f32.mrb[221].mxu1  ;;  %v15534_v26 = vld [vmem:[%s19876_s3 + $0x28] sm:$0xff]   ;;  %v18552_v46 = vld [vmem:[%s19875_s2] ss:$0 sm:$0xff] }
 0x569   :  { %v6993_v31 = vadd.f32 %v6874_v55, %v18387_v51  ;;  %v14439_v4 = vpop.f32.mrb[229].mxu0  ;;  %v6654_v6 = vpop.f32.mrb[222].mxu1  ;;  %13538 = vmatpush3.bf16.msra.mxu0 %v15534_v26 }
 0x56a   :  { %v18519_v49 = vadd.f32 %v6654_v6, %v6453_v35  ;;  %v6877_v13 = vpop.f32.mrb[230].mxu0  ;;  %v14426_v14 = vpop.f32.mrb[223].mxu1  ;;  %13539 = vmatprep.subr.bf16.mxu0 %v15537_v50 }
 0x56b   :  { %v6994_v16 = vadd.f32 %v6877_v13, %v18393_v57  ;;  %v14440_v47 = vpop.f32.mrb[231].mxu0 }
 0x56f   :  { %v6659_v30 = vpop.f32.mrb[224].mxu1 }
 0x570   :  { %v6882_v15 = vpop.f32.mrb[232].mxu0  ;;  %v14429_v51 = vpop.f32.mrb[225].mxu1 }
 0x571   :  { %v6995_v57 = vadd.f32 %v6882_v15, %v18402_v10  ;;  %v14443_v52 = vpop.f32.mrb[233].mxu0  ;;  %v6662_v40 = vpop.f32.mrb[226].mxu1  ;;  %v15538_v10 = vld [vmem:[%s19876_s3 + $0x30] sm:$0xff]  }
 0x572   :  { %v6885_v9 = vpop.f32.mrb[234].mxu0  ;;  %v14430_v48 = vpop.f32.mrb[227].mxu1  ;;  %13540 = vmatpush3.bf16.msra.mxu0 %v15538_v10 }
 0x573   :  { %v6996_v12 = vadd.f32 %v6885_v9, %v18405_v59  ;;  %v14444_v35 = vpop.f32.mrb[235].mxu0  ;;  %v15540_v59 = vld [vmem:[%s19876_s3 + $0xb0] sm:$0xff]  }
 0x574   :  { %13562 = vmatpush3.bf16.msra.mxu1 %v15540_v59 }
 0x577   :  { %v7359_v41 = vpop.f32.mrb[228].mxu1 }
 0x578   :  { %v6890_v33 = vpop.f32.mrb[236].mxu0  ;;  %v7478_v60 = vadd.f32 %v7359_v41, %v6993_v31  ;;  %v14505_v58 = vpop.f32.mrb[229].mxu1 }
 0x579   :  { %v6997_v21 = vadd.f32 %v6890_v33, %v18410_v3  ;;  %v14447_v43 = vpop.f32.mrb[237].mxu0  ;;  %v7362_v44 = vpop.f32.mrb[230].mxu1 }
 0x57a   :  { %v7508_v55 = vadd.f32 %v18552_v46, %v7478_v60  ;;  %v6893_v38 = vpop.f32.mrb[238].mxu0  ;;  %v7479_v18 = vadd.f32 %v7362_v44, %v6994_v16  ;;  %v14506_v54 = vpop.f32.mrb[231].mxu1 }
 0x57b   :  { %v6998_v25 = vadd.f32 %v6893_v38, %v18413_v8  ;;  %v14448_v31 = vpop.f32.mrb[239].mxu0 }
 0x57c   :  { %v7538_v4 = vmax.f32 %v7508_v55, 0.0  ;;  %v7509_v3 = vadd.f32 %v18552_v46, %v7479_v18 }
 0x57e   :  { %7568 = vst.msk [vmem:[#allocation2 + $0xf0] sm:$0xff] %vm1606_vm3, %v7538_v4  ;;  %v7539_v6 = vmax.f32 %v7509_v3, 0.0 }
 0x57f   :  { %v7367_v2 = vpop.f32.mrb[232].mxu1 }
 0x580   :  { %7569 = vst.msk [vmem:[#allocation2 + $0xf8] sm:$0xff] %vm1606_vm3, %v7539_v6  ;;  %v6898_v13 = vpop.f32.mrb[240].mxu0  ;;  %v7480_v14 = vadd.f32 %v7367_v2, %v6995_v57  ;;  %v14509_v47 = vpop.f32.mrb[233].mxu1 }
 0x581   :  { %v6999_v30 = vadd.f32 %v6898_v13, %v18416_v32  ;;  %v14451_v15 = vpop.f32.mrb[241].mxu0  ;;  %v7370_v16 = vpop.f32.mrb[234].mxu1 }
 0x582   :  { %v7510_v51 = vadd.f32 %v18552_v46, %v7480_v14  ;;  %v6901_v8 = vpop.f32.mrb[242].mxu0  ;;  %v7481_v28 = vadd.f32 %v7370_v16, %v6996_v12  ;;  %v14510_v26 = vpop.f32.mrb[235].mxu1  ;;  %v15545_v15 = vld [vmem:[%s19876_s3 + $0xf8] sm:$0xff]  }
 0x583   :  { %v7000_v53 = vadd.f32 %v6901_v8, %v18418_v22  ;;  %v14452_v52 = vpop.f32.mrb[243].mxu0  ;;  %13563 = vmatprep.subr.bf16.mxu1 %v15545_v15 }
 0x584   :  { %v7540_v40 = vmax.f32 %v7510_v51, 0.0  ;;  %v7511_v9 = vadd.f32 %v18552_v46, %v7481_v28 }
 0x586   :  { %7570 = vst.msk [vmem:[#allocation2 + $0x100] sm:$0xff] %vm1606_vm3, %v7540_v40  ;;  %v7541_v48 = vmax.f32 %v7511_v9, 0.0 }
 0x587   :  { %v7375_v57 = vpop.f32.mrb[236].mxu1  ;;  %v7603_v44 = vld [vmem:[#allocation2 + $0xf2] ss:$2 sm:$0x3f] }
 0x588   :  { %7571 = vst.msk [vmem:[#allocation2 + $0x108] sm:$0xff] %vm1606_vm3, %v7541_v48  ;;  %v6906_v32 = vpop.f32.mrb[244].mxu0  ;;  %v7482_v7 = vadd.f32 %v7375_v57, %v6997_v21  ;;  %v14513_v35 = vpop.f32.mrb[237].mxu1  ;;  %v15541_v21 = vld [vmem:[%s19876_s3 + $0x78] sm:$0xff]  }
 0x589   :  { %v7001_v50 = vadd.f32 %v6906_v32, %v18420_v37  ;;  %v14455_v10 = vpop.f32.mrb[245].mxu0  ;;  %v7378_v12 = vpop.f32.mrb[238].mxu1  ;;  %v15542_v37 = vld [vmem:[%s19876_s3 + $0x38] sm:$0xff]   ;;  %13541 = vmatprep.subr.bf16.mxu0 %v15541_v21 }
 0x58a   :  { %v7512_v29 = vadd.f32 %v18552_v46, %v7482_v7  ;;  %v6909_v22 = vpop.f32.mrb[246].mxu0  ;;  %v7483_v41 = vadd.f32 %v7378_v12, %v6998_v25  ;;  %v14514_v59 = vpop.f32.mrb[239].mxu1  ;;  %v7601_v38 = vld [vmem:[#allocation2 + $0xf1] ss:$2 sm:$0x3f]  ;;  %13542 = vmatpush3.bf16.msra.mxu0 %v15542_v37 }
 0x58b   :  { %v7002_v33 = vadd.f32 %v6909_v22, %v18422_v19  ;;  %v14456_v60 = vpop.f32.mrb[247].mxu0  ;;  %v15543_v19 = vld [vmem:[%s19876_s3 + $0x40] sm:$0xff]   ;;  %v7605_v48 = vld [vmem:[#allocation2 + $0xf3] ss:$2 sm:$0x3f] }
 0x58c   :  { %v7542_v58 = vmax.f32 %v7512_v29, 0.0  ;;  %v7513_v43 = vadd.f32 %v18552_v46, %v7483_v41  ;;  %13571 = vmatprep.subr.bf16.mxu0 %v15543_v19 }
 0x58e   :  { %7572 = vst.msk [vmem:[#allocation2 + $0x110] sm:$0xff] %vm1606_vm3, %v7542_v58  ;;  %v7543_v55 = vmax.f32 %v7513_v43, 0.0 }
 0x58f   :  { %v7383_v18 = vpop.f32.mrb[240].mxu1  ;;  %v7611_v54 = vld [vmem:[#allocation2 + $0x102] ss:$2 sm:$0x3f] }
 0x590   :  { %7573 = vst.msk [vmem:[#allocation2 + $0x118] sm:$0xff] %vm1606_vm3, %v7543_v55  ;;  %v6914_v25 = vpop.f32.mrb[248].mxu0  ;;  %v7484_v31 = vadd.f32 %v7383_v18, %v6999_v30  ;;  %v14517_v4 = vpop.f32.mrb[241].mxu1  ;;  %v14844_v3 = vpack.i.bf16 %v7603_v44, %v7611_v54  ;;  %v7609_v6 = vld [vmem:[#allocation2 + $0x101] ss:$2 sm:$0x3f] }
 0x591   :  { %v7003_v2 = vadd.f32 %v6914_v25, %v18424_v17  ;;  %v14459_v13 = vpop.f32.mrb[249].mxu0  ;;  %v7386_v14 = vpop.f32.mrb[242].mxu1  ;;  %v14839_v47 = vpack.i.bf16 %v7601_v38, %v7609_v6  ;;  %v7613_v30 = vld [vmem:[#allocation2 + $0x103] ss:$2 sm:$0x3f]  ;;  %v15546_v17 = vld [vmem:[%s19876_s3 + $0xb8] sm:$0xff]  }
 0x592   :  { %v7514_v16 = vadd.f32 %v18552_v46, %v7484_v31  ;;  %v6917_v51 = vpop.f32.mrb[250].mxu0  ;;  %v7485_v8 = vadd.f32 %v7386_v14, %v7000_v53  ;;  %v14518_v28 = vpop.f32.mrb[243].mxu1  ;;  %14845 = vrot.lane.b32.xlu1 %v14844_v3, %s15880_s28  ;;  %13564 = vmatpush3.bf16.msra.mxu1 %v15546_v17  ;;  %v14849_v53 = vpack.i.bf16 %v7605_v48, %v7613_v30 }
 0x593   :  { %v7004_v26 = vadd.f32 %v6917_v51, %v18432_v61  ;;  %14840 = vrot.lane.b32.xlu0 %v14839_v47, %s15879_s27  ;;  %v14460_v52 = vpop.f32.mrb[251].mxu0 }
 0x594   :  { %v7544_v40 = vmax.f32 %v7514_v16, 0.0  ;;  %v7515_v9 = vadd.f32 %v18552_v46, %v7485_v8 }
 0x596   :  { %7574 = vst.msk [vmem:[#allocation2 + $0x120] sm:$0xff] %vm1606_vm3, %v7544_v40  ;;  %v7545_v57 = vmax.f32 %v7515_v9, 0.0 }
 0x597   :  { %14850 = vrot.lane.b32.xlu0 %v14849_v53, %s15878_s22  ;;  %v7391_v32 = vpop.f32.mrb[244].mxu1  ;;  %v7619_v37 = vld [vmem:[#allocation2 + $0x112] ss:$2 sm:$0x3f] }
 0x598   :  { %7575 = vst.msk [vmem:[#allocation2 + $0x128] sm:$0xff] %vm1606_vm3, %v7545_v57  ;;  %v6922_v7 = vpop.f32.mrb[252].mxu0  ;;  %v7486_v61 = vadd.f32 %v7391_v32, %v7001_v50  ;;  %v14521_v35 = vpop.f32.mrb[245].mxu1  ;;  %v7617_v55 = vld [vmem:[#allocation2 + $0x111] ss:$2 sm:$0x3f] }
 0x599   :  { %v7005_v10 = vadd.f32 %v6922_v7, %v18440_v56  ;;  %v14463_v12 = vpop.f32.mrb[253].mxu0  ;;  %v7394_v29 = vpop.f32.mrb[246].mxu1  ;;  %v7621_v52 = vld [vmem:[#allocation2 + $0x113] ss:$2 sm:$0x3f] }
 0x59a   :  { %v7516_v22 = vadd.f32 %v18552_v46, %v7486_v61  ;;  %v6925_v41 = vpop.f32.mrb[254].mxu0  ;;  %v7487_v59 = vadd.f32 %v7394_v29, %v7002_v33  ;;  %v14522_v60 = vpop.f32.mrb[247].mxu1  ;;  %v8035_v53 = vld [vmem:[#allocation2 + $0x113] ss:$2 sm:$0x3f] }
 0x59b   :  { %v7006_v58 = vadd.f32 %v6925_v41, %v18442_v20  ;;  %v14464_v43 = vpop.f32.mrb[255].mxu0  ;;  %v8034_v35 = vld [vmem:[#allocation2 + $0x112] ss:$2 sm:$0x3f] }
 0x59c   :  { %v7546_v44 = vmax.f32 %v7516_v22, 0.0  ;;  %v7517_v21 = vadd.f32 %v18552_v46, %v7487_v59 }
 0x59e   :  { %7576 = vst.msk [vmem:[#allocation2 + $0x130] sm:$0xff] %vm1606_vm3, %v7546_v44  ;;  %v7547_v50 = vmax.f32 %v7517_v21, 0.0 }
 0x59f   :  { %v7399_v38 = vpop.f32.mrb[248].mxu1  ;;  %v7627_v56 = vld [vmem:[#allocation2 + $0x122] ss:$2 sm:$0x3f] }
 0x5a0   :  { %7577 = vst.msk [vmem:[#allocation2 + $0x138] sm:$0xff] %vm1606_vm3, %v7547_v50  ;;  %v6930_v18 = vpop.f32.mrb[0].mxu0  ;;  %v7488_v54 = vadd.f32 %v7399_v38, %v7003_v2  ;;  %v14525_v19 = vpop.f32.mrb[249].mxu1  ;;  %v14859_v33 = vpack.i.bf16 %v7619_v37, %v7627_v56  ;;  %v7625_v25 = vld [vmem:[#allocation2 + $0x121] ss:$2 sm:$0x3f] }
 0x5a1   :  { %v7007_v20 = vadd.f32 %v6930_v18, %v18444_v11  ;;  %v14467_v31 = vpop.f32.mrb[1].mxu0  ;;  %v7402_v4 = vpop.f32.mrb[250].mxu1  ;;  %v14854_v3 = vpack.i.bf16 %v7617_v55, %v7625_v25  ;;  %v8037_v6 = vld [vmem:[#allocation2 + $0x121] ss:$2 sm:$0x3f] }
 0x5a2   :  { %v7518_v13 = vadd.f32 %v18552_v46, %v7488_v54  ;;  %v6933_v14 = vpop.f32.mrb[2].mxu0  ;;  %v7489_v47 = vadd.f32 %v7402_v4, %v7004_v26  ;;  %14860 = vrot.lane.b32.xlu0 %v14859_v33, %s15880_s28  ;;  %v14526_v15 = vpop.f32.mrb[251].mxu1  ;;  %v7629_v16 = vld [vmem:[#allocation2 + $0x123] ss:$2 sm:$0x3f] }
 0x5a3   :  { %v7008_v51 = vadd.f32 %v6933_v14, %v18455_v42  ;;  %14855 = vrot.lane.b32.xlu1 %v14854_v3, %s15879_s27  ;;  %v8033_v2 = vld [vmem:[#allocation2 + $0x111] ss:$2 sm:$0x3f]  ;;  %v14468_v8 = vpop.f32.mrb[3].mxu0  ;;  %v15554_v11 = vld [vmem:[%s19876_s3 + $0xc0] sm:$0xff]   ;;  %v14864_v26 = vpack.i.bf16 %v7621_v52, %v7629_v16 }
 0x5a4   :  { %v7548_v28 = vmax.f32 %v7518_v13, 0.0  ;;  %v7519_v30 = vadd.f32 %v18552_v46, %v7489_v47  ;;  %v14869_v17 = vpack.i.bf16 %v8033_v2, %v8037_v6  ;;  %v8039_v40 = vld [vmem:[#allocation2 + $0x123] ss:$2 sm:$0x3f]  ;;  %13593 = vmatprep.subr.bf16.mxu1 %v15554_v11 }
 0x5a5   :  { %v8038_v42 = vld [vmem:[#allocation2 + $0x122] ss:$2 sm:$0x3f]  ;;  %v14879_v61 = vpack.i.bf16 %v8035_v53, %v8039_v40 }
 0x5a6   :  { %7578 = vst.msk [vmem:[#allocation2 + $0x140] sm:$0xff] %vm1606_vm3, %v7548_v28  ;;  %v7549_v9 = vmax.f32 %v7519_v30, 0.0  ;;  %14870 = vrot.lane.b32.xlu0 %v14869_v17, %s15879_s27  ;;  %v14874_v41 = vpack.i.bf16 %v8034_v35, %v8038_v42 }
 0x5a7   :  { %14865 = vrot.lane.b32.xlu1 %v14864_v26, %s15878_s22  ;;  %v7407_v48 = vpop.f32.mrb[252].mxu1  ;;  %v8045_v55 = vld [vmem:[#allocation2 + $0x132] ss:$2 sm:$0x3f] }
 0x5a8   :  { %7579 = vst.msk [vmem:[#allocation2 + $0x148] sm:$0xff] %vm1606_vm3, %v7549_v9  ;;  %v6938_v57 = vpop.f32.mrb[4].mxu0  ;;  %v7490_v32 = vadd.f32 %v7407_v48, %v7005_v10  ;;  %v14529_v7 = vpop.f32.mrb[253].mxu1  ;;  %v8043_v38 = vld [vmem:[#allocation2 + $0x131] ss:$2 sm:$0x3f] }
 0x5a9   :  { %v7009_v12 = vadd.f32 %v6938_v57, %v18460_v45  ;;  %v14471_v29 = vpop.f32.mrb[5].mxu0  ;;  %v7410_v22 = vpop.f32.mrb[254].mxu1  ;;  %v8047_v30 = vld [vmem:[#allocation2 + $0x133] ss:$2 sm:$0x3f] }
 0x5aa   :  { %v7520_v59 = vadd.f32 %v18552_v46, %v7490_v32  ;;  %v6941_v60 = vpop.f32.mrb[6].mxu0  ;;  %v7491_v43 = vadd.f32 %v7410_v22, %v7006_v58  ;;  %14880 = vrot.lane.b32.xlu0 %v14879_v61, %s15878_s22  ;;  %v14530_v44 = vpop.f32.mrb[255].mxu1  ;;  %v8461_v40 = vld [vmem:[#allocation2 + $0x133] ss:$2 sm:$0x3f] }
 0x5ab   :  { %v7010_v21 = vadd.f32 %v6941_v60, %v18462_v36  ;;  %14875 = vrot.lane.b32.xlu1 %v14874_v41, %s15880_s28  ;;  %v14472_v10 = vpop.f32.mrb[7].mxu0  ;;  %v8460_v57 = vld [vmem:[#allocation2 + $0x132] ss:$2 sm:$0x3f] }
 0x5ac   :  { %v7550_v37 = vmax.f32 %v7520_v59, 0.0  ;;  %v7521_v50 = vadd.f32 %v18552_v46, %v7491_v43 }
 0x5ae   :  { %7580 = vst.msk [vmem:[#allocation2 + $0x150] sm:$0xff] %vm1606_vm3, %v7550_v37  ;;  %v7551_v45 = vmax.f32 %v7521_v50, 0.0 }
 0x5af   :  { %v7415_v56 = vpop.f32.mrb[0].mxu1  ;;  %v8053_v18 = vld [vmem:[#allocation2 + $0x142] ss:$2 sm:$0x3f] }
 0x5b0   :  { %7581 = vst.msk [vmem:[#allocation2 + $0x158] sm:$0xff] %vm1606_vm3, %v7551_v45  ;;  %v6946_v58 = vpop.f32.mrb[8].mxu0  ;;  %v7492_v54 = vadd.f32 %v7415_v56, %v7007_v20  ;;  %v14533_v19 = vpop.f32.mrb[1].mxu1  ;;  %v14889_v33 = vpack.i.bf16 %v8045_v55, %v8053_v18  ;;  %v8051_v36 = vld [vmem:[#allocation2 + $0x141] ss:$2 sm:$0x3f] }
 0x5b1   :  { %v7011_v25 = vadd.f32 %v6946_v58, %v18464_v27  ;;  %v14475_v31 = vpop.f32.mrb[9].mxu0  ;;  %v7418_v4 = vpop.f32.mrb[2].mxu1  ;;  %v14884_v3 = vpack.i.bf16 %v8043_v38, %v8051_v36  ;;  %v8463_v6 = vld [vmem:[#allocation2 + $0x141] ss:$2 sm:$0x3f] }
 0x5b2   :  { %v7522_v13 = vadd.f32 %v18552_v46, %v7492_v54  ;;  %v6949_v14 = vpop.f32.mrb[10].mxu0  ;;  %v7493_v47 = vadd.f32 %v7418_v4, %v7008_v51  ;;  %14890 = vrot.lane.b32.xlu0 %v14889_v33, %s15880_s28  ;;  %v14534_v15 = vpop.f32.mrb[3].mxu1  ;;  %v8055_v16 = vld [vmem:[#allocation2 + $0x143] ss:$2 sm:$0x3f] }
 0x5b3   :  { %v7012_v2 = vadd.f32 %v6949_v14, %v18478_v24  ;;  %14885 = vrot.lane.b32.xlu1 %v14884_v3, %s15879_s27  ;;  %v8459_v20 = vld [vmem:[#allocation2 + $0x131] ss:$2 sm:$0x3f]  ;;  %v14476_v8 = vpop.f32.mrb[11].mxu0  ;;  %v14894_v17 = vpack.i.bf16 %v8047_v30, %v8055_v16 }
 0x5b4   :  { %v7552_v11 = vmax.f32 %v7522_v13, 0.0  ;;  %v7523_v27 = vadd.f32 %v18552_v46, %v7493_v47  ;;  %v14899_v28 = vpack.i.bf16 %v8459_v20, %v8463_v6  ;;  %v8465_v52 = vld [vmem:[#allocation2 + $0x143] ss:$2 sm:$0x3f] }
 0x5b5   :  { %v8464_v26 = vld [vmem:[#allocation2 + $0x142] ss:$2 sm:$0x3f]  ;;  %v14909_v53 = vpack.i.bf16 %v8461_v40, %v8465_v52 }
 0x5b6   :  { %7582 = vst.msk [vmem:[#allocation2 + $0x160] sm:$0xff] %vm1606_vm3, %v7552_v11  ;;  %v7553_v51 = vmax.f32 %v7523_v27, 0.0  ;;  %14900 = vrot.lane.b32.xlu0 %v14899_v28, %s15879_s27  ;;  %v14904_v35 = vpack.i.bf16 %v8460_v57, %v8464_v26 }
 0x5b7   :  { %14895 = vrot.lane.b32.xlu1 %v14894_v17, %s15878_s22  ;;  %v7423_v24 = vpop.f32.mrb[4].mxu1  ;;  %v8471_v10 = vld [vmem:[#allocation2 + $0x152] ss:$2 sm:$0x3f] }
 0x5b8   :  { %7583 = vst.msk [vmem:[#allocation2 + $0x168] sm:$0xff] %vm1606_vm3, %v7553_v51  ;;  %v6954_v9 = vpop.f32.mrb[12].mxu0  ;;  %v7494_v42 = vadd.f32 %v7423_v24, %v7009_v12  ;;  %v14537_v48 = vpop.f32.mrb[5].mxu1  ;;  %v8469_v37 = vld [vmem:[#allocation2 + $0x151] ss:$2 sm:$0x3f] }
 0x5b9   :  { %v7013_v32 = vadd.f32 %v6954_v9, %v18480_v0  ;;  %v14479_v7 = vpop.f32.mrb[13].mxu0  ;;  %v7426_v61 = vpop.f32.mrb[6].mxu1  ;;  %v8473_v16 = vld [vmem:[#allocation2 + $0x153] ss:$2 sm:$0x3f] }
 0x5ba   :  { %v7524_v29 = vadd.f32 %v18552_v46, %v7494_v42  ;;  %v6957_v22 = vpop.f32.mrb[14].mxu0  ;;  %v7495_v41 = vadd.f32 %v7426_v61, %v7010_v21  ;;  %14910 = vrot.lane.b32.xlu0 %v14909_v53, %s15878_s22  ;;  %v14538_v59 = vpop.f32.mrb[7].mxu1  ;;  %v8887_v27 = vld [vmem:[#allocation2 + $0x153] ss:$2 sm:$0x3f] }
 0x5bb   :  { %v7014_v60 = vadd.f32 %v6957_v22, %v18482_v62  ;;  %14905 = vrot.lane.b32.xlu1 %v14904_v35, %s15880_s28  ;;  %v14480_v12 = vpop.f32.mrb[15].mxu0  ;;  %v8886_v51 = vld [vmem:[#allocation2 + $0x152] ss:$2 sm:$0x3f] }
 0x5bc   :  { %v7554_v43 = vmax.f32 %v7524_v29, 0.0  ;;  %v7525_v44 = vadd.f32 %v18552_v46, %v7495_v41 }
 0x5be   :  { %7584 = vst.msk [vmem:[#allocation2 + $0x170] sm:$0xff] %vm1606_vm3, %v7554_v43  ;;  %v7555_v0 = vmax.f32 %v7525_v44, 0.0 }
 0x5bf   :  { %v7431_v50 = vpop.f32.mrb[8].mxu1  ;;  %v8479_v55 = vld [vmem:[#allocation2 + $0x162] ss:$2 sm:$0x3f] }
 0x5c0   :  { %7585 = vst.msk [vmem:[#allocation2 + $0x178] sm:$0xff] %vm1606_vm3, %v7555_v0  ;;  %v6962_v21 = vpop.f32.mrb[16].mxu0  ;;  %v7496_v45 = vadd.f32 %v7431_v50, %v7011_v25  ;;  %v14541_v38 = vpop.f32.mrb[9].mxu1  ;;  %v14919_v56 = vpack.i.bf16 %v8471_v10, %v8479_v55  ;;  %v8477_v62 = vld [vmem:[#allocation2 + $0x161] ss:$2 sm:$0x3f] }
 0x5c1   :  { %v7015_v18 = vadd.f32 %v6962_v21, %v18484_v23  ;;  %v14483_v58 = vpop.f32.mrb[17].mxu0  ;;  %v7434_v54 = vpop.f32.mrb[10].mxu1  ;;  %v14914_v19 = vpack.i.bf16 %v8469_v37, %v8477_v62  ;;  %v8889_v33 = vld [vmem:[#allocation2 + $0x161] ss:$2 sm:$0x3f] }
 0x5c2   :  { %v7526_v36 = vadd.f32 %v18552_v46, %v7496_v45  ;;  %v6965_v31 = vpop.f32.mrb[18].mxu0  ;;  %v7497_v4 = vadd.f32 %v7434_v54, %v7012_v2  ;;  %14920 = vrot.lane.b32.xlu0 %v14919_v56, %s15880_s28  ;;  %v14542_v3 = vpop.f32.mrb[11].mxu1  ;;  %v8481_v6 = vld [vmem:[#allocation2 + $0x163] ss:$2 sm:$0x3f] }
 0x5c3   :  { %v7016_v13 = vadd.f32 %v6965_v31, %v18498_v5  ;;  %14915 = vrot.lane.b32.xlu1 %v14914_v19, %s15879_s27  ;;  %v8885_v25 = vld [vmem:[#allocation2 + $0x151] ss:$2 sm:$0x3f]  ;;  %v14484_v14 = vpop.f32.mrb[19].mxu0  ;;  %v14924_v20 = vpack.i.bf16 %v8473_v16, %v8481_v6 }
 0x5c4   :  { %v7556_v47 = vmax.f32 %v7526_v36, 0.0  ;;  %v7527_v23 = vadd.f32 %v18552_v46, %v7497_v4  ;;  %v14929_v15 = vpack.i.bf16 %v8885_v25, %v8889_v33  ;;  %v8891_v8 = vld [vmem:[#allocation2 + $0x163] ss:$2 sm:$0x3f] }
 0x5c5   :  { %v8890_v11 = vld [vmem:[#allocation2 + $0x162] ss:$2 sm:$0x3f]  ;;  %v14939_v52 = vpack.i.bf16 %v8887_v27, %v8891_v8 }
 0x5c6   :  { %7586 = vst.msk [vmem:[#allocation2 + $0x180] sm:$0xff] %vm1606_vm3, %v7556_v47  ;;  %v7557_v2 = vmax.f32 %v7527_v23, 0.0  ;;  %14930 = vrot.lane.b32.xlu0 %v14929_v15, %s15879_s27  ;;  %v14934_v9 = vpack.i.bf16 %v8886_v51, %v8890_v11 }
 0x5c7   :  { %14925 = vrot.lane.b32.xlu1 %v14924_v20, %s15878_s22  ;;  %v7439_v5 = vpop.f32.mrb[12].mxu1  ;;  %v8897_v29 = vld [vmem:[#allocation2 + $0x172] ss:$2 sm:$0x3f] }
 0x5c8   :  { %7587 = vst.msk [vmem:[#allocation2 + $0x188] sm:$0xff] %vm1606_vm3, %v7557_v2  ;;  %v6970_v28 = vpop.f32.mrb[20].mxu0  ;;  %v7498_v30 = vadd.f32 %v7439_v5, %v7013_v32  ;;  %v14545_v17 = vpop.f32.mrb[13].mxu1  ;;  %v8895_v22 = vld [vmem:[#allocation2 + $0x171] ss:$2 sm:$0x3f] }
 0x5c9   :  { %v7017_v26 = vadd.f32 %v6970_v28, %v18500_v63  ;;  %v14487_v24 = vpop.f32.mrb[21].mxu0  ;;  %v7442_v40 = vpop.f32.mrb[14].mxu1  ;;  %v8899_v36 = vld [vmem:[#allocation2 + $0x173] ss:$2 sm:$0x3f] }
 0x5ca   :  { %v7528_v42 = vadd.f32 %v18552_v46, %v7498_v30  ;;  %v6973_v48 = vpop.f32.mrb[22].mxu0  ;;  %v7499_v53 = vadd.f32 %v7442_v40, %v7014_v60  ;;  %14940 = vrot.lane.b32.xlu0 %v14939_v52, %s15878_s22  ;;  %v14546_v57 = vpop.f32.mrb[15].mxu1  ;;  %v9312_v15 = vld [vmem:[#allocation2 + $0x172] ss:$2 sm:$0x3f] }
 0x5cb   :  { %v7018_v7 = vadd.f32 %v6973_v48, %v18502_v34  ;;  %14935 = vrot.lane.b32.xlu1 %v14934_v9, %s15880_s28  ;;  %v14488_v32 = vpop.f32.mrb[23].mxu0 }
 0x5cc   :  { %v7558_v61 = vmax.f32 %v7528_v42, 0.0  ;;  %v7529_v35 = vadd.f32 %v18552_v46, %v7499_v53 }
 0x5ce   :  { %7588 = vst.msk [vmem:[#allocation2 + $0x190] sm:$0xff] %vm1606_vm3, %v7558_v61  ;;  %v7559_v63 = vmax.f32 %v7529_v35, 0.0 }
 0x5cf   :  { %v7447_v41 = vpop.f32.mrb[16].mxu1  ;;  %v8905_v59 = vld [vmem:[#allocation2 + $0x182] ss:$2 sm:$0x3f] }
 0x5d0   :  { %7589 = vst.msk [vmem:[#allocation2 + $0x198] sm:$0xff] %vm1606_vm3, %v7559_v63  ;;  %v6978_v60 = vpop.f32.mrb[24].mxu0  ;;  %v7500_v12 = vadd.f32 %v7447_v41, %v7015_v18  ;;  %v14549_v43 = vpop.f32.mrb[17].mxu1  ;;  %v14949_v44 = vpack.i.bf16 %v8897_v29, %v8905_v59  ;;  %v8903_v34 = vld [vmem:[#allocation2 + $0x181] ss:$2 sm:$0x3f] }
 0x5d1   :  { %v7019_v10 = vadd.f32 %v6978_v60, %v18504_v39  ;;  %v14491_v0 = vpop.f32.mrb[25].mxu0  ;;  %v7450_v37 = vpop.f32.mrb[18].mxu1  ;;  %v14944_v50 = vpack.i.bf16 %v8895_v22, %v8903_v34  ;;  %v9315_v55 = vld [vmem:[#allocation2 + $0x181] ss:$2 sm:$0x3f] }
 0x5d2   :  { %v7530_v21 = vadd.f32 %v18552_v46, %v7500_v12  ;;  %v6981_v45 = vpop.f32.mrb[26].mxu0  ;;  %v7501_v38 = vadd.f32 %v7450_v37, %v7016_v13  ;;  %14950 = vrot.lane.b32.xlu0 %v14949_v44, %s15880_s28  ;;  %v14550_v56 = vpop.f32.mrb[19].mxu1  ;;  %v8907_v62 = vld [vmem:[#allocation2 + $0x183] ss:$2 sm:$0x3f] }
 0x5d3   :  { %v7020_v58 = vadd.f32 %v6981_v45, %v18519_v49  ;;  %14945 = vrot.lane.b32.xlu1 %v14944_v50, %s15879_s27  ;;  %v9311_v18 = vld [vmem:[#allocation2 + $0x171] ss:$2 sm:$0x3f]  ;;  %v14492_v54 = vpop.f32.mrb[27].mxu0  ;;  %v14954_v31 = vpack.i.bf16 %v8899_v36, %v8907_v62 }
 0x5d4   :  { %v7560_v19 = vmax.f32 %v7530_v21, 0.0  ;;  %v7531_v39 = vadd.f32 %v18552_v46, %v7501_v38  ;;  %v14959_v33 = vpack.i.bf16 %v9311_v18, %v9315_v55  ;;  %v9317_v4 = vld [vmem:[#allocation2 + $0x183] ss:$2 sm:$0x3f] }
 0x5d5   :  { %v9316_v6 = vld [vmem:[#allocation2 + $0x182] ss:$2 sm:$0x3f]  ;;  %v9313_v13 = vld [vmem:[#allocation2 + $0x173] ss:$2 sm:$0x3f] }
 0x5d6   :  { %7590 = vst.msk [vmem:[#allocation2 + $0x1a0] sm:$0xff] %vm1606_vm3, %v7560_v19  ;;  %v7561_v3 = vmax.f32 %v7531_v39, 0.0  ;;  %14960 = vrot.lane.b32.xlu0 %v14959_v33, %s15879_s27  ;;  %v14969_v23 = vpack.i.bf16 %v9313_v13, %v9317_v4  ;;  %v14964_v8 = vpack.i.bf16 %v9312_v15, %v9316_v6 }
 0x5d7   :  { %14955 = vrot.lane.b32.xlu1 %v14954_v31, %s15878_s22  ;;  %v7455_v49 = vpop.f32.mrb[20].mxu1  ;;  %v9323_v52 = vld [vmem:[#allocation2 + $0x192] ss:$2 sm:$0x3f] }
 0x5d8   :  { %7591 = vst.msk [vmem:[#allocation2 + $0x1a8] sm:$0xff] %vm1606_vm3, %v7561_v3  ;;  %v6986_v25 = vpop.f32.mrb[28].mxu0  ;;  %v7502_v14 = vadd.f32 %v7455_v49, %v7017_v26  ;;  %v14553_v47 = vpop.f32.mrb[21].mxu1  ;;  %v9321_v26 = vld [vmem:[#allocation2 + $0x191] ss:$2 sm:$0x3f] }
 0x5d9   :  { %v14495_v16 = vpop.f32.mrb[29].mxu0  ;;  %v7458_v20 = vpop.f32.mrb[22].mxu1  ;;  %v9737_v22 = vld [vmem:[#allocation2 + $0x191] ss:$2 sm:$0x3f] }
 0x5da   :  { %v7532_v2 = vadd.f32 %v18552_v46, %v7502_v14  ;;  %v6989_v11 = vpop.f32.mrb[30].mxu0  ;;  %v7503_v5 = vadd.f32 %v7458_v20, %v7018_v7  ;;  %14970 = vrot.lane.b32.xlu0 %v14969_v23, %s15878_s22  ;;  %v14554_v27 = vpop.f32.mrb[23].mxu1  ;;  %v9325_v12 = vld [vmem:[#allocation2 + $0x193] ss:$2 sm:$0x3f] }
 0x5db   :  { %14965 = vrot.lane.b32.xlu1 %v14964_v8, %s15880_s28  ;;  %v14496_v17 = vpop.f32.mrb[31].mxu0  ;;  %v9739_v37 = vld [vmem:[#allocation2 + $0x193] ss:$2 sm:$0x3f] }
 0x5dc   :  { %v7562_v28 = vmax.f32 %v7532_v2, 0.0  ;;  %v7533_v30 = vadd.f32 %v18552_v46, %v7503_v5  ;;  %v9738_v21 = vld [vmem:[#allocation2 + $0x192] ss:$2 sm:$0x3f]  ;;  %v15547_v17 = vld [vmem:[%s19876_s3 + $0x48] sm:$0xff]  }
 0x5dd   :  { %v7599_v25 = vld [vmem:[#allocation2 + $0xf0] ss:$2 sm:$0x3f]  ;;  %v7607_v14 = vld [vmem:[#allocation2 + $0x100] ss:$2 sm:$0x3f] }
 0x5de   :  { %7592 = vst.msk [vmem:[#allocation2 + $0x1b0] sm:$0xff] %vm1606_vm3, %v7562_v28  ;;  %v7563_v51 = vmax.f32 %v7533_v30, 0.0  ;;  %v15544_v30 = vld [vmem:[%s19876_s3] sm:$0xff]  }
 0x5df   :  { %v7463_v24 = vpop.f32.mrb[24].mxu1  ;;  %v9331_v40 = vld [vmem:[#allocation2 + $0x1a2] ss:$2 sm:$0x3f] }
 0x5e0   :  { %7593 = vst.msk [vmem:[#allocation2 + $0x1b8] sm:$0xff] %vm1606_vm3, %v7563_v51  ;;  %v7504_v9 = vadd.f32 %v7463_v24, %v7019_v10  ;;  %v14557_v42 = vpop.f32.mrb[25].mxu1  ;;  %v14979_v48 = vpack.i.bf16 %v9323_v52, %v9331_v40  ;;  %v9329_v53 = vld [vmem:[#allocation2 + $0x1a1] ss:$2 sm:$0x3f]  ;;  %v15549_v51 = vld [vmem:[%s19876_s3 + $0x50] sm:$0xff]  }
 0x5e1   :  { %v7466_v57 = vpop.f32.mrb[26].mxu1  ;;  %v14974_v7 = vpack.i.bf16 %v9321_v26, %v9329_v53  ;;  %v9741_v32 = vld [vmem:[#allocation2 + $0x1a1] ss:$2 sm:$0x3f]  ;;  %v15550_v40 = vld [vmem:[%s19876_s3 + $0x10] sm:$0xff]  }
 0x5e2   :  { %v7534_v61 = vadd.f32 %v18552_v46, %v7504_v9  ;;  %v7505_v35 = vadd.f32 %v7466_v57, %v7020_v58  ;;  %14980 = vrot.lane.b32.xlu0 %v14979_v48, %s15880_s28  ;;  %v14558_v29 = vpop.f32.mrb[27].mxu1  ;;  %v9333_v63 = vld [vmem:[#allocation2 + $0x1a3] ss:$2 sm:$0x3f]  ;;  %v14989_v60 = vpack.i.bf16 %v9737_v22, %v9741_v32  ;;  %v15551_v48 = vld [vmem:[%s19876_s3 + $0x58] sm:$0xff]  }
 0x5e3   :  { %14975 = vrot.lane.b32.xlu1 %v14974_v7, %s15879_s27  ;;  %v14984_v43 = vpack.i.bf16 %v9325_v12, %v9333_v63  ;;  %v9743_v44 = vld [vmem:[#allocation2 + $0x1a3] ss:$2 sm:$0x3f]  ;;  %v9742_v10 = vld [vmem:[#allocation2 + $0x1a2] ss:$2 sm:$0x3f] }
 0x5e4   :  { %v7564_v41 = vmax.f32 %v7534_v61, 0.0  ;;  %v7535_v59 = vadd.f32 %v18552_v46, %v7505_v35  ;;  %v14999_v55 = vpack.i.bf16 %v9739_v37, %v9743_v44  ;;  %v14994_v45 = vpack.i.bf16 %v9738_v21, %v9742_v10  ;;  %v15548_v52 = vld [vmem:[%s19876_s3 + $0x8] sm:$0xff]   ;;  %v7615_v7 = vld [vmem:[#allocation2 + $0x110] ss:$2 sm:$0x3f] }
 0x5e5   :  { %v7623_v32 = vld [vmem:[#allocation2 + $0x120] ss:$2 sm:$0x3f]  ;;  %v15552_v22 = vld [vmem:[%s19876_s3 + $0x18] sm:$0xff]  }
 0x5e6   :  { %7594 = vst.msk [vmem:[#allocation2 + $0x1c0] sm:$0xff] %vm1606_vm3, %v7564_v41  ;;  %v7565_v34 = vmax.f32 %v7535_v59, 0.0  ;;  %14990 = vrot.lane.b32.xlu0 %v14989_v60, %s15879_s27  ;;  %v15553_v60 = vld [vmem:[%s19876_s3 + $0x60] sm:$0xff]  }
 0x5e7   :  { %14985 = vrot.lane.b32.xlu1 %v14984_v43, %s15878_s22  ;;  %v7471_v0 = vpop.f32.mrb[28].mxu1  ;;  %v9749_v56 = vld [vmem:[#allocation2 + $0x1b2] ss:$2 sm:$0x3f] }
 0x5e8   :  { %7595 = vst.msk [vmem:[#allocation2 + $0x1c8] sm:$0xff] %vm1606_vm3, %v7565_v34  ;;  %v14561_v50 = vpop.f32.mrb[29].mxu1  ;;  %v9747_v62 = vld [vmem:[#allocation2 + $0x1b1] ss:$2 sm:$0x3f] }
 0x5e9   :  { %v7474_v46 = vpop.f32.mrb[30].mxu1  ;;  %v9751_v33 = vld [vmem:[#allocation2 + $0x1b3] ss:$2 sm:$0x3f] }
 0x5ea   :  { %15000 = vrot.lane.b32.xlu0 %v14999_v55, %s15878_s22  ;;  %v14562_v38 = vpop.f32.mrb[31].mxu1  ;;  %v15555_v46 = vld [vmem:[%s19876_s3 + $0x20] sm:$0xff]  }
 0x5eb   :  { %14995 = vrot.lane.b32.xlu1 %v14994_v45, %s15880_s28  ;;  %v15556_v45 = vld [vmem:[%s19876_s3 + $0x80] sm:$0xff]  }
 0x5ec   :  { %v8036_v38 = vld [vmem:[#allocation2 + $0x120] ss:$2 sm:$0x3f] }
 0x5ef   :  { %v9757_v58 = vld [vmem:[#allocation2 + $0x1c2] ss:$2 sm:$0x3f]  ;;  %v9755_v18 = vld [vmem:[#allocation2 + $0x1c1] ss:$2 sm:$0x3f] }
 0x5f0   :  { %v15009_v54 = vpack.i.bf16 %v9749_v56, %v9757_v58  ;;  %v15004_v19 = vpack.i.bf16 %v9747_v62, %v9755_v18  ;;  %v9759_v39 = vld [vmem:[#allocation2 + $0x1c3] ss:$2 sm:$0x3f] }
 0x5f1   :  { %v15014_v36 = vpack.i.bf16 %v9751_v33, %v9759_v39  ;;  %v15557_v62 = vld [vmem:[%s19876_s3 + $0x68] sm:$0xff]  }
 0x5f2   :  { %15010 = vrot.lane.b32.xlu0 %v15009_v54, %s15880_s28  ;;  %15005 = vrot.lane.b32.xlu1 %v15004_v19, %s15879_s27  ;;  %v15558_v58 = vld [vmem:[%s19876_s3 + $0xc8] sm:$0xff]  }
 0x5f3   :  { %v15559_v19 = vld [vmem:[%s19876_s3 + $0x28] sm:$0xff]  }
 0x5f4   :  { %v15560_v33 = vld [vmem:[%s19876_s3 + $0x88] sm:$0xff]  }
 0x5f6   :  { %15015 = vrot.lane.b32.xlu1 %v15014_v36, %s15878_s22 }
 0x604   :  { %v14846_v31 = vpop.permute.xlu1 %14845 }
 0x605   :  { %v14841_v4 = vpop.permute.xlu0 %14840  ;;  %v14848_v49 = vunpack.i.h.bf16 %v14846_v31  ;;  %v14847_v13 = vunpack.i.l.bf16 %v14846_v31  ;;  %v15561_v31 = vld [vmem:[%s19876_s3 + $0x70] sm:$0xff]  }
 0x606   :  { %v14843_v3 = vunpack.i.h.bf16 %v14841_v4  ;;  %v14842_v6 = vunpack.i.l.bf16 %v14841_v4  ;;  %v15562_v4 = vld [vmem:[%s19876_s3 + $0xd0] sm:$0xff]  }
 0x608   :  { %v7678_v47 = vsel %vm1606_vm3, %v7599_v25, %v14843_v3  ;;  %v7681_v23 = vsel %vm1606_vm3, %v7607_v14, %v14842_v6  ;;  %v15563_v25 = vld [vmem:[%s19876_s3 + $0x30] sm:$0xff]  }
 0x609   :  { %v14851_v15 = vpop.permute.xlu0 %14850  ;;  %v7679_v8 = vsel %vm1717_vm4, %v7678_v47, %v14848_v49  ;;  %v7682_v2 = vsel %vm1717_vm4, %v7681_v23, %v14847_v13  ;;  %v15564_v14 = vld [vmem:[%s19876_s3 + $0x90] sm:$0xff]  }
 0x60a   :  { %v14853_v16 = vunpack.i.h.bf16 %v14851_v15  ;;  %v14852_v20 = vunpack.i.l.bf16 %v14851_v15  ;;  %v8032_v47 = vld [vmem:[#allocation2 + $0x110] ss:$2 sm:$0x3f] }
 0x60b   :  { %v15565_v15 = vld [vmem:[%s19876_s3 + $0x78] sm:$0xff]  }
 0x60c   :  { %v7680_v11 = vsel %vm1719_vm5, %v7679_v8, %v14853_v16  ;;  %v7683_v5 = vsel %vm1719_vm5, %v7682_v2, %v14852_v20  ;;  %v15566_v16 = vld [vmem:[%s19876_s3 + $0xd8] sm:$0xff]  }
 0x60d   :  { %v7690_v27 = vpack.c.bf16 %v7680_v11, %v7680_v11  ;;  %v7691_v28 = vpack.c.bf16 %v7683_v5, %v7683_v5  ;;  %v8049_v11 = vld [vmem:[#allocation2 + $0x140] ss:$2 sm:$0x3f] }
 0x60f   :  { %7982 = vmatprep.mubr.bf16.mxu0 %v7691_v28 }
 0x610   :  { %7983 = vmatmul.mubr.bf16.vlgmr.msra.gmra.mrb[32].mxu0 %v7690_v27 }
 0x611   :  { %13572 = vmatpush3.bf16.msra.mxu0 %v15544_v30 }
 0x612   :  { %13573 = vmatprep.subr.bf16.mxu0 %v15547_v17  ;;  %v15567_v17 = vld [vmem:[%s19876_s3 + $0x38] sm:$0xff]  }
 0x614   :  { %v14861_v26 = vpop.permute.xlu0 %14860 }
 0x615   :  { %13574 = vmatpush3.bf16.msra.mxu0 %v15548_v52  ;;  %v14856_v24 = vpop.permute.xlu1 %14855  ;;  %v14863_v53 = vunpack.i.h.bf16 %v14861_v26  ;;  %v14862_v57 = vunpack.i.l.bf16 %v14861_v26  ;;  %v15568_v52 = vld [vmem:[%s19876_s3 + $0x98] sm:$0xff]   ;;  %v15569_v26 = vld [vmem:[%s19876_s3 + $0xe0] sm:$0xff]  }
 0x616   :  { %v14858_v9 = vunpack.i.h.bf16 %v14856_v24  ;;  %v14857_v42 = vunpack.i.l.bf16 %v14856_v24  ;;  %13575 = vmatprep.subr.bf16.mxu0 %v15549_v51  ;;  %v15570_v24 = vld [vmem:[%s19876_s3 + $0x40] sm:$0xff]  }
 0x618   :  { %v7684_v61 = vsel %vm1606_vm3, %v7615_v7, %v14858_v9  ;;  %v7687_v35 = vsel %vm1606_vm3, %v7623_v32, %v14857_v42  ;;  %v14871_v29 = vpop.permute.xlu0 %14870 }
 0x619   :  { %13576 = vmatpush3.bf16.msra.mxu0 %v15550_v40  ;;  %v14866_v63 = vpop.permute.xlu1 %14865  ;;  %v14872_v12 = vunpack.i.l.bf16 %v14871_v29  ;;  %v7685_v43 = vsel %vm1717_vm4, %v7684_v61, %v14863_v53  ;;  %v7688_v44 = vsel %vm1717_vm4, %v7687_v35, %v14862_v57  ;;  %v14873_v3 = vunpack.i.h.bf16 %v14871_v29  ;;  %v15571_v61 = vld [vmem:[%s19876_s3 + $0xa0] sm:$0xff]  }
 0x61a   :  { %v14868_v41 = vunpack.i.h.bf16 %v14866_v63  ;;  %v14867_v59 = vunpack.i.l.bf16 %v14866_v63  ;;  %13577 = vmatprep.subr.bf16.mxu0 %v15551_v48  ;;  %v15572_v35 = vld [vmem:[%s19876_s3] sm:$0xff]  }
 0x61b   :  { %v8107_v18 = vsel %vm1606_vm3, %v8036_v38, %v14872_v12  ;;  %v8104_v20 = vsel %vm1606_vm3, %v8032_v47, %v14873_v3  ;;  %v8462_v63 = vld [vmem:[#allocation2 + $0x140] ss:$2 sm:$0x3f]  ;;  %v15584_v3 = vld [vmem:[%s19876_s3 + $0x18] sm:$0xff]  }
 0x61c   :  { %v7686_v34 = vsel %vm1719_vm5, %v7685_v43, %v14868_v41  ;;  %v14881_v10 = vpop.permute.xlu0 %14880  ;;  %v7689_v0 = vsel %vm1719_vm5, %v7688_v44, %v14867_v59  ;;  %v15573_v41 = vld [vmem:[%s19876_s3 + $0xe8] sm:$0xff]  }
 0x61d   :  { %v7692_v37 = vpack.c.bf16 %v7686_v34, %v7686_v34  ;;  %13578 = vmatpush3.bf16.msra.mxu0 %v15552_v22  ;;  %v14882_v50 = vunpack.i.l.bf16 %v14881_v10  ;;  %v14876_v55 = vpop.permute.xlu1 %14875  ;;  %v7693_v21 = vpack.c.bf16 %v7689_v0, %v7689_v0  ;;  %v14883_v8 = vunpack.i.h.bf16 %v14881_v10  ;;  %v15574_v59 = vld [vmem:[%s19876_s3 + $0x48] sm:$0xff]   ;;  %v15577_v0 = vld [vmem:[%s19876_s3 + $0xf0] sm:$0xff]  }
 0x61e   :  { %v14877_v56 = vunpack.i.l.bf16 %v14876_v55  ;;  %13579 = vmatprep.subr.bf16.mxu0 %v15553_v60  ;;  %v14878_v6 = vunpack.i.h.bf16 %v14876_v55  ;;  %v15575_v43 = vld [vmem:[%s19876_s3 + $0xa8] sm:$0xff]  }
 0x61f   :  { %8022 = vmatprep.mubr.bf16.mxu1 %v7693_v21  ;;  %v15576_v44 = vld [vmem:[%s19876_s3 + $0x8] sm:$0xff]  }
 0x620   :  { %v8108_v54 = vsel %vm1717_vm4, %v8107_v18, %v14877_v56  ;;  %8023 = vmatmul.mubr.bf16.vlgmr.msra.gmra.mrb[32].mxu1 %v7692_v37  ;;  %v8105_v5 = vsel %vm1717_vm4, %v8104_v20, %v14878_v6  ;;  %v15578_v37 = vld [vmem:[%s19876_s3 + $0x50] sm:$0xff]   ;;  %v15582_v18 = vld [vmem:[%s19876_s3 + $0x58] sm:$0xff]  }
 0x621   :  { %13580 = vmatpush3.bf16.msra.mxu0 %v15555_v46  ;;  %13594 = vmatpush3.bf16.msra.mxu1 %v15556_v45  ;;  %v8109_v39 = vsel %vm1719_vm5, %v8108_v54, %v14882_v50  ;;  %v8106_v40 = vsel %vm1719_vm5, %v8105_v5, %v14883_v8  ;;  %v15579_v46 = vld [vmem:[%s19876_s3 + $0xb0] sm:$0xff]  }
 0x622   :  { %13581 = vmatprep.subr.bf16.mxu0 %v15557_v62  ;;  %13595 = vmatprep.subr.bf16.mxu1 %v15558_v58  ;;  %v8117_v36 = vpack.c.bf16 %v8109_v39, %v8109_v39  ;;  %v8116_v29 = vpack.c.bf16 %v8106_v40, %v8106_v40  ;;  %v15580_v45 = vld [vmem:[%s19876_s3 + $0x10] sm:$0xff]   ;;  %v15581_v58 = vld [vmem:[%s19876_s3 + $0xf8] sm:$0xff]  }
 0x623   :  { %v8041_v56 = vld [vmem:[#allocation2 + $0x130] ss:$2 sm:$0x3f] }
 0x624   :  { %8408 = vmatprep.mubr.bf16.mxu0 %v8117_v36  ;;  %v18750_v49 = vpop.permute.xlu0 %14890 }
 0x625   :  { %13582 = vmatpush3.bf16.msra.mxu0 %v15559_v19  ;;  %13596 = vmatpush3.bf16.msra.mxu1 %v15560_v33  ;;  %v18752_v13 = vpop.permute.xlu1 %14885  ;;  %v14892_v2 = vunpack.i.l.bf16 %v18750_v49  ;;  %v14893_v38 = vunpack.i.h.bf16 %v18750_v49  ;;  %v8475_v33 = vld [vmem:[#allocation2 + $0x160] ss:$2 sm:$0x3f] }
 0x626   :  { %v14887_v23 = vunpack.i.l.bf16 %v18752_v13  ;;  %13583 = vmatprep.subr.bf16.mxu0 %v15561_v31  ;;  %13597 = vmatprep.subr.bf16.mxu1 %v15562_v4  ;;  %v14888_v50 = vunpack.i.h.bf16 %v18752_v13  ;;  %v15583_v4 = vld [vmem:[%s19876_s3 + $0xb8] sm:$0xff]   ;;  %v15585_v13 = vld [vmem:[%s19876_s3 + $0x60] sm:$0xff]  }
 0x628   :  { %v8113_v27 = vsel %vm1606_vm3, %v8049_v11, %v14887_v23  ;;  %v18771_v28 = vpop.permute.xlu0 %14900  ;;  %v8110_v54 = vsel %vm1606_vm3, %v8041_v56, %v14888_v50  ;;  %v15590_v11 = vld [vmem:[%s19876_s3 + $0xc8] sm:$0xff]  }
 0x629   :  { %13584 = vmatpush3.bf16.msra.mxu0 %v15563_v25  ;;  %13598 = vmatpush3.bf16.msra.mxu1 %v15564_v14  ;;  %v18773_v30 = vpop.permute.xlu1 %14895  ;;  %v14902_v9 = vunpack.i.l.bf16 %v18771_v28  ;;  %v8114_v42 = vsel %vm1717_vm4, %v8113_v27, %v14892_v2  ;;  %v8111_v6 = vsel %vm1717_vm4, %v8110_v54, %v14893_v38  ;;  %v15586_v25 = vld [vmem:[%s19876_s3 + $0xc0] sm:$0xff]   ;;  %v15589_v2 = vld [vmem:[%s19876_s3 + $0x68] sm:$0xff]  }
 0x62a   :  { %v14897_v51 = vunpack.i.l.bf16 %v18773_v30  ;;  %13585 = vmatprep.subr.bf16.mxu0 %v15565_v15  ;;  %13599 = vmatprep.subr.bf16.mxu1 %v15566_v16  ;;  %v14898_v19 = vunpack.i.h.bf16 %v18773_v30  ;;  %v15587_v15 = vld [vmem:[%s19876_s3 + $0x20] sm:$0xff]   ;;  %v15591_v27 = vld [vmem:[%s19876_s3 + $0x28] sm:$0xff]  }
 0x62b   :  { %v8533_v60 = vsel %vm1606_vm3, %v8462_v63, %v14902_v9  ;;  %v15588_v16 = vld [vmem:[%s19876_s3 + $0x80] sm:$0xff]   ;;  %v15592_v30 = vld [vmem:[%s19876_s3 + $0x88] sm:$0xff]   ;;  %v15595_v9 = vld [vmem:[%s19876_s3 + $0x30] sm:$0xff]  }
 0x62c   :  { %v18791_v48 = vpop.permute.xlu0 %14910  ;;  %v8115_v53 = vsel %vm1719_vm5, %v8114_v42, %v14897_v51  ;;  %v8112_v14 = vsel %vm1719_vm5, %v8111_v6, %v14898_v19  ;;  %v14903_v51 = vunpack.i.h.bf16 %v18771_v28  ;;  %v15596_v42 = vld [vmem:[%s19876_s3 + $0x90] sm:$0xff]   ;;  %v8888_v63 = vld [vmem:[#allocation2 + $0x160] ss:$2 sm:$0x3f] }
 0x62d   :  { %13586 = vmatpush3.bf16.msra.mxu0 %v15567_v17  ;;  %13600 = vmatpush3.bf16.msra.mxu1 %v15568_v52  ;;  %v14912_v57 = vunpack.i.l.bf16 %v18791_v48  ;;  %v18795_v7 = vpop.permute.xlu1 %14905  ;;  %v8119_v32 = vpack.c.bf16 %v8115_v53, %v8115_v53  ;;  %v8118_v20 = vpack.c.bf16 %v8112_v14, %v8112_v14  ;;  %v15593_v17 = vld [vmem:[%s19876_s3 + $0x70] sm:$0xff]   ;;  %v15605_v50 = vld [vmem:[%s19876_s3 + $0xe8] sm:$0xff]  }
 0x62e   :  { %v14907_v22 = vunpack.i.l.bf16 %v18795_v7  ;;  %13601 = vmatprep.subr.bf16.mxu1 %v15569_v26  ;;  %13615 = vmatprep.subr.bf16.mxu0 %v15570_v24  ;;  %v15594_v52 = vld [vmem:[%s19876_s3 + $0xd0] sm:$0xff]   ;;  %v14908_v24 = vunpack.i.h.bf16 %v18795_v7  ;;  %v15597_v7 = vld [vmem:[%s19876_s3 + $0x78] sm:$0xff]   ;;  %v15607_v56 = vld [vmem:[%s19876_s3 + $0xa8] sm:$0xff]  }
 0x62f   :  { %8448 = vmatprep.mubr.bf16.mxu1 %v8119_v32  ;;  %v8458_v53 = vld [vmem:[#allocation2 + $0x130] ss:$2 sm:$0x3f] }
 0x630   :  { %v8534_v12 = vsel %vm1717_vm4, %v8533_v60, %v14907_v22  ;;  %8409 = vmatmul.mubr.bf16.vlgmr.msra.gmra.mrb[36].mxu0 %v8116_v29  ;;  %v15598_v32 = vld [vmem:[%s19876_s3 + $0xd8] sm:$0xff]  }
 0x631   :  { %13602 = vmatpush3.bf16.msra.mxu1 %v15571_v61  ;;  %13616 = vmatpush3.bf16.msra.mxu0 %v15572_v35  ;;  %v8535_v34 = vsel %vm1719_vm5, %v8534_v12, %v14912_v57  ;;  %v8530_v61 = vsel %vm1606_vm3, %v8458_v53, %v14903_v51  ;;  %v14913_v35 = vunpack.i.h.bf16 %v18791_v48  ;;  %v15600_v60 = vld [vmem:[%s19876_s3 + $0x98] sm:$0xff]   ;;  %v15601_v48 = vld [vmem:[%s19876_s3 + $0xe0] sm:$0xff]   ;;  %v15621_v51 = vld [vmem:[%s19876_s3 + $0x68] sm:$0xff]  }
 0x632   :  { %13603 = vmatprep.subr.bf16.mxu1 %v15573_v41  ;;  %13617 = vmatprep.subr.bf16.mxu0 %v15574_v59  ;;  %v8543_v10 = vpack.c.bf16 %v8535_v34, %v8535_v34  ;;  %v8531_v29 = vsel %vm1717_vm4, %v8530_v61, %v14908_v24  ;;  %v15599_v59 = vld [vmem:[%s19876_s3 + $0x38] sm:$0xff]   ;;  %v15603_v34 = vld [vmem:[%s19876_s3 + $0xa0] sm:$0xff]   ;;  %v15622_v24 = vld [vmem:[%s19876_s3 + $0xc8] sm:$0xff]  }
 0x633   :  { %v15624_v53 = vld [vmem:[%s19876_s3 + $0x88] sm:$0xff]  }
 0x634   :  { %8834 = vmatprep.mubr.bf16.mxu0 %v8543_v10  ;;  %v18826_v55 = vpop.permute.xlu0 %14920  ;;  %v15604_v10 = vld [vmem:[%s19876_s3] sm:$0xff]  }
 0x635   :  { %13604 = vmatpush3.bf16.msra.mxu1 %v15575_v43  ;;  %13618 = vmatpush3.bf16.msra.mxu0 %v15576_v44  ;;  %v18828_v21 = vpop.permute.xlu1 %14915  ;;  %v14922_v39 = vunpack.i.l.bf16 %v18826_v55  ;;  %v15602_v43 = vld [vmem:[%s19876_s3 + $0x40] sm:$0xff]   ;;  %v8532_v44 = vsel %vm1719_vm5, %v8531_v29, %v14913_v35 }
 0x636   :  { %v14917_v62 = vunpack.i.l.bf16 %v18828_v21  ;;  %13605 = vmatprep.subr.bf16.mxu1 %v15577_v0  ;;  %13619 = vmatprep.subr.bf16.mxu0 %v15578_v37  ;;  %v8542_v37 = vpack.c.bf16 %v8532_v44, %v8532_v44  ;;  %v14918_v54 = vunpack.i.h.bf16 %v18828_v21  ;;  %v15613_v21 = vld [vmem:[%s19876_s3 + $0xf8] sm:$0xff]   ;;  %v9314_v44 = vld [vmem:[#allocation2 + $0x180] ss:$2 sm:$0x3f] }
 0x638   :  { %v8539_v36 = vsel %vm1606_vm3, %v8475_v33, %v14917_v62  ;;  %v18879_v5 = vpop.permute.xlu0 %14930  ;;  %v15608_v62 = vld [vmem:[%s19876_s3 + $0x8] sm:$0xff]   ;;  %v15611_v33 = vld [vmem:[%s19876_s3 + $0xb0] sm:$0xff]  }
 0x639   :  { %13606 = vmatpush3.bf16.msra.mxu1 %v15579_v46  ;;  %13620 = vmatpush3.bf16.msra.mxu0 %v15580_v45  ;;  %v18848_v31 = vpop.permute.xlu1 %14925  ;;  %v8540_v47 = vsel %vm1717_vm4, %v8539_v36, %v14922_v39  ;;  %v14932_v40 = vunpack.i.l.bf16 %v18879_v5  ;;  %v15606_v46 = vld [vmem:[%s19876_s3 + $0x48] sm:$0xff]   ;;  %v15612_v36 = vld [vmem:[%s19876_s3 + $0x10] sm:$0xff]  }
 0x63a   :  { %v14927_v49 = vunpack.i.l.bf16 %v18848_v31  ;;  %13607 = vmatprep.subr.bf16.mxu1 %v15581_v58  ;;  %13621 = vmatprep.subr.bf16.mxu0 %v15582_v18  ;;  %v15609_v58 = vld [vmem:[%s19876_s3 + $0xf0] sm:$0xff]  }
 0x63b   :  { %v8959_v22 = vsel %vm1606_vm3, %v8888_v63, %v14932_v40  ;;  %v15610_v18 = vld [vmem:[%s19876_s3 + $0x50] sm:$0xff]  }
 0x63c   :  { %v8541_v23 = vsel %vm1719_vm5, %v8540_v47, %v14927_v49  ;;  %v18904_v57 = vpop.permute.xlu0 %14940  ;;  %v15614_v49 = vld [vmem:[%s19876_s3 + $0x58] sm:$0xff]   ;;  %v15627_v63 = vld [vmem:[%s19876_s3 + $0x30] sm:$0xff]  }
 0x63d   :  { %13608 = vmatpush3.bf16.msra.mxu1 %v15583_v4  ;;  %13622 = vmatpush3.bf16.msra.mxu0 %v15584_v3  ;;  %v8545_v8 = vpack.c.bf16 %v8541_v23, %v8541_v23  ;;  %v18894_v26 = vpop.permute.xlu1 %14935  ;;  %v14942_v41 = vunpack.i.l.bf16 %v18904_v57  ;;  %v14923_v4 = vunpack.i.h.bf16 %v18826_v55  ;;  %v8467_v3 = vld [vmem:[#allocation2 + $0x150] ss:$2 sm:$0x3f]  ;;  %v8901_v55 = vld [vmem:[#allocation2 + $0x180] ss:$2 sm:$0x3f] }
 0x63e   :  { %13623 = vmatprep.subr.bf16.mxu0 %v15585_v13  ;;  %13637 = vmatprep.subr.bf16.mxu1 %v15586_v25  ;;  %v14937_v28 = vunpack.i.l.bf16 %v18894_v26  ;;  %v8536_v13 = vsel %vm1606_vm3, %v8467_v3, %v14918_v54  ;;  %v14928_v25 = vunpack.i.h.bf16 %v18848_v31  ;;  %v15617_v31 = vld [vmem:[%s19876_s3 + $0x60] sm:$0xff]   ;;  %v14938_v35 = vunpack.i.h.bf16 %v18894_v26  ;;  %v15629_v26 = vld [vmem:[%s19876_s3 + $0x78] sm:$0xff]   ;;  %v15637_v54 = vld [vmem:[%s19876_s3 + $0xe8] sm:$0xff]  }
 0x63f   :  { %v15640_v3 = vld [vmem:[%s19876_s3 + $0x8] sm:$0xff]  }
 0x640   :  { %8449 = vmatmul.mubr.bf16.vlgmr.msra.gmra.mrb[36].mxu1 %v8118_v20  ;;  %v8960_v12 = vsel %vm1717_vm4, %v8959_v22, %v14937_v28  ;;  %v8537_v20 = vsel %vm1717_vm4, %v8536_v13, %v14923_v4  ;;  %v15625_v28 = vld [vmem:[%s19876_s3 + $0x70] sm:$0xff]   ;;  %v15639_v4 = vld [vmem:[%s19876_s3 + $0xa8] sm:$0xff]  }
 0x641   :  { %13624 = vmatpush3.bf16.msra.mxu0 %v15587_v15  ;;  %13638 = vmatpush3.bf16.msra.mxu1 %v15588_v16  ;;  %v8961_v0 = vsel %vm1719_vm5, %v8960_v12, %v14942_v41  ;;  %v15615_v15 = vld [vmem:[%s19876_s3 + $0xb8] sm:$0xff]   ;;  %v15628_v22 = vld [vmem:[%s19876_s3 + $0x90] sm:$0xff]  }
 0x642   :  { %8874 = vmatprep.mubr.bf16.mxu1 %v8545_v8  ;;  %13625 = vmatprep.subr.bf16.mxu0 %v15589_v2  ;;  %v8969_v38 = vpack.c.bf16 %v8961_v0, %v8961_v0  ;;  %v15616_v16 = vld [vmem:[%s19876_s3 + $0x18] sm:$0xff]   ;;  %v15618_v8 = vld [vmem:[%s19876_s3 + $0xc0] sm:$0xff]   ;;  %v8538_v2 = vsel %vm1719_vm5, %v8537_v20, %v14928_v25 }
 0x643   :  { %13639 = vmatprep.subr.bf16.mxu1 %v15590_v11  ;;  %v8884_v41 = vld [vmem:[#allocation2 + $0x150] ss:$2 sm:$0x3f] }
 0x644   :  { %v18960_v19 = vpop.permute.xlu0 %14950  ;;  %v15631_v0 = vld [vmem:[%s19876_s3 + $0x38] sm:$0xff]  }
 0x645   :  { %13626 = vmatpush3.bf16.msra.mxu0 %v15591_v27  ;;  %13640 = vmatpush3.bf16.msra.mxu1 %v15592_v30  ;;  %v18945_v45 = vpop.permute.xlu1 %14945  ;;  %v14952_v14 = vunpack.i.l.bf16 %v18960_v19  ;;  %v15619_v27 = vld [vmem:[%s19876_s3 + $0x20] sm:$0xff]   ;;  %v15646_v20 = vld [vmem:[%s19876_s3 + $0x58] sm:$0xff]  }
 0x646   :  { %13627 = vmatprep.subr.bf16.mxu0 %v15593_v17  ;;  %13641 = vmatprep.subr.bf16.mxu1 %v15594_v52  ;;  %v14947_v39 = vunpack.i.l.bf16 %v18945_v45  ;;  %v15620_v30 = vld [vmem:[%s19876_s3 + $0x80] sm:$0xff]   ;;  %v8544_v52 = vpack.c.bf16 %v8538_v2, %v8538_v2  ;;  %v14948_v13 = vunpack.i.h.bf16 %v18945_v45  ;;  %v15645_v45 = vld [vmem:[%s19876_s3 + $0xf8] sm:$0xff]  }
 0x648   :  { %v8965_v47 = vsel %vm1606_vm3, %v8901_v55, %v14947_v39  ;;  %v19011_v40 = vpop.permute.xlu0 %14960  ;;  %v15638_v39 = vld [vmem:[%s19876_s3 + $0x48] sm:$0xff]   ;;  %v15643_v55 = vld [vmem:[%s19876_s3 + $0xb0] sm:$0xff]  }
 0x649   :  { %13628 = vmatpush3.bf16.msra.mxu0 %v15595_v9  ;;  %13642 = vmatpush3.bf16.msra.mxu1 %v15596_v42  ;;  %v18970_v6 = vpop.permute.xlu1 %14955  ;;  %v8966_v11 = vsel %vm1717_vm4, %v8965_v47, %v14952_v14  ;;  %v15623_v42 = vld [vmem:[%s19876_s3 + $0x28] sm:$0xff]   ;;  %v14962_v29 = vunpack.i.l.bf16 %v19011_v40  ;;  %v15644_v47 = vld [vmem:[%s19876_s3 + $0x10] sm:$0xff]  }
 0x64a   :  { %13629 = vmatprep.subr.bf16.mxu0 %v15597_v7  ;;  %13643 = vmatprep.subr.bf16.mxu1 %v15598_v32  ;;  %v14957_v23 = vunpack.i.l.bf16 %v18970_v6  ;;  %v15626_v7 = vld [vmem:[%s19876_s3 + $0xd0] sm:$0xff]   ;;  %v14933_v32 = vunpack.i.h.bf16 %v18879_v5 }
 0x64c   :  { %v8967_v17 = vsel %vm1719_vm5, %v8966_v11, %v14957_v23  ;;  %v8956_v12 = vsel %vm1606_vm3, %v8884_v41, %v14933_v32  ;;  %v14953_v23 = vunpack.i.h.bf16 %v18960_v19  ;;  %v9327_v19 = vld [vmem:[#allocation2 + $0x1a0] ss:$2 sm:$0x3f] }
 0x64d   :  { %13630 = vmatpush3.bf16.msra.mxu0 %v15599_v59  ;;  %13644 = vmatpush3.bf16.msra.mxu1 %v15600_v60  ;;  %v8971_v9 = vpack.c.bf16 %v8967_v17, %v8967_v17  ;;  %v19026_v61 = vpop.permute.xlu1 %14965  ;;  %v19036_v59 = vpop.permute.xlu0 %14970  ;;  %v15630_v60 = vld [vmem:[%s19876_s3 + $0xd8] sm:$0xff]   ;;  %v15653_v32 = vld [vmem:[%s19876_s3 + $0x68] sm:$0xff]  }
 0x64e   :  { %13645 = vmatprep.subr.bf16.mxu1 %v15601_v48  ;;  %13659 = vmatprep.subr.bf16.mxu0 %v15602_v43  ;;  %v14967_v5 = vunpack.i.l.bf16 %v19026_v61  ;;  %v14943_v48 = vunpack.i.h.bf16 %v18904_v57  ;;  %v8957_v43 = vsel %vm1717_vm4, %v8956_v12, %v14938_v35  ;;  %v15633_v57 = vld [vmem:[%s19876_s3 + $0xe0] sm:$0xff]   ;;  %v15648_v17 = vld [vmem:[%s19876_s3 + $0x18] sm:$0xff]   ;;  %v15654_v35 = vld [vmem:[%s19876_s3 + $0xc8] sm:$0xff]  }
 0x64f   :  { %v15656_v41 = vld [vmem:[%s19876_s3 + $0x88] sm:$0xff]  }
 0x650   :  { %8835 = vmatmul.mubr.bf16.vlgmr.msra.gmra.mrb[40].mxu0 %v8542_v37  ;;  %v15632_v37 = vld [vmem:[%s19876_s3 + $0x98] sm:$0xff]  }
 0x651   :  { %13646 = vmatpush3.bf16.msra.mxu1 %v15603_v34  ;;  %13660 = vmatpush3.bf16.msra.mxu0 %v15604_v10  ;;  %v9385_v34 = vsel %vm1606_vm3, %v9314_v44, %v14962_v29  ;;  %v14972_v10 = vunpack.i.l.bf16 %v19036_v59  ;;  %v15659_v44 = vld [vmem:[%s19876_s3 + $0x30] sm:$0xff]  }
 0x652   :  { %9260 = vmatprep.mubr.bf16.mxu0 %v8969_v38  ;;  %13647 = vmatprep.subr.bf16.mxu1 %v15605_v50  ;;  %v9386_v50 = vsel %vm1717_vm4, %v9385_v34, %v14967_v5  ;;  %v8958_v38 = vsel %vm1719_vm5, %v8957_v43, %v14943_v48  ;;  %v15657_v5 = vld [vmem:[%s19876_s3 + $0x70] sm:$0xff]   ;;  %v14968_v48 = vunpack.i.h.bf16 %v19026_v61  ;;  %v15661_v61 = vld [vmem:[%s19876_s3 + $0x78] sm:$0xff]  }
 0x653   :  { %13661 = vmatprep.subr.bf16.mxu0 %v15606_v46  ;;  %v15634_v46 = vld [vmem:[%s19876_s3 + $0x40] sm:$0xff]   ;;  %v15660_v34 = vld [vmem:[%s19876_s3 + $0x90] sm:$0xff]  }
 0x654   :  { %v19092_v25 = vpop.permute.xlu0 %14980 }
 0x655   :  { %13648 = vmatpush3.bf16.msra.mxu1 %v15607_v56  ;;  %13662 = vmatpush3.bf16.msra.mxu0 %v15608_v62  ;;  %v15635_v56 = vld [vmem:[%s19876_s3 + $0xa0] sm:$0xff]   ;;  %v14982_v2 = vunpack.i.l.bf16 %v19092_v25 }
 0x656   :  { %13649 = vmatprep.subr.bf16.mxu1 %v15609_v58  ;;  %13663 = vmatprep.subr.bf16.mxu0 %v15610_v18  ;;  %v15636_v62 = vld [vmem:[%s19876_s3] sm:$0xff]   ;;  %v9387_v58 = vsel %vm1719_vm5, %v9386_v50, %v14972_v10  ;;  %v8968_v18 = vpack.c.bf16 %v8958_v38, %v8958_v38  ;;  %v9310_v10 = vld [vmem:[#allocation2 + $0x170] ss:$2 sm:$0x3f] }
 0x657   :  { %v9740_v38 = vld [vmem:[#allocation2 + $0x1a0] ss:$2 sm:$0x3f] }
 0x658   :  { %v19143_v29 = vpop.permute.xlu0 %14990 }
 0x659   :  { %13650 = vmatpush3.bf16.msra.mxu1 %v15611_v33  ;;  %13664 = vmatpush3.bf16.msra.mxu0 %v15612_v36  ;;  %v19077_v33 = vpop.permute.xlu1 %14975  ;;  %v9395_v36 = vpack.c.bf16 %v9387_v58, %v9387_v58  ;;  %v14992_v43 = vunpack.i.l.bf16 %v19143_v29  ;;  %v15663_v58 = vld [vmem:[%s19876_s3 + $0x38] sm:$0xff]  }
 0x65a   :  { %13651 = vmatprep.subr.bf16.mxu1 %v15613_v21  ;;  %13665 = vmatprep.subr.bf16.mxu0 %v15614_v49  ;;  %v15641_v21 = vld [vmem:[%s19876_s3 + $0xf0] sm:$0xff]   ;;  %v14977_v14 = vunpack.i.l.bf16 %v19077_v33 }
 0x65b   :  { %v15642_v49 = vld [vmem:[%s19876_s3 + $0x50] sm:$0xff]  }
 0x65c   :  { %v9391_v11 = vsel %vm1606_vm3, %v9327_v19, %v14977_v14  ;;  %v15670_v14 = vld [vmem:[%s19876_s3 + $0x48] sm:$0xff]   ;;  %v15675_v19 = vld [vmem:[%s19876_s3 + $0xb0] sm:$0xff]  }
 0x65d   :  { %13652 = vmatpush3.bf16.msra.mxu1 %v15615_v15  ;;  %13666 = vmatpush3.bf16.msra.mxu0 %v15616_v16  ;;  %v8893_v15 = vld [vmem:[#allocation2 + $0x170] ss:$2 sm:$0x3f]  ;;  %v19102_v16 = vpop.permute.xlu1 %14985 }
 0x65e   :  { %13667 = vmatprep.subr.bf16.mxu0 %v15617_v31  ;;  %13681 = vmatprep.subr.bf16.mxu1 %v15618_v8  ;;  %v8962_v31 = vsel %vm1606_vm3, %v8893_v15, %v14948_v13  ;;  %v14958_v8 = vunpack.i.h.bf16 %v18970_v6  ;;  %v15649_v6 = vld [vmem:[%s19876_s3 + $0x60] sm:$0xff]   ;;  %v15669_v13 = vld [vmem:[%s19876_s3 + $0xe8] sm:$0xff]  }
 0x65f   :  { %v15672_v15 = vld [vmem:[%s19876_s3 + $0x8] sm:$0xff]  }
 0x660   :  { %8875 = vmatmul.mubr.bf16.vlgmr.msra.gmra.mrb[40].mxu1 %v8544_v52  ;;  %v8963_v52 = vsel %vm1717_vm4, %v8962_v31, %v14953_v23  ;;  %v15671_v23 = vld [vmem:[%s19876_s3 + $0xa8] sm:$0xff]   ;;  %v14978_v31 = vunpack.i.h.bf16 %v19077_v33  ;;  %v15677_v33 = vld [vmem:[%s19876_s3 + $0xf8] sm:$0xff]  }
 0x661   :  { %13668 = vmatpush3.bf16.msra.mxu0 %v15619_v27  ;;  %13682 = vmatpush3.bf16.msra.mxu1 %v15620_v30  ;;  %v14987_v27 = vunpack.i.l.bf16 %v19102_v16  ;;  %v15647_v30 = vld [vmem:[%s19876_s3 + $0xb8] sm:$0xff]   ;;  %v19158_v12 = vpop.permute.xlu1 %14995 }
 0x662   :  { %9300 = vmatprep.mubr.bf16.mxu1 %v8971_v9  ;;  %13669 = vmatprep.subr.bf16.mxu0 %v15621_v51  ;;  %v15650_v51 = vld [vmem:[%s19876_s3 + $0xc0] sm:$0xff]   ;;  %v9392_v9 = vsel %vm1717_vm4, %v9391_v11, %v14982_v2  ;;  %v15676_v11 = vld [vmem:[%s19876_s3 + $0x10] sm:$0xff]  }
 0x663   :  { %13683 = vmatprep.subr.bf16.mxu1 %v15622_v24  ;;  %v8964_v24 = vsel %vm1719_vm5, %v8963_v52, %v14958_v8  ;;  %v15678_v52 = vld [vmem:[%s19876_s3 + $0x58] sm:$0xff]  }
 0x665   :  { %13670 = vmatpush3.bf16.msra.mxu0 %v15623_v42  ;;  %13684 = vmatpush3.bf16.msra.mxu1 %v15624_v53  ;;  %v15651_v42 = vld [vmem:[%s19876_s3 + $0x20] sm:$0xff]  }
 0x666   :  { %13671 = vmatprep.subr.bf16.mxu0 %v15625_v28  ;;  %13685 = vmatprep.subr.bf16.mxu1 %v15626_v7  ;;  %v15652_v53 = vld [vmem:[%s19876_s3 + $0x80] sm:$0xff]   ;;  %v9393_v28 = vsel %vm1719_vm5, %v9392_v9, %v14987_v27  ;;  %v8970_v7 = vpack.c.bf16 %v8964_v24, %v8964_v24  ;;  %v14983_v27 = vunpack.i.h.bf16 %v19092_v25 }
 0x667   :  { %v9753_v25 = vld [vmem:[#allocation2 + $0x1c0] ss:$2 sm:$0x3f] }
 0x669   :  { %13672 = vmatpush3.bf16.msra.mxu0 %v15627_v63  ;;  %13686 = vmatpush3.bf16.msra.mxu1 %v15628_v22  ;;  %v9397_v63 = vpack.c.bf16 %v9393_v28, %v9393_v28  ;;  %v15655_v22 = vld [vmem:[%s19876_s3 + $0x28] sm:$0xff]   ;;  %v15680_v28 = vld [vmem:[%s19876_s3 + $0x18] sm:$0xff]  }
 0x66a   :  { %13673 = vmatprep.subr.bf16.mxu0 %v15629_v26  ;;  %13687 = vmatprep.subr.bf16.mxu1 %v15630_v60  ;;  %v15658_v26 = vld [vmem:[%s19876_s3 + $0xd0] sm:$0xff]   ;;  %v14963_v60 = vunpack.i.h.bf16 %v19011_v40  ;;  %v14997_v40 = vunpack.i.l.bf16 %v19158_v12 }
 0x66c   :  { %v9382_v50 = vsel %vm1606_vm3, %v9310_v10, %v14963_v60  ;;  %v15685_v60 = vld [vmem:[%s19876_s3 + $0x68] sm:$0xff]   ;;  %v15689_v10 = vld [vmem:[%s19876_s3 + $0x70] sm:$0xff]  }
 0x66d   :  { %13674 = vmatpush3.bf16.msra.mxu0 %v15631_v0  ;;  %13688 = vmatpush3.bf16.msra.mxu1 %v15632_v37  ;;  %v19168_v0 = vpop.permute.xlu0 %15000  ;;  %v15662_v37 = vld [vmem:[%s19876_s3 + $0xd8] sm:$0xff]  }
 0x66e   :  { %13689 = vmatprep.subr.bf16.mxu1 %v15633_v57  ;;  %13703 = vmatprep.subr.bf16.mxu0 %v15634_v46  ;;  %v14973_v57 = vunpack.i.h.bf16 %v19036_v59  ;;  %v9383_v46 = vsel %vm1717_vm4, %v9382_v50, %v14968_v48  ;;  %v15665_v59 = vld [vmem:[%s19876_s3 + $0xe0] sm:$0xff]   ;;  %v15686_v48 = vld [vmem:[%s19876_s3 + $0xc8] sm:$0xff]   ;;  %v15691_v50 = vld [vmem:[%s19876_s3 + $0x30] sm:$0xff]  }
 0x670   :  { %9261 = vmatmul.mubr.bf16.vlgmr.msra.gmra.mrb[44].mxu0 %v8968_v18  ;;  %v15664_v18 = vld [vmem:[%s19876_s3 + $0x98] sm:$0xff]  }
 0x671   :  { %13690 = vmatpush3.bf16.msra.mxu1 %v15635_v56  ;;  %13704 = vmatpush3.bf16.msra.mxu0 %v15636_v62  ;;  %v9811_v56 = vsel %vm1606_vm3, %v9740_v38, %v14992_v43  ;;  %v15002_v62 = vunpack.i.l.bf16 %v19168_v0  ;;  %v19224_v8 = vpop.permute.xlu0 %15010 }
 0x672   :  { %9686 = vmatprep.mubr.bf16.mxu0 %v9395_v36  ;;  %13691 = vmatprep.subr.bf16.mxu1 %v15637_v54  ;;  %v9812_v54 = vsel %vm1717_vm4, %v9811_v56, %v14997_v40  ;;  %v9384_v36 = vsel %vm1719_vm5, %v9383_v46, %v14973_v57  ;;  %v15012_v24 = vunpack.i.l.bf16 %v19224_v8  ;;  %v15690_v40 = vld [vmem:[%s19876_s3 + $0xd0] sm:$0xff]   ;;  %v15003_v56 = vunpack.i.h.bf16 %v19168_v0 }
 0x673   :  { %13705 = vmatprep.subr.bf16.mxu0 %v15638_v39  ;;  %v15666_v39 = vld [vmem:[%s19876_s3 + $0x40] sm:$0xff]   ;;  %v15692_v57 = vld [vmem:[%s19876_s3 + $0x90] sm:$0xff]  }
 0x674   :  { %v9736_v46 = vld [vmem:[#allocation2 + $0x190] ss:$2 sm:$0x3f] }
 0x675   :  { %13692 = vmatpush3.bf16.msra.mxu1 %v15639_v4  ;;  %13706 = vmatpush3.bf16.msra.mxu0 %v15640_v3  ;;  %v15667_v4 = vld [vmem:[%s19876_s3 + $0xa0] sm:$0xff]  }
 0x676   :  { %13693 = vmatprep.subr.bf16.mxu1 %v15641_v21  ;;  %13707 = vmatprep.subr.bf16.mxu0 %v15642_v49  ;;  %v15668_v3 = vld [vmem:[%s19876_s3] sm:$0xff]   ;;  %v9813_v21 = vsel %vm1719_vm5, %v9812_v54, %v15002_v62  ;;  %v9394_v49 = vpack.c.bf16 %v9384_v36, %v9384_v36  ;;  %v15699_v36 = vld [vmem:[%s19876_s3 + $0xe8] sm:$0xff]  }
 0x677   :  { %v15697_v54 = vld [vmem:[%s19876_s3 + $0xe0] sm:$0xff]  }
 0x679   :  { %13694 = vmatpush3.bf16.msra.mxu1 %v15643_v55  ;;  %13708 = vmatpush3.bf16.msra.mxu0 %v15644_v47  ;;  %v19209_v55 = vpop.permute.xlu1 %15005  ;;  %v9821_v47 = vpack.c.bf16 %v9813_v21, %v9813_v21 }
 0x67a   :  { %13695 = vmatprep.subr.bf16.mxu1 %v15645_v45  ;;  %13709 = vmatprep.subr.bf16.mxu0 %v15646_v20  ;;  %v15673_v45 = vld [vmem:[%s19876_s3 + $0xf0] sm:$0xff]   ;;  %v15007_v2 = vunpack.i.l.bf16 %v19209_v55  ;;  %v15008_v21 = vunpack.i.h.bf16 %v19209_v55  ;;  %v15704_v55 = vld [vmem:[%s19876_s3 + $0xb8] sm:$0xff]  }
 0x67b   :  { %v15674_v20 = vld [vmem:[%s19876_s3 + $0x50] sm:$0xff]  }
 0x67c   :  { %v9817_v9 = vsel %vm1606_vm3, %v9753_v25, %v15007_v2 }
 0x67d   :  { %13696 = vmatpush3.bf16.msra.mxu1 %v15647_v30  ;;  %13710 = vmatpush3.bf16.msra.mxu0 %v15648_v17  ;;  %v9319_v30 = vld [vmem:[#allocation2 + $0x190] ss:$2 sm:$0x3f]  ;;  %v19234_v17 = vpop.permute.xlu1 %15015 }
 0x67e   :  { %13711 = vmatprep.subr.bf16.mxu0 %v15649_v6  ;;  %13725 = vmatprep.subr.bf16.mxu1 %v15650_v51  ;;  %v9388_v6 = vsel %vm1606_vm3, %v9319_v30, %v14978_v31  ;;  %v14988_v51 = vunpack.i.h.bf16 %v19102_v16  ;;  %v15681_v16 = vld [vmem:[%s19876_s3 + $0x60] sm:$0xff]  }
 0x680   :  { %9301 = vmatmul.mubr.bf16.vlgmr.msra.gmra.mrb[44].mxu1 %v8970_v7  ;;  %v9389_v7 = vsel %vm1717_vm4, %v9388_v6, %v14983_v27 }
 0x681   :  { %13712 = vmatpush3.bf16.msra.mxu0 %v15651_v42  ;;  %13726 = vmatpush3.bf16.msra.mxu1 %v15652_v53  ;;  %v15017_v42 = vunpack.i.l.bf16 %v19234_v17  ;;  %v15679_v53 = vld [vmem:[%s19876_s3 + $0xb8] sm:$0xff]  }
 0x682   :  { %9726 = vmatprep.mubr.bf16.mxu1 %v9397_v63  ;;  %13713 = vmatprep.subr.bf16.mxu0 %v15653_v32  ;;  %v15682_v32 = vld [vmem:[%s19876_s3 + $0xc0] sm:$0xff]   ;;  %v9818_v63 = vsel %vm1717_vm4, %v9817_v9, %v15012_v24 }
 0x683   :  { %13727 = vmatprep.subr.bf16.mxu1 %v15654_v35  ;;  %v9390_v35 = vsel %vm1719_vm5, %v9389_v7, %v14988_v51  ;;  %v15707_v7 = vld [vmem:[%s19878_s5 + $0x48] sm:$0xff]  }
 0x685   :  { %13714 = vmatpush3.bf16.msra.mxu0 %v15655_v22  ;;  %13728 = vmatpush3.bf16.msra.mxu1 %v15656_v41  ;;  %v15683_v22 = vld [vmem:[%s19876_s3 + $0x20] sm:$0xff]  }
 0x686   :  { %13715 = vmatprep.subr.bf16.mxu0 %v15657_v5  ;;  %13729 = vmatprep.subr.bf16.mxu1 %v15658_v26  ;;  %v15684_v41 = vld [vmem:[%s19876_s3 + $0x80] sm:$0xff]   ;;  %v9819_v5 = vsel %vm1719_vm5, %v9818_v63, %v15017_v42  ;;  %v9396_v26 = vpack.c.bf16 %v9390_v35, %v9390_v35 }
 0x687   :  { %v9823_v43 = vpack.c.bf16 %v9819_v5, %v9819_v5  ;;  %v15705_v42 = vld [vmem:[%s19878_s5 + $0x40] sm:$0xff]   ;;  %v15710_v5 = vld [vmem:[%s19878_s5 + $0x10] sm:$0xff]  }
 0x689   :  { %13716 = vmatpush3.bf16.msra.mxu0 %v15659_v44  ;;  %13730 = vmatpush3.bf16.msra.mxu1 %v15660_v34  ;;  %v15687_v44 = vld [vmem:[%s19876_s3 + $0x28] sm:$0xff]  }
 0x68a   :  { %13717 = vmatprep.subr.bf16.mxu0 %v15661_v61  ;;  %13731 = vmatprep.subr.bf16.mxu1 %v15662_v37  ;;  %v15688_v34 = vld [vmem:[%s19876_s3 + $0x88] sm:$0xff]   ;;  %v14993_v61 = vunpack.i.h.bf16 %v19143_v29  ;;  %v14998_v37 = vunpack.i.h.bf16 %v19158_v12  ;;  %v15693_v29 = vld [vmem:[%s19876_s3 + $0x78] sm:$0xff]  }
 0x68b   :  { %v15694_v12 = vld [vmem:[%s19876_s3 + $0xd8] sm:$0xff]  }
 0x68c   :  { %v9808_v38 = vsel %vm1606_vm3, %v9736_v46, %v14993_v61 }
 0x68d   :  { %13718 = vmatpush3.bf16.msra.mxu0 %v15663_v58  ;;  %13732 = vmatpush3.bf16.msra.mxu1 %v15664_v18  ;;  %v9809_v62 = vsel %vm1717_vm4, %v9808_v38, %v14998_v37  ;;  %v15695_v58 = vld [vmem:[%s19876_s3 + $0x38] sm:$0xff]  }
 0x68e   :  { %13733 = vmatprep.subr.bf16.mxu1 %v15665_v59  ;;  %13747 = vmatprep.subr.bf16.mxu0 %v15666_v39  ;;  %v15696_v18 = vld [vmem:[%s19876_s3 + $0x98] sm:$0xff]   ;;  %v9810_v0 = vsel %vm1719_vm5, %v9809_v62, %v15003_v56  ;;  %v15698_v59 = vld [vmem:[%s19876_s3 + $0xa0] sm:$0xff]  }
 0x68f   :  { %v9820_v39 = vpack.c.bf16 %v9810_v0, %v9810_v0  ;;  %v15719_v56 = vld [vmem:[%s19878_s5 + $0x78] sm:$0xff]  }
 0x690   :  { %9687 = vmatmul.mubr.bf16.vlgmr.msra.gmra.mrb[48].mxu0 %v9394_v49  ;;  %v15702_v49 = vld [vmem:[%s19876_s3 + $0xb0] sm:$0xff]   ;;  %v15720_v62 = vld [vmem:[%s19878_s5 + $0x38] sm:$0xff]  }
 0x691   :  { %13734 = vmatpush3.bf16.msra.mxu1 %v15667_v4  ;;  %13748 = vmatpush3.bf16.msra.mxu0 %v15668_v3  ;;  %v15700_v4 = vld [vmem:[%s19876_s3 + $0xa8] sm:$0xff]   ;;  %v15701_v3 = vld [vmem:[%s19876_s3 + $0xf0] sm:$0xff]  }
 0x692   :  { %10112 = vmatprep.mubr.bf16.mxu0 %v9821_v47  ;;  %13735 = vmatprep.subr.bf16.mxu1 %v15669_v13  ;;  %v15013_v13 = vunpack.i.h.bf16 %v19224_v8  ;;  %v15703_v47 = vld [vmem:[%s19876_s3 + $0xf8] sm:$0xff]  }
 0x693   :  { %13749 = vmatprep.subr.bf16.mxu0 %v15670_v14  ;;  %v9745_v14 = vld [vmem:[#allocation2 + $0x1b0] ss:$2 sm:$0x3f] }
 0x695   :  { %13736 = vmatpush3.bf16.msra.mxu1 %v15671_v23  ;;  %13750 = vmatpush3.bf16.msra.mxu0 %v15672_v15  ;;  %v9814_v23 = vsel %vm1606_vm3, %v9745_v14, %v15008_v21  ;;  %v15018_v15 = vunpack.i.h.bf16 %v19234_v17  ;;  %v15727_v21 = vld [vmem:[%s19878_s5 + $0xd0] sm:$0xff]  }
 0x696   :  { %13737 = vmatprep.subr.bf16.mxu1 %v15673_v45  ;;  %13751 = vmatprep.subr.bf16.mxu0 %v15674_v20  ;;  %v9815_v45 = vsel %vm1717_vm4, %v9814_v23, %v15013_v13  ;;  %v15730_v23 = vld [vmem:[%s19878_s5 + $0xd8] sm:$0xff]  }
 0x697   :  { %v9816_v20 = vsel %vm1719_vm5, %v9815_v45, %v15018_v15  ;;  %v15731_v15 = vld [vmem:[%s19878_s5 + $0x98] sm:$0xff]   ;;  %v15734_v45 = vld [vmem:[%s19878_s5 + $0xa0] sm:$0xff]  }
 0x698   :  { %v9822_v31 = vpack.c.bf16 %v9816_v20, %v9816_v20  ;;  %v15735_v20 = vld [vmem:[%s19878_s5 + $0xe8] sm:$0xff]  }
 0x699   :  { %13738 = vmatpush3.bf16.msra.mxu1 %v15675_v19  ;;  %13752 = vmatpush3.bf16.msra.mxu0 %v15676_v11 }
 0x69a   :  { %13739 = vmatprep.subr.bf16.mxu1 %v15677_v33  ;;  %13753 = vmatprep.subr.bf16.mxu0 %v15678_v52  ;;  %v19344_v33 = vld [vmem:[%s19877_s4] ss:$0 sm:$0xff] }
 0x69d   :  { %13740 = vmatpush3.bf16.msra.mxu1 %v15679_v53  ;;  %13754 = vmatpush3.bf16.msra.mxu0 %v15680_v28  ;;  %v15706_v53 = vld [vmem:[%s19878_s5] sm:$0xff]  }
 0x69e   :  { %13755 = vmatprep.subr.bf16.mxu0 %v15681_v16  ;;  %13769 = vmatprep.subr.bf16.mxu1 %v15682_v32  ;;  %v15708_v16 = vld [vmem:[%s19878_s5 + $0x8] sm:$0xff]  }
 0x6a0   :  { %9727 = vmatmul.mubr.bf16.vlgmr.msra.gmra.mrb[48].mxu1 %v9396_v26  ;;  %v15711_v26 = vld [vmem:[%s19878_s5 + $0x58] sm:$0xff]  }
 0x6a1   :  { %13756 = vmatpush3.bf16.msra.mxu0 %v15683_v22  ;;  %13770 = vmatpush3.bf16.msra.mxu1 %v15684_v41  ;;  %v15709_v41 = vld [vmem:[%s19878_s5 + $0x50] sm:$0xff]  }
 0x6a2   :  { %10152 = vmatprep.mubr.bf16.mxu1 %v9823_v43  ;;  %13757 = vmatprep.subr.bf16.mxu0 %v15685_v60  ;;  %v15712_v60 = vld [vmem:[%s19878_s5 + $0x18] sm:$0xff]   ;;  %v15714_v43 = vld [vmem:[%s19878_s5 + $0x20] sm:$0xff]  }
 0x6a3   :  { %13771 = vmatprep.subr.bf16.mxu1 %v15686_v48  ;;  %v15713_v48 = vld [vmem:[%s19878_s5 + $0x60] sm:$0xff]  }
 0x6a5   :  { %13758 = vmatpush3.bf16.msra.mxu0 %v15687_v44  ;;  %13772 = vmatpush3.bf16.msra.mxu1 %v15688_v34  ;;  %v15715_v44 = vld [vmem:[%s19878_s5 + $0x68] sm:$0xff]  }
 0x6a6   :  { %13759 = vmatprep.subr.bf16.mxu0 %v15689_v10  ;;  %13773 = vmatprep.subr.bf16.mxu1 %v15690_v40  ;;  %v15716_v34 = vld [vmem:[%s19878_s5 + $0x28] sm:$0xff]  }
 0x6a9   :  { %13760 = vmatpush3.bf16.msra.mxu0 %v15691_v50  ;;  %13774 = vmatpush3.bf16.msra.mxu1 %v15692_v57 }
 0x6aa   :  { %13761 = vmatprep.subr.bf16.mxu0 %v15693_v29  ;;  %13775 = vmatprep.subr.bf16.mxu1 %v15694_v12  ;;  %v15717_v29 = vld [vmem:[%s19878_s5 + $0x70] sm:$0xff]  }
 0x6ab   :  { %v15718_v12 = vld [vmem:[%s19878_s5 + $0x30] sm:$0xff]  }
 0x6ad   :  { %13762 = vmatpush3.bf16.msra.mxu0 %v15695_v58  ;;  %13776 = vmatpush3.bf16.msra.mxu1 %v15696_v18  ;;  %v15721_v58 = vld [vmem:[%s19878_s5 + $0xc0] sm:$0xff]  }
 0x6ae   :  { %13777 = vmatprep.subr.bf16.mxu1 %v15697_v54  ;;  %13791 = vmatprep.subr.bf16.mxu0 %v15705_v42  ;;  %v15722_v18 = vld [vmem:[%s19878_s5 + $0x80] sm:$0xff]  }
 0x6b0   :  { %10113 = vmatmul.mubr.bf16.vlgmr.msra.gmra.mrb[52].mxu0 %v9820_v39 }
 0x6b1   :  { %13778 = vmatpush3.bf16.msra.mxu1 %v15698_v59  ;;  %13792 = vmatpush3.bf16.msra.mxu0 %v15706_v53 }
 0x6b2   :  { %13779 = vmatprep.subr.bf16.mxu1 %v15699_v36  ;;  %13793 = vmatprep.subr.bf16.mxu0 %v15707_v7  ;;  %v15724_v36 = vld [vmem:[%s19878_s5 + $0xc8] sm:$0xff]  }
 0x6b5   :  { %13780 = vmatpush3.bf16.msra.mxu1 %v15700_v4  ;;  %13794 = vmatpush3.bf16.msra.mxu0 %v15708_v16  ;;  %v15725_v4 = vld [vmem:[%s19878_s5 + $0x88] sm:$0xff]  }
 0x6b6   :  { %13781 = vmatprep.subr.bf16.mxu1 %v15701_v3  ;;  %13795 = vmatprep.subr.bf16.mxu0 %v15709_v41 }
 0x6b9   :  { %13782 = vmatpush3.bf16.msra.mxu1 %v15702_v49  ;;  %13796 = vmatpush3.bf16.msra.mxu0 %v15710_v5 }
 0x6ba   :  { %13783 = vmatprep.subr.bf16.mxu1 %v15703_v47  ;;  %13797 = vmatprep.subr.bf16.mxu0 %v15711_v26  ;;  %v15728_v47 = vld [vmem:[%s19878_s5 + $0x90] sm:$0xff]  }
 0x6bd   :  { %13784 = vmatpush3.bf16.msra.mxu1 %v15704_v55  ;;  %13798 = vmatpush3.bf16.msra.mxu0 %v15712_v60  ;;  %v15733_v55 = vld [vmem:[%s19878_s5 + $0xe0] sm:$0xff]  }
 0x6be   :  { %13799 = vmatprep.subr.bf16.mxu0 %v15713_v48  ;;  %13813 = vmatprep.subr.bf16.mxu1 %v15721_v58 }
 0x6c0   :  { %10153 = vmatmul.mubr.bf16.vlgmr.msra.gmra.mrb[52].mxu1 %v9822_v31  ;;  %v15736_v31 = vld [vmem:[%s19878_s5 + $0xa8] sm:$0xff]  }
 0x6c1   :  { %13800 = vmatpush3.bf16.msra.mxu0 %v15714_v43  ;;  %13814 = vmatpush3.bf16.msra.mxu1 %v15722_v18 }
 0x6c2   :  { %13801 = vmatprep.subr.bf16.mxu0 %v15715_v44  ;;  %13815 = vmatprep.subr.bf16.mxu1 %v15724_v36 }
 0x6c5   :  { %13802 = vmatpush3.bf16.msra.mxu0 %v15716_v34  ;;  %13816 = vmatpush3.bf16.msra.mxu1 %v15725_v4 }
 0x6c6   :  { %13803 = vmatprep.subr.bf16.mxu0 %v15717_v29  ;;  %13817 = vmatprep.subr.bf16.mxu1 %v15727_v21 }
 0x6c9   :  { %13804 = vmatpush3.bf16.msra.mxu0 %v15718_v12  ;;  %13818 = vmatpush3.bf16.msra.mxu1 %v15728_v47 }
 0x6ca   :  { %13805 = vmatprep.subr.bf16.mxu0 %v15719_v56  ;;  %13819 = vmatprep.subr.bf16.mxu1 %v15730_v23 }
 0x6cd   :  { %13806 = vmatpush3.bf16.msra.mxu0 %v15720_v62  ;;  %13820 = vmatpush3.bf16.msra.mxu1 %v15731_v15 }
 0x6ce   :  { %14563 = vmatprep.subr.bf16.mxu0 %v15876_v1  ;;  %13821 = vmatprep.subr.bf16.mxu1 %v15733_v55 }
 0x6d1   :  { %13822 = vmatpush3.bf16.msra.mxu1 %v15734_v45 }
 0x6d2   :  { %13823 = vmatprep.subr.bf16.mxu1 %v15735_v20 }
 0x6d5   :  { %13824 = vmatpush3.bf16.msra.mxu1 %v15736_v31 }
 0x6e3   :  { %v13543_v8 = vpop.f32.mrb[32].mxu0 }
 0x6e4   :  { %v13544_v2 = vpop.f32.mrb[33].mxu0 }
 0x6e5   :  { %v13545_v19 = vadd.f32 %v13544_v2, %v13543_v8  ;;  %v13546_v11 = vpop.f32.mrb[34].mxu0  ;;  %v15737_v2 = vld [vmem:[%s19878_s5 + $0xf0] sm:$0xff]  }
 0x6e6   :  { %v13547_v27 = vpop.f32.mrb[35].mxu0  ;;  %13825 = vmatprep.subr.bf16.mxu1 %v15737_v2 }
 0x6e7   :  { %v7985_v52 = vadd.f32 %v19344_v33, %v13545_v19 }
 0x6f3   :  { %v13565_v30 = vpop.f32.mrb[32].mxu1 }
 0x6f4   :  { %v13566_v17 = vpop.f32.mrb[33].mxu1 }
 0x6f5   :  { %v13567_v6 = vadd.f32 %v13566_v17, %v13565_v30  ;;  %v13568_v51 = vpop.f32.mrb[34].mxu1 }
 0x6f6   :  { %v13569_v24 = vpop.f32.mrb[35].mxu1 }
 0x6f7   :  { %v8025_v25 = vadd.f32 %v13567_v6, %v7985_v52  ;;  %v15738_v52 = vld [vmem:[%s19878_s5 + $0xb0] sm:$0xff]   ;;  %v15739_v24 = vld [vmem:[%s19878_s5 + $0xf8] sm:$0xff]  }
 0x6f8   :  { %13826 = vmatpush3.bf16.msra.mxu1 %v15738_v52 }
 0x6f9   :  { %v8030_v9 = vmax.f32 %v8025_v25, 0.0  ;;  %v15740_v25 = vld [vmem:[%s19878_s5 + $0xb8] sm:$0xff]   ;;  %13827 = vmatprep.subr.bf16.mxu1 %v15739_v24 }
 0x6fb   :  { %8031 = vst.msk [vmem:[#allocation3 + $0x24] sm:$0x3f] %vm2077_vm6, %v8030_v9  ;;  %v15741_v9 = vld [vmem:[%s19878_s5 + $0x40] sm:$0xff]  }
 0x6fc   :  { %13828 = vmatpush3.bf16.msra.mxu1 %v15740_v25 }
 0x6fd   :  { %13840 = vmatprep.subr.bf16.mxu1 %v15741_v9 }
 0x702   :  { %v10163_v54 = vld [vmem:[#allocation3 + $0x25] sm:$0xf] }
 0x703   :  { %v13587_v28 = vpop.f32.mrb[36].mxu0  ;;  %v10162_v25 = vld [vmem:[#allocation3 + $0x24] sm:$0xf] }
 0x704   :  { %v13588_v32 = vpop.f32.mrb[37].mxu0  ;;  %v10164_v9 = vld [vmem:[#allocation3 + $0x26] sm:$0xf] }
 0x705   :  { %v13589_v35 = vadd.f32 %v13588_v32, %v13587_v28  ;;  %v13590_v63 = vpop.f32.mrb[38].mxu0 }
 0x706   :  { %v13591_v22 = vpop.f32.mrb[39].mxu0 }
 0x707   :  { %v8411_v61 = vadd.f32 %v19344_v33, %v13589_v35 }
 0x713   :  { %v13609_v10 = vpop.f32.mrb[36].mxu1 }
 0x714   :  { %v13610_v40 = vpop.f32.mrb[37].mxu1 }
 0x715   :  { %v13611_v37 = vadd.f32 %v13610_v40, %v13609_v10  ;;  %v13612_v50 = vpop.f32.mrb[38].mxu1 }
 0x716   :  { %v13613_v57 = vpop.f32.mrb[39].mxu1 }
 0x717   :  { %v8451_v46 = vadd.f32 %v13611_v37, %v8411_v61 }
 0x719   :  { %v8456_v38 = vmax.f32 %v8451_v46, 0.0 }
 0x71b   :  { %8457 = vst.msk [vmem:[#allocation3 + $0x2a] sm:$0x3f] %vm2077_vm6, %v8456_v38 }
 0x722   :  { %v10165_v0 = vld [vmem:[#allocation3 + $0x2a] sm:$0xf] }
 0x723   :  { %v13631_v59 = vpop.f32.mrb[40].mxu0  ;;  %v15019_v39 = vpack.i.bf16 %v10163_v54, %v10165_v0  ;;  %v10167_v42 = vld [vmem:[#allocation3 + $0x2c] sm:$0xf] }
 0x724   :  { %v13632_v3 = vpop.f32.mrb[41].mxu0  ;;  %v10610_v28 = vld [vmem:[#allocation3 + $0x2b] sm:$0xf] }
 0x725   :  { %v13633_v49 = vadd.f32 %v13632_v3, %v13631_v59  ;;  %v13634_v13 = vpop.f32.mrb[42].mxu0  ;;  %15020 = vrot.lane.b32.xlu0 %v15019_v39, %s15880_s28 }
 0x726   :  { %v13635_v14 = vpop.f32.mrb[43].mxu0 }
 0x727   :  { %v8837_v11 = vadd.f32 %v19344_v33, %v13633_v49 }
 0x733   :  { %v13653_v8 = vpop.f32.mrb[40].mxu1 }
 0x734   :  { %v13654_v19 = vpop.f32.mrb[41].mxu1 }
 0x735   :  { %v13655_v27 = vadd.f32 %v13654_v19, %v13653_v8  ;;  %v13656_v30 = vpop.f32.mrb[42].mxu1 }
 0x736   :  { %v13657_v17 = vpop.f32.mrb[43].mxu1 }
 0x737   :  { %v8877_v6 = vadd.f32 %v13655_v27, %v8837_v11 }
 0x739   :  { %v8882_v51 = vmax.f32 %v8877_v6, 0.0 }
 0x73b   :  { %8883 = vst.msk [vmem:[#allocation3 + $0x30] sm:$0x3f] %vm2077_vm6, %v8882_v51 }
 0x742   :  { %v10169_v53 = vld [vmem:[#allocation3 + $0x31] sm:$0xf] }
 0x743   :  { %v10612_v7 = vld [vmem:[#allocation3 + $0x30] sm:$0xf]  ;;  %v13675_v16 = vpop.f32.mrb[44].mxu0  ;;  %v15024_v32 = vpack.i.bf16 %v10167_v42, %v10169_v53 }
 0x744   :  { %v15029_v35 = vpack.i.bf16 %v10610_v28, %v10612_v7  ;;  %v13676_v63 = vpop.f32.mrb[45].mxu0  ;;  %v10614_v61 = vld [vmem:[#allocation3 + $0x32] sm:$0xf] }
 0x745   :  { %v13677_v22 = vadd.f32 %v13676_v63, %v13675_v16  ;;  %v13678_v41 = vpop.f32.mrb[46].mxu0  ;;  %15025 = vrot.lane.b32.xlu1 %v15024_v32, %s15880_s28  ;;  %v11057_v50 = vld [vmem:[#allocation3 + $0x31] sm:$0xf]  ;;  %v15726_v16 = vld [vmem:[%s19878_s5 + $0x108] sm:$0xff]  }
 0x746   :  { %15030 = vrot.lane.b32.xlu0 %v15029_v35, %s15880_s28  ;;  %v13679_v5 = vpop.f32.mrb[47].mxu0  ;;  %v15732_v41 = vld [vmem:[%s19878_s5 + $0x118] sm:$0xff]  }
 0x747   :  { %v9263_v48 = vadd.f32 %v19344_v33, %v13677_v22  ;;  %v15729_v22 = vld [vmem:[%s19878_s5 + $0x110] sm:$0xff]   ;;  %v15742_v5 = vld [vmem:[%s19878_s5 + $0xc0] sm:$0xff]  }
 0x753   :  { %v13697_v26 = vpop.f32.mrb[44].mxu1 }
 0x754   :  { %v13698_v60 = vpop.f32.mrb[45].mxu1 }
 0x755   :  { %v13699_v43 = vadd.f32 %v13698_v60, %v13697_v26  ;;  %v13700_v44 = vpop.f32.mrb[46].mxu1  ;;  %v10170_v26 = vld [vmem:[#allocation3 + $0x32] sm:$0xf]  ;;  %v15744_v60 = vld [vmem:[%s19878_s5 + $0x80] sm:$0xff]  }
 0x756   :  { %v13701_v34 = vpop.f32.mrb[47].mxu1  ;;  %v15748_v44 = vld [vmem:[%s19878_s5 + $0x88] sm:$0xff]  }
 0x757   :  { %v9303_v10 = vadd.f32 %v13699_v43, %v9263_v48  ;;  %v10195_v48 = vpack.c.bf16 %v10170_v26, %v10170_v26  ;;  %v15746_v43 = vld [vmem:[%s19878_s5 + $0xc8] sm:$0xff]   ;;  %v15750_v34 = vld [vmem:[%s19878_s5 + $0xd0] sm:$0xff]   ;;  %v15775_v26 = vld [vmem:[%s19878_s5] sm:$0xff]  }
 0x759   :  { %v9308_v40 = vmax.f32 %v9303_v10, 0.0  ;;  %v15752_v10 = vld [vmem:[%s19878_s5 + $0x90] sm:$0xff]  }
 0x75b   :  { %9309 = vst.msk [vmem:[#allocation3 + $0x36] sm:$0x3f] %vm2077_vm6, %v9308_v40  ;;  %v15754_v40 = vld [vmem:[%s19878_s5 + $0xd8] sm:$0xff]  }
 0x762   :  { %v10616_v37 = vld [vmem:[#allocation3 + $0x37] sm:$0xf] }
 0x763   :  { %v11059_v57 = vld [vmem:[#allocation3 + $0x36] sm:$0xf]  ;;  %v13719_v46 = vpop.f32.mrb[48].mxu0  ;;  %v15034_v29 = vpack.i.bf16 %v10614_v61, %v10616_v37 }
 0x764   :  { %v15039_v12 = vpack.i.bf16 %v11057_v50, %v11059_v57  ;;  %v13720_v38 = vpop.f32.mrb[49].mxu0  ;;  %v11061_v21 = vld [vmem:[#allocation3 + $0x38] sm:$0xf] }
 0x765   :  { %v13721_v56 = vadd.f32 %v13720_v38, %v13719_v46  ;;  %v13722_v62 = vpop.f32.mrb[50].mxu0  ;;  %15035 = vrot.lane.b32.xlu1 %v15034_v29, %s15880_s28  ;;  %v11504_v13 = vld [vmem:[#allocation3 + $0x37] sm:$0xf]  ;;  %v10166_v38 = vld [vmem:[#allocation3 + $0x2b] sm:$0xf] }
 0x766   :  { %15040 = vrot.lane.b32.xlu0 %v15039_v12, %s15880_s28  ;;  %v13723_v58 = vpop.f32.mrb[51].mxu0  ;;  %v15756_v50 = vld [vmem:[%s19878_s5 + $0x98] sm:$0xff]   ;;  %v15758_v12 = vld [vmem:[%s19878_s5 + $0xe0] sm:$0xff]   ;;  %v10611_v62 = vld [vmem:[#allocation3 + $0x2c] sm:$0xf] }
 0x767   :  { %v9689_v0 = vadd.f32 %v19344_v33, %v13721_v56  ;;  %v10168_v56 = vld [vmem:[#allocation3 + $0x30] sm:$0xf] }
 0x773   :  { %v13741_v18 = vpop.f32.mrb[48].mxu1 }
 0x774   :  { %v13742_v54 = vpop.f32.mrb[49].mxu1 }
 0x775   :  { %v13743_v59 = vadd.f32 %v13742_v54, %v13741_v18  ;;  %v13744_v39 = vpop.f32.mrb[50].mxu1 }
 0x776   :  { %v13745_v36 = vpop.f32.mrb[51].mxu1  ;;  %v15743_v39 = vld [vmem:[%s19878_s5] sm:$0xff]  }
 0x777   :  { %v9729_v4 = vadd.f32 %v13743_v59, %v9689_v0  ;;  %v15745_v36 = vld [vmem:[%s19878_s5 + $0x48] sm:$0xff]  }
 0x779   :  { %v9734_v3 = vmax.f32 %v9729_v4, 0.0  ;;  %v15760_v4 = vld [vmem:[%s19878_s5 + $0xa0] sm:$0xff]  }
 0x77b   :  { %9735 = vst.msk [vmem:[#allocation3 + $0x3c] sm:$0x3f] %vm2077_vm6, %v9734_v3 }
 0x782   :  { %v11063_v49 = vld [vmem:[#allocation3 + $0x3d] sm:$0xf] }
 0x783   :  { %v11506_v14 = vld [vmem:[#allocation3 + $0x3c] sm:$0xf]  ;;  %v13763_v47 = vpop.f32.mrb[52].mxu0  ;;  %v15044_v23 = vpack.i.bf16 %v11061_v21, %v11063_v49  ;;  %v15762_v21 = vld [vmem:[%s19878_s5 + $0xe8] sm:$0xff]  }
 0x784   :  { %v15049_v15 = vpack.i.bf16 %v11504_v13, %v11506_v14  ;;  %v13764_v55 = vpop.f32.mrb[53].mxu0  ;;  %v11508_v32 = vld [vmem:[#allocation3 + $0x3e] sm:$0xf]  ;;  %v15747_v49 = vld [vmem:[%s19878_s5 + $0x8] sm:$0xff]   ;;  %v15749_v13 = vld [vmem:[%s19878_s5 + $0x50] sm:$0xff]  }
 0x785   :  { %v13765_v45 = vadd.f32 %v13764_v55, %v13763_v47  ;;  %v13766_v20 = vpop.f32.mrb[54].mxu0  ;;  %15045 = vrot.lane.b32.xlu1 %v15044_v23, %s15880_s28  ;;  %v15764_v14 = vld [vmem:[%s19878_s5 + $0xa8] sm:$0xff]   ;;  %v15766_v47 = vld [vmem:[%s19878_s5 + $0xf0] sm:$0xff]  }
 0x786   :  { %15050 = vrot.lane.b32.xlu0 %v15049_v15, %s15880_s28  ;;  %v13767_v31 = vpop.f32.mrb[55].mxu0  ;;  %v15751_v23 = vld [vmem:[%s19878_s5 + $0x10] sm:$0xff]   ;;  %v15753_v15 = vld [vmem:[%s19878_s5 + $0x58] sm:$0xff]  }
 0x787   :  { %v10115_v19 = vadd.f32 %v19344_v33, %v13765_v45  ;;  %v15723_v33 = vld [vmem:[%s19878_s5 + $0x100] sm:$0xff]   ;;  %v15768_v55 = vld [vmem:[%s19878_s5 + $0xb0] sm:$0xff]   ;;  %v15770_v45 = vld [vmem:[%s19878_s5 + $0xf8] sm:$0xff]  }
 0x788   :  { %v15755_v20 = vld [vmem:[%s19878_s5 + $0x18] sm:$0xff]   ;;  %v15757_v31 = vld [vmem:[%s19878_s5 + $0x60] sm:$0xff]  }
 0x793   :  { %v13785_v8 = vpop.f32.mrb[52].mxu1 }
 0x794   :  { %v13786_v2 = vpop.f32.mrb[53].mxu1 }
 0x795   :  { %v13787_v11 = vadd.f32 %v13786_v2, %v13785_v8  ;;  %v13788_v27 = vpop.f32.mrb[54].mxu1  ;;  %v15772_v8 = vld [vmem:[%s19878_s5 + $0xb8] sm:$0xff]   ;;  %v15773_v2 = vld [vmem:[%s19878_s5 + $0x40] sm:$0xff]  }
 0x796   :  { %v13789_v30 = vpop.f32.mrb[55].mxu1  ;;  %v15763_v27 = vld [vmem:[%s19878_s5 + $0x28] sm:$0xff]  }
 0x797   :  { %v10155_v17 = vadd.f32 %v13787_v11, %v10115_v19  ;;  %v15021_v52 = vpop.permute.xlu0 %15020  ;;  %v15759_v19 = vld [vmem:[%s19878_s5 + $0x20] sm:$0xff]   ;;  %v15761_v11 = vld [vmem:[%s19878_s5 + $0x68] sm:$0xff]   ;;  %v15765_v30 = vld [vmem:[%s19878_s5 + $0x70] sm:$0xff]  }
 0x798   :  { %v15023_v6 = vunpack.i.h.bf16 %v15021_v52  ;;  %v15022_v51 = vunpack.i.l.bf16 %v15021_v52  ;;  %v15769_v52 = vld [vmem:[%s19878_s5 + $0x78] sm:$0xff]  }
 0x799   :  { %v10160_v24 = vmax.f32 %v10155_v17, 0.0  ;;  %v15767_v17 = vld [vmem:[%s19878_s5 + $0x30] sm:$0xff]  }
 0x79a   :  { %v10187_v42 = vsel %vm1717_vm4, %v10162_v25, %v15023_v6  ;;  %v10188_v53 = vsel %vm1717_vm4, %v10164_v9, %v15022_v51  ;;  %v15771_v25 = vld [vmem:[%s19878_s5 + $0x38] sm:$0xff]   ;;  %v10609_v9 = vld [vmem:[#allocation3 + $0x2a] sm:$0xf] }
 0x79b   :  { %10161 = vst.msk [vmem:[#allocation3 + $0x42] sm:$0x3f] %vm2077_vm6, %v10160_v24  ;;  %v10191_v28 = vpack.c.bf16 %v10187_v42, %v10187_v42  ;;  %v10192_v7 = vpack.c.bf16 %v10188_v53, %v10188_v53 }
 0x79d   :  { %10519 = vmatprep.mubr.bf16.mxu0 %v10192_v7 }
 0x79e   :  { %10520 = vmatmul.mubr.bf16.vlgmr.msra.gmra.mrb[56].mxu0 %v10191_v28 }
 0x79f   :  { %14564 = vmatpush3.bf16.msra.mxu0 %v15723_v33  ;;  %14571 = vmatprep.mubr.msk.bf16.mxu0 %vm15877_vm0, %v15876_v1  ;;  %v10613_v33 = vld [vmem:[#allocation3 + $0x31] sm:$0xf] }
 0x7a0   :  { %14565 = vmatprep.subr.bf16.mxu0 %v15876_v1 }
 0x7a2   :  { %v11510_v35 = vld [vmem:[#allocation3 + $0x43] sm:$0xf] }
 0x7a3   :  { %14566 = vmatpush3.bf16.msra.mxu0 %v15726_v16  ;;  %v15054_v63 = vpack.i.bf16 %v11508_v32, %v11510_v35  ;;  %v10615_v16 = vld [vmem:[#allocation3 + $0x36] sm:$0xf] }
 0x7a4   :  { %14567 = vmatprep.subr.bf16.mxu0 %v15876_v1 }
 0x7a5   :  { %15055 = vrot.lane.b32.xlu1 %v15054_v63, %s15880_s28  ;;  %v11058_v63 = vld [vmem:[#allocation3 + $0x32] sm:$0xf] }
 0x7a7   :  { %14568 = vmatpush3.bf16.msra.mxu0 %v15729_v22 }
 0x7a8   :  { %14569 = vmatprep.subr.bf16.mxu0 %v15876_v1 }
 0x7ab   :  { %14570 = vmatpush3.bf16.msra.mxu0 %v15732_v41 }
 0x7ac   :  { %13862 = vmatprep.subr.bf16.mxu0 %v15742_v5  ;;  %v15774_v5 = vld [vmem:[%s19878_s5 + $0x100] sm:$0xff]  }
 0x7ae   :  { %14572 = vmatmul.mubr.msk.bf16.vlgmr.msra.gmra.mrb[60].mxu0 %vm1717_vm4, %v10195_v48 }
 0x7af   :  { %13863 = vmatpush3.bf16.msra.mxu0 %v15744_v60 }
 0x7b0   :  { %13864 = vmatprep.subr.bf16.mxu0 %v15746_v43  ;;  %v15776_v43 = vld [vmem:[%s19878_s5 + $0x48] sm:$0xff]  }
 0x7b3   :  { %13865 = vmatpush3.bf16.msra.mxu0 %v15748_v44 }
 0x7b4   :  { %13866 = vmatprep.subr.bf16.mxu0 %v15750_v34  ;;  %v15777_v34 = vld [vmem:[%s19878_s5 + $0x108] sm:$0xff]  }
 0x7b7   :  { %v15026_v61 = vpop.permute.xlu1 %15025  ;;  %13867 = vmatpush3.bf16.msra.mxu0 %v15752_v10  ;;  %v15778_v10 = vld [vmem:[%s19878_s5 + $0x8] sm:$0xff]  }
 0x7b8   :  { %v19507_v37 = vpop.permute.xlu0 %15030  ;;  %v15028_v57 = vunpack.i.h.bf16 %v15026_v61  ;;  %v15027_v46 = vunpack.i.l.bf16 %v15026_v61  ;;  %13868 = vmatprep.subr.bf16.mxu0 %v15754_v40  ;;  %v15779_v40 = vld [vmem:[%s19878_s5 + $0x50] sm:$0xff]  }
 0x7b9   :  { %v15032_v29 = vunpack.i.l.bf16 %v19507_v37  ;;  %v15033_v6 = vunpack.i.h.bf16 %v19507_v37  ;;  %v15780_v61 = vld [vmem:[%s19878_s5 + $0x110] sm:$0xff]  }
 0x7ba   :  { %v10189_v58 = vsel %vm1717_vm4, %v10166_v38, %v15028_v57  ;;  %v10190_v18 = vsel %vm1717_vm4, %v10168_v56, %v15027_v46  ;;  %v15781_v37 = vld [vmem:[%s19878_s5 + $0x10] sm:$0xff]   ;;  %v15783_v57 = vld [vmem:[%s19878_s5 + $0x118] sm:$0xff]   ;;  %v15787_v56 = vld [vmem:[%s19878_s5 + $0x20] sm:$0xff]  }
 0x7bb   :  { %v10635_v54 = vsel %vm1717_vm4, %v10611_v62, %v15032_v29  ;;  %v10193_v0 = vpack.c.bf16 %v10189_v58, %v10189_v58  ;;  %v10194_v59 = vpack.c.bf16 %v10190_v18, %v10190_v18  ;;  %13869 = vmatpush3.bf16.msra.mxu0 %v15756_v50  ;;  %v10634_v7 = vsel %vm1717_vm4, %v10609_v9, %v15033_v6  ;;  %v15782_v50 = vld [vmem:[%s19878_s5 + $0x58] sm:$0xff]   ;;  %v15785_v29 = vld [vmem:[%s19878_s5 + $0x60] sm:$0xff]   ;;  %v15789_v18 = vld [vmem:[%s19878_s5 + $0x68] sm:$0xff]  }
 0x7bc   :  { %13870 = vmatprep.subr.bf16.mxu0 %v15758_v12  ;;  %v10639_v3 = vpack.c.bf16 %v10635_v54, %v10635_v54  ;;  %v10638_v48 = vpack.c.bf16 %v10634_v7, %v10634_v7  ;;  %v15784_v46 = vld [vmem:[%s19878_s5 + $0x18] sm:$0xff]   ;;  %v15786_v12 = vld [vmem:[%s19878_s5 + $0xc0] sm:$0xff]   ;;  %v15790_v54 = vld [vmem:[%s19878_s5 + $0xc8] sm:$0xff]  }
 0x7bd   :  { %10559 = vmatprep.mubr.bf16.mxu1 %v10194_v59  ;;  %v10617_v38 = vld [vmem:[#allocation3 + $0x38] sm:$0xf]  ;;  %v15788_v62 = vld [vmem:[%s19878_s5 + $0x80] sm:$0xff]   ;;  %v15792_v59 = vld [vmem:[%s19878_s5 + $0x88] sm:$0xff]  }
 0x7be   :  { %10560 = vmatmul.mubr.bf16.vlgmr.msra.gmra.mrb[56].mxu1 %v10193_v0  ;;  %v10642_v58 = vpack.c.bf16 %v10617_v38, %v10617_v38  ;;  %v15791_v0 = vld [vmem:[%s19878_s5 + $0x28] sm:$0xff]   ;;  %v15807_v6 = vld [vmem:[%s19878_s5 + $0xf0] sm:$0xff]   ;;  %v15810_v9 = vld [vmem:[%s19878_s5 + $0xf8] sm:$0xff]  }
 0x7bf   :  { %13841 = vmatpush3.bf16.msra.mxu1 %v15743_v39  ;;  %10966 = vmatprep.mubr.bf16.mxu1 %v10639_v3  ;;  %v15793_v39 = vld [vmem:[%s19878_s5 + $0x70] sm:$0xff]   ;;  %v15812_v7 = vld [vmem:[%s19878_s5 + $0x118] sm:$0xff]  }
 0x7c0   :  { %13842 = vmatprep.subr.bf16.mxu1 %v15745_v36  ;;  %13871 = vmatpush3.bf16.msra.mxu0 %v15760_v4  ;;  %v15794_v36 = vld [vmem:[%s19878_s5 + $0xd0] sm:$0xff]   ;;  %v15827_v38 = vld [vmem:[%s19878_s5 + $0x18] sm:$0xff]  }
 0x7c1   :  { %13872 = vmatprep.subr.bf16.mxu0 %v15762_v21  ;;  %v15795_v4 = vld [vmem:[%s19878_s5 + $0x30] sm:$0xff]   ;;  %v15797_v21 = vld [vmem:[%s19878_s5 + $0x78] sm:$0xff]  }
 0x7c2   :  { %v15796_v3 = vld [vmem:[%s19878_s5 + $0x90] sm:$0xff]  }
 0x7c3   :  { %13843 = vmatpush3.bf16.msra.mxu1 %v15747_v49  ;;  %v15798_v49 = vld [vmem:[%s19878_s5 + $0xd8] sm:$0xff]  }
 0x7c4   :  { %13844 = vmatprep.subr.bf16.mxu1 %v15749_v13  ;;  %13873 = vmatpush3.bf16.msra.mxu0 %v15764_v14 }
 0x7c5   :  { %13874 = vmatprep.subr.bf16.mxu0 %v15766_v47  ;;  %v15799_v47 = vld [vmem:[%s19878_s5 + $0x38] sm:$0xff]  }
 0x7c7   :  { %13845 = vmatpush3.bf16.msra.mxu1 %v15751_v23  ;;  %v15800_v23 = vld [vmem:[%s19878_s5 + $0x98] sm:$0xff]  }
 0x7c8   :  { %13846 = vmatprep.subr.bf16.mxu1 %v15753_v15  ;;  %13875 = vmatpush3.bf16.msra.mxu0 %v15768_v55  ;;  %v11056_v15 = vld [vmem:[#allocation3 + $0x30] sm:$0xf] }
 0x7c9   :  { %13876 = vmatprep.subr.bf16.mxu0 %v15770_v45  ;;  %v15801_v45 = vld [vmem:[%s19878_s5 + $0xe0] sm:$0xff]  }
 0x7cb   :  { %13847 = vmatpush3.bf16.msra.mxu1 %v15755_v20 }
 0x7cc   :  { %13848 = vmatprep.subr.bf16.mxu1 %v15757_v31  ;;  %13877 = vmatpush3.bf16.msra.mxu0 %v15772_v8  ;;  %v11062_v31 = vld [vmem:[#allocation3 + $0x3c] sm:$0xf] }
 0x7cd   :  { %13889 = vmatprep.subr.bf16.mxu0 %v15773_v2 }
 0x7cf   :  { %13849 = vmatpush3.bf16.msra.mxu1 %v15759_v19  ;;  %v15802_v19 = vld [vmem:[%s19878_s5 + $0xa0] sm:$0xff]  }
 0x7d0   :  { %13850 = vmatprep.subr.bf16.mxu1 %v15761_v11  ;;  %v15803_v11 = vld [vmem:[%s19878_s5 + $0x100] sm:$0xff]  }
 0x7d3   :  { %13851 = vmatpush3.bf16.msra.mxu1 %v15763_v27 }
 0x7d4   :  { %13852 = vmatprep.subr.bf16.mxu1 %v15765_v30  ;;  %v15804_v30 = vld [vmem:[%s19878_s5 + $0xe8] sm:$0xff]  }
 0x7d7   :  { %13853 = vmatpush3.bf16.msra.mxu1 %v15767_v17  ;;  %v15036_v51 = vpop.permute.xlu1 %15035  ;;  %v15805_v17 = vld [vmem:[%s19878_s5 + $0xa8] sm:$0xff]  }
 0x7d8   :  { %v19586_v24 = vpop.permute.xlu0 %15040  ;;  %v15038_v42 = vunpack.i.h.bf16 %v15036_v51  ;;  %v15037_v53 = vunpack.i.l.bf16 %v15036_v51  ;;  %13854 = vmatprep.subr.bf16.mxu1 %v15769_v52  ;;  %v15806_v52 = vld [vmem:[%s19878_s5 + $0x108] sm:$0xff]  }
 0x7d9   :  { %v15042_v28 = vunpack.i.l.bf16 %v19586_v24  ;;  %v15043_v13 = vunpack.i.h.bf16 %v19586_v24  ;;  %v15808_v24 = vld [vmem:[%s19878_s5 + $0xb0] sm:$0xff]  }
 0x7da   :  { %v10636_v32 = vsel %vm1717_vm4, %v10613_v33, %v15038_v42  ;;  %v10637_v35 = vsel %vm1717_vm4, %v10615_v16, %v15037_v53  ;;  %v11060_v33 = vld [vmem:[#allocation3 + $0x37] sm:$0xf]  ;;  %v15813_v16 = vld [vmem:[%s19878_s5 + $0x40] sm:$0xff]  }
 0x7db   :  { %v10640_v22 = vpack.c.bf16 %v10636_v32, %v10636_v32  ;;  %13855 = vmatpush3.bf16.msra.mxu1 %v15771_v25  ;;  %v10641_v41 = vpack.c.bf16 %v10637_v35, %v10637_v35  ;;  %v11082_v60 = vsel %vm1717_vm4, %v11058_v63, %v15042_v28  ;;  %v11081_v20 = vsel %vm1717_vm4, %v11056_v15, %v15043_v13  ;;  %v15809_v25 = vld [vmem:[%s19878_s5 + $0x110] sm:$0xff]   ;;  %v15811_v28 = vld [vmem:[%s19878_s5 + $0xb8] sm:$0xff]   ;;  %v15814_v32 = vld [vmem:[%s19878_s5 + $0xc0] sm:$0xff]  }
 0x7dc   :  { %14575 = vmatprep.subr.bf16.mxu1 %v15876_v1  ;;  %v11086_v44 = vpack.c.bf16 %v11082_v60, %v11082_v60  ;;  %v11085_v27 = vpack.c.bf16 %v11081_v20, %v11081_v20  ;;  %v11064_v35 = vld [vmem:[#allocation3 + $0x3e] sm:$0xf]  ;;  %v15837_v13 = vld [vmem:[%s19878_s5 + $0x70] sm:$0xff]  }
 0x7dd   :  { %11006 = vmatprep.mubr.bf16.mxu0 %v10641_v41  ;;  %v15841_v15 = vld [vmem:[%s19878_s5 + $0x78] sm:$0xff]  }
 0x7de   :  { %10967 = vmatmul.mubr.bf16.vlgmr.msra.gmra.mrb[60].mxu1 %v10638_v48  ;;  %11007 = vmatmul.mubr.bf16.vlgmr.msra.gmra.mrb[64].mxu0 %v10640_v22  ;;  %v11505_v22 = vld [vmem:[#allocation3 + $0x38] sm:$0xf]  ;;  %v15816_v48 = vld [vmem:[%s19878_s5 + $0x80] sm:$0xff]  }
 0x7df   :  { %14576 = vmatpush3.bf16.msra.mxu1 %v15774_v5  ;;  %13890 = vmatpush3.bf16.msra.mxu0 %v15775_v26  ;;  %v15815_v5 = vld [vmem:[%s19878_s5] sm:$0xff]   ;;  %v11089_v26 = vpack.c.bf16 %v11064_v35, %v11064_v35 }
 0x7e0   :  { %11413 = vmatprep.mubr.bf16.mxu0 %v11086_v44  ;;  %14577 = vmatprep.subr.bf16.mxu1 %v15876_v1 }
 0x7e1   :  { %13891 = vmatprep.subr.bf16.mxu0 %v15776_v43  ;;  %14583 = vmatprep.mubr.msk.bf16.mxu1 %vm15877_vm0, %v15876_v1  ;;  %v15817_v43 = vld [vmem:[%s19878_s5 + $0x48] sm:$0xff]  }
 0x7e3   :  { %14578 = vmatpush3.bf16.msra.mxu1 %v15777_v34  ;;  %13892 = vmatpush3.bf16.msra.mxu0 %v15778_v10  ;;  %v15818_v34 = vld [vmem:[%s19878_s5 + $0xc8] sm:$0xff]  }
 0x7e4   :  { %14579 = vmatprep.subr.bf16.mxu1 %v15876_v1  ;;  %13893 = vmatprep.subr.bf16.mxu0 %v15779_v40  ;;  %v15819_v10 = vld [vmem:[%s19878_s5 + $0x8] sm:$0xff]  }
 0x7e5   :  { %v15820_v40 = vld [vmem:[%s19878_s5 + $0x88] sm:$0xff]  }
 0x7e7   :  { %14580 = vmatpush3.bf16.msra.mxu1 %v15780_v61  ;;  %13894 = vmatpush3.bf16.msra.mxu0 %v15781_v37  ;;  %v15821_v61 = vld [vmem:[%s19878_s5 + $0x50] sm:$0xff]  }
 0x7e8   :  { %14581 = vmatprep.subr.bf16.mxu1 %v15876_v1  ;;  %13895 = vmatprep.subr.bf16.mxu0 %v15782_v50  ;;  %v15822_v37 = vld [vmem:[%s19878_s5 + $0xd0] sm:$0xff]  }
 0x7e9   :  { %v15823_v50 = vld [vmem:[%s19878_s5 + $0x10] sm:$0xff]  }
 0x7eb   :  { %14582 = vmatpush3.bf16.msra.mxu1 %v15783_v57  ;;  %13896 = vmatpush3.bf16.msra.mxu0 %v15784_v46  ;;  %v15824_v57 = vld [vmem:[%s19878_s5 + $0x90] sm:$0xff]   ;;  %v15825_v46 = vld [vmem:[%s19878_s5 + $0x58] sm:$0xff]  }
 0x7ec   :  { %13897 = vmatprep.subr.bf16.mxu0 %v15785_v29  ;;  %13911 = vmatprep.subr.bf16.mxu1 %v15786_v12  ;;  %v15826_v29 = vld [vmem:[%s19878_s5 + $0xd8] sm:$0xff]  }
 0x7ee   :  { %14584 = vmatmul.mubr.msk.bf16.vlgmr.msra.gmra.mrb[64].mxu1 %vm1717_vm4, %v10642_v58  ;;  %v15829_v58 = vld [vmem:[%s19878_s5 + $0x60] sm:$0xff]  }
 0x7ef   :  { %13898 = vmatpush3.bf16.msra.mxu0 %v15787_v56  ;;  %13912 = vmatpush3.bf16.msra.mxu1 %v15788_v62  ;;  %v15828_v62 = vld [vmem:[%s19878_s5 + $0x98] sm:$0xff]  }
 0x7f0   :  { %13899 = vmatprep.subr.bf16.mxu0 %v15789_v18  ;;  %13913 = vmatprep.subr.bf16.mxu1 %v15790_v54  ;;  %v15830_v18 = vld [vmem:[%s19878_s5 + $0xe0] sm:$0xff]  }
 0x7f1   :  { %v11509_v54 = vld [vmem:[#allocation3 + $0x42] sm:$0xf] }
 0x7f3   :  { %13900 = vmatpush3.bf16.msra.mxu0 %v15791_v0  ;;  %13914 = vmatpush3.bf16.msra.mxu1 %v15792_v59 }
 0x7f4   :  { %13901 = vmatprep.subr.bf16.mxu0 %v15793_v39  ;;  %13915 = vmatprep.subr.bf16.mxu1 %v15794_v36  ;;  %v15831_v39 = vld [vmem:[%s19878_s5 + $0x20] sm:$0xff]  }
 0x7f5   :  { %v15832_v36 = vld [vmem:[%s19878_s5 + $0xa0] sm:$0xff]  }
 0x7f7   :  { %13902 = vmatpush3.bf16.msra.mxu0 %v15795_v4  ;;  %13916 = vmatpush3.bf16.msra.mxu1 %v15796_v3  ;;  %v15046_v14 = vpop.permute.xlu1 %15045  ;;  %v15833_v4 = vld [vmem:[%s19878_s5 + $0x68] sm:$0xff]  }
 0x7f8   :  { %v15047_v55 = vunpack.i.l.bf16 %v15046_v14  ;;  %13903 = vmatprep.subr.bf16.mxu0 %v15797_v21  ;;  %13917 = vmatprep.subr.bf16.mxu1 %v15798_v49  ;;  %v19712_v51 = vpop.permute.xlu0 %15050  ;;  %v15048_v42 = vunpack.i.h.bf16 %v15046_v14  ;;  %v15834_v3 = vld [vmem:[%s19878_s5 + $0xe8] sm:$0xff]   ;;  %v15838_v14 = vld [vmem:[%s19878_s5 + $0xf0] sm:$0xff]  }
 0x7f9   :  { %v15052_v53 = vunpack.i.l.bf16 %v19712_v51  ;;  %v15835_v21 = vld [vmem:[%s19878_s5 + $0x28] sm:$0xff]  }
 0x7fa   :  { %v11084_v8 = vsel %vm1717_vm4, %v11062_v31, %v15047_v55  ;;  %v11083_v63 = vsel %vm1717_vm4, %v11060_v33, %v15048_v42  ;;  %v15836_v49 = vld [vmem:[%s19878_s5 + $0xa8] sm:$0xff]   ;;  %v15053_v55 = vunpack.i.h.bf16 %v19712_v51  ;;  %v15843_v31 = vld [vmem:[%s19878_s5 + $0x38] sm:$0xff]   ;;  %v15847_v51 = vld [vmem:[%s19878_s5 + $0x110] sm:$0xff]  }
 0x7fb   :  { %13904 = vmatpush3.bf16.msra.mxu0 %v15799_v47  ;;  %13918 = vmatpush3.bf16.msra.mxu1 %v15800_v23  ;;  %v11088_v2 = vpack.c.bf16 %v11084_v8, %v11084_v8  ;;  %v11529_v41 = vsel %vm1717_vm4, %v11505_v22, %v15052_v53  ;;  %v11087_v60 = vpack.c.bf16 %v11083_v63, %v11083_v63  ;;  %v15839_v47 = vld [vmem:[%s19878_s5 + $0x30] sm:$0xff]  }
 0x7fc   :  { %13919 = vmatprep.subr.bf16.mxu1 %v15801_v45  ;;  %14587 = vmatprep.subr.bf16.mxu0 %v15876_v1  ;;  %v11533_v44 = vpack.c.bf16 %v11529_v41, %v11529_v41  ;;  %v15840_v23 = vld [vmem:[%s19878_s5 + $0xb0] sm:$0xff]   ;;  %v15842_v45 = vld [vmem:[%s19878_s5 + $0xf8] sm:$0xff]  }
 0x7fd   :  { %11453 = vmatprep.mubr.bf16.mxu1 %v11088_v2  ;;  %v11503_v8 = vld [vmem:[#allocation3 + $0x36] sm:$0xf] }
 0x7fe   :  { %11414 = vmatmul.mubr.bf16.vlgmr.msra.gmra.mrb[68].mxu0 %v11085_v27  ;;  %v15844_v2 = vld [vmem:[%s19878_s5 + $0xb8] sm:$0xff]  }
 0x7ff   :  { %13920 = vmatpush3.bf16.msra.mxu1 %v15802_v19  ;;  %14588 = vmatpush3.bf16.msra.mxu0 %v15803_v11  ;;  %v11528_v19 = vsel %vm1717_vm4, %v11503_v8, %v15053_v55  ;;  %v11507_v11 = vld [vmem:[#allocation3 + $0x3d] sm:$0xf] }
 0x800   :  { %13921 = vmatprep.subr.bf16.mxu1 %v15804_v30  ;;  %14589 = vmatprep.subr.bf16.mxu0 %v15876_v1  ;;  %v15845_v30 = vld [vmem:[%s19878_s5 + $0x100] sm:$0xff]  }
 0x801   :  { %14595 = vmatprep.mubr.msk.bf16.mxu0 %vm15877_vm0, %v15876_v1 }
 0x803   :  { %13922 = vmatpush3.bf16.msra.mxu1 %v15805_v17  ;;  %14590 = vmatpush3.bf16.msra.mxu0 %v15806_v52  ;;  %v11532_v17 = vpack.c.bf16 %v11528_v19, %v11528_v19 }
 0x804   :  { %13923 = vmatprep.subr.bf16.mxu1 %v15807_v6  ;;  %14591 = vmatprep.subr.bf16.mxu0 %v15876_v1  ;;  %v15846_v6 = vld [vmem:[%s19878_s5 + $0x108] sm:$0xff]  }
 0x807   :  { %13924 = vmatpush3.bf16.msra.mxu1 %v15808_v24  ;;  %14592 = vmatpush3.bf16.msra.mxu0 %v15809_v25  ;;  %v15848_v24 = vld [vmem:[%s19878_s5 + $0x118] sm:$0xff]   ;;  %v11511_v25 = vld [vmem:[#allocation3 + $0x44] sm:$0xf] }
 0x808   :  { %13925 = vmatprep.subr.bf16.mxu1 %v15810_v9  ;;  %14593 = vmatprep.subr.bf16.mxu0 %v15876_v1  ;;  %v11536_v9 = vpack.c.bf16 %v11511_v25, %v11511_v25 }
 0x80b   :  { %13926 = vmatpush3.bf16.msra.mxu1 %v15811_v28  ;;  %14594 = vmatpush3.bf16.msra.mxu0 %v15812_v7 }
 0x80c   :  { %13938 = vmatprep.subr.bf16.mxu1 %v15813_v16  ;;  %13960 = vmatprep.subr.bf16.mxu0 %v15814_v32 }
 0x80e   :  { %11454 = vmatmul.mubr.bf16.vlgmr.msra.gmra.mrb[68].mxu1 %v11087_v60  ;;  %14596 = vmatmul.mubr.msk.bf16.vlgmr.msra.gmra.mrb[72].mxu0 %vm1717_vm4, %v11089_v26 }
 0x80f   :  { %13939 = vmatpush3.bf16.msra.mxu1 %v15815_v5  ;;  %11860 = vmatprep.mubr.bf16.mxu1 %v11533_v44 }
 0x810   :  { %13961 = vmatpush3.bf16.msra.mxu0 %v15816_v48  ;;  %13940 = vmatprep.subr.bf16.mxu1 %v15817_v43 }
 0x811   :  { %13962 = vmatprep.subr.bf16.mxu0 %v15818_v34 }
 0x813   :  { %13941 = vmatpush3.bf16.msra.mxu1 %v15819_v10 }
 0x814   :  { %13963 = vmatpush3.bf16.msra.mxu0 %v15820_v40  ;;  %13942 = vmatprep.subr.bf16.mxu1 %v15821_v61 }
 0x815   :  { %13964 = vmatprep.subr.bf16.mxu0 %v15822_v37 }
 0x817   :  { %13943 = vmatpush3.bf16.msra.mxu1 %v15823_v50  ;;  %v15056_v12 = vpop.permute.xlu1 %15055 }
 0x818   :  { %13965 = vmatpush3.bf16.msra.mxu0 %v15824_v57  ;;  %v15057_v56 = vunpack.i.l.bf16 %v15056_v12  ;;  %13944 = vmatprep.subr.bf16.mxu1 %v15825_v46  ;;  %v15058_v20 = vunpack.i.h.bf16 %v15056_v12 }
 0x819   :  { %13966 = vmatprep.subr.bf16.mxu0 %v15826_v29 }
 0x81a   :  { %v11531_v0 = vsel %vm1717_vm4, %v11509_v54, %v15057_v56  ;;  %v11530_v27 = vsel %vm1717_vm4, %v11507_v11, %v15058_v20 }
 0x81b   :  { %13945 = vmatpush3.bf16.msra.mxu1 %v15827_v38  ;;  %v11535_v59 = vpack.c.bf16 %v11531_v0, %v11531_v0  ;;  %v11534_v52 = vpack.c.bf16 %v11530_v27, %v11530_v27 }
 0x81c   :  { %13967 = vmatpush3.bf16.msra.mxu0 %v15828_v62  ;;  %13946 = vmatprep.subr.bf16.mxu1 %v15829_v58 }
 0x81d   :  { %13968 = vmatprep.subr.bf16.mxu0 %v15830_v18  ;;  %11900 = vmatprep.mubr.bf16.mxu0 %v11535_v59 }
 0x81f   :  { %13947 = vmatpush3.bf16.msra.mxu1 %v15831_v39 }
 0x820   :  { %13969 = vmatpush3.bf16.msra.mxu0 %v15832_v36  ;;  %13948 = vmatprep.subr.bf16.mxu1 %v15833_v4 }
 0x821   :  { %13970 = vmatprep.subr.bf16.mxu0 %v15834_v3 }
 0x823   :  { %13949 = vmatpush3.bf16.msra.mxu1 %v15835_v21 }
 0x824   :  { %13971 = vmatpush3.bf16.msra.mxu0 %v15836_v49  ;;  %13950 = vmatprep.subr.bf16.mxu1 %v15837_v13 }
 0x825   :  { %13972 = vmatprep.subr.bf16.mxu0 %v15838_v14 }
 0x827   :  { %13951 = vmatpush3.bf16.msra.mxu1 %v15839_v47 }
 0x828   :  { %13973 = vmatpush3.bf16.msra.mxu0 %v15840_v23  ;;  %13952 = vmatprep.subr.bf16.mxu1 %v15841_v15 }
 0x829   :  { %13974 = vmatprep.subr.bf16.mxu0 %v15842_v45 }
 0x82b   :  { %13953 = vmatpush3.bf16.msra.mxu1 %v15843_v31 }
 0x82c   :  { %13975 = vmatpush3.bf16.msra.mxu0 %v15844_v2  ;;  %14599 = vmatprep.subr.bf16.mxu1 %v15876_v1 }
 0x82e   :  { %11861 = vmatmul.mubr.bf16.vlgmr.msra.gmra.mrb[72].mxu1 %v11532_v17 }
 0x82f   :  { %11901 = vmatmul.mubr.bf16.vlgmr.msra.gmra.mrb[76].mxu0 %v11534_v52  ;;  %14600 = vmatpush3.bf16.msra.mxu1 %v15845_v30 }
 0x830   :  { %14601 = vmatprep.subr.bf16.mxu1 %v15876_v1  ;;  %14607 = vmatprep.mubr.msk.bf16.mxu1 %vm15877_vm0, %v15876_v1 }
 0x833   :  { %14602 = vmatpush3.bf16.msra.mxu1 %v15846_v6 }
 0x834   :  { %14603 = vmatprep.subr.bf16.mxu1 %v15876_v1 }
 0x837   :  { %14604 = vmatpush3.bf16.msra.mxu1 %v15847_v51 }
 0x838   :  { %14605 = vmatprep.subr.bf16.mxu1 %v15876_v1  ;;  %v15851_v1 = vld [vmem:[%s19879_s6] ss:$0 sm:$0xff]  ;;  %s15881_s6 = smov [#allocation4]  }
 0x839   :  { %s11955_s1 = sshll.u32 %s15881_s6, 4  ;;  %s11956_s1 = int_to_ptr.vmem [resolvable:$true] %s11955_s1 }
 0x83a   :  { %s15852_s12 = scalar_lea.vmem %s11956_s1, 512  ;;  %p15857_p1 = scmp.lt.s32.totalorder %s11956_s1, %s11956_s1 }
 0x83b   :  { %14606 = vmatpush3.bf16.msra.mxu1 %v15848_v24  ;;  %p15853_p0 = scmp.ne.s32.totalorder %s11956_s1, %s15852_s12  ;;  %p15858_p2 = scmp.lt.s32.totalorder %s15852_s12, %s15852_s12 }
 0x83d   :  { %p15859_p3 = por %p15858_p2, %p15857_p1 }
 0x83e   :  { %14608 = vmatmul.mubr.msk.bf16.vlgmr.msra.gmra.mrb[76].mxu1 %vm1717_vm4, %v11536_v9 }
 0x83f   :  { %p15860_p4 = pnand %p15859_p3, %p15853_p0 }
 0x871   :  { %v13807_v42 = vpop.f32.mrb[56].mxu0 }
 0x872   :  { %v13808_v53 = vpop.f32.mrb[57].mxu0 }
 0x873   :  { %v13809_v28 = vadd.f32 %v13808_v53, %v13807_v42  ;;  %v13810_v7 = vpop.f32.mrb[58].mxu0 }
 0x874   :  { %v13811_v33 = vpop.f32.mrb[59].mxu0 }
 0x875   :  { %v10522_v5 = vadd.f32 %v15851_v1, %v13809_v28 }
 0x881   :  { %v10601_v16 = vpop.f32.mrb[60].mxu0 }
 0x882   :  { %v14573_v32 = vpop.f32.mrb[61].mxu0 }
 0x883   :  { %v10604_v35 = vpop.f32.mrb[62].mxu0 }
 0x884   :  { %v14574_v63 = vpop.f32.mrb[63].mxu0 }
 0x891   :  { %v13829_v22 = vpop.f32.mrb[56].mxu1 }
 0x892   :  { %v13830_v41 = vpop.f32.mrb[57].mxu1 }
 0x893   :  { %v13831_v26 = vadd.f32 %v13830_v41, %v13829_v22  ;;  %v13832_v60 = vpop.f32.mrb[58].mxu1 }
 0x894   :  { %v13833_v48 = vpop.f32.mrb[59].mxu1 }
 0x895   :  { %v10562_v43 = vadd.f32 %v13831_v26, %v10522_v5 }
 0x897   :  { %v10602_v44 = vadd.f32 %v10601_v16, %v10562_v43 }
 0x899   :  { %v10607_v34 = vmax.f32 %v10602_v44, 0.0 }
 0x89b   :  { %10608 = vst.msk [vmem:[#allocation4 + $0x10] sm:$0xf] %vm4661_vm7, %v10607_v34 }
 0x8b1   :  { %v13856_v10 = vpop.f32.mrb[60].mxu1  ;;  %v13878_v40 = vpop.f32.mrb[64].mxu0 }
 0x8b2   :  { %v13857_v61 = vpop.f32.mrb[61].mxu1  ;;  %v13879_v37 = vpop.f32.mrb[65].mxu0 }
 0x8b3   :  { %v13858_v50 = vadd.f32 %v13857_v61, %v13856_v10  ;;  %v13859_v57 = vpop.f32.mrb[62].mxu1  ;;  %v13880_v46 = vadd.f32 %v13879_v37, %v13878_v40  ;;  %v13881_v29 = vpop.f32.mrb[66].mxu0 }
 0x8b4   :  { %v13860_v12 = vpop.f32.mrb[63].mxu1  ;;  %v13882_v38 = vpop.f32.mrb[67].mxu0 }
 0x8b5   :  { %v10969_v56 = vadd.f32 %v15851_v1, %v13858_v50 }
 0x8b7   :  { %v11009_v62 = vadd.f32 %v13880_v46, %v10969_v56 }
 0x8c1   :  { %v11048_v58 = vpop.f32.mrb[64].mxu1 }
 0x8c2   :  { %v11049_v18 = vadd.f32 %v11048_v58, %v11009_v62  ;;  %v14585_v54 = vpop.f32.mrb[65].mxu1 }
 0x8c3   :  { %v11051_v0 = vpop.f32.mrb[66].mxu1 }
 0x8c4   :  { %v11054_v59 = vmax.f32 %v11049_v18, 0.0  ;;  %v14586_v39 = vpop.f32.mrb[67].mxu1 }
 0x8c6   :  { %11055 = vst.msk [vmem:[#allocation4 + $0x14] sm:$0xf] %vm4661_vm7, %v11054_v59 }
 0x8d1   :  { %v13905_v36 = vpop.f32.mrb[68].mxu0 }
 0x8d2   :  { %v13906_v4 = vpop.f32.mrb[69].mxu0 }
 0x8d3   :  { %v13907_v3 = vadd.f32 %v13906_v4, %v13905_v36  ;;  %v13908_v21 = vpop.f32.mrb[70].mxu0 }
 0x8d4   :  { %v13909_v49 = vpop.f32.mrb[71].mxu0 }
 0x8d5   :  { %v11416_v15 = vadd.f32 %v15851_v1, %v13907_v3 }
 0x8e1   :  { %v13927_v13 = vpop.f32.mrb[68].mxu1  ;;  %v11495_v14 = vpop.f32.mrb[72].mxu0 }
 0x8e2   :  { %v13928_v47 = vpop.f32.mrb[69].mxu1  ;;  %v14597_v23 = vpop.f32.mrb[73].mxu0 }
 0x8e3   :  { %v13929_v55 = vadd.f32 %v13928_v47, %v13927_v13  ;;  %v13930_v45 = vpop.f32.mrb[70].mxu1  ;;  %v11498_v20 = vpop.f32.mrb[74].mxu0 }
 0x8e4   :  { %v13931_v31 = vpop.f32.mrb[71].mxu1  ;;  %v14598_v8 = vpop.f32.mrb[75].mxu0 }
 0x8e5   :  { %v11456_v2 = vadd.f32 %v13929_v55, %v11416_v15 }
 0x8e7   :  { %v11496_v19 = vadd.f32 %v11495_v14, %v11456_v2 }
 0x8e9   :  { %v11501_v11 = vmax.f32 %v11496_v19, 0.0 }
 0x8eb   :  { %11502 = vst.msk [vmem:[#allocation4 + $0x18] sm:$0xf] %vm4661_vm7, %v11501_v11 }
 0x901   :  { %v13954_v27 = vpop.f32.mrb[72].mxu1 }
 0x902   :  { %v13976_v30 = vpop.f32.mrb[76].mxu0  ;;  %v13955_v17 = vpop.f32.mrb[73].mxu1 }
 0x903   :  { %v13956_v52 = vadd.f32 %v13955_v17, %v13954_v27  ;;  %v13977_v6 = vpop.f32.mrb[77].mxu0  ;;  %v13957_v51 = vpop.f32.mrb[74].mxu1 }
 0x904   :  { %v13978_v24 = vadd.f32 %v13977_v6, %v13976_v30  ;;  %v13979_v25 = vpop.f32.mrb[78].mxu0  ;;  %v13958_v9 = vpop.f32.mrb[75].mxu1 }
 0x905   :  { %v11863_v42 = vadd.f32 %v15851_v1, %v13956_v52  ;;  %v13980_v53 = vpop.f32.mrb[79].mxu0 }
 0x907   :  { %v11903_v28 = vadd.f32 %v13978_v24, %v11863_v42 }
 0x911   :  { %v11942_v7 = vpop.f32.mrb[76].mxu1 }
 0x912   :  { %v11943_v33 = vadd.f32 %v11942_v7, %v11903_v28  ;;  %v14609_v16 = vpop.f32.mrb[77].mxu1 }
 0x913   :  { %v11945_v32 = vpop.f32.mrb[78].mxu1 }
 0x914   :  { %v11948_v35 = vmax.f32 %v11943_v33, 0.0  ;;  %v14610_v63 = vpop.f32.mrb[79].mxu1 }
 0x916   :  { %11949 = vst.msk [vmem:[#allocation4 + $0x1c] sm:$0xf] %vm4661_vm7, %v11948_v35 }
 0x917   :  { %15863 = shalt.err (!%p15860_p4)
}
 0x918   :  { %s15864_s15 = scalar_lea.hbm %s19880_s7, 512 }
 0x919   :  { %p15865_p5 = scmp.ne.s32.totalorder %s19880_s7, %s15864_s15  ;;  %p15868_p6 = scmp.lt.u32.totalorder %s15864_s15, %s19880_s7 }
 0x91b   :  { %p15870_p7 = pnand %p15868_p6, %p15865_p5 }
 0x91d   :  { %15873 = shalt.err (!%p15870_p7)
}
 0x91e   :  { %s15882_s20 = smov 128   ;;  %s15883_s21 = smov 8  }
 0x91f   :  { %11961 = dma.vmem_to_hbm [thread:$0]  %s11956_s1, 512, %s19880_s7, [#allocation5], %s15882_s20, %s15882_s20, %s15883_s21  }
 0x920   :  { %15874 = dma.done.wait [#allocation5], 512  }
 0x921   :  { %15875 = vsyncadd [#allocation5], 4294966784 }
 0x922   :  { %11965 = vsyncpa [#allocation5], 1 }

</bundles_post_ra>
